<compile_context>
chip_gen: v7x
topology: tpu7x:2x2x1
jax: 0.10.0
libtpu: 0.0.40
codegen_flags: <defaults>
</compile_context>

<pallas_src>
import jax
import jax.numpy as jnp
from jax.experimental import pallas as pl
from jax.experimental.pallas import tpu as pltpu

_HID = 512                       # LatentInjector hidden width (Linear(515, 512))
_INJECT_MIN_PALLAS_BYTES = 1 << 20   # below this, let XLA fuse the broadcast-add
_INJECT_BLOCK_BYTES = 2 << 20        # ~2 MiB per (1, C, TN) block (v5e-safe double-buffered)
_PRED_BLOCK_BYTES = 1 << 20          # ~1 MiB per (1, 256, TN) block (h intermediate fits)


def _choose_tile_n(n, c, bytes_per_elem=4, block_budget_bytes=_INJECT_BLOCK_BYTES):
    """Byte-aware lane tile along the point axis: largest multiple of 128 whose
    (1, c, TN) block fits the per-block byte budget; full extent if it already fits."""
    if n * c * bytes_per_elem <= block_budget_bytes:
        return int(n)
    t = (block_budget_bytes // (c * bytes_per_elem)) // 128 * 128
    return int(max(128, min(t, n)))


# ----------------------------------------------------------------------------
# Hoisted ctx-MLP: all six injectors' `lat` vectors in one kernel.
#   h     = ReLU((ctx @ W1cat) * scale + shift')       shift' = b1*scale + shift
#   lat_g = h[:, g*512:(g+1)*512] @ W2pad[g] + b2pad[g]   (one lane-dense (6,B,512) store)
# ----------------------------------------------------------------------------
def compute_latents(ctx, mlp):
    """ctx: (B, 515) f32 -> tuple of six (B, dim_i) f32 latents."""
    B = ctx.shape[0]
    dims = mlp["dims"]
    n_inj = len(dims)
    # Whole-array-in-VMEM kernel: ~13 MiB of weights + O(B*KB) activations.
    # Fine for small B; guard against silent VMEM blowup if batch scales.
    assert B <= 1024, "compute_latents: grid over B before scaling batch this far"

    def kernel(ctx_ref, w1_ref, scale_ref, shift_ref, w2_ref, b2_ref, o_ref):
        h = jnp.dot(ctx_ref[...], w1_ref[...],
                    preferred_element_type=jnp.float32)              # (B, 6*512)
        h = jnp.maximum(h * scale_ref[...] + shift_ref[...], 0.0)    # folded BN + ReLU
        for g in range(n_inj):
            hg = h[:, g * _HID:(g + 1) * _HID]                       # (B, 512)
            o_ref[g] = (jnp.dot(hg, w2_ref[g],
                                preferred_element_type=jnp.float32)
                        + b2_ref[g])                                 # dense (B, 512) store

    lat_all = pl.pallas_call(
        kernel,
        out_shape=jax.ShapeDtypeStruct((n_inj, B, _HID), jnp.float32),
        compiler_params=pltpu.CompilerParams(vmem_limit_bytes=32 * 1024 * 1024),
    )(ctx, mlp["w1cat"], mlp["scale"], mlp["shift"], mlp["w2stk"], mlp["b2stk"])
    # per-injector slicing of the padded, lane-dense result happens outside the kernel
    return tuple(lat_all[g, :, :dims[g]] for g in range(n_inj))


# ----------------------------------------------------------------------------
# LatentInjector residual add:  out = x + broadcast_N(lat)
#   x: (B, C, N), lat passed pre-shaped (B, C, 1) -> pure VPU broadcast-add.
# ----------------------------------------------------------------------------
def _inject_add_kernel(x_ref, lat_ref, o_ref):
    o_ref[...] = x_ref[...] + lat_ref[...]


def latent_injector(x, lat):
    """x: (B, C, N) f32, lat: (B, C) f32 (precomputed by compute_latents)."""
    B, C, N = x.shape
    if x.size * x.dtype.itemsize < _INJECT_MIN_PALLAS_BYTES:
        # Tiny stage: per-step pipeline (~0.35us) + dispatch overhead dominates a
        # sub-MiB broadcast-add; let XLA fuse it into neighbouring ops for free.
        return x + lat[:, :, None]
    lat3 = lat[:, :, None]                                # (B, C, 1)
    TN = _choose_tile_n(N, C, x.dtype.itemsize, _INJECT_BLOCK_BYTES)
    grid = (B, pl.cdiv(N, TN))
    return pl.pallas_call(
        _inject_add_kernel,
        out_shape=jax.ShapeDtypeStruct((B, C, N), x.dtype),
        grid=grid,
        in_specs=[
            pl.BlockSpec((1, C, TN), lambda b, t: (b, 0, t)),
            pl.BlockSpec((1, C, 1), lambda b, t: (b, 0, 0)),
        ],
        out_specs=pl.BlockSpec((1, C, TN), lambda b, t: (b, 0, t)),
        compiler_params=pltpu.CompilerParams(
            dimension_semantics=("parallel", "parallel")),
    )(x, lat3)


# ----------------------------------------------------------------------------
# predictor head:  Conv1d(256,512,1) -> BN -> LeakyReLU(0.2) -> Conv1d(512,3,1)
#   gridded over (B, N//TN); bf16 weights + bf16 activation tiles, f32 accumulation.
# ----------------------------------------------------------------------------
def _predictor_kernel(f_ref, w1_ref, scale_ref, shift_ref, w2_ref, b2_ref, o_ref):
    f = f_ref[0].astype(jnp.bfloat16)                                # (256, TN)
    h = jnp.dot(w1_ref[...], f, preferred_element_type=jnp.float32)  # (512, TN)
    h = h * scale_ref[...] + shift_ref[...]                          # folded BN (+ conv bias)
    h = jnp.maximum(h, 0.2 * h)                                      # LeakyReLU(0.2)
    o_ref[0] = (jnp.dot(w2_ref[...], h.astype(jnp.bfloat16),
                        preferred_element_type=jnp.float32)
                + b2_ref[...]).astype(o_ref.dtype)                   # (3, TN)


def predictor(feat, p):
    """feat: (B, 256, N) f32 -> et: (B, 3, N) f32 (no external transposes)."""
    B, C, N = feat.shape
    TN = _choose_tile_n(N, C, 4, _PRED_BLOCK_BYTES)
    # v7x has 2 TensorCores: make sure the parallel grid has >= 2 steps.
    if B * pl.cdiv(N, TN) < 2 and N >= 256:
        TN = max(128, ((pl.cdiv(N, 2) + 127) // 128) * 128)
    grid = (B, pl.cdiv(N, TN))
    return pl.pallas_call(
        _predictor_kernel,
        out_shape=jax.ShapeDtypeStruct((B, 3, N), feat.dtype),
        grid=grid,
        in_specs=[
            pl.BlockSpec((1, C, TN), lambda b, t: (b, 0, t)),
            pl.BlockSpec((512, C), lambda b, t: (0, 0)),
            pl.BlockSpec((512, 1), lambda b, t: (0, 0)),
            pl.BlockSpec((512, 1), lambda b, t: (0, 0)),
            pl.BlockSpec((3, 512), lambda b, t: (0, 0)),
            pl.BlockSpec((3, 1), lambda b, t: (0, 0)),
        ],
        out_specs=pl.BlockSpec((1, 3, TN), lambda b, t: (b, 0, t)),
        compiler_params=pltpu.CompilerParams(
            dimension_semantics=("parallel", "parallel")),
    )(feat, p["w1"], p["scale"], p["shiftp"], p["w2"], p["b2"])


# ----------------------------------------------------------------------------
# deterministic synthetic parameters (inference-mode BatchNorm folded offline)
# ----------------------------------------------------------------------------
def _fold_bn(key, c, eps=1e-5):
    kg, kb, km, kv = jax.random.split(key, 4)
    gamma = 1.0 + 0.1 * jax.random.normal(kg, (c,), jnp.float32)
    beta = 0.1 * jax.random.normal(kb, (c,), jnp.float32)
    mean = 0.1 * jax.random.normal(km, (c,), jnp.float32)
    var = 1.0 + 0.1 * jax.random.uniform(kv, (c,), jnp.float32)
    scale = gamma / jnp.sqrt(var + eps)
    shift = beta - mean * scale
    return scale, shift


def init_latent_injector(key, dim_in):
    k1, k2, k3, k4, kbn = jax.random.split(key, 5)
    scale, shift = _fold_bn(kbn, _HID)
    return {
        "w1": 0.03 * jax.random.normal(k1, (515, _HID), jnp.float32),
        "b1": 0.01 * jax.random.normal(k2, (_HID,), jnp.float32),
        "scale": scale,
        "shift": shift,
        "w2": 0.03 * jax.random.normal(k3, (_HID, dim_in), jnp.float32),
        "b2": 0.01 * jax.random.normal(k4, (dim_in,), jnp.float32),
    }


def prepare_ctx_mlp(p_list):
    """Concatenate the six injector first layers, fold b1 into the BN shift, and
    zero-pad/stack the second layers so the kernel emits one lane-dense output."""
    dims = tuple(int(p["w2"].shape[1]) for p in p_list)
    w2stk = jnp.stack([jnp.pad(p["w2"], ((0, 0), (0, _HID - d)))
                       for p, d in zip(p_list, dims)])                            # (6,512,512)
    b2stk = jnp.stack([jnp.pad(p["b2"], (0, _HID - d))[None, :]
                       for p, d in zip(p_list, dims)])                            # (6,1,512)
    return {
        "dims": dims,
        "w1cat": jnp.concatenate([p["w1"] for p in p_list], axis=1),              # (515, 6*512)
        "scale": jnp.concatenate([p["scale"] for p in p_list])[None, :],          # (1, 6*512)
        "shift": jnp.concatenate([p["b1"] * p["scale"] + p["shift"]
                                  for p in p_list])[None, :],                     # (1, 6*512)
        "w2stk": w2stk,
        "b2stk": b2stk,
    }


def init_predictor(key):
    k1, k2, k3, k4, kbn = jax.random.split(key, 5)
    scale, shift = _fold_bn(kbn, 512)
    return {
        "w1": 0.03 * jax.random.normal(k1, (512, 256), jnp.float32),
        "b1": 0.01 * jax.random.normal(k2, (512,), jnp.float32),
        "scale": scale,
        "shift": shift,
        "w2": 0.03 * jax.random.normal(k3, (3, 512), jnp.float32),
        "b2": 0.01 * jax.random.normal(k4, (3,), jnp.float32),
    }


def prepare_predictor(p):
    return {
        "w1": p["w1"].astype(jnp.bfloat16),                              # bf16 MXU path
        "scale": p["scale"].reshape(512, 1),
        "shiftp": (p["b1"] * p["scale"] + p["shift"]).reshape(512, 1),   # b1 folded, f32
        "w2": p["w2"].astype(jnp.bfloat16),
        "b2": p["b2"].reshape(3, 1),
    }


# pure-JAX references (raw, unfolded, f32 params) for sanity checking
def latent_injector_ref(x, ctx, p):
    h = (ctx @ p["w1"] + p["b1"]) * p["scale"] + p["shift"]
    h = jnp.maximum(h, 0.0)
    lat = h @ p["w2"] + p["b2"]
    return x + lat[:, :, None]


def predictor_ref(f, p):
    h = jnp.einsum("oc,bcn->bon", p["w1"], f) + p["b1"][None, :, None]
    h = h * p["scale"][None, :, None] + p["shift"][None, :, None]
    h = jnp.where(h > 0, h, 0.2 * h)
    return jnp.einsum("oc,bcn->bon", p["w2"], h) + p["b2"][None, :, None]


# ----------------------------------------------------------------------------
if __name__ == "__main__":
    key = jax.random.PRNGKey(0)
    ks = jax.random.split(key, 18)

    B, N0, time_dim = 2, 1024, 3          # Linear(515, 512) => z(512) + time_emb(3)
    N1, N2, N3 = 256, 64, 32              # scaled-down point counts for the down stages

    xt = jax.random.normal(ks[0], (B, 3, N0), jnp.float32)
    z = jax.random.normal(ks[1], (B, 512), jnp.float32)
    time_emb = jax.random.normal(ks[2], (B, time_dim), jnp.float32)

    # get_ctx with z given: ctx = cat(z, time_emb)
    ctx = jnp.concatenate([z, time_emb], axis=1)                     # (B, 515)

    inj_dims = [("an1", 3), ("an2", 96), ("an3", 256),
                ("an4", 512), ("an5", 256), ("an6", 128)]
    p_an = {name: init_latent_injector(ks[3 + i], d)
            for i, (name, d) in enumerate(inj_dims)}
    mlp_params = prepare_ctx_mlp([p_an[name] for name, _ in inj_dims])
    p_pred_raw = init_predictor(ks[10])
    p_pred = prepare_predictor(p_pred_raw)

    # hoisted ctx-MLP: all six injector latents in one kernel call (lane-dense output)
    lats = compute_latents(ctx, mlp_params)                          # 6 x (B, dim_i)

    # ---- defined stage: an1 on xt -------------------------------------------------
    feat0 = latent_injector(xt, lats[0])                             # (B, 3, N0)

    # TODO(synk): PointNetEncoder, PointNetMSG (down1/2/3), Attention1d and
    # FeaturePropagation (up1/2/3) are not defined in the reference source, so their
    # forward passes cannot be reproduced; synthetic stand-in features with the correct
    # channel counts are used below purely to exercise the remaining defined kernels.
    feat1_in = jax.random.normal(ks[11], (B, 96, N1), jnp.float32)   # would be down1 output
    feat1 = latent_injector(feat1_in, lats[1])
    feat2_in = jax.random.normal(ks[12], (B, 256, N2), jnp.float32)  # would be down2 output
    feat2 = latent_injector(feat2_in, lats[2])
    feat3_in = jax.random.normal(ks[13], (B, 512, N3), jnp.float32)  # would be attn1(down3)
    feat3 = latent_injector(feat3_in, lats[3])
    feat2u_in = jax.random.normal(ks[14], (B, 256, N2), jnp.float32) # would be up1 output
    feat2u = latent_injector(feat2u_in, lats[4])
    feat1u_in = jax.random.normal(ks[15], (B, 128, N1), jnp.float32) # would be up2 output
    feat1u = latent_injector(feat1u_in, lats[5])

    # ---- defined stage: predictor head on up3 output ------------------------------
    feat0u = jax.random.normal(ks[9], (B, 256, N0), jnp.float32)     # would be up3 output
    et = predictor(feat0u, p_pred)                                   # (B, 3, N0)

    # explicitly exercise the tiled Pallas broadcast-add path (the scaled-down stages
    # above are < 1 MiB and dispatch to the fused plain-JAX add)
    x_big = jax.random.normal(ks[16], (B, 512, 1024), jnp.float32)   # 4 MiB > threshold
    feat_big = latent_injector(x_big, lats[3])

    jax.block_until_ready((feat0, feat1, feat2, feat3, feat2u, feat1u, et, feat_big))

    # sanity checks against pure-JAX references (f32 paths keep 1e-3)
    assert jnp.allclose(feat0, latent_injector_ref(xt, ctx, p_an["an1"]),
                        atol=1e-3, rtol=1e-3)
    assert jnp.allclose(feat1u, latent_injector_ref(feat1u_in, ctx, p_an["an6"]),
                        atol=1e-3, rtol=1e-3)
    assert jnp.allclose(feat_big, latent_injector_ref(x_big, ctx, p_an["an4"]),
                        atol=1e-3, rtol=1e-3)
    # the head uses the bf16 MXU path (f32 accumulation) -> looser tolerance vs. f32 ref
    assert jnp.allclose(et, predictor_ref(feat0u, p_pred_raw), atol=2e-2, rtol=2e-2)
    assert et.shape == (B, 3, N0)

    print("KERNEL_OK")
</pallas_src>

<mosaic_0001>
module attributes {stable_mosaic.version = 11 : i64} {
  func.func @kernel(%arg0: memref<2x515xf32, #tpu.memory_space<vmem>>, %arg1: memref<515x3072xf32, #tpu.memory_space<vmem>>, %arg2: memref<1x3072xf32, #tpu.memory_space<vmem>>, %arg3: memref<1x3072xf32, #tpu.memory_space<vmem>>, %arg4: memref<6x512x512xf32, #tpu.memory_space<vmem>>, %arg5: memref<6x1x512xf32, #tpu.memory_space<vmem>>, %arg6: memref<6x2x512xf32, #tpu.memory_space<vmem>>) attributes {dimension_semantics = [], scalar_prefetch = 0 : i64, scratch_operands = 0 : i64, tpu.core_type = #tpu.core_type<tc>} {
    %c0 = arith.constant 0 : index
    %c0_0 = arith.constant 0 : index
    %0 = vector.load %arg0[%c0, %c0_0] : memref<2x515xf32, #tpu.memory_space<vmem>>, vector<2x515xf32>
    %c0_1 = arith.constant 0 : index
    %c0_2 = arith.constant 0 : index
    %1 = vector.load %arg1[%c0_1, %c0_2] : memref<515x3072xf32, #tpu.memory_space<vmem>>, vector<515x3072xf32>
    %cst = arith.constant dense<0.000000e+00> : vector<2x3072xf32>
    %2 = tpu.matmul %0, %1, %cst {dimension_numbers = #tpu.dot_dimension_numbers<[1], [0], [0], [1], [0, 0, 1, 1], [], []>} : vector<2x515xf32>, vector<515x3072xf32>, vector<2x3072xf32> -> vector<2x3072xf32>
    %c0_3 = arith.constant 0 : index
    %c0_4 = arith.constant 0 : index
    %3 = vector.load %arg2[%c0_3, %c0_4] : memref<1x3072xf32, #tpu.memory_space<vmem>>, vector<1x3072xf32>
    %4 = vector.broadcast %3 : vector<1x3072xf32> to vector<2x3072xf32>
    %5 = arith.mulf %2, %4 : vector<2x3072xf32>
    %c0_5 = arith.constant 0 : index
    %c0_6 = arith.constant 0 : index
    %6 = vector.load %arg3[%c0_5, %c0_6] : memref<1x3072xf32, #tpu.memory_space<vmem>>, vector<1x3072xf32>
    %7 = vector.broadcast %6 : vector<1x3072xf32> to vector<2x3072xf32>
    %8 = arith.addf %5, %7 : vector<2x3072xf32>
    %cst_7 = arith.constant 0.000000e+00 : f32
    %9 = vector.broadcast %cst_7 : f32 to vector<2x3072xf32>
    %10 = arith.maximumf %8, %9 : vector<2x3072xf32>
    %11 = vector.extract_strided_slice %10 {offsets = [0, 0], sizes = [2, 512], strides = [1, 1]} : vector<2x3072xf32> to vector<2x512xf32>
    %c0_8 = arith.constant 0 : index
    %c0_9 = arith.constant 0 : index
    %c0_10 = arith.constant 0 : index
    %12 = vector.load %arg4[%c0_8, %c0_9, %c0_10] : memref<6x512x512xf32, #tpu.memory_space<vmem>>, vector<1x512x512xf32>
    %13 = vector.shape_cast %12 : vector<1x512x512xf32> to vector<512x512xf32>
    %cst_11 = arith.constant dense<0.000000e+00> : vector<2x512xf32>
    %14 = tpu.matmul %11, %13, %cst_11 {dimension_numbers = #tpu.dot_dimension_numbers<[1], [0], [0], [1], [0, 0, 1, 1], [], []>} : vector<2x512xf32>, vector<512x512xf32>, vector<2x512xf32> -> vector<2x512xf32>
    %c0_12 = arith.constant 0 : index
    %c0_13 = arith.constant 0 : index
    %c0_14 = arith.constant 0 : index
    %15 = vector.load %arg5[%c0_12, %c0_13, %c0_14] : memref<6x1x512xf32, #tpu.memory_space<vmem>>, vector<1x1x512xf32>
    %16 = vector.shape_cast %15 : vector<1x1x512xf32> to vector<1x512xf32>
    %17 = vector.broadcast %16 : vector<1x512xf32> to vector<2x512xf32>
    %18 = arith.addf %14, %17 : vector<2x512xf32>
    %c0_15 = arith.constant 0 : index
    %c0_16 = arith.constant 0 : index
    %c0_17 = arith.constant 0 : index
    %19 = vector.load %arg6[%c0_15, %c0_16, %c0_17] : memref<6x2x512xf32, #tpu.memory_space<vmem>>, vector<1x2x512xf32>
    %20 = vector.shape_cast %19 : vector<1x2x512xf32> to vector<2x512xf32>
    %21 = vector.shape_cast %18 : vector<2x512xf32> to vector<1x2x512xf32>
    tpu.vector_store %arg6[%c0_15, %c0_16, %c0_17], %21 {strides = array<i32>} : memref<6x2x512xf32, #tpu.memory_space<vmem>>, vector<1x2x512xf32>,
    %22 = vector.extract_strided_slice %10 {offsets = [0, 512], sizes = [2, 512], strides = [1, 1]} : vector<2x3072xf32> to vector<2x512xf32>
    %c1 = arith.constant 1 : index
    %c0_18 = arith.constant 0 : index
    %c0_19 = arith.constant 0 : index
    %23 = vector.load %arg4[%c1, %c0_18, %c0_19] : memref<6x512x512xf32, #tpu.memory_space<vmem>>, vector<1x512x512xf32>
    %24 = vector.shape_cast %23 : vector<1x512x512xf32> to vector<512x512xf32>
    %cst_20 = arith.constant dense<0.000000e+00> : vector<2x512xf32>
    %25 = tpu.matmul %22, %24, %cst_20 {dimension_numbers = #tpu.dot_dimension_numbers<[1], [0], [0], [1], [0, 0, 1, 1], [], []>} : vector<2x512xf32>, vector<512x512xf32>, vector<2x512xf32> -> vector<2x512xf32>
    %c1_21 = arith.constant 1 : index
    %c0_22 = arith.constant 0 : index
    %c0_23 = arith.constant 0 : index
    %26 = vector.load %arg5[%c1_21, %c0_22, %c0_23] : memref<6x1x512xf32, #tpu.memory_space<vmem>>, vector<1x1x512xf32>
    %27 = vector.shape_cast %26 : vector<1x1x512xf32> to vector<1x512xf32>
    %28 = vector.broadcast %27 : vector<1x512xf32> to vector<2x512xf32>
    %29 = arith.addf %25, %28 : vector<2x512xf32>
    %c1_24 = arith.constant 1 : index
    %c0_25 = arith.constant 0 : index
    %c0_26 = arith.constant 0 : index
    %30 = vector.load %arg6[%c1_24, %c0_25, %c0_26] : memref<6x2x512xf32, #tpu.memory_space<vmem>>, vector<1x2x512xf32>
    %31 = vector.shape_cast %30 : vector<1x2x512xf32> to vector<2x512xf32>
    %32 = vector.shape_cast %29 : vector<2x512xf32> to vector<1x2x512xf32>
    tpu.vector_store %arg6[%c1_24, %c0_25, %c0_26], %32 {strides = array<i32>} : memref<6x2x512xf32, #tpu.memory_space<vmem>>, vector<1x2x512xf32>,
    %33 = vector.extract_strided_slice %10 {offsets = [0, 1024], sizes = [2, 512], strides = [1, 1]} : vector<2x3072xf32> to vector<2x512xf32>
    %c2 = arith.constant 2 : index
    %c0_27 = arith.constant 0 : index
    %c0_28 = arith.constant 0 : index
    %34 = vector.load %arg4[%c2, %c0_27, %c0_28] : memref<6x512x512xf32, #tpu.memory_space<vmem>>, vector<1x512x512xf32>
    %35 = vector.shape_cast %34 : vector<1x512x512xf32> to vector<512x512xf32>
    %cst_29 = arith.constant dense<0.000000e+00> : vector<2x512xf32>
    %36 = tpu.matmul %33, %35, %cst_29 {dimension_numbers = #tpu.dot_dimension_numbers<[1], [0], [0], [1], [0, 0, 1, 1], [], []>} : vector<2x512xf32>, vector<512x512xf32>, vector<2x512xf32> -> vector<2x512xf32>
    %c2_30 = arith.constant 2 : index
    %c0_31 = arith.constant 0 : index
    %c0_32 = arith.constant 0 : index
    %37 = vector.load %arg5[%c2_30, %c0_31, %c0_32] : memref<6x1x512xf32, #tpu.memory_space<vmem>>, vector<1x1x512xf32>
    %38 = vector.shape_cast %37 : vector<1x1x512xf32> to vector<1x512xf32>
    %39 = vector.broadcast %38 : vector<1x512xf32> to vector<2x512xf32>
    %40 = arith.addf %36, %39 : vector<2x512xf32>
    %c2_33 = arith.constant 2 : index
    %c0_34 = arith.constant 0 : index
    %c0_35 = arith.constant 0 : index
    %41 = vector.load %arg6[%c2_33, %c0_34, %c0_35] : memref<6x2x512xf32, #tpu.memory_space<vmem>>, vector<1x2x512xf32>
    %42 = vector.shape_cast %41 : vector<1x2x512xf32> to vector<2x512xf32>
    %43 = vector.shape_cast %40 : vector<2x512xf32> to vector<1x2x512xf32>
    tpu.vector_store %arg6[%c2_33, %c0_34, %c0_35], %43 {strides = array<i32>} : memref<6x2x512xf32, #tpu.memory_space<vmem>>, vector<1x2x512xf32>,
    %44 = vector.extract_strided_slice %10 {offsets = [0, 1536], sizes = [2, 512], strides = [1, 1]} : vector<2x3072xf32> to vector<2x512xf32>
    %c3 = arith.constant 3 : index
    %c0_36 = arith.constant 0 : index
    %c0_37 = arith.constant 0 : index
    %45 = vector.load %arg4[%c3, %c0_36, %c0_37] : memref<6x512x512xf32, #tpu.memory_space<vmem>>, vector<1x512x512xf32>
    %46 = vector.shape_cast %45 : vector<1x512x512xf32> to vector<512x512xf32>
    %cst_38 = arith.constant dense<0.000000e+00> : vector<2x512xf32>
    %47 = tpu.matmul %44, %46, %cst_38 {dimension_numbers = #tpu.dot_dimension_numbers<[1], [0], [0], [1], [0, 0, 1, 1], [], []>} : vector<2x512xf32>, vector<512x512xf32>, vector<2x512xf32> -> vector<2x512xf32>
    %c3_39 = arith.constant 3 : index
    %c0_40 = arith.constant 0 : index
    %c0_41 = arith.constant 0 : index
    %48 = vector.load %arg5[%c3_39, %c0_40, %c0_41] : memref<6x1x512xf32, #tpu.memory_space<vmem>>, vector<1x1x512xf32>
    %49 = vector.shape_cast %48 : vector<1x1x512xf32> to vector<1x512xf32>
    %50 = vector.broadcast %49 : vector<1x512xf32> to vector<2x512xf32>
    %51 = arith.addf %47, %50 : vector<2x512xf32>
    %c3_42 = arith.constant 3 : index
    %c0_43 = arith.constant 0 : index
    %c0_44 = arith.constant 0 : index
    %52 = vector.load %arg6[%c3_42, %c0_43, %c0_44] : memref<6x2x512xf32, #tpu.memory_space<vmem>>, vector<1x2x512xf32>
    %53 = vector.shape_cast %52 : vector<1x2x512xf32> to vector<2x512xf32>
    %54 = vector.shape_cast %51 : vector<2x512xf32> to vector<1x2x512xf32>
    tpu.vector_store %arg6[%c3_42, %c0_43, %c0_44], %54 {strides = array<i32>} : memref<6x2x512xf32, #tpu.memory_space<vmem>>, vector<1x2x512xf32>,
    %55 = vector.extract_strided_slice %10 {offsets = [0, 2048], sizes = [2, 512], strides = [1, 1]} : vector<2x3072xf32> to vector<2x512xf32>
    %c4 = arith.constant 4 : index
    %c0_45 = arith.constant 0 : index
    %c0_46 = arith.constant 0 : index
    %56 = vector.load %arg4[%c4, %c0_45, %c0_46] : memref<6x512x512xf32, #tpu.memory_space<vmem>>, vector<1x512x512xf32>
    %57 = vector.shape_cast %56 : vector<1x512x512xf32> to vector<512x512xf32>
    %cst_47 = arith.constant dense<0.000000e+00> : vector<2x512xf32>
    %58 = tpu.matmul %55, %57, %cst_47 {dimension_numbers = #tpu.dot_dimension_numbers<[1], [0], [0], [1], [0, 0, 1, 1], [], []>} : vector<2x512xf32>, vector<512x512xf32>, vector<2x512xf32> -> vector<2x512xf32>
    %c4_48 = arith.constant 4 : index
    %c0_49 = arith.constant 0 : index
    %c0_50 = arith.constant 0 : index
    %59 = vector.load %arg5[%c4_48, %c0_49, %c0_50] : memref<6x1x512xf32, #tpu.memory_space<vmem>>, vector<1x1x512xf32>
    %60 = vector.shape_cast %59 : vector<1x1x512xf32> to vector<1x512xf32>
    %61 = vector.broadcast %60 : vector<1x512xf32> to vector<2x512xf32>
    %62 = arith.addf %58, %61 : vector<2x512xf32>
    %c4_51 = arith.constant 4 : index
    %c0_52 = arith.constant 0 : index
    %c0_53 = arith.constant 0 : index
    %63 = vector.load %arg6[%c4_51, %c0_52, %c0_53] : memref<6x2x512xf32, #tpu.memory_space<vmem>>, vector<1x2x512xf32>
    %64 = vector.shape_cast %63 : vector<1x2x512xf32> to vector<2x512xf32>
    %65 = vector.shape_cast %62 : vector<2x512xf32> to vector<1x2x512xf32>
    tpu.vector_store %arg6[%c4_51, %c0_52, %c0_53], %65 {strides = array<i32>} : memref<6x2x512xf32, #tpu.memory_space<vmem>>, vector<1x2x512xf32>,
    %66 = vector.extract_strided_slice %10 {offsets = [0, 2560], sizes = [2, 512], strides = [1, 1]} : vector<2x3072xf32> to vector<2x512xf32>
    %c5 = arith.constant 5 : index
    %c0_54 = arith.constant 0 : index
    %c0_55 = arith.constant 0 : index
    %67 = vector.load %arg4[%c5, %c0_54, %c0_55] : memref<6x512x512xf32, #tpu.memory_space<vmem>>, vector<1x512x512xf32>
    %68 = vector.shape_cast %67 : vector<1x512x512xf32> to vector<512x512xf32>
    %cst_56 = arith.constant dense<0.000000e+00> : vector<2x512xf32>
    %69 = tpu.matmul %66, %68, %cst_56 {dimension_numbers = #tpu.dot_dimension_numbers<[1], [0], [0], [1], [0, 0, 1, 1], [], []>} : vector<2x512xf32>, vector<512x512xf32>, vector<2x512xf32> -> vector<2x512xf32>
    %c5_57 = arith.constant 5 : index
    %c0_58 = arith.constant 0 : index
    %c0_59 = arith.constant 0 : index
    %70 = vector.load %arg5[%c5_57, %c0_58, %c0_59] : memref<6x1x512xf32, #tpu.memory_space<vmem>>, vector<1x1x512xf32>
    %71 = vector.shape_cast %70 : vector<1x1x512xf32> to vector<1x512xf32>
    %72 = vector.broadcast %71 : vector<1x512xf32> to vector<2x512xf32>
    %73 = arith.addf %69, %72 : vector<2x512xf32>
    %c5_60 = arith.constant 5 : index
    %c0_61 = arith.constant 0 : index
    %c0_62 = arith.constant 0 : index
    %74 = vector.load %arg6[%c5_60, %c0_61, %c0_62] : memref<6x2x512xf32, #tpu.memory_space<vmem>>, vector<1x2x512xf32>
    %75 = vector.shape_cast %74 : vector<1x2x512xf32> to vector<2x512xf32>
    %76 = vector.shape_cast %73 : vector<2x512xf32> to vector<1x2x512xf32>
    tpu.vector_store %arg6[%c5_60, %c0_61, %c0_62], %76 {strides = array<i32>} : memref<6x2x512xf32, #tpu.memory_space<vmem>>, vector<1x2x512xf32>,
    return
  }
}

</mosaic_0001>

<bundles_post_ra>
// kernel: tpu_custom_call.1
= control target key start
LH: loop header
LB: loop body
LE: loop exit
PB: predicated region body
PF: predicated region fallthrough
CT: control target
= control target key end

     0   :  { %11 = vsyncpa [#allocation3], 0  ;;  %s12099_s0 = inlined_call_operand.hbm [shape: f32[2,515], index: 0, kind: input, shape index: {}]   ;;  %s12100_s1 = inlined_call_operand.hbm [shape: f32[515,3072], index: 1, kind: input, shape index: {}]   ;;  %s12101_s2 = inlined_call_operand.hbm [shape: f32[1,3072], index: 2, kind: input, shape index: {}]   ;;  %s12102_s3 = inlined_call_operand.hbm [shape: f32[1,3072], index: 3, kind: input, shape index: {}]   ;;  %s12103_s4 = inlined_call_operand.hbm [shape: f32[6,512,512], index: 4, kind: input, shape index: {}]   ;;  %s12104_s5 = inlined_call_operand.hbm [shape: f32[6,1,512], index: 5, kind: input, shape index: {}]   ;;  %s12105_s6 = inlined_call_operand.hbm [shape: f32[6,2,512], index: 6, kind: output, shape index: {}]  }
   0x1   :  { %12 = vsyncpa [#allocation6], 0 }
   0x2   :  { %13 = vsyncpa [#allocation9], 0 }
   0x3   :  { %14 = vsyncpa [#allocation12], 0 }
   0x4   :  { %15 = vsyncpa [#allocation4], 0  ;;  %s11597_s21 = smov [#allocation5]   ;;  %s11433_s25 = scalar_lea.hbm %s12100_s1, 199680 }
   0x5   :  { %s31_s22 = sshll.u32 %s11597_s21, 4  ;;  %p11434_p0 = scmp.ne.s32.totalorder %s12100_s1, %s11433_s25  ;;  %s32_s22 = int_to_ptr.vmem [resolvable:$true] %s31_s22 }
   0x6   :  { %p11437_p1 = scmp.lt.u32.totalorder %s11433_s25, %s12100_s1 }
   0x8   :  { %p11439_p2 = pnand %p11437_p1, %p11434_p0 }
   0xa   :  { %11442 = shalt.err (!%p11439_p2)
}
   0xb   :  { %s11443_s30 = scalar_lea.vmem %s32_s22, 199680  ;;  %p11448_p4 = scmp.lt.s32.totalorder %s32_s22, %s32_s22 }
   0xc   :  { %p11444_p3 = scmp.ne.s32.totalorder %s32_s22, %s11443_s30  ;;  %p11449_p5 = scmp.lt.s32.totalorder %s11443_s30, %s11443_s30 }
   0xe   :  { %p11450_p6 = por %p11449_p5, %p11448_p4 }
  0x10   :  { %p11451_p7 = pnand %p11450_p6, %p11444_p3 }
  0x12   :  { %11454 = shalt.err (!%p11451_p7)
}
  0x13   :  { %s11598_s7 = smov 3072   ;;  %s11599_s8 = smov 192  }
  0x14   :  { %37 = dma.hbm_to_vmem [thread:$0]  %s12100_s1, 199680, %s32_s22, [#allocation6], %s11598_s7, %s11598_s7, %s11599_s8  }
  0x15   :  { %s11600_s11 = smov [#allocation8]   ;;  %s11601_s13 = smov [#allocation2]  }
  0x16   :  { %s54_s12 = sshll.u32 %s11600_s11, 4  ;;  %s22_s14 = sshll.u32 %s11601_s13, 4  ;;  %s55_s12 = int_to_ptr.vmem [resolvable:$true] %s54_s12  ;;  %s23_s14 = int_to_ptr.vmem [resolvable:$true] %s22_s14 }
  0x17   :  { %s11455_s17 = scalar_lea.hbm %s12102_s3, 384 }
  0x18   :  { %p11456_p8 = scmp.ne.s32.totalorder %s12102_s3, %s11455_s17  ;;  %p11459_p9 = scmp.lt.u32.totalorder %s11455_s17, %s12102_s3 }
  0x1a   :  { %p11461_p10 = pnand %p11459_p9, %p11456_p8 }
  0x1c   :  { %11464 = shalt.err (!%p11461_p10)
}
  0x1d   :  { %s11465_s1 = scalar_lea.vmem %s55_s12, 384  ;;  %p11470_p12 = scmp.lt.s32.totalorder %s55_s12, %s55_s12 }
  0x1e   :  { %p11466_p11 = scmp.ne.s32.totalorder %s55_s12, %s11465_s1  ;;  %p11471_p13 = scmp.lt.s32.totalorder %s11465_s1, %s11465_s1 }
  0x20   :  { %p11472_p0 = por %p11471_p13, %p11470_p12 }
  0x22   :  { %p11473_p1 = pnand %p11472_p0, %p11466_p11 }
  0x24   :  { %11476 = shalt.err (!%p11473_p1)
}
  0x25   :  { %57 = dma.hbm_to_vmem [thread:$0]  %s12102_s3, 384, %s55_s12, [#allocation9]  }
  0x26   :  { %s11477_s26 = scalar_lea.hbm %s12099_s0, 160 }
  0x27   :  { %p11478_p2 = scmp.ne.s32.totalorder %s12099_s0, %s11477_s26  ;;  %p11481_p3 = scmp.lt.u32.totalorder %s11477_s26, %s12099_s0 }
  0x29   :  { %p11483_p4 = pnand %p11481_p3, %p11478_p2 }
  0x2b   :  { %11486 = shalt.err (!%p11483_p4)
}
  0x2c   :  { %s11487_s7 = scalar_lea.vmem %s23_s14, 160  ;;  %p11492_p6 = scmp.lt.s32.totalorder %s23_s14, %s23_s14 }
  0x2d   :  { %p11488_p5 = scmp.ne.s32.totalorder %s23_s14, %s11487_s7  ;;  %p11493_p7 = scmp.lt.s32.totalorder %s11487_s7, %s11487_s7 }
  0x2f   :  { %p11494_p8 = por %p11493_p7, %p11492_p6 }
  0x31   :  { %p11495_p9 = pnand %p11494_p8, %p11488_p5 }
  0x33   :  { %11498 = shalt.err (!%p11495_p9)
}
  0x34   :  { %25 = dma.hbm_to_vmem [thread:$0]  %s12099_s0, 160, %s23_s14, [#allocation3]  }
  0x35   :  { %s11602_s9 = smov [#allocation7]   ;;  %s11603_s11 = smov [#allocation10]  }
  0x36   :  { %s44_s10 = sshll.u32 %s11602_s9, 4  ;;  %s63_s12 = sshll.u32 %s11603_s11, 4  ;;  %s45_s10 = int_to_ptr.vmem [resolvable:$true] %s44_s10  ;;  %s64_s12 = int_to_ptr.vmem [resolvable:$true] %s63_s12 }
  0x37   :  { %s11499_s16 = scalar_lea.hbm %s12101_s2, 384 }
  0x38   :  { %p11500_p10 = scmp.ne.s32.totalorder %s12101_s2, %s11499_s16  ;;  %p11503_p11 = scmp.lt.u32.totalorder %s11499_s16, %s12101_s2 }
  0x3a   :  { %p11505_p12 = pnand %p11503_p11, %p11500_p10 }
  0x3c   :  { %11508 = shalt.err (!%p11505_p12)
}
  0x3d   :  { %s11509_s0 = scalar_lea.vmem %s45_s10, 384  ;;  %p11514_p0 = scmp.lt.s32.totalorder %s45_s10, %s45_s10 }
  0x3e   :  { %p11510_p13 = scmp.ne.s32.totalorder %s45_s10, %s11509_s0  ;;  %p11515_p1 = scmp.lt.s32.totalorder %s11509_s0, %s11509_s0 }
  0x40   :  { %p11516_p2 = por %p11515_p1, %p11514_p0 }
  0x42   :  { %p11517_p3 = pnand %p11516_p2, %p11510_p13 }
  0x44   :  { %11520 = shalt.err (!%p11517_p3)
}
  0x45   :  { %47 = dma.hbm_to_vmem [thread:$0]  %s12101_s2, 384, %s45_s10, [#allocation6]  }
  0x46   :  { %s11521_s23 = scalar_lea.hbm %s12103_s4, 196608 }
  0x47   :  { %p11522_p4 = scmp.ne.s32.totalorder %s12103_s4, %s11521_s23  ;;  %p11525_p5 = scmp.lt.u32.totalorder %s11521_s23, %s12103_s4 }
  0x49   :  { %p11527_p6 = pnand %p11525_p5, %p11522_p4 }
  0x4b   :  { %11530 = shalt.err (!%p11527_p6)
}
  0x4c   :  { %s11531_s28 = scalar_lea.vmem %s64_s12, 196608  ;;  %p11536_p8 = scmp.lt.s32.totalorder %s64_s12, %s64_s12 }
  0x4d   :  { %p11532_p7 = scmp.ne.s32.totalorder %s64_s12, %s11531_s28  ;;  %p11537_p9 = scmp.lt.s32.totalorder %s11531_s28, %s11531_s28 }
  0x4f   :  { %p11538_p10 = por %p11537_p9, %p11536_p8 }
  0x51   :  { %p11539_p11 = pnand %p11538_p10, %p11532_p7 }
  0x53   :  { %11542 = shalt.err (!%p11539_p11)
}
  0x54   :  { %s11604_s2 = smov 512   ;;  %s11605_s29 = smov 32  }
  0x55   :  { %69 = dma.hbm_to_vmem [thread:$0]  %s12103_s4, 196608, %s64_s12, [#allocation9], %s11604_s2, %s11604_s2, %s11605_s29  }
  0x56   :  { %s11606_s3 = smov [#allocation11]   ;;  %s11543_s11 = scalar_lea.hbm %s12104_s5, 384 }
  0x57   :  { %s75_s8 = sshll.u32 %s11606_s3, 4  ;;  %p11544_p12 = scmp.ne.s32.totalorder %s12104_s5, %s11543_s11  ;;  %s76_s8 = int_to_ptr.vmem [resolvable:$true] %s75_s8 }
  0x58   :  { %p11547_p13 = scmp.lt.u32.totalorder %s11543_s11, %s12104_s5 }
  0x5a   :  { %p11549_p0 = pnand %p11547_p13, %p11544_p12 }
  0x5c   :  { %11552 = shalt.err (!%p11549_p0)
}
  0x5d   :  { %s11553_s18 = scalar_lea.vmem %s76_s8, 384  ;;  %p11558_p2 = scmp.lt.s32.totalorder %s76_s8, %s76_s8 }
  0x5e   :  { %p11554_p1 = scmp.ne.s32.totalorder %s76_s8, %s11553_s18  ;;  %p11559_p3 = scmp.lt.s32.totalorder %s11553_s18, %s11553_s18 }
  0x60   :  { %p11560_p4 = por %p11559_p3, %p11558_p2 }
  0x62   :  { %p11561_p5 = pnand %p11560_p4, %p11554_p1 }
  0x64   :  { %11564 = shalt.err (!%p11561_p5)
}
  0x65   :  { %s11607_s4 = smov 64   ;;  %s11608_s12 = smov 4  }
  0x66   :  { %81 = dma.hbm_to_vmem [thread:$0]  %s12104_s5, 384, %s76_s8, [#allocation12], %s11607_s4, %s11607_s4, %s11608_s12  }
  0x67   :  { %11587 = dma.done.wait [#allocation3], 160  }
  0x68   :  { %11588 = vsyncadd [#allocation3], 4294967136 }
  0x69   :  { %11589 = dma.done.wait [#allocation6], 200064  }
  0x6a   :  { %11590 = vsyncadd [#allocation6], 4294767232 }
  0x6b   :  { %11591 = dma.done.wait [#allocation9], 196992  }
  0x6c   :  { %11592 = vsyncadd [#allocation9], 4294770304 }
  0x6d   :  { %11593 = dma.done.wait [#allocation12], 384  }
  0x6e   :  { %11594 = vsyncadd [#allocation12], 4294966912  ;;  %v103_v0 = vld [vmem:[#allocation5 + $0x8] sm:$0xff]  ;;  %v105_v2 = vld [vmem:[#allocation5 + $0x18] sm:$0xff]  ;;  %vm1695_vm0 = vcmask 1042432   ;;  %vm1692_vm1 = vcmask 23552  }
  0x6f   :  { %v127_v1 = vld [vmem:[#allocation5 + $0xc8] sm:$0xff]  ;;  %v129_v4 = vld [vmem:[#allocation5 + $0xd8] sm:$0xff]  ;;  %v102_v5 = vld [vmem:[#allocation5] sm:$0xff]  ;;  %s11611_s5 = smov [#allocation13]  }
  0x70   :  { %v8230_v3 = vpack.c.bf16 %v127_v1, %v103_v0  ;;  %v126_v6 = vld [vmem:[#allocation5 + $0xc0] sm:$0xff]  ;;  %v8358_v7 = vpack.c.bf16 %v129_v4, %v105_v2  ;;  %v104_v9 = vld [vmem:[#allocation5 + $0x10] sm:$0xff]  ;;  %v151_v11 = vld [vmem:[#allocation5 + $0x188] sm:$0xff]  ;;  %s8178_s0 = sshll.u32 %s11611_s5, 4  ;;  %s8179_s0 = int_to_ptr.vmem [resolvable:$true] %s8178_s0 }
  0x71   :  { %v8232_v8 = vpack.c.bf16 %v126_v6, %v102_v5  ;;  %v128_v10 = vld [vmem:[#allocation5 + $0xd0] sm:$0xff]  ;;  %v175_v13 = vld [vmem:[#allocation5 + $0x248] sm:$0xff]  ;;  %v153_v14 = vld [vmem:[#allocation5 + $0x198] sm:$0xff]  ;;  %s11565_s14 = scalar_lea.vmem %s8179_s0, 768  ;;  %p11570_p7 = scmp.lt.s32.totalorder %s8179_s0, %s8179_s0 }
  0x72   :  { %8231 = vmatprep.subr.bf16.mxu0 %v8230_v3  ;;  %v8360_v12 = vpack.c.bf16 %v128_v10, %v104_v9  ;;  %v177_v15 = vld [vmem:[#allocation5 + $0x258] sm:$0xff]  ;;  %8359 = vmatprep.subr.bf16.mxu1 %v8358_v7  ;;  %v8234_v16 = vpack.c.bf16 %v175_v13, %v151_v11  ;;  %v150_v18 = vld [vmem:[#allocation5 + $0x180] sm:$0xff]  ;;  %v152_v20 = vld [vmem:[#allocation5 + $0x190] sm:$0xff]  ;;  %p11566_p6 = scmp.ne.s32.totalorder %s8179_s0, %s11565_s14  ;;  %p11571_p8 = scmp.lt.s32.totalorder %s11565_s14, %s11565_s14 }
  0x73   :  { %8233 = vmatpush1.bf16.msra.mxu0 %v8232_v8  ;;  %v8362_v17 = vpack.c.bf16 %v177_v15, %v153_v14  ;;  %v174_v19 = vld [vmem:[#allocation5 + $0x240] sm:$0xff]  ;;  %v176_v22 = vld [vmem:[#allocation5 + $0x250] sm:$0xff]  ;;  %v199_v23 = vld [vmem:[#allocation5 + $0x308] sm:$0xff] }
  0x74   :  { %8361 = vmatpush1.bf16.msra.mxu1 %v8360_v12  ;;  %v8236_v21 = vpack.c.bf16 %v174_v19, %v150_v18  ;;  %v223_v24 = vld [vmem:[#allocation5 + $0x3c8] sm:$0xff]  ;;  %8235 = vmatprep.subr.bf16.mxu0 %v8234_v16  ;;  %v8364_v25 = vpack.c.bf16 %v176_v22, %v152_v20  ;;  %v201_v27 = vld [vmem:[#allocation5 + $0x318] sm:$0xff]  ;;  %v198_v29 = vld [vmem:[#allocation5 + $0x300] sm:$0xff]  ;;  %p11572_p9 = por %p11571_p8, %p11570_p7 }
  0x75   :  { %8363 = vmatprep.subr.bf16.mxu1 %v8362_v17  ;;  %v8238_v26 = vpack.c.bf16 %v223_v24, %v199_v23  ;;  %v225_v28 = vld [vmem:[#allocation5 + $0x3d8] sm:$0xff]  ;;  %v222_v31 = vld [vmem:[#allocation5 + $0x3c0] sm:$0xff]  ;;  %v200_v32 = vld [vmem:[#allocation5 + $0x310] sm:$0xff] }
  0x76   :  { %v8366_v30 = vpack.c.bf16 %v225_v28, %v201_v27  ;;  %v224_v33 = vld [vmem:[#allocation5 + $0x3d0] sm:$0xff]  ;;  %v8240_v34 = vpack.c.bf16 %v222_v31, %v198_v29  ;;  %v247_v35 = vld [vmem:[#allocation5 + $0x488] sm:$0xff]  ;;  %v249_v37 = vld [vmem:[#allocation5 + $0x498] sm:$0xff]  ;;  %p11573_p10 = pnand %p11572_p9, %p11566_p6 }
  0x77   :  { %8237 = vmatpush1.bf16.msra.mxu0 %v8236_v21  ;;  %v271_v36 = vld [vmem:[#allocation5 + $0x548] sm:$0xff]  ;;  %v8368_v38 = vpack.c.bf16 %v224_v33, %v200_v32  ;;  %v273_v40 = vld [vmem:[#allocation5 + $0x558] sm:$0xff]  ;;  %v246_v41 = vld [vmem:[#allocation5 + $0x480] sm:$0xff] }
  0x78   :  { %8365 = vmatpush1.bf16.msra.mxu1 %v8364_v25  ;;  %8239 = vmatprep.subr.bf16.mxu0 %v8238_v26  ;;  %v8242_v39 = vpack.c.bf16 %v271_v36, %v247_v35  ;;  %v270_v42 = vld [vmem:[#allocation5 + $0x540] sm:$0xff]  ;;  %v8370_v43 = vpack.c.bf16 %v273_v40, %v249_v37  ;;  %v248_v44 = vld [vmem:[#allocation5 + $0x490] sm:$0xff]  ;;  %v295_v46 = vld [vmem:[#allocation5 + $0x608] sm:$0xff] }
  0x79   :  { %8367 = vmatprep.subr.bf16.mxu1 %v8366_v30  ;;  %v272_v45 = vld [vmem:[#allocation5 + $0x550] sm:$0xff]  ;;  %v319_v47 = vld [vmem:[#allocation5 + $0x6c8] sm:$0xff]  ;;  %v297_v48 = vld [vmem:[#allocation5 + $0x618] sm:$0xff]  ;;  %v8244_v50 = vpack.c.bf16 %v270_v42, %v246_v41 }
  0x7a   :  { %v321_v49 = vld [vmem:[#allocation5 + $0x6d8] sm:$0xff]  ;;  %v8372_v51 = vpack.c.bf16 %v272_v45, %v248_v44  ;;  %v8246_v52 = vpack.c.bf16 %v319_v47, %v295_v46  ;;  %v294_v53 = vld [vmem:[#allocation5 + $0x600] sm:$0xff]  ;;  %v296_v55 = vld [vmem:[#allocation5 + $0x610] sm:$0xff]  ;;  %v11609_v46 = vmov 1983009808  }
  0x7b   :  { %8241 = vmatpush1.bf16.msra.mxu0 %v8240_v34  ;;  %v318_v54 = vld [vmem:[#allocation5 + $0x6c0] sm:$0xff]  ;;  %v8374_v56 = vpack.c.bf16 %v321_v49, %v297_v48  ;;  %v320_v57 = vld [vmem:[#allocation5 + $0x6d0] sm:$0xff]  ;;  %v343_v58 = vld [vmem:[#allocation5 + $0x788] sm:$0xff]  ;;  %v1666_v47 = vunpack.c.l.s4 %v11609_v46  ;;  %v1668_v48 = vlaneseq }
  0x7c   :  { %8369 = vmatpush1.bf16.msra.mxu1 %v8368_v38  ;;  %8243 = vmatprep.subr.bf16.mxu0 %v8242_v39  ;;  %v367_v59 = vld [vmem:[#allocation5 + $0x848] sm:$0xff]  ;;  %v345_v60 = vld [vmem:[#allocation5 + $0x798] sm:$0xff]  ;;  %v8248_v62 = vpack.c.bf16 %v318_v54, %v294_v53  ;;  %v8376_v63 = vpack.c.bf16 %v320_v57, %v296_v55  ;;  %v342_v1 = vld [vmem:[#allocation5 + $0x780] sm:$0xff] }
  0x7d   :  { %8371 = vmatprep.subr.bf16.mxu1 %v8370_v43  ;;  %v369_v61 = vld [vmem:[#allocation5 + $0x858] sm:$0xff]  ;;  %v8250_v0 = vpack.c.bf16 %v367_v59, %v343_v58  ;;  %v366_v2 = vld [vmem:[#allocation5 + $0x840] sm:$0xff]  ;;  %v344_v3 = vld [vmem:[#allocation5 + $0x790] sm:$0xff] }
  0x7e   :  { %v8378_v4 = vpack.c.bf16 %v369_v61, %v345_v60  ;;  %v368_v5 = vld [vmem:[#allocation5 + $0x850] sm:$0xff]  ;;  %v391_v6 = vld [vmem:[#allocation5 + $0x908] sm:$0xff]  ;;  %v393_v8 = vld [vmem:[#allocation5 + $0x918] sm:$0xff]  ;;  %v8252_v10 = vpack.c.bf16 %v366_v2, %v342_v1  ;;  %v1667_v61 = vunpack.c.0.s8 %v1666_v47 }
  0x7f   :  { %8245 = vmatpush1.bf16.msra.mxu0 %v8244_v50  ;;  %v415_v7 = vld [vmem:[#allocation5 + $0x9c8] sm:$0xff]  ;;  %v417_v9 = vld [vmem:[#allocation5 + $0x9d8] sm:$0xff]  ;;  %v8380_v11 = vpack.c.bf16 %v368_v5, %v344_v3  ;;  %v390_v13 = vld [vmem:[#allocation5 + $0x900] sm:$0xff] }
  0x80   :  { %8373 = vmatpush1.bf16.msra.mxu1 %v8372_v51  ;;  %8247 = vmatprep.subr.bf16.mxu0 %v8246_v52  ;;  %v8254_v12 = vpack.c.bf16 %v415_v7, %v391_v6  ;;  %v414_v14 = vld [vmem:[#allocation5 + $0x9c0] sm:$0xff]  ;;  %v392_v15 = vld [vmem:[#allocation5 + $0x910] sm:$0xff]  ;;  %v8382_v16 = vpack.c.bf16 %v417_v9, %v393_v8  ;;  %v439_v18 = vld [vmem:[#allocation5 + $0xa88] sm:$0xff] }
  0x81   :  { %8375 = vmatprep.subr.bf16.mxu1 %v8374_v56  ;;  %v416_v17 = vld [vmem:[#allocation5 + $0x9d0] sm:$0xff]  ;;  %v463_v19 = vld [vmem:[#allocation5 + $0xb48] sm:$0xff]  ;;  %v441_v20 = vld [vmem:[#allocation5 + $0xa98] sm:$0xff]  ;;  %v8256_v22 = vpack.c.bf16 %v414_v14, %v390_v13 }
  0x82   :  { %v465_v21 = vld [vmem:[#allocation5 + $0xb58] sm:$0xff]  ;;  %v8384_v23 = vpack.c.bf16 %v416_v17, %v392_v15  ;;  %v8258_v24 = vpack.c.bf16 %v463_v19, %v439_v18  ;;  %v438_v25 = vld [vmem:[#allocation5 + $0xa80] sm:$0xff]  ;;  %v440_v27 = vld [vmem:[#allocation5 + $0xa90] sm:$0xff] }
  0x83   :  { %8249 = vmatpush1.bf16.msra.mxu0 %v8248_v62  ;;  %v462_v26 = vld [vmem:[#allocation5 + $0xb40] sm:$0xff]  ;;  %v8386_v28 = vpack.c.bf16 %v465_v21, %v441_v20  ;;  %v464_v29 = vld [vmem:[#allocation5 + $0xb50] sm:$0xff]  ;;  %v487_v30 = vld [vmem:[#allocation5 + $0xc08] sm:$0xff]  ;;  %v11721_v62 = vshrl.u32 %v1668_v48, 7 }
  0x84   :  { %8377 = vmatpush1.bf16.msra.mxu1 %v8376_v63  ;;  %8251 = vmatprep.subr.bf16.mxu0 %v8250_v0  ;;  %v511_v31 = vld [vmem:[#allocation5 + $0xcc8] sm:$0xff]  ;;  %v489_v32 = vld [vmem:[#allocation5 + $0xc18] sm:$0xff]  ;;  %v8260_v34 = vpack.c.bf16 %v462_v26, %v438_v25  ;;  %v8388_v35 = vpack.c.bf16 %v464_v29, %v440_v27  ;;  %v486_v37 = vld [vmem:[#allocation5 + $0xc00] sm:$0xff] }
  0x85   :  { %8379 = vmatprep.subr.bf16.mxu1 %v8378_v4  ;;  %v513_v33 = vld [vmem:[#allocation5 + $0xcd8] sm:$0xff]  ;;  %v8262_v36 = vpack.c.bf16 %v511_v31, %v487_v30  ;;  %v510_v38 = vld [vmem:[#allocation5 + $0xcc0] sm:$0xff]  ;;  %v488_v39 = vld [vmem:[#allocation5 + $0xc10] sm:$0xff] }
  0x86   :  { %v8390_v40 = vpack.c.bf16 %v513_v33, %v489_v32  ;;  %v512_v41 = vld [vmem:[#allocation5 + $0xcd0] sm:$0xff]  ;;  %v535_v42 = vld [vmem:[#allocation5 + $0xd88] sm:$0xff]  ;;  %v537_v44 = vld [vmem:[#allocation5 + $0xd98] sm:$0xff]  ;;  %v8264_v49 = vpack.c.bf16 %v510_v38, %v486_v37 }
  0x87   :  { %8253 = vmatpush1.bf16.msra.mxu0 %v8252_v10  ;;  %v559_v43 = vld [vmem:[#allocation5 + $0xe48] sm:$0xff]  ;;  %v561_v45 = vld [vmem:[#allocation5 + $0xe58] sm:$0xff]  ;;  %v8392_v50 = vpack.c.bf16 %v512_v41, %v488_v39  ;;  %v534_v52 = vld [vmem:[#allocation5 + $0xd80] sm:$0xff] }
  0x88   :  { %8381 = vmatpush1.bf16.msra.mxu1 %v8380_v11  ;;  %8255 = vmatprep.subr.bf16.mxu0 %v8254_v12  ;;  %v8266_v51 = vpack.c.bf16 %v559_v43, %v535_v42  ;;  %v558_v53 = vld [vmem:[#allocation5 + $0xe40] sm:$0xff]  ;;  %v536_v54 = vld [vmem:[#allocation5 + $0xd90] sm:$0xff]  ;;  %v8394_v55 = vpack.c.bf16 %v561_v45, %v537_v44  ;;  %v583_v57 = vld [vmem:[#allocation5 + $0xf08] sm:$0xff]  ;;  %v11724_v11 = vsub.s32 %v1667_v61, %v11721_v62 }
  0x89   :  { %8383 = vmatprep.subr.bf16.mxu1 %v8382_v16  ;;  %v560_v56 = vld [vmem:[#allocation5 + $0xe50] sm:$0xff]  ;;  %v607_v58 = vld [vmem:[#allocation5 + $0xfc8] sm:$0xff]  ;;  %v585_v59 = vld [vmem:[#allocation5 + $0xf18] sm:$0xff]  ;;  %v8268_v63 = vpack.c.bf16 %v558_v53, %v534_v52 }
  0x8a   :  { %v609_v60 = vld [vmem:[#allocation5 + $0xfd8] sm:$0xff]  ;;  %v8396_v0 = vpack.c.bf16 %v560_v56, %v536_v54  ;;  %v8270_v1 = vpack.c.bf16 %v607_v58, %v583_v57  ;;  %v582_v2 = vld [vmem:[#allocation5 + $0xf00] sm:$0xff]  ;;  %v584_v4 = vld [vmem:[#allocation5 + $0xf10] sm:$0xff] }
  0x8b   :  { %8257 = vmatpush1.bf16.msra.mxu0 %v8256_v22  ;;  %v606_v3 = vld [vmem:[#allocation5 + $0xfc0] sm:$0xff]  ;;  %v8398_v5 = vpack.c.bf16 %v609_v60, %v585_v59  ;;  %v608_v6 = vld [vmem:[#allocation5 + $0xfd0] sm:$0xff]  ;;  %v631_v7 = vld [vmem:[#allocation5 + $0x1088] sm:$0xff] }
  0x8c   :  { %8385 = vmatpush1.bf16.msra.mxu1 %v8384_v23  ;;  %8259 = vmatprep.subr.bf16.mxu0 %v8258_v24  ;;  %v655_v8 = vld [vmem:[#allocation5 + $0x1148] sm:$0xff]  ;;  %v633_v9 = vld [vmem:[#allocation5 + $0x1098] sm:$0xff]  ;;  %v8272_v12 = vpack.c.bf16 %v606_v3, %v582_v2  ;;  %v630_v13 = vld [vmem:[#allocation5 + $0x1080] sm:$0xff]  ;;  %v8400_v14 = vpack.c.bf16 %v608_v6, %v584_v4 }
  0x8d   :  { %8387 = vmatprep.subr.bf16.mxu1 %v8386_v28  ;;  %v657_v10 = vld [vmem:[#allocation5 + $0x1158] sm:$0xff]  ;;  %v8274_v15 = vpack.c.bf16 %v655_v8, %v631_v7  ;;  %v654_v16 = vld [vmem:[#allocation5 + $0x1140] sm:$0xff]  ;;  %v632_v17 = vld [vmem:[#allocation5 + $0x1090] sm:$0xff] }
  0x8e   :  { %v656_v18 = vld [vmem:[#allocation5 + $0x1150] sm:$0xff]  ;;  %v8402_v19 = vpack.c.bf16 %v657_v10, %v633_v9  ;;  %v679_v20 = vld [vmem:[#allocation5 + $0x1208] sm:$0xff]  ;;  %v681_v23 = vld [vmem:[#allocation5 + $0x1218] sm:$0xff]  ;;  %v8276_v26 = vpack.c.bf16 %v654_v16, %v630_v13 }
  0x8f   :  { %8261 = vmatpush1.bf16.msra.mxu0 %v8260_v34  ;;  %v703_v21 = vld [vmem:[#allocation5 + $0x12c8] sm:$0xff]  ;;  %v11726_v22 = vld [vmem:[#allocation2] sm:$0xff]  ;;  %v8404_v27 = vpack.c.bf16 %v656_v18, %v632_v17  ;;  %v678_v29 = vld [vmem:[#allocation5 + $0x1200] sm:$0xff] }
  0x90   :  { %8389 = vmatpush1.bf16.msra.mxu1 %v8388_v35  ;;  %8263 = vmatprep.subr.bf16.mxu0 %v8262_v36  ;;  %v705_v24 = vld [vmem:[#allocation5 + $0x12d8] sm:$0xff]  ;;  %v11730_v25 = vrot.slane %v11726_v22, %v11724_v11  ;;  %v8278_v28 = vpack.c.bf16 %v703_v21, %v679_v20  ;;  %v702_v30 = vld [vmem:[#allocation5 + $0x12c0] sm:$0xff]  ;;  %v680_v31 = vld [vmem:[#allocation5 + $0x1210] sm:$0xff]  ;;  %v1664_v10 = vcombine.high %v11726_v22, %v11726_v22 }
  0x91   :  { %8391 = vmatprep.subr.bf16.mxu1 %v8390_v40  ;;  %v8406_v33 = vpack.c.bf16 %v705_v24, %v681_v23  ;;  %v704_v34 = vld [vmem:[#allocation5 + $0x12d0] sm:$0xff]  ;;  %v727_v35 = vld [vmem:[#allocation5 + $0x1388] sm:$0xff]  ;;  %v729_v37 = vld [vmem:[#allocation5 + $0x1398] sm:$0xff]  ;;  %v8280_v39 = vpack.c.bf16 %v702_v30, %v678_v29 }
  0x92   :  { %v11734_v32 = vcombine.high %v11730_v25, %v11730_v25  ;;  %v751_v36 = vld [vmem:[#allocation5 + $0x1448] sm:$0xff]  ;;  %v753_v38 = vld [vmem:[#allocation5 + $0x1458] sm:$0xff]  ;;  %v8408_v40 = vpack.c.bf16 %v704_v34, %v680_v31  ;;  %v726_v42 = vld [vmem:[#allocation5 + $0x1380] sm:$0xff] }
  0x93   :  { %8265 = vmatpush1.bf16.msra.mxu0 %v8264_v49  ;;  %v8282_v41 = vpack.c.bf16 %v751_v36, %v727_v35  ;;  %v750_v43 = vld [vmem:[#allocation5 + $0x1440] sm:$0xff]  ;;  %v728_v44 = vld [vmem:[#allocation5 + $0x1390] sm:$0xff]  ;;  %v8410_v45 = vpack.c.bf16 %v753_v38, %v729_v37  ;;  %v775_v47 = vld [vmem:[#allocation5 + $0x1508] sm:$0xff] }
  0x94   :  { %8393 = vmatpush1.bf16.msra.mxu1 %v8392_v50  ;;  %8267 = vmatprep.subr.bf16.mxu0 %v8266_v51  ;;  %v752_v46 = vld [vmem:[#allocation5 + $0x1450] sm:$0xff]  ;;  %v799_v48 = vld [vmem:[#allocation5 + $0x15c8] sm:$0xff]  ;;  %v777_v49 = vld [vmem:[#allocation5 + $0x1518] sm:$0xff]  ;;  %v8284_v51 = vpack.c.bf16 %v750_v43, %v726_v42 }
  0x95   :  { %8395 = vmatprep.subr.bf16.mxu1 %v8394_v55  ;;  %1832 = vmatprep.mubr.f32.mxu0 %v11734_v32  ;;  %v801_v50 = vld [vmem:[#allocation5 + $0x15d8] sm:$0xff]  ;;  %v8412_v52 = vpack.c.bf16 %v752_v46, %v728_v44  ;;  %v8286_v53 = vpack.c.bf16 %v799_v48, %v775_v47  ;;  %v774_v54 = vld [vmem:[#allocation5 + $0x1500] sm:$0xff]  ;;  %v776_v56 = vld [vmem:[#allocation5 + $0x1510] sm:$0xff] }
  0x96   :  { %2045 = vmatprep.mubr.f32.mxu1 %v11734_v32  ;;  %v798_v55 = vld [vmem:[#allocation5 + $0x15c0] sm:$0xff]  ;;  %v8414_v57 = vpack.c.bf16 %v801_v50, %v777_v49  ;;  %v800_v58 = vld [vmem:[#allocation5 + $0x15d0] sm:$0xff]  ;;  %v823_v59 = vld [vmem:[#allocation5 + $0x1688] sm:$0xff] }
  0x97   :  { %8269 = vmatpush1.bf16.msra.mxu0 %v8268_v63  ;;  %v847_v60 = vld [vmem:[#allocation5 + $0x1748] sm:$0xff]  ;;  %v825_v61 = vld [vmem:[#allocation5 + $0x1698] sm:$0xff]  ;;  %v822_v3 = vld [vmem:[#allocation5 + $0x1680] sm:$0xff] }
  0x98   :  { %8397 = vmatpush1.bf16.msra.mxu1 %v8396_v0  ;;  %8271 = vmatprep.subr.bf16.mxu0 %v8270_v1  ;;  %v849_v63 = vld [vmem:[#allocation5 + $0x1758] sm:$0xff]  ;;  %v8288_v0 = vpack.c.bf16 %v798_v55, %v774_v54  ;;  %v8416_v1 = vpack.c.bf16 %v800_v58, %v776_v56  ;;  %v8290_v2 = vpack.c.bf16 %v847_v60, %v823_v59  ;;  %v846_v4 = vld [vmem:[#allocation5 + $0x1740] sm:$0xff]  ;;  %v848_v7 = vld [vmem:[#allocation5 + $0x1750] sm:$0xff] }
  0x99   :  { %8399 = vmatprep.subr.bf16.mxu1 %v8398_v5  ;;  %v824_v5 = vld [vmem:[#allocation5 + $0x1690] sm:$0xff]  ;;  %v8418_v6 = vpack.c.bf16 %v849_v63, %v825_v61  ;;  %v871_v8 = vld [vmem:[#allocation5 + $0x1808] sm:$0xff]  ;;  %v897_v13 = vld [vmem:[#allocation5 + $0x18d8] sm:$0xff] }
  0x9a   :  { %v895_v9 = vld [vmem:[#allocation5 + $0x18c8] sm:$0xff]  ;;  %v870_v17 = vld [vmem:[#allocation5 + $0x1800] sm:$0xff]  ;;  %v896_v21 = vld [vmem:[#allocation5 + $0x18d0] sm:$0xff] }
  0x9b   :  { %8273 = vmatpush1.bf16.msra.mxu0 %v8272_v12  ;;  %v873_v12 = vld [vmem:[#allocation5 + $0x1818] sm:$0xff]  ;;  %v8294_v16 = vpack.c.bf16 %v895_v9, %v871_v8  ;;  %v894_v18 = vld [vmem:[#allocation5 + $0x18c0] sm:$0xff]  ;;  %v919_v23 = vld [vmem:[#allocation5 + $0x1988] sm:$0xff] }
  0x9c   :  { %8401 = vmatpush1.bf16.msra.mxu1 %v8400_v14  ;;  %8275 = vmatprep.subr.bf16.mxu0 %v8274_v15  ;;  %v8292_v14 = vpack.c.bf16 %v846_v4, %v822_v3  ;;  %v8420_v15 = vpack.c.bf16 %v848_v7, %v824_v5  ;;  %v8422_v20 = vpack.c.bf16 %v897_v13, %v873_v12  ;;  %v943_v24 = vld [vmem:[#allocation5 + $0x1a48] sm:$0xff]  ;;  %v921_v22 = vld [vmem:[#allocation5 + $0x1998] sm:$0xff]  ;;  %v918_v31 = vld [vmem:[#allocation5 + $0x1980] sm:$0xff] }
  0x9d   :  { %8403 = vmatprep.subr.bf16.mxu1 %v8402_v19  ;;  %v872_v19 = vld [vmem:[#allocation5 + $0x1810] sm:$0xff]  ;;  %v8298_v30 = vpack.c.bf16 %v943_v24, %v919_v23  ;;  %v967_v37 = vld [vmem:[#allocation5 + $0x1b08] sm:$0xff]  ;;  %v990_v46 = vld [vmem:[#allocation5 + $0x1bc0] sm:$0xff] }
  0x9e   :  { %v8424_v29 = vpack.c.bf16 %v896_v21, %v872_v19  ;;  %v920_v34 = vld [vmem:[#allocation5 + $0x1990] sm:$0xff]  ;;  %v991_v38 = vld [vmem:[#allocation5 + $0x1bc8] sm:$0xff]  ;;  %v1038_v58 = vld [vmem:[#allocation5 + $0x1d40] sm:$0xff] }
  0x9f   :  { %8277 = vmatpush1.bf16.msra.mxu0 %v8276_v26  ;;  %v11741_v26 = vrot.slane %v1664_v10, %v11724_v11  ;;  %v944_v36 = vld [vmem:[#allocation5 + $0x1a50] sm:$0xff]  ;;  %v8302_v44 = vpack.c.bf16 %v991_v38, %v967_v37  ;;  %v1015_v50 = vld [vmem:[#allocation5 + $0x1c88] sm:$0xff]  ;;  %v1086_v7 = vld [vmem:[#allocation5 + $0x1ec0] sm:$0xff] }
  0xa0   :  { %8405 = vmatpush1.bf16.msra.mxu1 %v8404_v27  ;;  %8279 = vmatprep.subr.bf16.mxu0 %v8278_v28  ;;  %v945_v27 = vld [vmem:[#allocation5 + $0x1a58] sm:$0xff]  ;;  %v8296_v28 = vpack.c.bf16 %v894_v18, %v870_v17  ;;  %v8428_v43 = vpack.c.bf16 %v944_v36, %v920_v34  ;;  %v968_v47 = vld [vmem:[#allocation5 + $0x1b10] sm:$0xff]  ;;  %v1063_v63 = vld [vmem:[#allocation5 + $0x1e08] sm:$0xff] }
  0xa1   :  { %8407 = vmatprep.subr.bf16.mxu1 %v8406_v33  ;;  %v942_v33 = vld [vmem:[#allocation5 + $0x1a40] sm:$0xff]  ;;  %v8426_v35 = vpack.c.bf16 %v945_v27, %v921_v22  ;;  %v992_v49 = vld [vmem:[#allocation5 + $0x1bd0] sm:$0xff]  ;;  %v1111_v12 = vld [vmem:[#allocation5 + $0x1f88] sm:$0xff] }
  0xa2   :  { %v8300_v42 = vpack.c.bf16 %v942_v33, %v918_v31  ;;  %v8432_v55 = vpack.c.bf16 %v992_v49, %v968_v47  ;;  %v1016_v59 = vld [vmem:[#allocation5 + $0x1c90] sm:$0xff]  ;;  %v1135_v13 = vld [vmem:[#allocation5 + $0x2048] sm:$0xff]  ;;  %v1110_v19 = vld [vmem:[#allocation5 + $0x1f80] sm:$0xff] }
  0xa3   :  { %8281 = vmatpush1.bf16.msra.mxu0 %v8280_v39  ;;  %v11745_v39 = vcombine.high %v11741_v26, %v11741_v26  ;;  %v1040_v61 = vld [vmem:[#allocation5 + $0x1d50] sm:$0xff]  ;;  %v8314_v18 = vpack.c.bf16 %v1135_v13, %v1111_v12  ;;  %v1159_v22 = vld [vmem:[#allocation5 + $0x2108] sm:$0xff]  ;;  %v1158_v34 = vld [vmem:[#allocation5 + $0x2100] sm:$0xff] }
  0xa4   :  { %8409 = vmatpush1.bf16.msra.mxu1 %v8408_v40  ;;  %8283 = vmatprep.subr.bf16.mxu0 %v8282_v41  ;;  %v969_v40 = vld [vmem:[#allocation5 + $0x1b18] sm:$0xff]  ;;  %v8436_v4 = vpack.c.bf16 %v1040_v61, %v1016_v59  ;;  %v1064_v8 = vld [vmem:[#allocation5 + $0x1e10] sm:$0xff]  ;;  %v1183_v27 = vld [vmem:[#allocation5 + $0x21c8] sm:$0xff] }
  0xa5   :  { %8411 = vmatprep.subr.bf16.mxu1 %v8410_v45  ;;  %v993_v41 = vld [vmem:[#allocation5 + $0x1bd8] sm:$0xff]  ;;  %v966_v45 = vld [vmem:[#allocation5 + $0x1b00] sm:$0xff]  ;;  %v1088_v10 = vld [vmem:[#allocation5 + $0x1ed0] sm:$0xff]  ;;  %v8318_v33 = vpack.c.bf16 %v1183_v27, %v1159_v22 }
  0xa6   :  { %v8430_v48 = vpack.c.bf16 %v993_v41, %v969_v40  ;;  %v8304_v54 = vpack.c.bf16 %v990_v46, %v966_v45  ;;  %v8440_v17 = vpack.c.bf16 %v1088_v10, %v1064_v8  ;;  %v1112_v21 = vld [vmem:[#allocation5 + $0x1f90] sm:$0xff]  ;;  %v1207_v40 = vld [vmem:[#allocation5 + $0x2288] sm:$0xff]  ;;  %v1206_v47 = vld [vmem:[#allocation5 + $0x2280] sm:$0xff] }
  0xa7   :  { %8285 = vmatpush1.bf16.msra.mxu0 %v8284_v51  ;;  %v1039_v51 = vld [vmem:[#allocation5 + $0x1d48] sm:$0xff]  ;;  %v1136_v24 = vld [vmem:[#allocation5 + $0x2050] sm:$0xff]  ;;  %v1254_v59 = vld [vmem:[#allocation5 + $0x2400] sm:$0xff] }
  0xa8   :  { %8413 = vmatpush1.bf16.msra.mxu1 %v8412_v52  ;;  %8287 = vmatprep.subr.bf16.mxu0 %v8286_v53  ;;  %v1017_v52 = vld [vmem:[#allocation5 + $0x1c98] sm:$0xff]  ;;  %v8306_v56 = vpack.c.bf16 %v1039_v51, %v1015_v50  ;;  %v8444_v31 = vpack.c.bf16 %v1136_v24, %v1112_v21  ;;  %v1160_v36 = vld [vmem:[#allocation5 + $0x2110] sm:$0xff]  ;;  %v1231_v41 = vld [vmem:[#allocation5 + $0x2348] sm:$0xff] }
  0xa9   :  { %8415 = vmatprep.subr.bf16.mxu1 %v8414_v57  ;;  %v1041_v53 = vld [vmem:[#allocation5 + $0x1d58] sm:$0xff]  ;;  %v1014_v57 = vld [vmem:[#allocation5 + $0x1c80] sm:$0xff]  ;;  %v1184_v38 = vld [vmem:[#allocation5 + $0x21d0] sm:$0xff]  ;;  %v8322_v46 = vpack.c.bf16 %v1231_v41, %v1207_v40 }
  0xaa   :  { %v8434_v60 = vpack.c.bf16 %v1041_v53, %v1017_v52  ;;  %v8308_v3 = vpack.c.bf16 %v1038_v58, %v1014_v57  ;;  %v8448_v45 = vpack.c.bf16 %v1184_v38, %v1160_v36  ;;  %v1208_v49 = vld [vmem:[#allocation5 + $0x2290] sm:$0xff]  ;;  %v1255_v52 = vld [vmem:[#allocation5 + $0x2408] sm:$0xff]  ;;  %v1302_v8 = vld [vmem:[#allocation5 + $0x2580] sm:$0xff] }
  0xab   :  { %8289 = vmatpush1.bf16.msra.mxu0 %v8288_v0  ;;  %v1087_v0 = vld [vmem:[#allocation5 + $0x1ec8] sm:$0xff]  ;;  %v1232_v51 = vld [vmem:[#allocation5 + $0x2350] sm:$0xff]  ;;  %v1350_v21 = vld [vmem:[#allocation5 + $0x2700] sm:$0xff] }
  0xac   :  { %8417 = vmatpush1.bf16.msra.mxu1 %v8416_v1  ;;  %8291 = vmatprep.subr.bf16.mxu0 %v8290_v2  ;;  %v1065_v1 = vld [vmem:[#allocation5 + $0x1e18] sm:$0xff]  ;;  %v8310_v5 = vpack.c.bf16 %v1087_v0, %v1063_v63  ;;  %v1279_v53 = vld [vmem:[#allocation5 + $0x24c8] sm:$0xff]  ;;  %v8452_v57 = vpack.c.bf16 %v1232_v51, %v1208_v49  ;;  %v1256_v61 = vld [vmem:[#allocation5 + $0x2410] sm:$0xff] }
  0xad   :  { %8419 = vmatprep.subr.bf16.mxu1 %v8418_v6  ;;  %v1089_v2 = vld [vmem:[#allocation5 + $0x1ed8] sm:$0xff]  ;;  %v1062_v6 = vld [vmem:[#allocation5 + $0x1e00] sm:$0xff]  ;;  %v8326_v58 = vpack.c.bf16 %v1279_v53, %v1255_v52  ;;  %v1280_v0 = vld [vmem:[#allocation5 + $0x24d0] sm:$0xff] }
  0xae   :  { %v8438_v9 = vpack.c.bf16 %v1089_v2, %v1065_v1  ;;  %v1303_v1 = vld [vmem:[#allocation5 + $0x2588] sm:$0xff]  ;;  %v1304_v10 = vld [vmem:[#allocation5 + $0x2590] sm:$0xff]  ;;  %v1398_v36 = vld [vmem:[#allocation5 + $0x2880] sm:$0xff] }
  0xaf   :  { %8293 = vmatpush1.bf16.msra.mxu0 %v8292_v14  ;;  %v1113_v14 = vld [vmem:[#allocation5 + $0x1f98] sm:$0xff]  ;;  %v1327_v2 = vld [vmem:[#allocation5 + $0x2648] sm:$0xff]  ;;  %v1328_v13 = vld [vmem:[#allocation5 + $0x2650] sm:$0xff] }
  0xb0   :  { %8421 = vmatpush1.bf16.msra.mxu1 %v8420_v15  ;;  %8295 = vmatprep.subr.bf16.mxu0 %v8294_v16  ;;  %v1137_v15 = vld [vmem:[#allocation5 + $0x2058] sm:$0xff]  ;;  %v8312_v16 = vpack.c.bf16 %v1086_v7, %v1062_v6  ;;  %v8456_v6 = vpack.c.bf16 %v1280_v0, %v1256_v61  ;;  %v8330_v7 = vpack.c.bf16 %v1327_v2, %v1303_v1  ;;  %v1352_v24 = vld [vmem:[#allocation5 + $0x2710] sm:$0xff]  ;;  %v1446_v49 = vld [vmem:[#allocation5 + $0x2a00] sm:$0xff] }
  0xb1   :  { %8423 = vmatprep.subr.bf16.mxu1 %v8422_v20  ;;  %v1134_v20 = vld [vmem:[#allocation5 + $0x2040] sm:$0xff]  ;;  %v8442_v23 = vpack.c.bf16 %v1137_v15, %v1113_v14  ;;  %v1351_v14 = vld [vmem:[#allocation5 + $0x2708] sm:$0xff]  ;;  %v1376_v27 = vld [vmem:[#allocation5 + $0x27d0] sm:$0xff] }
  0xb2   :  { %1833 = vmatmul.mubr.f32.vlgmr.msra.gmra.mrb[0].mxu0 %v11730_v25  ;;  %v1375_v15 = vld [vmem:[#allocation5 + $0x27c8] sm:$0xff]  ;;  %v1400_v38 = vld [vmem:[#allocation5 + $0x2890] sm:$0xff]  ;;  %v1494_v61 = vld [vmem:[#allocation5 + $0x2b80] sm:$0xff] }
  0xb3   :  { %8297 = vmatpush1.bf16.msra.mxu0 %v8296_v28  ;;  %2046 = vmatmul.mubr.f32.vlgmr.msra.gmra.mrb[0].mxu1 %v11730_v25  ;;  %v1161_v28 = vld [vmem:[#allocation5 + $0x2118] sm:$0xff]  ;;  %v1424_v41 = vld [vmem:[#allocation5 + $0x2950] sm:$0xff] }
  0xb4   :  { %8425 = vmatpush1.bf16.msra.mxu1 %v8424_v29  ;;  %8299 = vmatprep.subr.bf16.mxu0 %v8298_v30  ;;  %v1185_v29 = vld [vmem:[#allocation5 + $0x21d8] sm:$0xff]  ;;  %v8316_v30 = vpack.c.bf16 %v1134_v20, %v1110_v19  ;;  %v8460_v19 = vpack.c.bf16 %v1328_v13, %v1304_v10  ;;  %v8334_v20 = vpack.c.bf16 %v1375_v15, %v1351_v14  ;;  %v1448_v51 = vld [vmem:[#allocation5 + $0x2a10] sm:$0xff]  ;;  %v1542_v10 = vld [vmem:[#allocation5 + $0x2d00] sm:$0xff] }
  0xb5   :  { %8427 = vmatprep.subr.bf16.mxu1 %v8426_v35  ;;  %1903 = vmatprep.mubr.f32.mxu0 %v11745_v39  ;;  %v1182_v35 = vld [vmem:[#allocation5 + $0x21c0] sm:$0xff]  ;;  %v8446_v37 = vpack.c.bf16 %v1185_v29, %v1161_v28  ;;  %v1399_v28 = vld [vmem:[#allocation5 + $0x2888] sm:$0xff]  ;;  %v1472_v53 = vld [vmem:[#allocation5 + $0x2ad0] sm:$0xff] }
  0xb6   :  { %2116 = vmatprep.mubr.f32.mxu1 %v11745_v39  ;;  %v1423_v29 = vld [vmem:[#allocation5 + $0x2948] sm:$0xff]  ;;  %v1496_v0 = vld [vmem:[#allocation5 + $0x2b90] sm:$0xff] }
  0xb7   :  { %8301 = vmatpush1.bf16.msra.mxu0 %v8300_v42  ;;  %v1209_v42 = vld [vmem:[#allocation5 + $0x2298] sm:$0xff]  ;;  %v1520_v2 = vld [vmem:[#allocation5 + $0x2c50] sm:$0xff] }
  0xb8   :  { %8429 = vmatpush1.bf16.msra.mxu1 %v8428_v43  ;;  %8303 = vmatprep.subr.bf16.mxu0 %v8302_v44  ;;  %v1233_v43 = vld [vmem:[#allocation5 + $0x2358] sm:$0xff]  ;;  %v8320_v44 = vpack.c.bf16 %v1182_v35, %v1158_v34  ;;  %v8464_v34 = vpack.c.bf16 %v1376_v27, %v1352_v24  ;;  %v8338_v35 = vpack.c.bf16 %v1423_v29, %v1399_v28  ;;  %v1544_v13 = vld [vmem:[#allocation5 + $0x2d10] sm:$0xff]  ;;  %v1590_v24 = vld [vmem:[#allocation5 + $0x2e80] sm:$0xff] }
  0xb9   :  { %8431 = vmatprep.subr.bf16.mxu1 %v8430_v48  ;;  %v1230_v48 = vld [vmem:[#allocation5 + $0x2340] sm:$0xff]  ;;  %v8450_v50 = vpack.c.bf16 %v1233_v43, %v1209_v42  ;;  %v1447_v42 = vld [vmem:[#allocation5 + $0x2a08] sm:$0xff]  ;;  %v1568_v15 = vld [vmem:[#allocation5 + $0x2dd0] sm:$0xff] }
  0xba   :  { %v1471_v43 = vld [vmem:[#allocation5 + $0x2ac8] sm:$0xff]  ;;  %v1592_v28 = vld [vmem:[#allocation5 + $0x2e90] sm:$0xff] }
  0xbb   :  { %8305 = vmatpush1.bf16.msra.mxu0 %v8304_v54  ;;  %v1257_v54 = vld [vmem:[#allocation5 + $0x2418] sm:$0xff]  ;;  %v1616_v29 = vld [vmem:[#allocation5 + $0x2f50] sm:$0xff] }
  0xbc   :  { %8433 = vmatpush1.bf16.msra.mxu1 %v8432_v55  ;;  %8307 = vmatprep.subr.bf16.mxu0 %v8306_v56  ;;  %v1281_v55 = vld [vmem:[#allocation5 + $0x24d8] sm:$0xff]  ;;  %v8324_v56 = vpack.c.bf16 %v1230_v48, %v1206_v47  ;;  %v8468_v47 = vpack.c.bf16 %v1424_v41, %v1400_v38  ;;  %v8342_v48 = vpack.c.bf16 %v1471_v43, %v1447_v42  ;;  %v1640_v41 = vld [vmem:[#allocation5 + $0x3010] sm:$0x7] }
  0xbd   :  { %8435 = vmatprep.subr.bf16.mxu1 %v8434_v60  ;;  %v1278_v60 = vld [vmem:[#allocation5 + $0x24c0] sm:$0xff]  ;;  %v8454_v63 = vpack.c.bf16 %v1281_v55, %v1257_v54  ;;  %v1495_v54 = vld [vmem:[#allocation5 + $0x2b88] sm:$0xff]  ;;  %v133_v38 = vld [vmem:[#allocation5 + $0xf8] sm:$0xff] }
  0xbe   :  { %v1519_v55 = vld [vmem:[#allocation5 + $0x2c48] sm:$0xff] }
  0xbf   :  { %8309 = vmatpush1.bf16.msra.mxu0 %v8308_v3  ;;  %v1305_v3 = vld [vmem:[#allocation5 + $0x2598] sm:$0xff] }
  0xc0   :  { %8437 = vmatpush1.bf16.msra.mxu1 %v8436_v4  ;;  %8311 = vmatprep.subr.bf16.mxu0 %v8310_v5  ;;  %v1329_v4 = vld [vmem:[#allocation5 + $0x2658] sm:$0xff]  ;;  %v8328_v5 = vpack.c.bf16 %v1278_v60, %v1254_v59  ;;  %v8472_v59 = vpack.c.bf16 %v1472_v53, %v1448_v51  ;;  %v8346_v60 = vpack.c.bf16 %v1519_v55, %v1495_v54 }
  0xc1   :  { %8439 = vmatprep.subr.bf16.mxu1 %v8438_v9  ;;  %v1326_v9 = vld [vmem:[#allocation5 + $0x2640] sm:$0xff]  ;;  %v8458_v12 = vpack.c.bf16 %v1329_v4, %v1305_v3  ;;  %v1543_v3 = vld [vmem:[#allocation5 + $0x2d08] sm:$0xff]  ;;  %v157_v51 = vld [vmem:[#allocation5 + $0x1b8] sm:$0xff] }
  0xc2   :  { %v1567_v4 = vld [vmem:[#allocation5 + $0x2dc8] sm:$0xff]  ;;  %v8193_v53 = vld.sshfl [vmem:[#allocation2 + $0x8] sm:$0x3 pattern:$0x76325410] }
  0xc3   :  { %8313 = vmatpush1.bf16.msra.mxu0 %v8312_v16  ;;  %v1353_v16 = vld [vmem:[#allocation5 + $0x2718] sm:$0xff] }
  0xc4   :  { %8441 = vmatpush1.bf16.msra.mxu1 %v8440_v17  ;;  %8315 = vmatprep.subr.bf16.mxu0 %v8314_v18  ;;  %v1377_v17 = vld [vmem:[#allocation5 + $0x27d8] sm:$0xff]  ;;  %v8332_v18 = vpack.c.bf16 %v1326_v9, %v1302_v8  ;;  %v8476_v8 = vpack.c.bf16 %v1520_v2, %v1496_v0  ;;  %v8350_v9 = vpack.c.bf16 %v1567_v4, %v1543_v3  ;;  %v227_v0 = vld [vmem:[#allocation5 + $0x3e8] sm:$0xff] }
  0xc5   :  { %8443 = vmatprep.subr.bf16.mxu1 %v8442_v23  ;;  %v1374_v23 = vld [vmem:[#allocation5 + $0x27c0] sm:$0xff]  ;;  %v8462_v22 = vpack.c.bf16 %v1377_v17, %v1353_v16  ;;  %v1591_v16 = vld [vmem:[#allocation5 + $0x2e88] sm:$0xff]  ;;  %v229_v2 = vld [vmem:[#allocation5 + $0x3f8] sm:$0xff] }
  0xc6   :  { %v1615_v17 = vld [vmem:[#allocation5 + $0x2f48] sm:$0xff] }
  0xc7   :  { %8317 = vmatpush1.bf16.msra.mxu0 %v8316_v30  ;;  %v1401_v30 = vld [vmem:[#allocation5 + $0x2898] sm:$0xff] }
  0xc8   :  { %8445 = vmatpush1.bf16.msra.mxu1 %v8444_v31  ;;  %8319 = vmatprep.subr.bf16.mxu0 %v8318_v33  ;;  %v1425_v31 = vld [vmem:[#allocation5 + $0x2958] sm:$0xff]  ;;  %v8336_v33 = vpack.c.bf16 %v1374_v23, %v1350_v21  ;;  %v8480_v21 = vpack.c.bf16 %v1568_v15, %v1544_v13  ;;  %v8354_v23 = vpack.c.bf16 %v1615_v17, %v1591_v16  ;;  %v275_v13 = vld [vmem:[#allocation5 + $0x568] sm:$0xff] }
  0xc9   :  { %8447 = vmatprep.subr.bf16.mxu1 %v8446_v37  ;;  %v1422_v37 = vld [vmem:[#allocation5 + $0x2940] sm:$0xff]  ;;  %v8466_v40 = vpack.c.bf16 %v1425_v31, %v1401_v30  ;;  %v8484_v31 = vpack.c.bf16 %v1616_v29, %v1592_v28  ;;  %v277_v15 = vld [vmem:[#allocation5 + $0x578] sm:$0xff] }
  0xca   :  { %v301_v28 = vld [vmem:[#allocation5 + $0x638] sm:$0xff] }
  0xcb   :  { %8321 = vmatpush1.bf16.msra.mxu0 %v8320_v44  ;;  %v1449_v44 = vld [vmem:[#allocation5 + $0x2a18] sm:$0xff] }
  0xcc   :  { %8449 = vmatpush1.bf16.msra.mxu1 %v8448_v45  ;;  %8323 = vmatprep.subr.bf16.mxu0 %v8322_v46  ;;  %v1473_v45 = vld [vmem:[#allocation5 + $0x2ad8] sm:$0xff]  ;;  %v8340_v46 = vpack.c.bf16 %v1422_v37, %v1398_v36  ;;  %v131_v36 = vld [vmem:[#allocation5 + $0xe8] sm:$0xff] }
  0xcd   :  { %8451 = vmatprep.subr.bf16.mxu1 %v8450_v50  ;;  %v1470_v50 = vld [vmem:[#allocation5 + $0x2ac0] sm:$0xff]  ;;  %v8470_v52 = vpack.c.bf16 %v1473_v45, %v1449_v44  ;;  %v109_v37 = vld [vmem:[#allocation5 + $0x38] sm:$0xff]  ;;  %v11610_v44 = vmov 0.0  }
  0xce   :  { %v8614_v43 = vpack.c.bf16 %v133_v38, %v109_v37  ;;  %v106_v45 = vld [vmem:[#allocation5 + $0x20] sm:$0xff]  ;;  %v325_v29 = vld [vmem:[#allocation5 + $0x6f8] sm:$0xff]  ;;  %v324_v38 = vld [vmem:[#allocation5 + $0x6f0] sm:$0xff] }
  0xcf   :  { %8325 = vmatpush1.bf16.msra.mxu0 %v8324_v56  ;;  %v1497_v56 = vld [vmem:[#allocation5 + $0x2b98] sm:$0xff]  ;;  %v8630_v37 = vpack.c.bf16 %v325_v29, %v301_v28  ;;  %v516_v28 = vld [vmem:[#allocation5 + $0xcf0] sm:$0xff]  ;;  %v539_v29 = vld [vmem:[#allocation5 + $0xda8] sm:$0xff] }
  0xd0   :  { %8453 = vmatpush1.bf16.msra.mxu1 %v8452_v57  ;;  %8327 = vmatprep.subr.bf16.mxu0 %v8326_v58  ;;  %v1521_v57 = vld [vmem:[#allocation5 + $0x2c58] sm:$0xff]  ;;  %v8344_v58 = vpack.c.bf16 %v1470_v50, %v1446_v49  ;;  %v155_v49 = vld [vmem:[#allocation5 + $0x1a8] sm:$0xff] }
  0xd1   :  { %8455 = vmatprep.subr.bf16.mxu1 %v8454_v63  ;;  %v1518_v63 = vld [vmem:[#allocation5 + $0x2c40] sm:$0xff]  ;;  %v8474_v1 = vpack.c.bf16 %v1521_v57, %v1497_v56  ;;  %v179_v50 = vld [vmem:[#allocation5 + $0x268] sm:$0xff] }
  0xd2   :  { %v8490_v56 = vpack.c.bf16 %v179_v50, %v155_v49  ;;  %v154_v57 = vld [vmem:[#allocation5 + $0x1a0] sm:$0xff]  ;;  %v348_v50 = vld [vmem:[#allocation5 + $0x7b0] sm:$0xff] }
  0xd3   :  { %8329 = vmatpush1.bf16.msra.mxu0 %v8328_v5  ;;  %v1545_v5 = vld [vmem:[#allocation5 + $0x2d18] sm:$0xff]  ;;  %v370_v49 = vld [vmem:[#allocation5 + $0x860] sm:$0xff] }
  0xd4   :  { %8457 = vmatpush1.bf16.msra.mxu1 %v8456_v6  ;;  %8331 = vmatprep.subr.bf16.mxu0 %v8330_v7  ;;  %v1569_v6 = vld [vmem:[#allocation5 + $0x2dd8] sm:$0xff]  ;;  %v8348_v7 = vpack.c.bf16 %v1518_v63, %v1494_v61  ;;  %v180_v61 = vld [vmem:[#allocation5 + $0x270] sm:$0xff]  ;;  %v203_v63 = vld [vmem:[#allocation5 + $0x328] sm:$0xff] }
  0xd5   :  { %8459 = vmatprep.subr.bf16.mxu1 %v8458_v12  ;;  %v1566_v12 = vld [vmem:[#allocation5 + $0x2dc0] sm:$0xff]  ;;  %v8478_v14 = vpack.c.bf16 %v1569_v6, %v1545_v5  ;;  %v8494_v5 = vpack.c.bf16 %v227_v0, %v203_v63  ;;  %v396_v63 = vld [vmem:[#allocation5 + $0x930] sm:$0xff] }
  0xd6   :  { %v202_v6 = vld [vmem:[#allocation5 + $0x320] sm:$0xff] }
  0xd7   :  { %8333 = vmatpush1.bf16.msra.mxu0 %v8332_v18  ;;  %v1593_v18 = vld [vmem:[#allocation5 + $0x2e98] sm:$0xff] }
  0xd8   :  { %8461 = vmatpush1.bf16.msra.mxu1 %v8460_v19  ;;  %8335 = vmatprep.subr.bf16.mxu0 %v8334_v20  ;;  %v1617_v19 = vld [vmem:[#allocation5 + $0x2f58] sm:$0xff]  ;;  %v8352_v20 = vpack.c.bf16 %v1566_v12, %v1542_v10  ;;  %v228_v10 = vld [vmem:[#allocation5 + $0x3f0] sm:$0xff]  ;;  %v251_v12 = vld [vmem:[#allocation5 + $0x4a8] sm:$0xff] }
  0xd9   :  { %8463 = vmatprep.subr.bf16.mxu1 %v8462_v22  ;;  %v1614_v22 = vld [vmem:[#allocation5 + $0x2f40] sm:$0xff]  ;;  %v8482_v27 = vpack.c.bf16 %v1617_v19, %v1593_v18  ;;  %v8498_v18 = vpack.c.bf16 %v275_v13, %v251_v12  ;;  %v444_v12 = vld [vmem:[#allocation5 + $0xab0] sm:$0xff] }
  0xda   :  { %v8356_v30 = vpack.c.bf16 %v1614_v22, %v1590_v24  ;;  %v250_v19 = vld [vmem:[#allocation5 + $0x4a0] sm:$0xff]  ;;  %v276_v24 = vld [vmem:[#allocation5 + $0x570] sm:$0xff]  ;;  %v299_v22 = vld [vmem:[#allocation5 + $0x628] sm:$0xff] }
  0xdb   :  { %8337 = vmatpush1.bf16.msra.mxu0 %v8336_v33  ;;  %v1639_v33 = vld [vmem:[#allocation5 + $0x3008] sm:$0x7] }
  0xdc   :  { %8465 = vmatpush1.bf16.msra.mxu1 %v8464_v34  ;;  %8339 = vmatprep.subr.bf16.mxu0 %v8338_v35  ;;  %v1641_v34 = vld [vmem:[#allocation5 + $0x3018] sm:$0x7]  ;;  %v107_v35 = vld [vmem:[#allocation5 + $0x28] sm:$0xff] }
  0xdd   :  { %8467 = vmatprep.subr.bf16.mxu1 %v8466_v40  ;;  %v1638_v40 = vld [vmem:[#allocation5 + $0x3000] sm:$0x7]  ;;  %v8486_v42 = vpack.c.bf16 %v131_v36, %v107_v35  ;;  %v300_v36 = vld [vmem:[#allocation5 + $0x630] sm:$0xff] }
  0xde   :  { %v322_v35 = vld [vmem:[#allocation5 + $0x6e0] sm:$0xff] }
  0xdf   :  { %8341 = vmatpush1.bf16.msra.mxu0 %v8340_v46  ;;  %v130_v46 = vld [vmem:[#allocation5 + $0xe0] sm:$0xff] }
  0xe0   :  { %8469 = vmatpush1.bf16.msra.mxu1 %v8468_v47  ;;  %8343 = vmatprep.subr.bf16.mxu0 %v8342_v48  ;;  %v108_v47 = vld [vmem:[#allocation5 + $0x30] sm:$0xff]  ;;  %v8488_v54 = vpack.c.bf16 %v130_v46, %v106_v45  ;;  %v8632_v46 = vpack.c.bf16 %v324_v38, %v300_v36  ;;  %v562_v38 = vld [vmem:[#allocation5 + $0xe60] sm:$0xff] }
  0xe1   :  { %8471 = vmatprep.subr.bf16.mxu1 %v8470_v52  ;;  %v132_v48 = vld [vmem:[#allocation5 + $0xf0] sm:$0xff]  ;;  %v181_v52 = vld [vmem:[#allocation5 + $0x278] sm:$0xff] }
  0xe2   :  { %v8616_v55 = vpack.c.bf16 %v132_v48, %v108_v47  ;;  %v346_v48 = vld [vmem:[#allocation5 + $0x7a0] sm:$0xff] }
  0xe3   :  { %8345 = vmatpush1.bf16.msra.mxu0 %v8344_v58  ;;  %v178_v58 = vld [vmem:[#allocation5 + $0x260] sm:$0xff] }
  0xe4   :  { %8473 = vmatpush1.bf16.msra.mxu1 %v8472_v59  ;;  %8347 = vmatprep.subr.bf16.mxu0 %v8346_v60  ;;  %v156_v59 = vld [vmem:[#allocation5 + $0x1b0] sm:$0xff]  ;;  %v8618_v60 = vpack.c.bf16 %v181_v52, %v157_v51  ;;  %v8492_v3 = vpack.c.bf16 %v178_v58, %v154_v57  ;;  %v8508_v57 = vpack.c.bf16 %v370_v49, %v346_v48 }
  0xe5   :  { %8475 = vmatprep.subr.bf16.mxu1 %v8474_v1  ;;  %v205_v1 = vld [vmem:[#allocation5 + $0x338] sm:$0xff]  ;;  %v8620_v4 = vpack.c.bf16 %v180_v61, %v156_v59  ;;  %v372_v52 = vld [vmem:[#allocation5 + $0x870] sm:$0xff]  ;;  %v418_v61 = vld [vmem:[#allocation5 + $0x9e0] sm:$0xff] }
  0xe6   :  { %v8636_v58 = vpack.c.bf16 %v372_v52, %v348_v50  ;;  %v610_v52 = vld [vmem:[#allocation5 + $0xfe0] sm:$0xff] }
  0xe7   :  { %8349 = vmatpush1.bf16.msra.mxu0 %v8348_v7  ;;  %v226_v7 = vld [vmem:[#allocation5 + $0x3e0] sm:$0xff] }
  0xe8   :  { %8477 = vmatpush1.bf16.msra.mxu1 %v8476_v8  ;;  %8351 = vmatprep.subr.bf16.mxu0 %v8350_v9  ;;  %v204_v8 = vld [vmem:[#allocation5 + $0x330] sm:$0xff]  ;;  %v8622_v9 = vpack.c.bf16 %v229_v2, %v205_v1  ;;  %v8496_v16 = vpack.c.bf16 %v226_v7, %v202_v6  ;;  %v443_v2 = vld [vmem:[#allocation5 + $0xaa8] sm:$0xff] }
  0xe9   :  { %8479 = vmatprep.subr.bf16.mxu1 %v8478_v14  ;;  %v253_v14 = vld [vmem:[#allocation5 + $0x4b8] sm:$0xff]  ;;  %v8624_v17 = vpack.c.bf16 %v228_v10, %v204_v8  ;;  %v420_v1 = vld [vmem:[#allocation5 + $0x9f0] sm:$0xff]  ;;  %v466_v10 = vld [vmem:[#allocation5 + $0xb60] sm:$0xff] }
  0xea   :  { %v8640_v7 = vpack.c.bf16 %v420_v1, %v396_v63  ;;  %v658_v1 = vld [vmem:[#allocation5 + $0x1160] sm:$0xff] }
  0xeb   :  { %8353 = vmatpush1.bf16.msra.mxu0 %v8352_v20  ;;  %v274_v20 = vld [vmem:[#allocation5 + $0x560] sm:$0xff] }
  0xec   :  { %8481 = vmatpush1.bf16.msra.mxu1 %v8480_v21  ;;  %8355 = vmatprep.subr.bf16.mxu0 %v8354_v23  ;;  %v252_v21 = vld [vmem:[#allocation5 + $0x4b0] sm:$0xff]  ;;  %v8626_v23 = vpack.c.bf16 %v277_v15, %v253_v14  ;;  %v491_v15 = vld [vmem:[#allocation5 + $0xc28] sm:$0xff] }
  0xed   :  { %8483 = vmatprep.subr.bf16.mxu1 %v8482_v27  ;;  %v323_v27 = vld [vmem:[#allocation5 + $0x6e8] sm:$0xff]  ;;  %v468_v14 = vld [vmem:[#allocation5 + $0xb70] sm:$0xff] }
  0xef   :  { %8357 = vmatpush1.bf16.msra.mxu0 %v8356_v30  ;;  %v8500_v30 = vpack.c.bf16 %v274_v20, %v250_v19  ;;  %v8644_v20 = vpack.c.bf16 %v468_v14, %v444_v12  ;;  %v706_v14 = vld [vmem:[#allocation5 + $0x12e0] sm:$0xff] }
  0xf0   :  { %8485 = vmatpush1.bf16.msra.mxu1 %v8484_v31  ;;  %8194 = vmatprep.subr.msk.mxu0 %vm1695_vm0, %v1639_v33  ;;  %v8628_v31 = vpack.c.bf16 %v276_v24, %v252_v21  ;;  %v8502_v33 = vpack.c.bf16 %v323_v27, %v299_v22  ;;  %v514_v24 = vld [vmem:[#allocation5 + $0xce0] sm:$0xff]  ;;  %v492_v22 = vld [vmem:[#allocation5 + $0xc30] sm:$0xff] }
  0xf1   :  { %8197 = vmatprep.subr.msk.mxu1 %vm1695_vm0, %v1641_v34  ;;  %v298_v34 = vld [vmem:[#allocation5 + $0x620] sm:$0xff] }
  0xf2   :  { %1904 = vmatmul.mubr.f32.vlgmr.msra.gmra.mrb[0].mxu0 %v11741_v26  ;;  %v8504_v45 = vpack.c.bf16 %v322_v35, %v298_v34  ;;  %v8648_v35 = vpack.c.bf16 %v516_v28, %v492_v22  ;;  %v754_v28 = vld [vmem:[#allocation5 + $0x1460] sm:$0xff] }
  0xf3   :  { %2117 = vmatmul.mubr.f32.vlgmr.msra.gmra.mrb[0].mxu1 %v11741_v26  ;;  %8195 = vmatpush1.msk.msra.mxu0 %vm1695_vm0, %v1638_v40  ;;  %v347_v40 = vld [vmem:[#allocation5 + $0x7a8] sm:$0xff] }
  0xf4   :  { %8198 = vmatpush1.msk.msra.mxu1 %vm1695_vm0, %v1640_v41  ;;  %1974 = vmatprep.mubr.f32.mxu0 %v11610_v44  ;;  %v371_v41 = vld [vmem:[#allocation5 + $0x868] sm:$0xff] }
  0xf5   :  { %2187 = vmatprep.mubr.f32.mxu1 %v11610_v44  ;;  %8487 = vmatprep.subr.bf16.mxu0 %v8486_v42  ;;  %v349_v42 = vld [vmem:[#allocation5 + $0x7b8] sm:$0xff]  ;;  %v8506_v47 = vpack.c.bf16 %v371_v41, %v347_v40  ;;  %v540_v40 = vld [vmem:[#allocation5 + $0xdb0] sm:$0xff] }
  0xf6   :  { %8615 = vmatprep.subr.bf16.mxu1 %v8614_v43  ;;  %v373_v43 = vld [vmem:[#allocation5 + $0x878] sm:$0xff] }
  0xf7   :  { %v8634_v51 = vpack.c.bf16 %v373_v43, %v349_v42  ;;  %v564_v42 = vld [vmem:[#allocation5 + $0xe70] sm:$0xff]  ;;  %v587_v43 = vld [vmem:[#allocation5 + $0xf28] sm:$0xff] }
  0xf8   :  { %v8652_v49 = vpack.c.bf16 %v564_v42, %v540_v40  ;;  %v802_v42 = vld [vmem:[#allocation5 + $0x15e0] sm:$0xff] }
  0xfa   :  { %8196 = vmatmul.mubr.msk.f32.vlgmr.msra.gmra.mrb[0].mxu0 %vm1692_vm1, %v8193_v53 }
  0xfb   :  { %8199 = vmatmul.mubr.msk.f32.vlgmr.msra.gmra.mrb[0].mxu1 %vm1692_vm1, %v8193_v53  ;;  %8489 = vmatpush1.bf16.msra.mxu0 %v8488_v54  ;;  %v395_v53 = vld [vmem:[#allocation5 + $0x928] sm:$0xff] }
  0xfc   :  { %8617 = vmatpush1.bf16.msra.mxu1 %v8616_v55  ;;  %8491 = vmatprep.subr.bf16.mxu0 %v8490_v56  ;;  %v419_v54 = vld [vmem:[#allocation5 + $0x9e8] sm:$0xff]  ;;  %v397_v55 = vld [vmem:[#allocation5 + $0x938] sm:$0xff] }
  0xfd   :  { %8619 = vmatprep.subr.bf16.mxu1 %v8618_v60  ;;  %2258 = vmatprep.mubr.f32.mxu0 %v11734_v32  ;;  %v421_v56 = vld [vmem:[#allocation5 + $0x9f8] sm:$0xff]  ;;  %v8510_v59 = vpack.c.bf16 %v419_v54, %v395_v53  ;;  %v394_v60 = vld [vmem:[#allocation5 + $0x920] sm:$0xff]  ;;  %v588_v53 = vld [vmem:[#allocation5 + $0xf30] sm:$0xff] }
  0xfe   :  { %2471 = vmatprep.mubr.f32.mxu1 %v11734_v32  ;;  %v8638_v0 = vpack.c.bf16 %v421_v56, %v397_v55  ;;  %v8512_v6 = vpack.c.bf16 %v418_v61, %v394_v60  ;;  %v612_v55 = vld [vmem:[#allocation5 + $0xff0] sm:$0xff]  ;;  %v635_v56 = vld [vmem:[#allocation5 + $0x10a8] sm:$0xff] }
  0xff   :  { %8493 = vmatpush1.bf16.msra.mxu0 %v8492_v3  ;;  %v467_v3 = vld [vmem:[#allocation5 + $0xb68] sm:$0xff]  ;;  %v8656_v61 = vpack.c.bf16 %v612_v55, %v588_v53  ;;  %v850_v55 = vld [vmem:[#allocation5 + $0x1760] sm:$0xff] }
 0x100   :  { %8621 = vmatpush1.bf16.msra.mxu1 %v8620_v4  ;;  %8495 = vmatprep.subr.bf16.mxu0 %v8494_v5  ;;  %v445_v4 = vld [vmem:[#allocation5 + $0xab8] sm:$0xff]  ;;  %v8514_v8 = vpack.c.bf16 %v467_v3, %v443_v2  ;;  %v636_v2 = vld [vmem:[#allocation5 + $0x10b0] sm:$0xff] }
 0x101   :  { %8623 = vmatprep.subr.bf16.mxu1 %v8622_v9  ;;  %v469_v5 = vld [vmem:[#allocation5 + $0xb78] sm:$0xff]  ;;  %v442_v9 = vld [vmem:[#allocation5 + $0xaa0] sm:$0xff] }
 0x102   :  { %v8642_v13 = vpack.c.bf16 %v469_v5, %v445_v4  ;;  %v8516_v19 = vpack.c.bf16 %v466_v10, %v442_v9  ;;  %v660_v4 = vld [vmem:[#allocation5 + $0x1170] sm:$0xff]  ;;  %v683_v5 = vld [vmem:[#allocation5 + $0x1228] sm:$0xff] }
 0x103   :  { %8497 = vmatpush1.bf16.msra.mxu0 %v8496_v16  ;;  %v515_v16 = vld [vmem:[#allocation5 + $0xce8] sm:$0xff]  ;;  %v8660_v10 = vpack.c.bf16 %v660_v4, %v636_v2  ;;  %v898_v4 = vld [vmem:[#allocation5 + $0x18e0] sm:$0xff] }
 0x104   :  { %8625 = vmatpush1.bf16.msra.mxu1 %v8624_v17  ;;  %8499 = vmatprep.subr.bf16.mxu0 %v8498_v18  ;;  %v493_v17 = vld [vmem:[#allocation5 + $0xc38] sm:$0xff]  ;;  %v8518_v21 = vpack.c.bf16 %v515_v16, %v491_v15  ;;  %v684_v15 = vld [vmem:[#allocation5 + $0x1230] sm:$0xff] }
 0x105   :  { %8627 = vmatprep.subr.bf16.mxu1 %v8626_v23  ;;  %v517_v18 = vld [vmem:[#allocation5 + $0xcf8] sm:$0xff]  ;;  %v490_v23 = vld [vmem:[#allocation5 + $0xc20] sm:$0xff] }
 0x106   :  { %v8646_v27 = vpack.c.bf16 %v517_v18, %v493_v17  ;;  %v8520_v34 = vpack.c.bf16 %v514_v24, %v490_v23  ;;  %v708_v17 = vld [vmem:[#allocation5 + $0x12f0] sm:$0xff]  ;;  %v731_v18 = vld [vmem:[#allocation5 + $0x13a8] sm:$0xff] }
 0x107   :  { %8501 = vmatpush1.bf16.msra.mxu0 %v8500_v30  ;;  %v563_v30 = vld [vmem:[#allocation5 + $0xe68] sm:$0xff]  ;;  %v8664_v24 = vpack.c.bf16 %v708_v17, %v684_v15  ;;  %v946_v17 = vld [vmem:[#allocation5 + $0x1a60] sm:$0xff] }
 0x108   :  { %8629 = vmatpush1.bf16.msra.mxu1 %v8628_v31  ;;  %8503 = vmatprep.subr.bf16.mxu0 %v8502_v33  ;;  %v541_v31 = vld [vmem:[#allocation5 + $0xdb8] sm:$0xff]  ;;  %v8522_v36 = vpack.c.bf16 %v563_v30, %v539_v29  ;;  %v732_v29 = vld [vmem:[#allocation5 + $0x13b0] sm:$0xff] }
 0x109   :  { %8631 = vmatprep.subr.bf16.mxu1 %v8630_v37  ;;  %v565_v33 = vld [vmem:[#allocation5 + $0xe78] sm:$0xff]  ;;  %v538_v37 = vld [vmem:[#allocation5 + $0xda0] sm:$0xff] }
 0x10a   :  { %v8650_v41 = vpack.c.bf16 %v565_v33, %v541_v31  ;;  %v8524_v48 = vpack.c.bf16 %v562_v38, %v538_v37  ;;  %v756_v31 = vld [vmem:[#allocation5 + $0x1470] sm:$0xff]  ;;  %v779_v33 = vld [vmem:[#allocation5 + $0x1528] sm:$0xff] }
 0x10b   :  { %8505 = vmatpush1.bf16.msra.mxu0 %v8504_v45  ;;  %v611_v45 = vld [vmem:[#allocation5 + $0xfe8] sm:$0xff]  ;;  %v8668_v38 = vpack.c.bf16 %v756_v31, %v732_v29  ;;  %v994_v31 = vld [vmem:[#allocation5 + $0x1be0] sm:$0xff] }
 0x10c   :  { %8633 = vmatpush1.bf16.msra.mxu1 %v8632_v46  ;;  %8507 = vmatprep.subr.bf16.mxu0 %v8506_v47  ;;  %v589_v46 = vld [vmem:[#allocation5 + $0xf38] sm:$0xff]  ;;  %v8526_v50 = vpack.c.bf16 %v611_v45, %v587_v43  ;;  %v780_v43 = vld [vmem:[#allocation5 + $0x1530] sm:$0xff] }
 0x10d   :  { %8635 = vmatprep.subr.bf16.mxu1 %v8634_v51  ;;  %v613_v47 = vld [vmem:[#allocation5 + $0xff8] sm:$0xff]  ;;  %v586_v51 = vld [vmem:[#allocation5 + $0xf20] sm:$0xff] }
 0x10e   :  { %v8654_v54 = vpack.c.bf16 %v613_v47, %v589_v46  ;;  %v8528_v60 = vpack.c.bf16 %v610_v52, %v586_v51  ;;  %v804_v46 = vld [vmem:[#allocation5 + $0x15f0] sm:$0xff]  ;;  %v827_v47 = vld [vmem:[#allocation5 + $0x16a8] sm:$0xff] }
 0x10f   :  { %8509 = vmatpush1.bf16.msra.mxu0 %v8508_v57  ;;  %v659_v57 = vld [vmem:[#allocation5 + $0x1168] sm:$0xff]  ;;  %v8672_v52 = vpack.c.bf16 %v804_v46, %v780_v43  ;;  %v1042_v46 = vld [vmem:[#allocation5 + $0x1d60] sm:$0xff] }
 0x110   :  { %8637 = vmatpush1.bf16.msra.mxu1 %v8636_v58  ;;  %8511 = vmatprep.subr.bf16.mxu0 %v8510_v59  ;;  %v637_v58 = vld [vmem:[#allocation5 + $0x10b8] sm:$0xff]  ;;  %v8530_v63 = vpack.c.bf16 %v659_v57, %v635_v56  ;;  %v828_v56 = vld [vmem:[#allocation5 + $0x16b0] sm:$0xff] }
 0x111   :  { %8639 = vmatprep.subr.bf16.mxu1 %v8638_v0  ;;  %v661_v59 = vld [vmem:[#allocation5 + $0x1178] sm:$0xff]  ;;  %v634_v0 = vld [vmem:[#allocation5 + $0x10a0] sm:$0xff] }
 0x112   :  { %v8658_v3 = vpack.c.bf16 %v661_v59, %v637_v58  ;;  %v8532_v9 = vpack.c.bf16 %v658_v1, %v634_v0  ;;  %v852_v58 = vld [vmem:[#allocation5 + $0x1770] sm:$0xff]  ;;  %v875_v59 = vld [vmem:[#allocation5 + $0x1828] sm:$0xff] }
 0x113   :  { %8513 = vmatpush1.bf16.msra.mxu0 %v8512_v6  ;;  %v707_v6 = vld [vmem:[#allocation5 + $0x12e8] sm:$0xff]  ;;  %v8676_v1 = vpack.c.bf16 %v852_v58, %v828_v56  ;;  %v1090_v58 = vld [vmem:[#allocation5 + $0x1ee0] sm:$0xff] }
 0x114   :  { %8641 = vmatpush1.bf16.msra.mxu1 %v8640_v7  ;;  %8515 = vmatprep.subr.bf16.mxu0 %v8514_v8  ;;  %v685_v7 = vld [vmem:[#allocation5 + $0x1238] sm:$0xff]  ;;  %v8534_v12 = vpack.c.bf16 %v707_v6, %v683_v5  ;;  %v876_v5 = vld [vmem:[#allocation5 + $0x1830] sm:$0xff] }
 0x115   :  { %8643 = vmatprep.subr.bf16.mxu1 %v8642_v13  ;;  %v709_v8 = vld [vmem:[#allocation5 + $0x12f8] sm:$0xff]  ;;  %v682_v13 = vld [vmem:[#allocation5 + $0x1220] sm:$0xff] }
 0x116   :  { %v8662_v16 = vpack.c.bf16 %v709_v8, %v685_v7  ;;  %v8536_v23 = vpack.c.bf16 %v706_v14, %v682_v13  ;;  %v900_v7 = vld [vmem:[#allocation5 + $0x18f0] sm:$0xff]  ;;  %v923_v8 = vld [vmem:[#allocation5 + $0x19a8] sm:$0xff] }
 0x117   :  { %8517 = vmatpush1.bf16.msra.mxu0 %v8516_v19  ;;  %v755_v19 = vld [vmem:[#allocation5 + $0x1468] sm:$0xff]  ;;  %v8680_v14 = vpack.c.bf16 %v900_v7, %v876_v5  ;;  %v1138_v7 = vld [vmem:[#allocation5 + $0x2060] sm:$0xff] }
 0x118   :  { %8645 = vmatpush1.bf16.msra.mxu1 %v8644_v20  ;;  %8519 = vmatprep.subr.bf16.mxu0 %v8518_v21  ;;  %v733_v20 = vld [vmem:[#allocation5 + $0x13b8] sm:$0xff]  ;;  %v8538_v22 = vpack.c.bf16 %v755_v19, %v731_v18  ;;  %v924_v18 = vld [vmem:[#allocation5 + $0x19b0] sm:$0xff] }
 0x119   :  { %8647 = vmatprep.subr.bf16.mxu1 %v8646_v27  ;;  %v757_v21 = vld [vmem:[#allocation5 + $0x1478] sm:$0xff]  ;;  %v730_v27 = vld [vmem:[#allocation5 + $0x13a0] sm:$0xff] }
 0x11a   :  { %v8666_v30 = vpack.c.bf16 %v757_v21, %v733_v20  ;;  %v8540_v37 = vpack.c.bf16 %v754_v28, %v730_v27  ;;  %v948_v20 = vld [vmem:[#allocation5 + $0x1a70] sm:$0xff]  ;;  %v971_v21 = vld [vmem:[#allocation5 + $0x1b28] sm:$0xff] }
 0x11b   :  { %8521 = vmatpush1.bf16.msra.mxu0 %v8520_v34  ;;  %v803_v34 = vld [vmem:[#allocation5 + $0x15e8] sm:$0xff]  ;;  %v8684_v28 = vpack.c.bf16 %v948_v20, %v924_v18  ;;  %v1186_v20 = vld [vmem:[#allocation5 + $0x21e0] sm:$0xff] }
 0x11c   :  { %8649 = vmatpush1.bf16.msra.mxu1 %v8648_v35  ;;  %8523 = vmatprep.subr.bf16.mxu0 %v8522_v36  ;;  %v781_v35 = vld [vmem:[#allocation5 + $0x1538] sm:$0xff]  ;;  %v8542_v40 = vpack.c.bf16 %v803_v34, %v779_v33  ;;  %v972_v33 = vld [vmem:[#allocation5 + $0x1b30] sm:$0xff] }
 0x11d   :  { %8651 = vmatprep.subr.bf16.mxu1 %v8650_v41  ;;  %v805_v36 = vld [vmem:[#allocation5 + $0x15f8] sm:$0xff]  ;;  %v778_v41 = vld [vmem:[#allocation5 + $0x1520] sm:$0xff] }
 0x11e   :  { %v8670_v45 = vpack.c.bf16 %v805_v36, %v781_v35  ;;  %v8544_v51 = vpack.c.bf16 %v802_v42, %v778_v41  ;;  %v996_v35 = vld [vmem:[#allocation5 + $0x1bf0] sm:$0xff]  ;;  %v1019_v36 = vld [vmem:[#allocation5 + $0x1ca8] sm:$0xff] }
 0x11f   :  { %8525 = vmatpush1.bf16.msra.mxu0 %v8524_v48  ;;  %v851_v48 = vld [vmem:[#allocation5 + $0x1768] sm:$0xff]  ;;  %v8688_v42 = vpack.c.bf16 %v996_v35, %v972_v33  ;;  %v1234_v35 = vld [vmem:[#allocation5 + $0x2360] sm:$0xff] }
 0x120   :  { %8653 = vmatpush1.bf16.msra.mxu1 %v8652_v49  ;;  %8527 = vmatprep.subr.bf16.mxu0 %v8526_v50  ;;  %v829_v49 = vld [vmem:[#allocation5 + $0x16b8] sm:$0xff]  ;;  %v8546_v53 = vpack.c.bf16 %v851_v48, %v827_v47  ;;  %v1020_v47 = vld [vmem:[#allocation5 + $0x1cb0] sm:$0xff] }
 0x121   :  { %8655 = vmatprep.subr.bf16.mxu1 %v8654_v54  ;;  %v853_v50 = vld [vmem:[#allocation5 + $0x1778] sm:$0xff]  ;;  %v826_v54 = vld [vmem:[#allocation5 + $0x16a0] sm:$0xff] }
 0x122   :  { %v8674_v57 = vpack.c.bf16 %v853_v50, %v829_v49  ;;  %v8548_v0 = vpack.c.bf16 %v850_v55, %v826_v54  ;;  %v1044_v49 = vld [vmem:[#allocation5 + $0x1d70] sm:$0xff]  ;;  %v1067_v50 = vld [vmem:[#allocation5 + $0x1e28] sm:$0xff] }
 0x123   :  { %8529 = vmatpush1.bf16.msra.mxu0 %v8528_v60  ;;  %v899_v60 = vld [vmem:[#allocation5 + $0x18e8] sm:$0xff]  ;;  %v8692_v55 = vpack.c.bf16 %v1044_v49, %v1020_v47  ;;  %v1282_v49 = vld [vmem:[#allocation5 + $0x24e0] sm:$0xff] }
 0x124   :  { %8657 = vmatpush1.bf16.msra.mxu1 %v8656_v61  ;;  %8531 = vmatprep.subr.bf16.mxu0 %v8530_v63  ;;  %v877_v61 = vld [vmem:[#allocation5 + $0x1838] sm:$0xff]  ;;  %v8550_v2 = vpack.c.bf16 %v899_v60, %v875_v59  ;;  %v1068_v59 = vld [vmem:[#allocation5 + $0x1e30] sm:$0xff] }
 0x125   :  { %8659 = vmatprep.subr.bf16.mxu1 %v8658_v3  ;;  %v901_v63 = vld [vmem:[#allocation5 + $0x18f8] sm:$0xff]  ;;  %v874_v3 = vld [vmem:[#allocation5 + $0x1820] sm:$0xff] }
 0x126   :  { %v8678_v6 = vpack.c.bf16 %v901_v63, %v877_v61  ;;  %v8552_v13 = vpack.c.bf16 %v898_v4, %v874_v3  ;;  %v1092_v61 = vld [vmem:[#allocation5 + $0x1ef0] sm:$0xff]  ;;  %v1115_v63 = vld [vmem:[#allocation5 + $0x1fa8] sm:$0xff] }
 0x127   :  { %8533 = vmatpush1.bf16.msra.mxu0 %v8532_v9  ;;  %v947_v9 = vld [vmem:[#allocation5 + $0x1a68] sm:$0xff]  ;;  %v8696_v4 = vpack.c.bf16 %v1092_v61, %v1068_v59  ;;  %v1330_v61 = vld [vmem:[#allocation5 + $0x2660] sm:$0xff] }
 0x128   :  { %8661 = vmatpush1.bf16.msra.mxu1 %v8660_v10  ;;  %8535 = vmatprep.subr.bf16.mxu0 %v8534_v12  ;;  %v925_v10 = vld [vmem:[#allocation5 + $0x19b8] sm:$0xff]  ;;  %v8554_v15 = vpack.c.bf16 %v947_v9, %v923_v8  ;;  %v1116_v8 = vld [vmem:[#allocation5 + $0x1fb0] sm:$0xff] }
 0x129   :  { %8663 = vmatprep.subr.bf16.mxu1 %v8662_v16  ;;  %v949_v12 = vld [vmem:[#allocation5 + $0x1a78] sm:$0xff]  ;;  %v922_v16 = vld [vmem:[#allocation5 + $0x19a0] sm:$0xff] }
 0x12a   :  { %v8682_v19 = vpack.c.bf16 %v949_v12, %v925_v10  ;;  %v8556_v27 = vpack.c.bf16 %v946_v17, %v922_v16  ;;  %v1140_v10 = vld [vmem:[#allocation5 + $0x2070] sm:$0xff]  ;;  %v1163_v12 = vld [vmem:[#allocation5 + $0x2128] sm:$0xff] }
 0x12b   :  { %8537 = vmatpush1.bf16.msra.mxu0 %v8536_v23  ;;  %v995_v23 = vld [vmem:[#allocation5 + $0x1be8] sm:$0xff]  ;;  %v8700_v17 = vpack.c.bf16 %v1140_v10, %v1116_v8  ;;  %v1378_v10 = vld [vmem:[#allocation5 + $0x27e0] sm:$0xff] }
 0x12c   :  { %8665 = vmatpush1.bf16.msra.mxu1 %v8664_v24  ;;  %8539 = vmatprep.subr.bf16.mxu0 %v8538_v22  ;;  %v973_v24 = vld [vmem:[#allocation5 + $0x1b38] sm:$0xff]  ;;  %v8558_v29 = vpack.c.bf16 %v995_v23, %v971_v21  ;;  %v1164_v21 = vld [vmem:[#allocation5 + $0x2130] sm:$0xff] }
 0x12d   :  { %8667 = vmatprep.subr.bf16.mxu1 %v8666_v30  ;;  %v997_v22 = vld [vmem:[#allocation5 + $0x1bf8] sm:$0xff]  ;;  %v970_v30 = vld [vmem:[#allocation5 + $0x1b20] sm:$0xff] }
 0x12e   :  { %v8686_v34 = vpack.c.bf16 %v997_v22, %v973_v24  ;;  %v8560_v41 = vpack.c.bf16 %v994_v31, %v970_v30  ;;  %v1188_v24 = vld [vmem:[#allocation5 + $0x21f0] sm:$0xff]  ;;  %v1211_v22 = vld [vmem:[#allocation5 + $0x22a8] sm:$0xff] }
 0x12f   :  { %8541 = vmatpush1.bf16.msra.mxu0 %v8540_v37  ;;  %v1043_v37 = vld [vmem:[#allocation5 + $0x1d68] sm:$0xff]  ;;  %v8704_v31 = vpack.c.bf16 %v1188_v24, %v1164_v21  ;;  %v1426_v24 = vld [vmem:[#allocation5 + $0x2960] sm:$0xff] }
 0x130   :  { %8669 = vmatpush1.bf16.msra.mxu1 %v8668_v38  ;;  %8543 = vmatprep.subr.bf16.mxu0 %v8542_v40  ;;  %v1021_v38 = vld [vmem:[#allocation5 + $0x1cb8] sm:$0xff]  ;;  %v8562_v43 = vpack.c.bf16 %v1043_v37, %v1019_v36  ;;  %v1212_v36 = vld [vmem:[#allocation5 + $0x22b0] sm:$0xff] }
 0x131   :  { %8671 = vmatprep.subr.bf16.mxu1 %v8670_v45  ;;  %v1045_v40 = vld [vmem:[#allocation5 + $0x1d78] sm:$0xff]  ;;  %v1018_v45 = vld [vmem:[#allocation5 + $0x1ca0] sm:$0xff] }
 0x132   :  { %v8690_v48 = vpack.c.bf16 %v1045_v40, %v1021_v38  ;;  %v8564_v54 = vpack.c.bf16 %v1042_v46, %v1018_v45  ;;  %v1236_v38 = vld [vmem:[#allocation5 + $0x2370] sm:$0xff]  ;;  %v1259_v40 = vld [vmem:[#allocation5 + $0x2428] sm:$0xff] }
 0x133   :  { %8545 = vmatpush1.bf16.msra.mxu0 %v8544_v51  ;;  %v1091_v51 = vld [vmem:[#allocation5 + $0x1ee8] sm:$0xff]  ;;  %v8708_v46 = vpack.c.bf16 %v1236_v38, %v1212_v36  ;;  %v1474_v38 = vld [vmem:[#allocation5 + $0x2ae0] sm:$0xff] }
 0x134   :  { %8673 = vmatpush1.bf16.msra.mxu1 %v8672_v52  ;;  %8547 = vmatprep.subr.bf16.mxu0 %v8546_v53  ;;  %v1069_v52 = vld [vmem:[#allocation5 + $0x1e38] sm:$0xff]  ;;  %v8566_v56 = vpack.c.bf16 %v1091_v51, %v1067_v50  ;;  %v1260_v50 = vld [vmem:[#allocation5 + $0x2430] sm:$0xff] }
 0x135   :  { %8675 = vmatprep.subr.bf16.mxu1 %v8674_v57  ;;  %v1093_v53 = vld [vmem:[#allocation5 + $0x1ef8] sm:$0xff]  ;;  %v1066_v57 = vld [vmem:[#allocation5 + $0x1e20] sm:$0xff] }
 0x136   :  { %v8694_v60 = vpack.c.bf16 %v1093_v53, %v1069_v52  ;;  %v8568_v3 = vpack.c.bf16 %v1090_v58, %v1066_v57  ;;  %v1284_v52 = vld [vmem:[#allocation5 + $0x24f0] sm:$0xff]  ;;  %v1307_v53 = vld [vmem:[#allocation5 + $0x25a8] sm:$0xff] }
 0x137   :  { %8549 = vmatpush1.bf16.msra.mxu0 %v8548_v0  ;;  %v1139_v0 = vld [vmem:[#allocation5 + $0x2068] sm:$0xff]  ;;  %v8712_v58 = vpack.c.bf16 %v1284_v52, %v1260_v50  ;;  %v1522_v52 = vld [vmem:[#allocation5 + $0x2c60] sm:$0xff] }
 0x138   :  { %8677 = vmatpush1.bf16.msra.mxu1 %v8676_v1  ;;  %8551 = vmatprep.subr.bf16.mxu0 %v8550_v2  ;;  %v1117_v1 = vld [vmem:[#allocation5 + $0x1fb8] sm:$0xff]  ;;  %v8570_v5 = vpack.c.bf16 %v1139_v0, %v1115_v63  ;;  %v1308_v63 = vld [vmem:[#allocation5 + $0x25b0] sm:$0xff] }
 0x139   :  { %8679 = vmatprep.subr.bf16.mxu1 %v8678_v6  ;;  %v1141_v2 = vld [vmem:[#allocation5 + $0x2078] sm:$0xff]  ;;  %v1114_v6 = vld [vmem:[#allocation5 + $0x1fa0] sm:$0xff] }
 0x13a   :  { %2259 = vmatmul.mubr.f32.vlgmr.msra.gmra.mrb[2].mxu0 %v11730_v25  ;;  %v8698_v9 = vpack.c.bf16 %v1141_v2, %v1117_v1  ;;  %v8572_v16 = vpack.c.bf16 %v1138_v7, %v1114_v6  ;;  %v1332_v1 = vld [vmem:[#allocation5 + $0x2670] sm:$0xff]  ;;  %v1355_v2 = vld [vmem:[#allocation5 + $0x2728] sm:$0xff] }
 0x13b   :  { %8553 = vmatpush1.bf16.msra.mxu0 %v8552_v13  ;;  %2472 = vmatmul.mubr.f32.vlgmr.msra.gmra.mrb[2].mxu1 %v11730_v25  ;;  %v1187_v13 = vld [vmem:[#allocation5 + $0x21e8] sm:$0xff]  ;;  %v8716_v7 = vpack.c.bf16 %v1332_v1, %v1308_v63  ;;  %v1570_v1 = vld [vmem:[#allocation5 + $0x2de0] sm:$0xff] }
 0x13c   :  { %8681 = vmatpush1.bf16.msra.mxu1 %v8680_v14  ;;  %8555 = vmatprep.subr.bf16.mxu0 %v8554_v15  ;;  %v1165_v14 = vld [vmem:[#allocation5 + $0x2138] sm:$0xff]  ;;  %v8574_v18 = vpack.c.bf16 %v1187_v13, %v1163_v12  ;;  %v1356_v12 = vld [vmem:[#allocation5 + $0x2730] sm:$0xff] }
 0x13d   :  { %8683 = vmatprep.subr.bf16.mxu1 %v8682_v19  ;;  %2329 = vmatprep.mubr.f32.mxu0 %v11745_v39  ;;  %v1189_v15 = vld [vmem:[#allocation5 + $0x21f8] sm:$0xff]  ;;  %v1162_v19 = vld [vmem:[#allocation5 + $0x2120] sm:$0xff] }
 0x13e   :  { %2542 = vmatprep.mubr.f32.mxu1 %v11745_v39  ;;  %v8702_v23 = vpack.c.bf16 %v1189_v15, %v1165_v14  ;;  %v8576_v30 = vpack.c.bf16 %v1186_v20, %v1162_v19  ;;  %v1380_v14 = vld [vmem:[#allocation5 + $0x27f0] sm:$0xff]  ;;  %v1403_v15 = vld [vmem:[#allocation5 + $0x28a8] sm:$0xff] }
 0x13f   :  { %8557 = vmatpush1.bf16.msra.mxu0 %v8556_v27  ;;  %v1235_v27 = vld [vmem:[#allocation5 + $0x2368] sm:$0xff]  ;;  %v8720_v20 = vpack.c.bf16 %v1380_v14, %v1356_v12  ;;  %v1618_v14 = vld [vmem:[#allocation5 + $0x2f60] sm:$0xff] }
 0x140   :  { %8685 = vmatpush1.bf16.msra.mxu1 %v8684_v28  ;;  %8559 = vmatprep.subr.bf16.mxu0 %v8558_v29  ;;  %v1213_v28 = vld [vmem:[#allocation5 + $0x22b8] sm:$0xff]  ;;  %v8578_v33 = vpack.c.bf16 %v1235_v27, %v1211_v22  ;;  %v1404_v22 = vld [vmem:[#allocation5 + $0x28b0] sm:$0xff] }
 0x141   :  { %8687 = vmatprep.subr.bf16.mxu1 %v8686_v34  ;;  %v1237_v29 = vld [vmem:[#allocation5 + $0x2378] sm:$0xff]  ;;  %v1210_v34 = vld [vmem:[#allocation5 + $0x22a0] sm:$0xff] }
 0x142   :  { %v8706_v37 = vpack.c.bf16 %v1237_v29, %v1213_v28  ;;  %v8580_v45 = vpack.c.bf16 %v1234_v35, %v1210_v34  ;;  %v1428_v28 = vld [vmem:[#allocation5 + $0x2970] sm:$0xff]  ;;  %v1451_v29 = vld [vmem:[#allocation5 + $0x2a28] sm:$0xff] }
 0x143   :  { %8561 = vmatpush1.bf16.msra.mxu0 %v8560_v41  ;;  %v1283_v41 = vld [vmem:[#allocation5 + $0x24e8] sm:$0xff]  ;;  %v8724_v35 = vpack.c.bf16 %v1428_v28, %v1404_v22  ;;  %v113_v22 = vld [vmem:[#allocation5 + $0x58] sm:$0xff]  ;;  %v1642_v28 = vld [vmem:[#allocation5 + $0x3020] sm:$0x7] }
 0x144   :  { %8689 = vmatpush1.bf16.msra.mxu1 %v8688_v42  ;;  %8563 = vmatprep.subr.bf16.mxu0 %v8562_v43  ;;  %v1261_v42 = vld [vmem:[#allocation5 + $0x2438] sm:$0xff]  ;;  %v8582_v47 = vpack.c.bf16 %v1283_v41, %v1259_v40  ;;  %v1452_v40 = vld [vmem:[#allocation5 + $0x2a30] sm:$0xff] }
 0x145   :  { %8691 = vmatprep.subr.bf16.mxu1 %v8690_v48  ;;  %v1285_v43 = vld [vmem:[#allocation5 + $0x24f8] sm:$0xff]  ;;  %v1258_v48 = vld [vmem:[#allocation5 + $0x2420] sm:$0xff] }
 0x146   :  { %v8710_v51 = vpack.c.bf16 %v1285_v43, %v1261_v42  ;;  %v8584_v57 = vpack.c.bf16 %v1282_v49, %v1258_v48  ;;  %v1476_v42 = vld [vmem:[#allocation5 + $0x2af0] sm:$0xff]  ;;  %v1499_v43 = vld [vmem:[#allocation5 + $0x2ba8] sm:$0xff] }
 0x147   :  { %8565 = vmatpush1.bf16.msra.mxu0 %v8564_v54  ;;  %v1331_v54 = vld [vmem:[#allocation5 + $0x2668] sm:$0xff]  ;;  %v8728_v49 = vpack.c.bf16 %v1476_v42, %v1452_v40  ;;  %v161_v40 = vld [vmem:[#allocation5 + $0x1d8] sm:$0xff] }
 0x148   :  { %8693 = vmatpush1.bf16.msra.mxu1 %v8692_v55  ;;  %8567 = vmatprep.subr.bf16.mxu0 %v8566_v56  ;;  %v1309_v55 = vld [vmem:[#allocation5 + $0x25b8] sm:$0xff]  ;;  %v8586_v59 = vpack.c.bf16 %v1331_v54, %v1307_v53  ;;  %v1500_v53 = vld [vmem:[#allocation5 + $0x2bb0] sm:$0xff] }
 0x149   :  { %8695 = vmatprep.subr.bf16.mxu1 %v8694_v60  ;;  %v1333_v56 = vld [vmem:[#allocation5 + $0x2678] sm:$0xff]  ;;  %v1306_v60 = vld [vmem:[#allocation5 + $0x25a0] sm:$0xff] }
 0x14a   :  { %v8714_v0 = vpack.c.bf16 %v1333_v56, %v1309_v55  ;;  %v8588_v6 = vpack.c.bf16 %v1330_v61, %v1306_v60  ;;  %v1524_v55 = vld [vmem:[#allocation5 + $0x2c70] sm:$0xff]  ;;  %v1547_v56 = vld [vmem:[#allocation5 + $0x2d28] sm:$0xff] }
 0x14b   :  { %8569 = vmatpush1.bf16.msra.mxu0 %v8568_v3  ;;  %v1379_v3 = vld [vmem:[#allocation5 + $0x27e8] sm:$0xff]  ;;  %v8732_v61 = vpack.c.bf16 %v1524_v55, %v1500_v53  ;;  %v11416_v53 = vld.sshfl [vmem:[#allocation2 + $0x8] sm:$0x3 pattern:$0x76325410] }
 0x14c   :  { %8697 = vmatpush1.bf16.msra.mxu1 %v8696_v4  ;;  %8571 = vmatprep.subr.bf16.mxu0 %v8570_v5  ;;  %v1357_v4 = vld [vmem:[#allocation5 + $0x2738] sm:$0xff]  ;;  %v8590_v8 = vpack.c.bf16 %v1379_v3, %v1355_v2  ;;  %v1548_v2 = vld [vmem:[#allocation5 + $0x2d30] sm:$0xff] }
 0x14d   :  { %8699 = vmatprep.subr.bf16.mxu1 %v8698_v9  ;;  %v1381_v5 = vld [vmem:[#allocation5 + $0x27f8] sm:$0xff]  ;;  %v1354_v9 = vld [vmem:[#allocation5 + $0x2720] sm:$0xff] }
 0x14e   :  { %v8718_v13 = vpack.c.bf16 %v1381_v5, %v1357_v4  ;;  %v8592_v19 = vpack.c.bf16 %v1378_v10, %v1354_v9  ;;  %v1572_v4 = vld [vmem:[#allocation5 + $0x2df0] sm:$0xff]  ;;  %v1595_v5 = vld [vmem:[#allocation5 + $0x2ea8] sm:$0xff]  ;;  %v233_v55 = vld [vmem:[#allocation5 + $0x418] sm:$0xff] }
 0x14f   :  { %8573 = vmatpush1.bf16.msra.mxu0 %v8572_v16  ;;  %v1427_v16 = vld [vmem:[#allocation5 + $0x2968] sm:$0xff]  ;;  %v8736_v10 = vpack.c.bf16 %v1572_v4, %v1548_v2  ;;  %v281_v4 = vld [vmem:[#allocation5 + $0x598] sm:$0xff] }
 0x150   :  { %8701 = vmatpush1.bf16.msra.mxu1 %v8700_v17  ;;  %8575 = vmatprep.subr.bf16.mxu0 %v8574_v18  ;;  %v1405_v17 = vld [vmem:[#allocation5 + $0x28b8] sm:$0xff]  ;;  %v8594_v21 = vpack.c.bf16 %v1427_v16, %v1403_v15  ;;  %v1596_v16 = vld [vmem:[#allocation5 + $0x2eb0] sm:$0xff]  ;;  %v279_v2 = vld [vmem:[#allocation5 + $0x588] sm:$0xff] }
 0x151   :  { %8703 = vmatprep.subr.bf16.mxu1 %v8702_v23  ;;  %v1429_v18 = vld [vmem:[#allocation5 + $0x2978] sm:$0xff]  ;;  %v1402_v23 = vld [vmem:[#allocation5 + $0x28a0] sm:$0xff] }
 0x152   :  { %v8722_v27 = vpack.c.bf16 %v1429_v18, %v1405_v17  ;;  %v8596_v34 = vpack.c.bf16 %v1426_v24, %v1402_v23  ;;  %v1620_v17 = vld [vmem:[#allocation5 + $0x2f70] sm:$0xff]  ;;  %v111_v23 = vld [vmem:[#allocation5 + $0x48] sm:$0xff] }
 0x153   :  { %8577 = vmatpush1.bf16.msra.mxu0 %v8576_v30  ;;  %v1475_v30 = vld [vmem:[#allocation5 + $0x2ae8] sm:$0xff] }
 0x154   :  { %8705 = vmatpush1.bf16.msra.mxu1 %v8704_v31  ;;  %8579 = vmatprep.subr.bf16.mxu0 %v8578_v33  ;;  %v1453_v31 = vld [vmem:[#allocation5 + $0x2a38] sm:$0xff]  ;;  %v8598_v36 = vpack.c.bf16 %v1475_v30, %v1451_v29  ;;  %v135_v24 = vld [vmem:[#allocation5 + $0x108] sm:$0xff]  ;;  %v1644_v29 = vld [vmem:[#allocation5 + $0x3030] sm:$0x7] }
 0x155   :  { %8707 = vmatprep.subr.bf16.mxu1 %v8706_v37  ;;  %v1477_v33 = vld [vmem:[#allocation5 + $0x2af8] sm:$0xff]  ;;  %v1450_v37 = vld [vmem:[#allocation5 + $0x2a20] sm:$0xff]  ;;  %v8742_v30 = vpack.c.bf16 %v135_v24, %v111_v23  ;;  %v304_v24 = vld [vmem:[#allocation5 + $0x650] sm:$0xff] }
 0x156   :  { %v8726_v41 = vpack.c.bf16 %v1477_v33, %v1453_v31  ;;  %v8600_v48 = vpack.c.bf16 %v1474_v38, %v1450_v37  ;;  %v110_v33 = vld [vmem:[#allocation5 + $0x40] sm:$0xff]  ;;  %v159_v37 = vld [vmem:[#allocation5 + $0x1c8] sm:$0xff] }
 0x157   :  { %8581 = vmatpush1.bf16.msra.mxu0 %v8580_v45  ;;  %v1523_v45 = vld [vmem:[#allocation5 + $0x2c68] sm:$0xff]  ;;  %v326_v23 = vld [vmem:[#allocation5 + $0x700] sm:$0xff] }
 0x158   :  { %8709 = vmatpush1.bf16.msra.mxu1 %v8708_v46  ;;  %8583 = vmatprep.subr.bf16.mxu0 %v8582_v47  ;;  %v1501_v46 = vld [vmem:[#allocation5 + $0x2bb8] sm:$0xff]  ;;  %v8602_v50 = vpack.c.bf16 %v1523_v45, %v1499_v43  ;;  %v183_v38 = vld [vmem:[#allocation5 + $0x288] sm:$0xff] }
 0x159   :  { %8711 = vmatprep.subr.bf16.mxu1 %v8710_v51  ;;  %v1525_v47 = vld [vmem:[#allocation5 + $0x2c78] sm:$0xff]  ;;  %v1498_v51 = vld [vmem:[#allocation5 + $0x2ba0] sm:$0xff]  ;;  %v8746_v45 = vpack.c.bf16 %v183_v38, %v159_v37  ;;  %v352_v38 = vld [vmem:[#allocation5 + $0x7d0] sm:$0xff] }
 0x15a   :  { %v8730_v54 = vpack.c.bf16 %v1525_v47, %v1501_v46  ;;  %v8604_v60 = vpack.c.bf16 %v1522_v52, %v1498_v51  ;;  %v158_v46 = vld [vmem:[#allocation5 + $0x1c0] sm:$0xff]  ;;  %v207_v51 = vld [vmem:[#allocation5 + $0x348] sm:$0xff] }
 0x15b   :  { %8585 = vmatpush1.bf16.msra.mxu0 %v8584_v57  ;;  %v1571_v57 = vld [vmem:[#allocation5 + $0x2de8] sm:$0xff]  ;;  %v182_v47 = vld [vmem:[#allocation5 + $0x280] sm:$0xff] }
 0x15c   :  { %8713 = vmatpush1.bf16.msra.mxu1 %v8712_v58  ;;  %8587 = vmatprep.subr.bf16.mxu0 %v8586_v59  ;;  %v1549_v58 = vld [vmem:[#allocation5 + $0x2d38] sm:$0xff]  ;;  %v8606_v63 = vpack.c.bf16 %v1571_v57, %v1547_v56  ;;  %v231_v52 = vld [vmem:[#allocation5 + $0x408] sm:$0xff]  ;;  %v8748_v56 = vpack.c.bf16 %v182_v47, %v158_v46  ;;  %v374_v37 = vld [vmem:[#allocation5 + $0x880] sm:$0xff] }
 0x15d   :  { %8715 = vmatprep.subr.bf16.mxu1 %v8714_v0  ;;  %v1573_v59 = vld [vmem:[#allocation5 + $0x2df8] sm:$0xff]  ;;  %v1546_v0 = vld [vmem:[#allocation5 + $0x2d20] sm:$0xff] }
 0x15e   :  { %v8734_v3 = vpack.c.bf16 %v1573_v59, %v1549_v58  ;;  %v8608_v9 = vpack.c.bf16 %v1570_v1, %v1546_v0  ;;  %v8750_v58 = vpack.c.bf16 %v231_v52, %v207_v51  ;;  %v206_v59 = vld [vmem:[#allocation5 + $0x340] sm:$0xff]  ;;  %v232_v0 = vld [vmem:[#allocation5 + $0x410] sm:$0xff]  ;;  %v255_v1 = vld [vmem:[#allocation5 + $0x4c8] sm:$0xff] }
 0x15f   :  { %8589 = vmatpush1.bf16.msra.mxu0 %v8588_v6  ;;  %v1619_v6 = vld [vmem:[#allocation5 + $0x2f68] sm:$0xff]  ;;  %v425_v46 = vld [vmem:[#allocation5 + $0xa18] sm:$0xff]  ;;  %v422_v51 = vld [vmem:[#allocation5 + $0xa00] sm:$0xff] }
 0x160   :  { %8717 = vmatpush1.bf16.msra.mxu1 %v8716_v7  ;;  %8591 = vmatprep.subr.bf16.mxu0 %v8590_v8  ;;  %v1597_v7 = vld [vmem:[#allocation5 + $0x2eb8] sm:$0xff]  ;;  %v8610_v12 = vpack.c.bf16 %v1619_v6, %v1595_v5  ;;  %v400_v52 = vld [vmem:[#allocation5 + $0x950] sm:$0xff] }
 0x161   :  { %8719 = vmatprep.subr.bf16.mxu1 %v8718_v13  ;;  %v1621_v8 = vld [vmem:[#allocation5 + $0x2f78] sm:$0xff]  ;;  %v1594_v13 = vld [vmem:[#allocation5 + $0x2ea0] sm:$0xff] }
 0x162   :  { %v8738_v15 = vpack.c.bf16 %v1621_v8, %v1597_v7  ;;  %v8612_v18 = vpack.c.bf16 %v1618_v14, %v1594_v13  ;;  %v8754_v7 = vpack.c.bf16 %v279_v2, %v255_v1  ;;  %v254_v8 = vld [vmem:[#allocation5 + $0x4c0] sm:$0xff]  ;;  %v280_v13 = vld [vmem:[#allocation5 + $0x590] sm:$0xff]  ;;  %v303_v14 = vld [vmem:[#allocation5 + $0x648] sm:$0xff] }
 0x163   :  { %8593 = vmatpush1.bf16.msra.mxu0 %v8592_v19  ;;  %v8740_v19 = vpack.c.bf16 %v1620_v17, %v1596_v16  ;;  %v305_v16 = vld [vmem:[#allocation5 + $0x658] sm:$0xff]  ;;  %v448_v1 = vld [vmem:[#allocation5 + $0xad0] sm:$0xff] }
 0x164   :  { %8721 = vmatpush1.bf16.msra.mxu1 %v8720_v20  ;;  %8595 = vmatprep.subr.bf16.mxu0 %v8594_v21  ;;  %v1643_v20 = vld [vmem:[#allocation5 + $0x3028] sm:$0x7]  ;;  %v1645_v21 = vld [vmem:[#allocation5 + $0x3038] sm:$0x7] }
 0x165   :  { %8723 = vmatprep.subr.bf16.mxu1 %v8722_v27  ;;  %v137_v27 = vld [vmem:[#allocation5 + $0x118] sm:$0xff] }
 0x166   :  { %v8870_v31 = vpack.c.bf16 %v137_v27, %v113_v22  ;;  %v329_v17 = vld [vmem:[#allocation5 + $0x718] sm:$0xff]  ;;  %v328_v27 = vld [vmem:[#allocation5 + $0x710] sm:$0xff] }
 0x167   :  { %8597 = vmatpush1.bf16.msra.mxu0 %v8596_v34  ;;  %v134_v34 = vld [vmem:[#allocation5 + $0x100] sm:$0xff]  ;;  %v8886_v22 = vpack.c.bf16 %v329_v17, %v305_v16  ;;  %v520_v16 = vld [vmem:[#allocation5 + $0xd10] sm:$0xff]  ;;  %v543_v17 = vld [vmem:[#allocation5 + $0xdc8] sm:$0xff] }
 0x168   :  { %8725 = vmatpush1.bf16.msra.mxu1 %v8724_v35  ;;  %8599 = vmatprep.subr.bf16.mxu0 %v8598_v36  ;;  %v112_v35 = vld [vmem:[#allocation5 + $0x50] sm:$0xff]  ;;  %v8744_v42 = vpack.c.bf16 %v134_v34, %v110_v33  ;;  %v8888_v34 = vpack.c.bf16 %v328_v27, %v304_v24  ;;  %v566_v27 = vld [vmem:[#allocation5 + $0xe80] sm:$0xff] }
 0x169   :  { %8727 = vmatprep.subr.bf16.mxu1 %v8726_v41  ;;  %v136_v36 = vld [vmem:[#allocation5 + $0x110] sm:$0xff]  ;;  %v185_v41 = vld [vmem:[#allocation5 + $0x298] sm:$0xff] }
 0x16a   :  { %v8872_v43 = vpack.c.bf16 %v136_v36, %v112_v35  ;;  %v350_v36 = vld [vmem:[#allocation5 + $0x7c0] sm:$0xff] }
 0x16b   :  { %8601 = vmatpush1.bf16.msra.mxu0 %v8600_v48  ;;  %v160_v48 = vld [vmem:[#allocation5 + $0x1d0] sm:$0xff]  ;;  %v8764_v47 = vpack.c.bf16 %v374_v37, %v350_v36 }
 0x16c   :  { %8729 = vmatpush1.bf16.msra.mxu1 %v8728_v49  ;;  %8603 = vmatprep.subr.bf16.mxu0 %v8602_v50  ;;  %v8874_v49 = vpack.c.bf16 %v185_v41, %v161_v40  ;;  %v184_v50 = vld [vmem:[#allocation5 + $0x290] sm:$0xff] }
 0x16d   :  { %8731 = vmatprep.subr.bf16.mxu1 %v8730_v54  ;;  %v209_v54 = vld [vmem:[#allocation5 + $0x358] sm:$0xff]  ;;  %v8876_v57 = vpack.c.bf16 %v184_v50, %v160_v48  ;;  %v376_v41 = vld [vmem:[#allocation5 + $0x890] sm:$0xff]  ;;  %v398_v50 = vld [vmem:[#allocation5 + $0x940] sm:$0xff] }
 0x16e   :  { %v8892_v48 = vpack.c.bf16 %v376_v41, %v352_v38  ;;  %v614_v41 = vld [vmem:[#allocation5 + $0x1000] sm:$0xff] }
 0x16f   :  { %8605 = vmatpush1.bf16.msra.mxu0 %v8604_v60  ;;  %v230_v60 = vld [vmem:[#allocation5 + $0x400] sm:$0xff] }
 0x170   :  { %8733 = vmatpush1.bf16.msra.mxu1 %v8732_v61  ;;  %8607 = vmatprep.subr.bf16.mxu0 %v8606_v63  ;;  %v208_v61 = vld [vmem:[#allocation5 + $0x350] sm:$0xff]  ;;  %v8878_v63 = vpack.c.bf16 %v233_v55, %v209_v54  ;;  %v8752_v5 = vpack.c.bf16 %v230_v60, %v206_v59  ;;  %v447_v55 = vld [vmem:[#allocation5 + $0xac8] sm:$0xff]  ;;  %v8768_v59 = vpack.c.bf16 %v422_v51, %v398_v50 }
 0x171   :  { %8735 = vmatprep.subr.bf16.mxu1 %v8734_v3  ;;  %v257_v3 = vld [vmem:[#allocation5 + $0x4d8] sm:$0xff]  ;;  %v8880_v6 = vpack.c.bf16 %v232_v0, %v208_v61  ;;  %v424_v54 = vld [vmem:[#allocation5 + $0xa10] sm:$0xff]  ;;  %v470_v0 = vld [vmem:[#allocation5 + $0xb80] sm:$0xff] }
 0x172   :  { %v8896_v60 = vpack.c.bf16 %v424_v54, %v400_v52  ;;  %v662_v54 = vld [vmem:[#allocation5 + $0x1180] sm:$0xff] }
 0x173   :  { %8609 = vmatpush1.bf16.msra.mxu0 %v8608_v9  ;;  %v278_v9 = vld [vmem:[#allocation5 + $0x580] sm:$0xff] }
 0x174   :  { %8737 = vmatpush1.bf16.msra.mxu1 %v8736_v10  ;;  %8611 = vmatprep.subr.bf16.mxu0 %v8610_v12  ;;  %v256_v10 = vld [vmem:[#allocation5 + $0x4d0] sm:$0xff]  ;;  %v8882_v12 = vpack.c.bf16 %v281_v4, %v257_v3  ;;  %v495_v4 = vld [vmem:[#allocation5 + $0xc48] sm:$0xff] }
 0x175   :  { %8739 = vmatprep.subr.bf16.mxu1 %v8738_v15  ;;  %v327_v15 = vld [vmem:[#allocation5 + $0x708] sm:$0xff]  ;;  %v472_v3 = vld [vmem:[#allocation5 + $0xb90] sm:$0xff] }
 0x177   :  { %8613 = vmatpush1.bf16.msra.mxu0 %v8612_v18  ;;  %v8756_v18 = vpack.c.bf16 %v278_v9, %v254_v8  ;;  %v8900_v9 = vpack.c.bf16 %v472_v3, %v448_v1  ;;  %v710_v3 = vld [vmem:[#allocation5 + $0x1300] sm:$0xff] }
 0x178   :  { %8741 = vmatpush1.bf16.msra.mxu1 %v8740_v19  ;;  %8200 = vmatprep.subr.msk.mxu0 %vm1695_vm0, %v1643_v20  ;;  %v8884_v19 = vpack.c.bf16 %v280_v13, %v256_v10  ;;  %v8758_v20 = vpack.c.bf16 %v327_v15, %v303_v14  ;;  %v518_v13 = vld [vmem:[#allocation5 + $0xd00] sm:$0xff]  ;;  %v496_v14 = vld [vmem:[#allocation5 + $0xc50] sm:$0xff] }
 0x179   :  { %8203 = vmatprep.subr.msk.mxu1 %vm1695_vm0, %v1645_v21  ;;  %v302_v21 = vld [vmem:[#allocation5 + $0x640] sm:$0xff] }
 0x17a   :  { %2330 = vmatmul.mubr.f32.vlgmr.msra.gmra.mrb[2].mxu0 %v11741_v26  ;;  %v8760_v33 = vpack.c.bf16 %v326_v23, %v302_v21  ;;  %v8904_v23 = vpack.c.bf16 %v520_v16, %v496_v14  ;;  %v758_v16 = vld [vmem:[#allocation5 + $0x1480] sm:$0xff] }
 0x17b   :  { %2543 = vmatmul.mubr.f32.vlgmr.msra.gmra.mrb[2].mxu1 %v11741_v26  ;;  %8201 = vmatpush1.msk.msra.mxu0 %vm1695_vm0, %v1642_v28  ;;  %v351_v28 = vld [vmem:[#allocation5 + $0x7c8] sm:$0xff] }
 0x17c   :  { %8204 = vmatpush1.msk.msra.mxu1 %vm1695_vm0, %v1644_v29  ;;  %2400 = vmatprep.mubr.f32.mxu0 %v11610_v44  ;;  %v375_v29 = vld [vmem:[#allocation5 + $0x888] sm:$0xff] }
 0x17d   :  { %2613 = vmatprep.mubr.f32.mxu1 %v11610_v44  ;;  %8743 = vmatprep.subr.bf16.mxu0 %v8742_v30  ;;  %v353_v30 = vld [vmem:[#allocation5 + $0x7d8] sm:$0xff]  ;;  %v8762_v35 = vpack.c.bf16 %v375_v29, %v351_v28  ;;  %v544_v28 = vld [vmem:[#allocation5 + $0xdd0] sm:$0xff] }
 0x17e   :  { %8871 = vmatprep.subr.bf16.mxu1 %v8870_v31  ;;  %v377_v31 = vld [vmem:[#allocation5 + $0x898] sm:$0xff] }
 0x17f   :  { %v8890_v40 = vpack.c.bf16 %v377_v31, %v353_v30  ;;  %v568_v30 = vld [vmem:[#allocation5 + $0xe90] sm:$0xff]  ;;  %v591_v31 = vld [vmem:[#allocation5 + $0xf48] sm:$0xff] }
 0x180   :  { %v8908_v37 = vpack.c.bf16 %v568_v30, %v544_v28  ;;  %v806_v30 = vld [vmem:[#allocation5 + $0x1600] sm:$0xff] }
 0x182   :  { %8202 = vmatmul.mubr.msk.f32.vlgmr.msra.gmra.mrb[2].mxu0 %vm1692_vm1, %v11416_v53 }
 0x183   :  { %8205 = vmatmul.mubr.msk.f32.vlgmr.msra.gmra.mrb[2].mxu1 %vm1692_vm1, %v11416_v53  ;;  %8745 = vmatpush1.bf16.msra.mxu0 %v8744_v42  ;;  %v399_v42 = vld [vmem:[#allocation5 + $0x948] sm:$0xff] }
 0x184   :  { %8873 = vmatpush1.bf16.msra.mxu1 %v8872_v43  ;;  %8747 = vmatprep.subr.bf16.mxu0 %v8746_v45  ;;  %v423_v43 = vld [vmem:[#allocation5 + $0xa08] sm:$0xff]  ;;  %v401_v45 = vld [vmem:[#allocation5 + $0x958] sm:$0xff] }
 0x185   :  { %8875 = vmatprep.subr.bf16.mxu1 %v8874_v49  ;;  %2684 = vmatprep.mubr.f32.mxu0 %v11734_v32  ;;  %v8766_v49 = vpack.c.bf16 %v423_v43, %v399_v42  ;;  %v8894_v53 = vpack.c.bf16 %v425_v46, %v401_v45  ;;  %v592_v42 = vld [vmem:[#allocation5 + $0xf50] sm:$0xff]  ;;  %v639_v46 = vld [vmem:[#allocation5 + $0x10c8] sm:$0xff] }
 0x186   :  { %2897 = vmatprep.mubr.f32.mxu1 %v11734_v32  ;;  %v616_v45 = vld [vmem:[#allocation5 + $0x1010] sm:$0xff] }
 0x187   :  { %8749 = vmatpush1.bf16.msra.mxu0 %v8748_v56  ;;  %v471_v56 = vld [vmem:[#allocation5 + $0xb88] sm:$0xff]  ;;  %v8912_v51 = vpack.c.bf16 %v616_v45, %v592_v42  ;;  %v854_v45 = vld [vmem:[#allocation5 + $0x1780] sm:$0xff] }
 0x188   :  { %8877 = vmatpush1.bf16.msra.mxu1 %v8876_v57  ;;  %8751 = vmatprep.subr.bf16.mxu0 %v8750_v58  ;;  %v449_v57 = vld [vmem:[#allocation5 + $0xad8] sm:$0xff]  ;;  %v8770_v61 = vpack.c.bf16 %v471_v56, %v447_v55  ;;  %v640_v55 = vld [vmem:[#allocation5 + $0x10d0] sm:$0xff] }
 0x189   :  { %8879 = vmatprep.subr.bf16.mxu1 %v8878_v63  ;;  %v473_v58 = vld [vmem:[#allocation5 + $0xb98] sm:$0xff]  ;;  %v446_v63 = vld [vmem:[#allocation5 + $0xac0] sm:$0xff] }
 0x18a   :  { %v8898_v2 = vpack.c.bf16 %v473_v58, %v449_v57  ;;  %v8772_v8 = vpack.c.bf16 %v470_v0, %v446_v63  ;;  %v664_v57 = vld [vmem:[#allocation5 + $0x1190] sm:$0xff]  ;;  %v687_v58 = vld [vmem:[#allocation5 + $0x1248] sm:$0xff] }
 0x18b   :  { %8753 = vmatpush1.bf16.msra.mxu0 %v8752_v5  ;;  %v519_v5 = vld [vmem:[#allocation5 + $0xd08] sm:$0xff]  ;;  %v8916_v0 = vpack.c.bf16 %v664_v57, %v640_v55  ;;  %v902_v57 = vld [vmem:[#allocation5 + $0x1900] sm:$0xff] }
 0x18c   :  { %8881 = vmatpush1.bf16.msra.mxu1 %v8880_v6  ;;  %8755 = vmatprep.subr.bf16.mxu0 %v8754_v7  ;;  %v497_v6 = vld [vmem:[#allocation5 + $0xc58] sm:$0xff]  ;;  %v8774_v10 = vpack.c.bf16 %v519_v5, %v495_v4  ;;  %v688_v4 = vld [vmem:[#allocation5 + $0x1250] sm:$0xff] }
 0x18d   :  { %8883 = vmatprep.subr.bf16.mxu1 %v8882_v12  ;;  %v521_v7 = vld [vmem:[#allocation5 + $0xd18] sm:$0xff]  ;;  %v494_v12 = vld [vmem:[#allocation5 + $0xc40] sm:$0xff] }
 0x18e   :  { %v8902_v15 = vpack.c.bf16 %v521_v7, %v497_v6  ;;  %v8776_v21 = vpack.c.bf16 %v518_v13, %v494_v12  ;;  %v712_v6 = vld [vmem:[#allocation5 + $0x1310] sm:$0xff]  ;;  %v735_v7 = vld [vmem:[#allocation5 + $0x13c8] sm:$0xff] }
 0x18f   :  { %8757 = vmatpush1.bf16.msra.mxu0 %v8756_v18  ;;  %v567_v18 = vld [vmem:[#allocation5 + $0xe88] sm:$0xff]  ;;  %v8920_v13 = vpack.c.bf16 %v712_v6, %v688_v4  ;;  %v950_v6 = vld [vmem:[#allocation5 + $0x1a80] sm:$0xff] }
 0x190   :  { %8885 = vmatpush1.bf16.msra.mxu1 %v8884_v19  ;;  %8759 = vmatprep.subr.bf16.mxu0 %v8758_v20  ;;  %v545_v19 = vld [vmem:[#allocation5 + $0xdd8] sm:$0xff]  ;;  %v8778_v24 = vpack.c.bf16 %v567_v18, %v543_v17  ;;  %v736_v17 = vld [vmem:[#allocation5 + $0x13d0] sm:$0xff] }
 0x191   :  { %8887 = vmatprep.subr.bf16.mxu1 %v8886_v22  ;;  %v569_v20 = vld [vmem:[#allocation5 + $0xe98] sm:$0xff]  ;;  %v542_v22 = vld [vmem:[#allocation5 + $0xdc0] sm:$0xff] }
 0x192   :  { %v8906_v29 = vpack.c.bf16 %v569_v20, %v545_v19  ;;  %v8780_v36 = vpack.c.bf16 %v566_v27, %v542_v22  ;;  %v760_v19 = vld [vmem:[#allocation5 + $0x1490] sm:$0xff]  ;;  %v783_v20 = vld [vmem:[#allocation5 + $0x1548] sm:$0xff] }
 0x193   :  { %8761 = vmatpush1.bf16.msra.mxu0 %v8760_v33  ;;  %v615_v33 = vld [vmem:[#allocation5 + $0x1008] sm:$0xff]  ;;  %v8924_v27 = vpack.c.bf16 %v760_v19, %v736_v17  ;;  %v998_v19 = vld [vmem:[#allocation5 + $0x1c00] sm:$0xff] }
 0x194   :  { %8889 = vmatpush1.bf16.msra.mxu1 %v8888_v34  ;;  %8763 = vmatprep.subr.bf16.mxu0 %v8762_v35  ;;  %v593_v34 = vld [vmem:[#allocation5 + $0xf58] sm:$0xff]  ;;  %v8782_v38 = vpack.c.bf16 %v615_v33, %v591_v31  ;;  %v784_v31 = vld [vmem:[#allocation5 + $0x1550] sm:$0xff] }
 0x195   :  { %8891 = vmatprep.subr.bf16.mxu1 %v8890_v40  ;;  %v617_v35 = vld [vmem:[#allocation5 + $0x1018] sm:$0xff]  ;;  %v590_v40 = vld [vmem:[#allocation5 + $0xf40] sm:$0xff] }
 0x196   :  { %v8910_v43 = vpack.c.bf16 %v617_v35, %v593_v34  ;;  %v8784_v50 = vpack.c.bf16 %v614_v41, %v590_v40  ;;  %v808_v34 = vld [vmem:[#allocation5 + $0x1610] sm:$0xff]  ;;  %v831_v35 = vld [vmem:[#allocation5 + $0x16c8] sm:$0xff] }
 0x197   :  { %8765 = vmatpush1.bf16.msra.mxu0 %v8764_v47  ;;  %v663_v47 = vld [vmem:[#allocation5 + $0x1188] sm:$0xff]  ;;  %v8928_v41 = vpack.c.bf16 %v808_v34, %v784_v31  ;;  %v1046_v34 = vld [vmem:[#allocation5 + $0x1d80] sm:$0xff] }
 0x198   :  { %8893 = vmatpush1.bf16.msra.mxu1 %v8892_v48  ;;  %8767 = vmatprep.subr.bf16.mxu0 %v8766_v49  ;;  %v641_v48 = vld [vmem:[#allocation5 + $0x10d8] sm:$0xff]  ;;  %v8786_v52 = vpack.c.bf16 %v663_v47, %v639_v46  ;;  %v832_v46 = vld [vmem:[#allocation5 + $0x16d0] sm:$0xff] }
 0x199   :  { %8895 = vmatprep.subr.bf16.mxu1 %v8894_v53  ;;  %v665_v49 = vld [vmem:[#allocation5 + $0x1198] sm:$0xff]  ;;  %v638_v53 = vld [vmem:[#allocation5 + $0x10c0] sm:$0xff] }
 0x19a   :  { %v8914_v56 = vpack.c.bf16 %v665_v49, %v641_v48  ;;  %v8788_v63 = vpack.c.bf16 %v662_v54, %v638_v53  ;;  %v856_v48 = vld [vmem:[#allocation5 + $0x1790] sm:$0xff]  ;;  %v879_v49 = vld [vmem:[#allocation5 + $0x1848] sm:$0xff] }
 0x19b   :  { %8769 = vmatpush1.bf16.msra.mxu0 %v8768_v59  ;;  %v711_v59 = vld [vmem:[#allocation5 + $0x1308] sm:$0xff]  ;;  %v8932_v54 = vpack.c.bf16 %v856_v48, %v832_v46  ;;  %v1094_v48 = vld [vmem:[#allocation5 + $0x1f00] sm:$0xff] }
 0x19c   :  { %8897 = vmatpush1.bf16.msra.mxu1 %v8896_v60  ;;  %8771 = vmatprep.subr.bf16.mxu0 %v8770_v61  ;;  %v689_v60 = vld [vmem:[#allocation5 + $0x1258] sm:$0xff]  ;;  %v8790_v1 = vpack.c.bf16 %v711_v59, %v687_v58  ;;  %v880_v58 = vld [vmem:[#allocation5 + $0x1850] sm:$0xff] }
 0x19d   :  { %8899 = vmatprep.subr.bf16.mxu1 %v8898_v2  ;;  %v713_v61 = vld [vmem:[#allocation5 + $0x1318] sm:$0xff]  ;;  %v686_v2 = vld [vmem:[#allocation5 + $0x1240] sm:$0xff] }
 0x19e   :  { %v8918_v5 = vpack.c.bf16 %v713_v61, %v689_v60  ;;  %v8792_v12 = vpack.c.bf16 %v710_v3, %v686_v2  ;;  %v904_v60 = vld [vmem:[#allocation5 + $0x1910] sm:$0xff]  ;;  %v927_v61 = vld [vmem:[#allocation5 + $0x19c8] sm:$0xff] }
 0x19f   :  { %8773 = vmatpush1.bf16.msra.mxu0 %v8772_v8  ;;  %v759_v8 = vld [vmem:[#allocation5 + $0x1488] sm:$0xff]  ;;  %v8936_v3 = vpack.c.bf16 %v904_v60, %v880_v58  ;;  %v1145_v58 = vld [vmem:[#allocation5 + $0x2098] sm:$0xff] }
 0x1a0   :  { %8901 = vmatpush1.bf16.msra.mxu1 %v8900_v9  ;;  %8775 = vmatprep.subr.bf16.mxu0 %v8774_v10  ;;  %v737_v9 = vld [vmem:[#allocation5 + $0x13d8] sm:$0xff]  ;;  %v8794_v14 = vpack.c.bf16 %v759_v8, %v735_v7  ;;  %v928_v7 = vld [vmem:[#allocation5 + $0x19d0] sm:$0xff] }
 0x1a1   :  { %8903 = vmatprep.subr.bf16.mxu1 %v8902_v15  ;;  %v761_v10 = vld [vmem:[#allocation5 + $0x1498] sm:$0xff]  ;;  %v734_v15 = vld [vmem:[#allocation5 + $0x13c0] sm:$0xff] }
 0x1a2   :  { %v8922_v18 = vpack.c.bf16 %v761_v10, %v737_v9  ;;  %v8796_v22 = vpack.c.bf16 %v758_v16, %v734_v15  ;;  %v952_v9 = vld [vmem:[#allocation5 + $0x1a90] sm:$0xff]  ;;  %v975_v10 = vld [vmem:[#allocation5 + $0x1b48] sm:$0xff] }
 0x1a3   :  { %8777 = vmatpush1.bf16.msra.mxu0 %v8776_v21  ;;  %v807_v21 = vld [vmem:[#allocation5 + $0x1608] sm:$0xff]  ;;  %v8940_v16 = vpack.c.bf16 %v952_v9, %v928_v7  ;;  %v1169_v7 = vld [vmem:[#allocation5 + $0x2158] sm:$0xff] }
 0x1a4   :  { %8905 = vmatpush1.bf16.msra.mxu1 %v8904_v23  ;;  %8779 = vmatprep.subr.bf16.mxu0 %v8778_v24  ;;  %v785_v23 = vld [vmem:[#allocation5 + $0x1558] sm:$0xff]  ;;  %v8798_v28 = vpack.c.bf16 %v807_v21, %v783_v20  ;;  %v976_v20 = vld [vmem:[#allocation5 + $0x1b50] sm:$0xff] }
 0x1a5   :  { %8907 = vmatprep.subr.bf16.mxu1 %v8906_v29  ;;  %v809_v24 = vld [vmem:[#allocation5 + $0x1618] sm:$0xff]  ;;  %v782_v29 = vld [vmem:[#allocation5 + $0x1540] sm:$0xff] }
 0x1a6   :  { %v8926_v33 = vpack.c.bf16 %v809_v24, %v785_v23  ;;  %v8800_v40 = vpack.c.bf16 %v806_v30, %v782_v29  ;;  %v1000_v23 = vld [vmem:[#allocation5 + $0x1c10] sm:$0xff]  ;;  %v1023_v24 = vld [vmem:[#allocation5 + $0x1cc8] sm:$0xff] }
 0x1a7   :  { %8781 = vmatpush1.bf16.msra.mxu0 %v8780_v36  ;;  %v855_v36 = vld [vmem:[#allocation5 + $0x1788] sm:$0xff]  ;;  %v8944_v30 = vpack.c.bf16 %v1000_v23, %v976_v20  ;;  %v1217_v20 = vld [vmem:[#allocation5 + $0x22d8] sm:$0xff] }
 0x1a8   :  { %8909 = vmatpush1.bf16.msra.mxu1 %v8908_v37  ;;  %8783 = vmatprep.subr.bf16.mxu0 %v8782_v38  ;;  %v833_v37 = vld [vmem:[#allocation5 + $0x16d8] sm:$0xff]  ;;  %v8802_v42 = vpack.c.bf16 %v855_v36, %v831_v35  ;;  %v1024_v35 = vld [vmem:[#allocation5 + $0x1cd0] sm:$0xff] }
 0x1a9   :  { %8911 = vmatprep.subr.bf16.mxu1 %v8910_v43  ;;  %v857_v38 = vld [vmem:[#allocation5 + $0x1798] sm:$0xff]  ;;  %v830_v43 = vld [vmem:[#allocation5 + $0x16c0] sm:$0xff] }
 0x1aa   :  { %v8930_v47 = vpack.c.bf16 %v857_v38, %v833_v37  ;;  %v8804_v53 = vpack.c.bf16 %v854_v45, %v830_v43  ;;  %v1048_v37 = vld [vmem:[#allocation5 + $0x1d90] sm:$0xff]  ;;  %v1071_v38 = vld [vmem:[#allocation5 + $0x1e48] sm:$0xff] }
 0x1ab   :  { %8785 = vmatpush1.bf16.msra.mxu0 %v8784_v50  ;;  %v903_v50 = vld [vmem:[#allocation5 + $0x1908] sm:$0xff]  ;;  %v8948_v45 = vpack.c.bf16 %v1048_v37, %v1024_v35  ;;  %v1265_v35 = vld [vmem:[#allocation5 + $0x2458] sm:$0xff] }
 0x1ac   :  { %8913 = vmatpush1.bf16.msra.mxu1 %v8912_v51  ;;  %8787 = vmatprep.subr.bf16.mxu0 %v8786_v52  ;;  %v881_v51 = vld [vmem:[#allocation5 + $0x1858] sm:$0xff]  ;;  %v8806_v55 = vpack.c.bf16 %v903_v50, %v879_v49  ;;  %v1072_v49 = vld [vmem:[#allocation5 + $0x1e50] sm:$0xff] }
 0x1ad   :  { %8915 = vmatprep.subr.bf16.mxu1 %v8914_v56  ;;  %v905_v52 = vld [vmem:[#allocation5 + $0x1918] sm:$0xff]  ;;  %v878_v56 = vld [vmem:[#allocation5 + $0x1840] sm:$0xff] }
 0x1ae   :  { %v8934_v59 = vpack.c.bf16 %v905_v52, %v881_v51  ;;  %v8808_v2 = vpack.c.bf16 %v902_v57, %v878_v56  ;;  %v1096_v52 = vld [vmem:[#allocation5 + $0x1f10] sm:$0xff]  ;;  %v1121_v57 = vld [vmem:[#allocation5 + $0x1fd8] sm:$0xff] }
 0x1af   :  { %8789 = vmatpush1.bf16.msra.mxu0 %v8788_v63  ;;  %v951_v63 = vld [vmem:[#allocation5 + $0x1a88] sm:$0xff] }
 0x1b0   :  { %8917 = vmatpush1.bf16.msra.mxu1 %v8916_v0  ;;  %8791 = vmatprep.subr.bf16.mxu0 %v8790_v1  ;;  %v929_v0 = vld [vmem:[#allocation5 + $0x19d8] sm:$0xff]  ;;  %v8810_v4 = vpack.c.bf16 %v951_v63, %v927_v61  ;;  %v8952_v61 = vpack.c.bf16 %v1096_v52, %v1072_v49 }
 0x1b1   :  { %8919 = vmatprep.subr.bf16.mxu1 %v8918_v5  ;;  %v953_v1 = vld [vmem:[#allocation5 + $0x1a98] sm:$0xff]  ;;  %v926_v5 = vld [vmem:[#allocation5 + $0x19c0] sm:$0xff] }
 0x1b2   :  { %v8938_v8 = vpack.c.bf16 %v953_v1, %v929_v0  ;;  %v8812_v15 = vpack.c.bf16 %v950_v6, %v926_v5  ;;  %v1118_v0 = vld [vmem:[#allocation5 + $0x1fc0] sm:$0xff]  ;;  %v1167_v5 = vld [vmem:[#allocation5 + $0x2148] sm:$0xff]  ;;  %v1313_v49 = vld [vmem:[#allocation5 + $0x25d8] sm:$0xff] }
 0x1b3   :  { %8793 = vmatpush1.bf16.msra.mxu0 %v8792_v12  ;;  %v999_v12 = vld [vmem:[#allocation5 + $0x1c08] sm:$0xff]  ;;  %v1142_v1 = vld [vmem:[#allocation5 + $0x2080] sm:$0xff] }
 0x1b4   :  { %8921 = vmatpush1.bf16.msra.mxu1 %v8920_v13  ;;  %8795 = vmatprep.subr.bf16.mxu0 %v8794_v14  ;;  %v977_v13 = vld [vmem:[#allocation5 + $0x1b58] sm:$0xff]  ;;  %v8814_v17 = vpack.c.bf16 %v999_v12, %v975_v10  ;;  %v1191_v6 = vld [vmem:[#allocation5 + $0x2208] sm:$0xff]  ;;  %v8828_v9 = vpack.c.bf16 %v1142_v1, %v1118_v0 }
 0x1b5   :  { %8923 = vmatprep.subr.bf16.mxu1 %v8922_v18  ;;  %v1001_v14 = vld [vmem:[#allocation5 + $0x1c18] sm:$0xff]  ;;  %v974_v18 = vld [vmem:[#allocation5 + $0x1b40] sm:$0xff]  ;;  %v8830_v12 = vpack.c.bf16 %v1191_v6, %v1167_v5  ;;  %v1359_v0 = vld [vmem:[#allocation5 + $0x2748] sm:$0xff] }
 0x1b6   :  { %v8942_v21 = vpack.c.bf16 %v1001_v14, %v977_v13  ;;  %v8816_v29 = vpack.c.bf16 %v998_v19, %v974_v18  ;;  %v1166_v13 = vld [vmem:[#allocation5 + $0x2140] sm:$0xff]  ;;  %v1215_v18 = vld [vmem:[#allocation5 + $0x22c8] sm:$0xff] }
 0x1b7   :  { %8797 = vmatpush1.bf16.msra.mxu0 %v8796_v22  ;;  %v1047_v22 = vld [vmem:[#allocation5 + $0x1d88] sm:$0xff]  ;;  %v1190_v14 = vld [vmem:[#allocation5 + $0x2200] sm:$0xff] }
 0x1b8   :  { %8925 = vmatpush1.bf16.msra.mxu1 %v8924_v27  ;;  %8799 = vmatprep.subr.bf16.mxu0 %v8798_v28  ;;  %v1025_v27 = vld [vmem:[#allocation5 + $0x1cd8] sm:$0xff]  ;;  %v8818_v31 = vpack.c.bf16 %v1047_v22, %v1023_v24  ;;  %v1239_v19 = vld [vmem:[#allocation5 + $0x2388] sm:$0xff]  ;;  %v8832_v23 = vpack.c.bf16 %v1190_v14, %v1166_v13 }
 0x1b9   :  { %8927 = vmatprep.subr.bf16.mxu1 %v8926_v33  ;;  %v1049_v28 = vld [vmem:[#allocation5 + $0x1d98] sm:$0xff]  ;;  %v1022_v33 = vld [vmem:[#allocation5 + $0x1cc0] sm:$0xff]  ;;  %v8834_v22 = vpack.c.bf16 %v1239_v19, %v1215_v18  ;;  %v1383_v1 = vld [vmem:[#allocation5 + $0x2808] sm:$0xff] }
 0x1ba   :  { %v8946_v36 = vpack.c.bf16 %v1049_v28, %v1025_v27  ;;  %v8820_v43 = vpack.c.bf16 %v1046_v34, %v1022_v33  ;;  %v1214_v27 = vld [vmem:[#allocation5 + $0x22c0] sm:$0xff]  ;;  %v1263_v33 = vld [vmem:[#allocation5 + $0x2448] sm:$0xff]  ;;  %v8846_v6 = vpack.c.bf16 %v1383_v1, %v1359_v0 }
 0x1bb   :  { %8801 = vmatpush1.bf16.msra.mxu0 %v8800_v40  ;;  %v1095_v40 = vld [vmem:[#allocation5 + $0x1f08] sm:$0xff]  ;;  %v1238_v28 = vld [vmem:[#allocation5 + $0x2380] sm:$0xff] }
 0x1bc   :  { %8929 = vmatpush1.bf16.msra.mxu1 %v8928_v41  ;;  %8803 = vmatprep.subr.bf16.mxu0 %v8802_v42  ;;  %v1073_v41 = vld [vmem:[#allocation5 + $0x1e58] sm:$0xff]  ;;  %v8822_v46 = vpack.c.bf16 %v1095_v40, %v1071_v38  ;;  %v1287_v34 = vld [vmem:[#allocation5 + $0x2508] sm:$0xff]  ;;  %v8836_v37 = vpack.c.bf16 %v1238_v28, %v1214_v27 }
 0x1bd   :  { %8931 = vmatprep.subr.bf16.mxu1 %v8930_v47  ;;  %v1097_v42 = vld [vmem:[#allocation5 + $0x1f18] sm:$0xff]  ;;  %v1070_v47 = vld [vmem:[#allocation5 + $0x1e40] sm:$0xff]  ;;  %v8838_v40 = vpack.c.bf16 %v1287_v34, %v1263_v33  ;;  %v1407_v13 = vld [vmem:[#allocation5 + $0x28c8] sm:$0xff] }
 0x1be   :  { %v8950_v51 = vpack.c.bf16 %v1097_v42, %v1073_v41  ;;  %v8824_v60 = vpack.c.bf16 %v1094_v48, %v1070_v47  ;;  %v1262_v41 = vld [vmem:[#allocation5 + $0x2440] sm:$0xff]  ;;  %v1311_v47 = vld [vmem:[#allocation5 + $0x25c8] sm:$0xff] }
 0x1bf   :  { %8805 = vmatpush1.bf16.msra.mxu0 %v8804_v53  ;;  %v1119_v53 = vld [vmem:[#allocation5 + $0x1fc8] sm:$0xff]  ;;  %v1286_v42 = vld [vmem:[#allocation5 + $0x2500] sm:$0xff] }
 0x1c0   :  { %8933 = vmatpush1.bf16.msra.mxu1 %v8932_v54  ;;  %8807 = vmatprep.subr.bf16.mxu0 %v8806_v55  ;;  %v1143_v54 = vld [vmem:[#allocation5 + $0x2088] sm:$0xff]  ;;  %v8840_v52 = vpack.c.bf16 %v1286_v42, %v1262_v41 }
 0x1c1   :  { %8935 = vmatprep.subr.bf16.mxu1 %v8934_v59  ;;  %v8826_v63 = vpack.c.bf16 %v1143_v54, %v1119_v53  ;;  %v1335_v48 = vld [vmem:[#allocation5 + $0x2688] sm:$0xff] }
 0x1c2   :  { %2685 = vmatmul.mubr.f32.vlgmr.msra.gmra.mrb[4].mxu0 %v11730_v25  ;;  %v8842_v54 = vpack.c.bf16 %v1335_v48, %v1311_v47  ;;  %v1431_v14 = vld [vmem:[#allocation5 + $0x2988] sm:$0xff] }
 0x1c3   :  { %8809 = vmatpush1.bf16.msra.mxu0 %v8808_v2  ;;  %2898 = vmatmul.mubr.f32.vlgmr.msra.gmra.mrb[4].mxu1 %v11730_v25  ;;  %v1120_v2 = vld [vmem:[#allocation5 + $0x1fd0] sm:$0xff]  ;;  %v8850_v19 = vpack.c.bf16 %v1431_v14, %v1407_v13  ;;  %v1455_v27 = vld [vmem:[#allocation5 + $0x2a48] sm:$0xff] }
 0x1c4   :  { %8937 = vmatpush1.bf16.msra.mxu1 %v8936_v3  ;;  %8811 = vmatprep.subr.bf16.mxu0 %v8810_v4  ;;  %v8954_v3 = vpack.c.bf16 %v1145_v58, %v1121_v57  ;;  %v1144_v4 = vld [vmem:[#allocation5 + $0x2090] sm:$0xff]  ;;  %v1310_v57 = vld [vmem:[#allocation5 + $0x25c0] sm:$0xff]  ;;  %v1479_v28 = vld [vmem:[#allocation5 + $0x2b08] sm:$0xff] }
 0x1c5   :  { %8939 = vmatprep.subr.bf16.mxu1 %v8938_v8  ;;  %2755 = vmatprep.mubr.f32.mxu0 %v11745_v39  ;;  %v1193_v8 = vld [vmem:[#allocation5 + $0x2218] sm:$0xff]  ;;  %v8956_v10 = vpack.c.bf16 %v1144_v4, %v1120_v2  ;;  %v1334_v58 = vld [vmem:[#allocation5 + $0x2680] sm:$0xff]  ;;  %v8854_v34 = vpack.c.bf16 %v1479_v28, %v1455_v27  ;;  %v1503_v41 = vld [vmem:[#allocation5 + $0x2bc8] sm:$0xff] }
 0x1c6   :  { %2968 = vmatprep.mubr.f32.mxu1 %v11745_v39  ;;  %v1361_v2 = vld [vmem:[#allocation5 + $0x2758] sm:$0xff]  ;;  %v8844_v4 = vpack.c.bf16 %v1334_v58, %v1310_v57  ;;  %v1527_v42 = vld [vmem:[#allocation5 + $0x2c88] sm:$0xff] }
 0x1c7   :  { %8813 = vmatpush1.bf16.msra.mxu0 %v8812_v15  ;;  %v1168_v15 = vld [vmem:[#allocation5 + $0x2150] sm:$0xff]  ;;  %v8858_v48 = vpack.c.bf16 %v1527_v42, %v1503_v41  ;;  %v1551_v57 = vld [vmem:[#allocation5 + $0x2d48] sm:$0xff]  ;;  %v117_v28 = vld [vmem:[#allocation5 + $0x78] sm:$0xff] }
 0x1c8   :  { %8941 = vmatpush1.bf16.msra.mxu1 %v8940_v16  ;;  %8815 = vmatprep.subr.bf16.mxu0 %v8814_v17  ;;  %v8958_v16 = vpack.c.bf16 %v1193_v8, %v1169_v7  ;;  %v1192_v17 = vld [vmem:[#allocation5 + $0x2210] sm:$0xff]  ;;  %v1358_v7 = vld [vmem:[#allocation5 + $0x2740] sm:$0xff]  ;;  %v1575_v58 = vld [vmem:[#allocation5 + $0x2e08] sm:$0xff] }
 0x1c9   :  { %8943 = vmatprep.subr.bf16.mxu1 %v8942_v21  ;;  %v1241_v21 = vld [vmem:[#allocation5 + $0x2398] sm:$0xff]  ;;  %v8960_v24 = vpack.c.bf16 %v1192_v17, %v1168_v15  ;;  %v1382_v8 = vld [vmem:[#allocation5 + $0x2800] sm:$0xff]  ;;  %v8862_v1 = vpack.c.bf16 %v1575_v58, %v1551_v57  ;;  %v139_v27 = vld [vmem:[#allocation5 + $0x128] sm:$0xff] }
 0x1ca   :  { %v1409_v15 = vld [vmem:[#allocation5 + $0x28d8] sm:$0xff]  ;;  %v8848_v17 = vpack.c.bf16 %v1382_v8, %v1358_v7  ;;  %v1599_v7 = vld [vmem:[#allocation5 + $0x2ec8] sm:$0xff] }
 0x1cb   :  { %8817 = vmatpush1.bf16.msra.mxu0 %v8816_v29  ;;  %v1216_v29 = vld [vmem:[#allocation5 + $0x22d0] sm:$0xff]  ;;  %v1623_v8 = vld [vmem:[#allocation5 + $0x2f88] sm:$0xff]  ;;  %v165_v42 = vld [vmem:[#allocation5 + $0x1f8] sm:$0xff] }
 0x1cc   :  { %8945 = vmatpush1.bf16.msra.mxu1 %v8944_v30  ;;  %8819 = vmatprep.subr.bf16.mxu0 %v8818_v31  ;;  %v8962_v30 = vpack.c.bf16 %v1241_v21, %v1217_v20  ;;  %v1240_v31 = vld [vmem:[#allocation5 + $0x2390] sm:$0xff]  ;;  %v1406_v20 = vld [vmem:[#allocation5 + $0x28c0] sm:$0xff]  ;;  %v8866_v14 = vpack.c.bf16 %v1623_v8, %v1599_v7  ;;  %v187_v41 = vld [vmem:[#allocation5 + $0x2a8] sm:$0xff] }
 0x1cd   :  { %8947 = vmatprep.subr.bf16.mxu1 %v8946_v36  ;;  %v11783_v50 = vpop.f32.mrb[0].mxu0  ;;  %v1289_v36 = vld [vmem:[#allocation5 + $0x2518] sm:$0xff]  ;;  %v8964_v38 = vpack.c.bf16 %v1240_v31, %v1216_v29  ;;  %v1430_v21 = vld [vmem:[#allocation5 + $0x2980] sm:$0xff]  ;;  %v235_v57 = vld [vmem:[#allocation5 + $0x428] sm:$0xff] }
 0x1ce   :  { %v11785_v55 = vpop.f32.mrb[0].mxu1  ;;  %v11787_v56 = vpop.f32.mrb[1].mxu0  ;;  %v1457_v29 = vld [vmem:[#allocation5 + $0x2a58] sm:$0xff]  ;;  %v8852_v31 = vpack.c.bf16 %v1430_v21, %v1406_v20  ;;  %v259_v7 = vld [vmem:[#allocation5 + $0x4e8] sm:$0xff] }
 0x1cf   :  { %8821 = vmatpush1.bf16.msra.mxu0 %v8820_v43  ;;  %v11789_v59 = vpop.f32.mrb[1].mxu1  ;;  %v1264_v43 = vld [vmem:[#allocation5 + $0x2450] sm:$0xff]  ;;  %v11417_v58 = vld.sshfl [vmem:[#allocation2 + $0x8] sm:$0x3 pattern:$0x76325410] }
 0x1d0   :  { %8949 = vmatpush1.bf16.msra.mxu1 %v8948_v45  ;;  %8823 = vmatprep.subr.bf16.mxu0 %v8822_v46  ;;  %v8966_v45 = vpack.c.bf16 %v1289_v36, %v1265_v35  ;;  %v1288_v46 = vld [vmem:[#allocation5 + $0x2510] sm:$0xff]  ;;  %v1454_v35 = vld [vmem:[#allocation5 + $0x2a40] sm:$0xff]  ;;  %v283_v8 = vld [vmem:[#allocation5 + $0x5a8] sm:$0xff] }
 0x1d1   :  { %8951 = vmatprep.subr.bf16.mxu1 %v8950_v51  ;;  %v1337_v51 = vld [vmem:[#allocation5 + $0x2698] sm:$0xff]  ;;  %v8968_v53 = vpack.c.bf16 %v1288_v46, %v1264_v43  ;;  %v1478_v36 = vld [vmem:[#allocation5 + $0x2b00] sm:$0xff] }
 0x1d2   :  { %v1505_v43 = vld [vmem:[#allocation5 + $0x2bd8] sm:$0xff]  ;;  %v8856_v46 = vpack.c.bf16 %v1478_v36, %v1454_v35  ;;  %v114_v35 = vld [vmem:[#allocation5 + $0x60] sm:$0xff] }
 0x1d3   :  { %8825 = vmatpush1.bf16.msra.mxu0 %v8824_v60  ;;  %v1312_v60 = vld [vmem:[#allocation5 + $0x25d0] sm:$0xff]  ;;  %v138_v36 = vld [vmem:[#allocation5 + $0x120] sm:$0xff] }
 0x1d4   :  { %8953 = vmatpush1.bf16.msra.mxu1 %v8952_v61  ;;  %8827 = vmatprep.subr.bf16.mxu0 %v8826_v63  ;;  %v8970_v61 = vpack.c.bf16 %v1337_v51, %v1313_v49  ;;  %v1336_v63 = vld [vmem:[#allocation5 + $0x2690] sm:$0xff]  ;;  %v1502_v49 = vld [vmem:[#allocation5 + $0x2bc0] sm:$0xff] }
 0x1d5   :  { %8955 = vmatprep.subr.bf16.mxu1 %v8954_v3  ;;  %v1385_v3 = vld [vmem:[#allocation5 + $0x2818] sm:$0xff]  ;;  %v8972_v5 = vpack.c.bf16 %v1336_v63, %v1312_v60  ;;  %v1526_v51 = vld [vmem:[#allocation5 + $0x2c80] sm:$0xff] }
 0x1d6   :  { %v1553_v60 = vld [vmem:[#allocation5 + $0x2d58] sm:$0xff]  ;;  %v8860_v63 = vpack.c.bf16 %v1526_v51, %v1502_v49  ;;  %v186_v49 = vld [vmem:[#allocation5 + $0x2a0] sm:$0xff]  ;;  %v164_v51 = vld [vmem:[#allocation5 + $0x1f0] sm:$0xff] }
 0x1d7   :  { %8829 = vmatpush1.bf16.msra.mxu0 %v8828_v9  ;;  %v1360_v9 = vld [vmem:[#allocation5 + $0x2750] sm:$0xff] }
 0x1d8   :  { %8957 = vmatpush1.bf16.msra.mxu1 %v8956_v10  ;;  %8831 = vmatprep.subr.bf16.mxu0 %v8830_v12  ;;  %v8974_v10 = vpack.c.bf16 %v1385_v3, %v1361_v2  ;;  %v1384_v12 = vld [vmem:[#allocation5 + $0x2810] sm:$0xff]  ;;  %v1550_v2 = vld [vmem:[#allocation5 + $0x2d40] sm:$0xff] }
 0x1d9   :  { %8959 = vmatprep.subr.bf16.mxu1 %v8958_v16  ;;  %v1433_v16 = vld [vmem:[#allocation5 + $0x2998] sm:$0xff]  ;;  %v8976_v18 = vpack.c.bf16 %v1384_v12, %v1360_v9  ;;  %v1574_v3 = vld [vmem:[#allocation5 + $0x2e00] sm:$0xff] }
 0x1da   :  { %v1601_v9 = vld [vmem:[#allocation5 + $0x2ed8] sm:$0xff]  ;;  %v8864_v12 = vpack.c.bf16 %v1574_v3, %v1550_v2  ;;  %v210_v2 = vld [vmem:[#allocation5 + $0x360] sm:$0xff] }
 0x1db   :  { %8833 = vmatpush1.bf16.msra.mxu0 %v8832_v23  ;;  %v1408_v23 = vld [vmem:[#allocation5 + $0x28d0] sm:$0xff]  ;;  %v234_v3 = vld [vmem:[#allocation5 + $0x420] sm:$0xff] }
 0x1dc   :  { %8961 = vmatpush1.bf16.msra.mxu1 %v8960_v24  ;;  %8835 = vmatprep.subr.bf16.mxu0 %v8834_v22  ;;  %v8978_v24 = vpack.c.bf16 %v1433_v16, %v1409_v15  ;;  %v1432_v22 = vld [vmem:[#allocation5 + $0x2990] sm:$0xff]  ;;  %v1598_v15 = vld [vmem:[#allocation5 + $0x2ec0] sm:$0xff] }
 0x1dd   :  { %8963 = vmatprep.subr.bf16.mxu1 %v8962_v30  ;;  %v1481_v30 = vld [vmem:[#allocation5 + $0x2b18] sm:$0xff]  ;;  %v8980_v33 = vpack.c.bf16 %v1432_v22, %v1408_v23  ;;  %v1622_v16 = vld [vmem:[#allocation5 + $0x2f80] sm:$0xff]  ;;  %v1647_v23 = vld [vmem:[#allocation5 + $0x3048] sm:$0x7] }
 0x1de   :  { %v8868_v20 = vpack.c.bf16 %v1622_v16, %v1598_v15  ;;  %v115_v22 = vld [vmem:[#allocation5 + $0x68] sm:$0xff]  ;;  %v258_v15 = vld [vmem:[#allocation5 + $0x4e0] sm:$0xff] }
 0x1df   :  { %8837 = vmatpush1.bf16.msra.mxu0 %v8836_v37  ;;  %v1456_v37 = vld [vmem:[#allocation5 + $0x2a50] sm:$0xff]  ;;  %v282_v16 = vld [vmem:[#allocation5 + $0x5a0] sm:$0xff] }
 0x1e0   :  { %8965 = vmatpush1.bf16.msra.mxu1 %v8964_v38  ;;  %8839 = vmatprep.subr.bf16.mxu0 %v8838_v40  ;;  %v8982_v38 = vpack.c.bf16 %v1481_v30, %v1457_v29  ;;  %v1480_v40 = vld [vmem:[#allocation5 + $0x2b10] sm:$0xff]  ;;  %v141_v29 = vld [vmem:[#allocation5 + $0x138] sm:$0xff]  ;;  %v1646_v30 = vld [vmem:[#allocation5 + $0x3040] sm:$0x7] }
 0x1e1   :  { %8967 = vmatprep.subr.bf16.mxu1 %v8966_v45  ;;  %v1529_v45 = vld [vmem:[#allocation5 + $0x2c98] sm:$0xff]  ;;  %v8984_v47 = vpack.c.bf16 %v1480_v40, %v1456_v37  ;;  %v116_v37 = vld [vmem:[#allocation5 + $0x70] sm:$0xff]  ;;  %v163_v40 = vld [vmem:[#allocation5 + $0x1e8] sm:$0xff] }
 0x1e3   :  { %8841 = vmatpush1.bf16.msra.mxu0 %v8840_v52  ;;  %v1504_v52 = vld [vmem:[#allocation5 + $0x2bd0] sm:$0xff] }
 0x1e4   :  { %8969 = vmatpush1.bf16.msra.mxu1 %v8968_v53  ;;  %8843 = vmatprep.subr.bf16.mxu0 %v8842_v54  ;;  %v8986_v53 = vpack.c.bf16 %v1529_v45, %v1505_v43  ;;  %v1528_v54 = vld [vmem:[#allocation5 + $0x2c90] sm:$0xff]  ;;  %v189_v43 = vld [vmem:[#allocation5 + $0x2b8] sm:$0xff]  ;;  %v9000_v45 = vpack.c.bf16 %v138_v36, %v114_v35  ;;  %v355_v35 = vld [vmem:[#allocation5 + $0x7e8] sm:$0xff] }
 0x1e5   :  { %8971 = vmatprep.subr.bf16.mxu1 %v8970_v61  ;;  %v1577_v61 = vld [vmem:[#allocation5 + $0x2e18] sm:$0xff]  ;;  %v8988_v0 = vpack.c.bf16 %v1528_v54, %v1504_v52  ;;  %v9130_v52 = vpack.c.bf16 %v189_v43, %v165_v42  ;;  %v211_v54 = vld [vmem:[#allocation5 + $0x368] sm:$0xff]  ;;  %v354_v43 = vld [vmem:[#allocation5 + $0x7e0] sm:$0xff] }
 0x1e6   :  { %v379_v36 = vld [vmem:[#allocation5 + $0x8a8] sm:$0xff] }
 0x1e7   :  { %8845 = vmatpush1.bf16.msra.mxu0 %v8844_v4  ;;  %v1552_v4 = vld [vmem:[#allocation5 + $0x2d50] sm:$0xff]  ;;  %v9018_v42 = vpack.c.bf16 %v379_v36, %v355_v35 }
 0x1e8   :  { %8973 = vmatpush1.bf16.msra.mxu1 %v8972_v5  ;;  %8847 = vmatprep.subr.bf16.mxu0 %v8846_v6  ;;  %v8990_v5 = vpack.c.bf16 %v1577_v61, %v1553_v60  ;;  %v1576_v6 = vld [vmem:[#allocation5 + $0x2e10] sm:$0xff]  ;;  %v213_v60 = vld [vmem:[#allocation5 + $0x378] sm:$0xff] }
 0x1e9   :  { %8975 = vmatprep.subr.bf16.mxu1 %v8974_v10  ;;  %v1625_v10 = vld [vmem:[#allocation5 + $0x2f98] sm:$0xff]  ;;  %v8992_v13 = vpack.c.bf16 %v1576_v6, %v1552_v4  ;;  %v212_v4 = vld [vmem:[#allocation5 + $0x370] sm:$0xff] }
 0x1ea   :  { %v237_v61 = vld [vmem:[#allocation5 + $0x438] sm:$0xff]  ;;  %v236_v6 = vld [vmem:[#allocation5 + $0x430] sm:$0xff] }
 0x1eb   :  { %8849 = vmatpush1.bf16.msra.mxu0 %v8848_v17  ;;  %v8994_v17 = vpack.c.bf16 %v1625_v10, %v1601_v9  ;;  %v261_v9 = vld [vmem:[#allocation5 + $0x4f8] sm:$0xff] }
 0x1ec   :  { %8977 = vmatpush1.bf16.msra.mxu1 %v8976_v18  ;;  %8851 = vmatprep.subr.bf16.mxu0 %v8850_v19  ;;  %v1600_v18 = vld [vmem:[#allocation5 + $0x2ed0] sm:$0xff]  ;;  %v285_v10 = vld [vmem:[#allocation5 + $0x5b8] sm:$0xff] }
 0x1ed   :  { %8979 = vmatprep.subr.bf16.mxu1 %v8978_v24  ;;  %v1624_v19 = vld [vmem:[#allocation5 + $0x2f90] sm:$0xff]  ;;  %v1649_v24 = vld [vmem:[#allocation5 + $0x3058] sm:$0x7] }
 0x1ee   :  { %v8996_v21 = vpack.c.bf16 %v1624_v19, %v1600_v18  ;;  %v9138_v18 = vpack.c.bf16 %v285_v10, %v261_v9  ;;  %v284_v19 = vld [vmem:[#allocation5 + $0x5b0] sm:$0xff]  ;;  %v450_v9 = vld [vmem:[#allocation5 + $0xae0] sm:$0xff] }
 0x1ef   :  { %8853 = vmatpush1.bf16.msra.mxu0 %v8852_v31  ;;  %v1648_v31 = vld [vmem:[#allocation5 + $0x3050] sm:$0x7]  ;;  %v474_v10 = vld [vmem:[#allocation5 + $0xba0] sm:$0xff] }
 0x1f0   :  { %8981 = vmatpush1.bf16.msra.mxu1 %v8980_v33  ;;  %8855 = vmatprep.subr.bf16.mxu0 %v8854_v34  ;;  %v8998_v33 = vpack.c.bf16 %v139_v27, %v115_v22  ;;  %v9126_v34 = vpack.c.bf16 %v141_v29, %v117_v28  ;;  %v9012_v22 = vpack.c.bf16 %v282_v16, %v258_v15  ;;  %v306_v29 = vld [vmem:[#allocation5 + $0x660] sm:$0xff]  ;;  %v499_v15 = vld [vmem:[#allocation5 + $0xc68] sm:$0xff] }
 0x1f1   :  { %8983 = vmatprep.subr.bf16.mxu1 %v8982_v38  ;;  %v140_v38 = vld [vmem:[#allocation5 + $0x130] sm:$0xff]  ;;  %v523_v16 = vld [vmem:[#allocation5 + $0xd28] sm:$0xff] }
 0x1f3   :  { %8857 = vmatpush1.bf16.msra.mxu0 %v8856_v46  ;;  %v9128_v46 = vpack.c.bf16 %v140_v38, %v116_v37  ;;  %v357_v37 = vld [vmem:[#allocation5 + $0x7f8] sm:$0xff] }
 0x1f4   :  { %8985 = vmatpush1.bf16.msra.mxu1 %v8984_v47  ;;  %8859 = vmatprep.subr.bf16.mxu0 %v8858_v48  ;;  %v9002_v47 = vpack.c.bf16 %v187_v41, %v163_v40  ;;  %v162_v48 = vld [vmem:[#allocation5 + $0x1e0] sm:$0xff]  ;;  %v381_v38 = vld [vmem:[#allocation5 + $0x8b8] sm:$0xff] }
 0x1f5   :  { %8987 = vmatprep.subr.bf16.mxu1 %v8986_v53  ;;  %v188_v53 = vld [vmem:[#allocation5 + $0x2b0] sm:$0xff] }
 0x1f7   :  { %8861 = vmatpush1.bf16.msra.mxu0 %v8860_v63  ;;  %v9004_v63 = vpack.c.bf16 %v186_v49, %v162_v48  ;;  %v380_v48 = vld [vmem:[#allocation5 + $0x8b0] sm:$0xff]  ;;  %v403_v49 = vld [vmem:[#allocation5 + $0x968] sm:$0xff] }
 0x1f8   :  { %8989 = vmatpush1.bf16.msra.mxu1 %v8988_v0  ;;  %8863 = vmatprep.subr.bf16.mxu0 %v8862_v1  ;;  %v9132_v0 = vpack.c.bf16 %v188_v53, %v164_v51  ;;  %v9006_v1 = vpack.c.bf16 %v235_v57, %v211_v54  ;;  %v427_v51 = vld [vmem:[#allocation5 + $0xa28] sm:$0xff]  ;;  %v429_v53 = vld [vmem:[#allocation5 + $0xa38] sm:$0xff] }
 0x1f9   :  { %8991 = vmatprep.subr.bf16.mxu1 %v8990_v5  ;;  %v9134_v5 = vpack.c.bf16 %v237_v61, %v213_v60  ;;  %v402_v60 = vld [vmem:[#allocation5 + $0x960] sm:$0xff] }
 0x1fa   :  { %v426_v61 = vld [vmem:[#allocation5 + $0xa20] sm:$0xff] }
 0x1fb   :  { %8865 = vmatpush1.bf16.msra.mxu0 %v8864_v12  ;;  %v9008_v12 = vpack.c.bf16 %v234_v3, %v210_v2  ;;  %v451_v2 = vld [vmem:[#allocation5 + $0xae8] sm:$0xff] }
 0x1fc   :  { %8993 = vmatpush1.bf16.msra.mxu1 %v8992_v13  ;;  %8867 = vmatprep.subr.bf16.mxu0 %v8866_v14  ;;  %v9136_v13 = vpack.c.bf16 %v236_v6, %v212_v4  ;;  %v9010_v14 = vpack.c.bf16 %v283_v8, %v259_v7  ;;  %v475_v3 = vld [vmem:[#allocation5 + $0xba8] sm:$0xff]  ;;  %v453_v4 = vld [vmem:[#allocation5 + $0xaf8] sm:$0xff]  ;;  %v9024_v6 = vpack.c.bf16 %v426_v61, %v402_v60 }
 0x1fd   :  { %8995 = vmatprep.subr.bf16.mxu1 %v8994_v17  ;;  %v260_v17 = vld [vmem:[#allocation5 + $0x4f0] sm:$0xff]  ;;  %v9026_v8 = vpack.c.bf16 %v475_v3, %v451_v2  ;;  %v643_v60 = vld [vmem:[#allocation5 + $0x10e8] sm:$0xff] }
 0x1fe   :  { %v9140_v27 = vpack.c.bf16 %v284_v19, %v260_v17  ;;  %v501_v17 = vld [vmem:[#allocation5 + $0xc78] sm:$0xff]  ;;  %v9028_v19 = vpack.c.bf16 %v474_v10, %v450_v9  ;;  %v667_v61 = vld [vmem:[#allocation5 + $0x11a8] sm:$0xff] }
 0x1ff   :  { %8869 = vmatpush1.bf16.msra.mxu0 %v8868_v20  ;;  %v307_v20 = vld [vmem:[#allocation5 + $0x668] sm:$0xff]  ;;  %v9042_v3 = vpack.c.bf16 %v667_v61, %v643_v60 }
 0x200   :  { %8997 = vmatpush1.bf16.msra.mxu1 %v8996_v21  ;;  %8206 = vmatprep.subr.msk.mxu0 %vm1695_vm0, %v1647_v23  ;;  %v331_v21 = vld [vmem:[#allocation5 + $0x728] sm:$0xff]  ;;  %v309_v23 = vld [vmem:[#allocation5 + $0x678] sm:$0xff] }
 0x201   :  { %8209 = vmatprep.subr.msk.mxu1 %vm1695_vm0, %v1649_v24  ;;  %v333_v24 = vld [vmem:[#allocation5 + $0x738] sm:$0xff]  ;;  %v9014_v28 = vpack.c.bf16 %v331_v21, %v307_v20  ;;  %v9030_v21 = vpack.c.bf16 %v523_v16, %v499_v15  ;;  %v691_v9 = vld [vmem:[#allocation5 + $0x1268] sm:$0xff] }
 0x202   :  { %2756 = vmatmul.mubr.f32.vlgmr.msra.gmra.mrb[4].mxu0 %v11741_v26  ;;  %v715_v10 = vld [vmem:[#allocation5 + $0x1328] sm:$0xff] }
 0x203   :  { %2969 = vmatmul.mubr.f32.vlgmr.msra.gmra.mrb[4].mxu1 %v11741_v26  ;;  %8207 = vmatpush1.msk.msra.mxu0 %vm1695_vm0, %v1646_v30  ;;  %v330_v30 = vld [vmem:[#allocation5 + $0x720] sm:$0xff]  ;;  %v9046_v16 = vpack.c.bf16 %v715_v10, %v691_v9 }
 0x204   :  { %8210 = vmatpush1.msk.msra.mxu1 %vm1695_vm0, %v1648_v31  ;;  %2826 = vmatprep.mubr.f32.mxu0 %v11610_v44  ;;  %v308_v31 = vld [vmem:[#allocation5 + $0x670] sm:$0xff]  ;;  %v9016_v40 = vpack.c.bf16 %v330_v30, %v306_v29  ;;  %v547_v29 = vld [vmem:[#allocation5 + $0xde8] sm:$0xff] }
 0x205   :  { %3039 = vmatprep.mubr.f32.mxu1 %v11610_v44  ;;  %8999 = vmatprep.subr.bf16.mxu0 %v8998_v33  ;;  %v9142_v33 = vpack.c.bf16 %v333_v24, %v309_v23  ;;  %v498_v23 = vld [vmem:[#allocation5 + $0xc60] sm:$0xff]  ;;  %v571_v30 = vld [vmem:[#allocation5 + $0xea8] sm:$0xff] }
 0x206   :  { %9127 = vmatprep.subr.bf16.mxu1 %v9126_v34  ;;  %v332_v34 = vld [vmem:[#allocation5 + $0x730] sm:$0xff]  ;;  %v522_v24 = vld [vmem:[#allocation5 + $0xd20] sm:$0xff]  ;;  %v9034_v36 = vpack.c.bf16 %v571_v30, %v547_v29 }
 0x207   :  { %v9144_v41 = vpack.c.bf16 %v332_v34, %v308_v31  ;;  %v549_v31 = vld [vmem:[#allocation5 + $0xdf8] sm:$0xff]  ;;  %v9032_v34 = vpack.c.bf16 %v522_v24, %v498_v23  ;;  %v739_v23 = vld [vmem:[#allocation5 + $0x13e8] sm:$0xff] }
 0x208   :  { %v763_v24 = vld [vmem:[#allocation5 + $0x14a8] sm:$0xff] }
 0x209   :  { %v9050_v30 = vpack.c.bf16 %v763_v24, %v739_v23 }
 0x20a   :  { %8208 = vmatmul.mubr.msk.f32.vlgmr.msra.gmra.mrb[4].mxu0 %vm1692_vm1, %v11417_v58 }
 0x20b   :  { %8211 = vmatmul.mubr.msk.f32.vlgmr.msra.gmra.mrb[4].mxu1 %vm1692_vm1, %v11417_v58  ;;  %9001 = vmatpush1.bf16.msra.mxu0 %v9000_v45  ;;  %v378_v45 = vld [vmem:[#allocation5 + $0x8a0] sm:$0xff]  ;;  %v9022_v58 = vpack.c.bf16 %v427_v51, %v403_v49 }
 0x20c   :  { %9129 = vmatpush1.bf16.msra.mxu1 %v9128_v46  ;;  %9003 = vmatprep.subr.bf16.mxu0 %v9002_v47  ;;  %v356_v46 = vld [vmem:[#allocation5 + $0x7f0] sm:$0xff]  ;;  %v9146_v47 = vpack.c.bf16 %v381_v38, %v357_v37  ;;  %v9020_v54 = vpack.c.bf16 %v378_v45, %v354_v43  ;;  %v546_v37 = vld [vmem:[#allocation5 + $0xde0] sm:$0xff]  ;;  %v595_v43 = vld [vmem:[#allocation5 + $0xf68] sm:$0xff] }
 0x20d   :  { %9131 = vmatprep.subr.bf16.mxu1 %v9130_v52  ;;  %3110 = vmatprep.mubr.f32.mxu0 %v11734_v32  ;;  %v405_v52 = vld [vmem:[#allocation5 + $0x978] sm:$0xff]  ;;  %v9148_v57 = vpack.c.bf16 %v380_v48, %v356_v46  ;;  %v570_v38 = vld [vmem:[#allocation5 + $0xea0] sm:$0xff]  ;;  %v619_v45 = vld [vmem:[#allocation5 + $0x1028] sm:$0xff] }
 0x20e   :  { %3323 = vmatprep.mubr.f32.mxu1 %v11734_v32  ;;  %v597_v46 = vld [vmem:[#allocation5 + $0xf78] sm:$0xff]  ;;  %v9036_v48 = vpack.c.bf16 %v570_v38, %v546_v37  ;;  %v9038_v51 = vpack.c.bf16 %v619_v45, %v595_v43  ;;  %v787_v37 = vld [vmem:[#allocation5 + $0x1568] sm:$0xff] }
 0x20f   :  { %9005 = vmatpush1.bf16.msra.mxu0 %v9004_v63  ;;  %v404_v63 = vld [vmem:[#allocation5 + $0x970] sm:$0xff]  ;;  %v811_v38 = vld [vmem:[#allocation5 + $0x1628] sm:$0xff] }
 0x210   :  { %9133 = vmatpush1.bf16.msra.mxu1 %v9132_v0  ;;  %9007 = vmatprep.subr.bf16.mxu0 %v9006_v1  ;;  %v9150_v0 = vpack.c.bf16 %v429_v53, %v405_v52  ;;  %v428_v1 = vld [vmem:[#allocation5 + $0xa30] sm:$0xff]  ;;  %v594_v52 = vld [vmem:[#allocation5 + $0xf60] sm:$0xff]  ;;  %v9054_v45 = vpack.c.bf16 %v811_v38, %v787_v37 }
 0x211   :  { %9135 = vmatprep.subr.bf16.mxu1 %v9134_v5  ;;  %v477_v5 = vld [vmem:[#allocation5 + $0xbb8] sm:$0xff]  ;;  %v9152_v7 = vpack.c.bf16 %v428_v1, %v404_v63  ;;  %v618_v53 = vld [vmem:[#allocation5 + $0x1020] sm:$0xff] }
 0x212   :  { %v645_v63 = vld [vmem:[#allocation5 + $0x10f8] sm:$0xff]  ;;  %v9040_v1 = vpack.c.bf16 %v618_v53, %v594_v52  ;;  %v835_v52 = vld [vmem:[#allocation5 + $0x16e8] sm:$0xff] }
 0x213   :  { %9009 = vmatpush1.bf16.msra.mxu0 %v9008_v12  ;;  %v452_v12 = vld [vmem:[#allocation5 + $0xaf0] sm:$0xff]  ;;  %v859_v53 = vld [vmem:[#allocation5 + $0x17a8] sm:$0xff] }
 0x214   :  { %9137 = vmatpush1.bf16.msra.mxu1 %v9136_v13  ;;  %9011 = vmatprep.subr.bf16.mxu0 %v9010_v14  ;;  %v9154_v13 = vpack.c.bf16 %v477_v5, %v453_v4  ;;  %v476_v14 = vld [vmem:[#allocation5 + $0xbb0] sm:$0xff]  ;;  %v642_v4 = vld [vmem:[#allocation5 + $0x10e0] sm:$0xff]  ;;  %v9058_v61 = vpack.c.bf16 %v859_v53, %v835_v52 }
 0x215   :  { %9139 = vmatprep.subr.bf16.mxu1 %v9138_v18  ;;  %v525_v18 = vld [vmem:[#allocation5 + $0xd38] sm:$0xff]  ;;  %v9156_v20 = vpack.c.bf16 %v476_v14, %v452_v12  ;;  %v666_v5 = vld [vmem:[#allocation5 + $0x11a0] sm:$0xff] }
 0x216   :  { %v693_v12 = vld [vmem:[#allocation5 + $0x1278] sm:$0xff]  ;;  %v9044_v14 = vpack.c.bf16 %v666_v5, %v642_v4  ;;  %v883_v4 = vld [vmem:[#allocation5 + $0x1868] sm:$0xff] }
 0x217   :  { %9013 = vmatpush1.bf16.msra.mxu0 %v9012_v22  ;;  %v500_v22 = vld [vmem:[#allocation5 + $0xc70] sm:$0xff]  ;;  %v907_v5 = vld [vmem:[#allocation5 + $0x1928] sm:$0xff] }
 0x218   :  { %9141 = vmatpush1.bf16.msra.mxu1 %v9140_v27  ;;  %9015 = vmatprep.subr.bf16.mxu0 %v9014_v28  ;;  %v9158_v27 = vpack.c.bf16 %v525_v18, %v501_v17  ;;  %v524_v28 = vld [vmem:[#allocation5 + $0xd30] sm:$0xff]  ;;  %v690_v17 = vld [vmem:[#allocation5 + $0x1260] sm:$0xff]  ;;  %v9062_v10 = vpack.c.bf16 %v907_v5, %v883_v4 }
 0x219   :  { %9143 = vmatprep.subr.bf16.mxu1 %v9142_v33  ;;  %v573_v33 = vld [vmem:[#allocation5 + $0xeb8] sm:$0xff]  ;;  %v9160_v35 = vpack.c.bf16 %v524_v28, %v500_v22  ;;  %v714_v18 = vld [vmem:[#allocation5 + $0x1320] sm:$0xff] }
 0x21a   :  { %v741_v22 = vld [vmem:[#allocation5 + $0x13f8] sm:$0xff]  ;;  %v9048_v28 = vpack.c.bf16 %v714_v18, %v690_v17  ;;  %v931_v17 = vld [vmem:[#allocation5 + $0x19e8] sm:$0xff] }
 0x21b   :  { %9017 = vmatpush1.bf16.msra.mxu0 %v9016_v40  ;;  %v548_v40 = vld [vmem:[#allocation5 + $0xdf0] sm:$0xff]  ;;  %v955_v18 = vld [vmem:[#allocation5 + $0x1aa8] sm:$0xff] }
 0x21c   :  { %9145 = vmatpush1.bf16.msra.mxu1 %v9144_v41  ;;  %9019 = vmatprep.subr.bf16.mxu0 %v9018_v42  ;;  %v9162_v41 = vpack.c.bf16 %v573_v33, %v549_v31  ;;  %v572_v42 = vld [vmem:[#allocation5 + $0xeb0] sm:$0xff]  ;;  %v738_v31 = vld [vmem:[#allocation5 + $0x13e0] sm:$0xff]  ;;  %v9066_v24 = vpack.c.bf16 %v955_v18, %v931_v17  ;;  %v1125_v17 = vld [vmem:[#allocation5 + $0x1ff8] sm:$0xff] }
 0x21d   :  { %9147 = vmatprep.subr.bf16.mxu1 %v9146_v47  ;;  %v621_v47 = vld [vmem:[#allocation5 + $0x1038] sm:$0xff]  ;;  %v9164_v49 = vpack.c.bf16 %v572_v42, %v548_v40  ;;  %v762_v33 = vld [vmem:[#allocation5 + $0x14a0] sm:$0xff] }
 0x21e   :  { %v789_v40 = vld [vmem:[#allocation5 + $0x1578] sm:$0xff]  ;;  %v9052_v42 = vpack.c.bf16 %v762_v33, %v738_v31  ;;  %v979_v31 = vld [vmem:[#allocation5 + $0x1b68] sm:$0xff] }
 0x21f   :  { %9021 = vmatpush1.bf16.msra.mxu0 %v9020_v54  ;;  %v596_v54 = vld [vmem:[#allocation5 + $0xf70] sm:$0xff]  ;;  %v1003_v33 = vld [vmem:[#allocation5 + $0x1c28] sm:$0xff]  ;;  %v1149_v18 = vld [vmem:[#allocation5 + $0x20b8] sm:$0xff] }
 0x220   :  { %9149 = vmatpush1.bf16.msra.mxu1 %v9148_v57  ;;  %9023 = vmatprep.subr.bf16.mxu0 %v9022_v58  ;;  %v9166_v57 = vpack.c.bf16 %v621_v47, %v597_v46  ;;  %v620_v58 = vld [vmem:[#allocation5 + $0x1030] sm:$0xff]  ;;  %v786_v46 = vld [vmem:[#allocation5 + $0x1560] sm:$0xff]  ;;  %v9070_v38 = vpack.c.bf16 %v1003_v33, %v979_v31  ;;  %v1195_v31 = vld [vmem:[#allocation5 + $0x2228] sm:$0xff] }
 0x221   :  { %9151 = vmatprep.subr.bf16.mxu1 %v9150_v0  ;;  %v669_v0 = vld [vmem:[#allocation5 + $0x11b8] sm:$0xff]  ;;  %v9168_v2 = vpack.c.bf16 %v620_v58, %v596_v54  ;;  %v810_v47 = vld [vmem:[#allocation5 + $0x1620] sm:$0xff] }
 0x222   :  { %v837_v54 = vld [vmem:[#allocation5 + $0x16f8] sm:$0xff]  ;;  %v9056_v58 = vpack.c.bf16 %v810_v47, %v786_v46  ;;  %v1027_v46 = vld [vmem:[#allocation5 + $0x1ce8] sm:$0xff] }
 0x223   :  { %9025 = vmatpush1.bf16.msra.mxu0 %v9024_v6  ;;  %v644_v6 = vld [vmem:[#allocation5 + $0x10f0] sm:$0xff]  ;;  %v1051_v47 = vld [vmem:[#allocation5 + $0x1da8] sm:$0xff]  ;;  %v1173_v33 = vld [vmem:[#allocation5 + $0x2178] sm:$0xff] }
 0x224   :  { %9153 = vmatpush1.bf16.msra.mxu1 %v9152_v7  ;;  %9027 = vmatprep.subr.bf16.mxu0 %v9026_v8  ;;  %v9170_v7 = vpack.c.bf16 %v669_v0, %v645_v63  ;;  %v668_v8 = vld [vmem:[#allocation5 + $0x11b0] sm:$0xff]  ;;  %v834_v63 = vld [vmem:[#allocation5 + $0x16e0] sm:$0xff]  ;;  %v9074_v53 = vpack.c.bf16 %v1051_v47, %v1027_v46  ;;  %v1243_v46 = vld [vmem:[#allocation5 + $0x23a8] sm:$0xff] }
 0x225   :  { %9155 = vmatprep.subr.bf16.mxu1 %v9154_v13  ;;  %v717_v13 = vld [vmem:[#allocation5 + $0x1338] sm:$0xff]  ;;  %v9172_v15 = vpack.c.bf16 %v668_v8, %v644_v6  ;;  %v858_v0 = vld [vmem:[#allocation5 + $0x17a0] sm:$0xff] }
 0x226   :  { %v885_v6 = vld [vmem:[#allocation5 + $0x1878] sm:$0xff]  ;;  %v9060_v8 = vpack.c.bf16 %v858_v0, %v834_v63  ;;  %v1075_v63 = vld [vmem:[#allocation5 + $0x1e68] sm:$0xff] }
 0x227   :  { %9029 = vmatpush1.bf16.msra.mxu0 %v9028_v19  ;;  %v692_v19 = vld [vmem:[#allocation5 + $0x1270] sm:$0xff]  ;;  %v1099_v0 = vld [vmem:[#allocation5 + $0x1f28] sm:$0xff]  ;;  %v1221_v47 = vld [vmem:[#allocation5 + $0x22f8] sm:$0xff] }
 0x228   :  { %9157 = vmatpush1.bf16.msra.mxu1 %v9156_v20  ;;  %9031 = vmatprep.subr.bf16.mxu0 %v9030_v21  ;;  %v9174_v20 = vpack.c.bf16 %v717_v13, %v693_v12  ;;  %v716_v21 = vld [vmem:[#allocation5 + $0x1330] sm:$0xff]  ;;  %v882_v12 = vld [vmem:[#allocation5 + $0x1860] sm:$0xff]  ;;  %v9078_v5 = vpack.c.bf16 %v1099_v0, %v1075_v63  ;;  %v1291_v63 = vld [vmem:[#allocation5 + $0x2528] sm:$0xff] }
 0x229   :  { %9159 = vmatprep.subr.bf16.mxu1 %v9158_v27  ;;  %v765_v27 = vld [vmem:[#allocation5 + $0x14b8] sm:$0xff]  ;;  %v9176_v29 = vpack.c.bf16 %v716_v21, %v692_v19  ;;  %v906_v13 = vld [vmem:[#allocation5 + $0x1920] sm:$0xff] }
 0x22a   :  { %v933_v19 = vld [vmem:[#allocation5 + $0x19f8] sm:$0xff]  ;;  %v9064_v21 = vpack.c.bf16 %v906_v13, %v882_v12  ;;  %v1100_v12 = vld [vmem:[#allocation5 + $0x1f30] sm:$0xff]  ;;  %v1123_v13 = vld [vmem:[#allocation5 + $0x1fe8] sm:$0xff] }
 0x22b   :  { %9033 = vmatpush1.bf16.msra.mxu0 %v9032_v34  ;;  %v740_v34 = vld [vmem:[#allocation5 + $0x13f0] sm:$0xff]  ;;  %v1269_v0 = vld [vmem:[#allocation5 + $0x2478] sm:$0xff] }
 0x22c   :  { %9161 = vmatpush1.bf16.msra.mxu1 %v9160_v35  ;;  %9035 = vmatprep.subr.bf16.mxu0 %v9034_v36  ;;  %v9178_v35 = vpack.c.bf16 %v765_v27, %v741_v22  ;;  %v764_v36 = vld [vmem:[#allocation5 + $0x14b0] sm:$0xff]  ;;  %v930_v22 = vld [vmem:[#allocation5 + $0x19e0] sm:$0xff] }
 0x22d   :  { %9163 = vmatprep.subr.bf16.mxu1 %v9162_v41  ;;  %v813_v41 = vld [vmem:[#allocation5 + $0x1638] sm:$0xff]  ;;  %v9180_v43 = vpack.c.bf16 %v764_v36, %v740_v34  ;;  %v954_v27 = vld [vmem:[#allocation5 + $0x1aa0] sm:$0xff] }
 0x22e   :  { %v981_v34 = vld [vmem:[#allocation5 + $0x1b78] sm:$0xff]  ;;  %v9068_v36 = vpack.c.bf16 %v954_v27, %v930_v22  ;;  %v1146_v22 = vld [vmem:[#allocation5 + $0x20a0] sm:$0xff]  ;;  %v1124_v27 = vld [vmem:[#allocation5 + $0x1ff0] sm:$0xff] }
 0x22f   :  { %9037 = vmatpush1.bf16.msra.mxu0 %v9036_v48  ;;  %v788_v48 = vld [vmem:[#allocation5 + $0x1570] sm:$0xff] }
 0x230   :  { %9165 = vmatpush1.bf16.msra.mxu1 %v9164_v49  ;;  %9039 = vmatprep.subr.bf16.mxu0 %v9038_v51  ;;  %v9182_v49 = vpack.c.bf16 %v813_v41, %v789_v40  ;;  %v812_v51 = vld [vmem:[#allocation5 + $0x1630] sm:$0xff]  ;;  %v978_v40 = vld [vmem:[#allocation5 + $0x1b60] sm:$0xff] }
 0x231   :  { %9167 = vmatprep.subr.bf16.mxu1 %v9166_v57  ;;  %v861_v57 = vld [vmem:[#allocation5 + $0x17b8] sm:$0xff]  ;;  %v9184_v60 = vpack.c.bf16 %v812_v51, %v788_v48  ;;  %v1002_v41 = vld [vmem:[#allocation5 + $0x1c20] sm:$0xff] }
 0x232   :  { %v1029_v48 = vld [vmem:[#allocation5 + $0x1cf8] sm:$0xff]  ;;  %v9072_v51 = vpack.c.bf16 %v1002_v41, %v978_v40  ;;  %v1194_v40 = vld [vmem:[#allocation5 + $0x2220] sm:$0xff]  ;;  %v1172_v41 = vld [vmem:[#allocation5 + $0x2170] sm:$0xff] }
 0x233   :  { %9041 = vmatpush1.bf16.msra.mxu0 %v9040_v1  ;;  %v836_v1 = vld [vmem:[#allocation5 + $0x16f0] sm:$0xff] }
 0x234   :  { %9169 = vmatpush1.bf16.msra.mxu1 %v9168_v2  ;;  %9043 = vmatprep.subr.bf16.mxu0 %v9042_v3  ;;  %v9186_v2 = vpack.c.bf16 %v861_v57, %v837_v54  ;;  %v860_v3 = vld [vmem:[#allocation5 + $0x17b0] sm:$0xff]  ;;  %v1026_v54 = vld [vmem:[#allocation5 + $0x1ce0] sm:$0xff] }
 0x235   :  { %9171 = vmatprep.subr.bf16.mxu1 %v9170_v7  ;;  %v909_v7 = vld [vmem:[#allocation5 + $0x1938] sm:$0xff]  ;;  %v9188_v9 = vpack.c.bf16 %v860_v3, %v836_v1  ;;  %v1050_v57 = vld [vmem:[#allocation5 + $0x1da0] sm:$0xff] }
 0x236   :  { %v1077_v1 = vld [vmem:[#allocation5 + $0x1e78] sm:$0xff]  ;;  %v9076_v3 = vpack.c.bf16 %v1050_v57, %v1026_v54  ;;  %v1242_v54 = vld [vmem:[#allocation5 + $0x23a0] sm:$0xff]  ;;  %v1220_v57 = vld [vmem:[#allocation5 + $0x22f0] sm:$0xff] }
 0x237   :  { %9045 = vmatpush1.bf16.msra.mxu0 %v9044_v14  ;;  %v884_v14 = vld [vmem:[#allocation5 + $0x1870] sm:$0xff] }
 0x238   :  { %9173 = vmatpush1.bf16.msra.mxu1 %v9172_v15  ;;  %9047 = vmatprep.subr.bf16.mxu0 %v9046_v16  ;;  %v9190_v15 = vpack.c.bf16 %v909_v7, %v885_v6  ;;  %v908_v16 = vld [vmem:[#allocation5 + $0x1930] sm:$0xff]  ;;  %v1074_v6 = vld [vmem:[#allocation5 + $0x1e60] sm:$0xff] }
 0x239   :  { %9175 = vmatprep.subr.bf16.mxu1 %v9174_v20  ;;  %v957_v20 = vld [vmem:[#allocation5 + $0x1ab8] sm:$0xff]  ;;  %v9192_v23 = vpack.c.bf16 %v908_v16, %v884_v14  ;;  %v1098_v7 = vld [vmem:[#allocation5 + $0x1f20] sm:$0xff]  ;;  %v1147_v14 = vld [vmem:[#allocation5 + $0x20a8] sm:$0xff] }
 0x23b   :  { %9049 = vmatpush1.bf16.msra.mxu0 %v9048_v28  ;;  %v932_v28 = vld [vmem:[#allocation5 + $0x19f0] sm:$0xff] }
 0x23c   :  { %9177 = vmatpush1.bf16.msra.mxu1 %v9176_v29  ;;  %9051 = vmatprep.subr.bf16.mxu0 %v9050_v30  ;;  %v9194_v29 = vpack.c.bf16 %v957_v20, %v933_v19  ;;  %v956_v30 = vld [vmem:[#allocation5 + $0x1ab0] sm:$0xff]  ;;  %v9080_v20 = vpack.c.bf16 %v1098_v7, %v1074_v6  ;;  %v1290_v6 = vld [vmem:[#allocation5 + $0x2520] sm:$0xff] }
 0x23d   :  { %9179 = vmatprep.subr.bf16.mxu1 %v9178_v35  ;;  %v1005_v35 = vld [vmem:[#allocation5 + $0x1c38] sm:$0xff]  ;;  %v9196_v37 = vpack.c.bf16 %v956_v30, %v932_v28  ;;  %v9210_v28 = vpack.c.bf16 %v1149_v18, %v1125_v17  ;;  %v1171_v30 = vld [vmem:[#allocation5 + $0x2168] sm:$0xff]  ;;  %v1268_v7 = vld [vmem:[#allocation5 + $0x2470] sm:$0xff] }
 0x23e   :  { %v1341_v17 = vld [vmem:[#allocation5 + $0x26b8] sm:$0xff] }
 0x23f   :  { %9053 = vmatpush1.bf16.msra.mxu0 %v9052_v42  ;;  %v980_v42 = vld [vmem:[#allocation5 + $0x1b70] sm:$0xff] }
 0x240   :  { %9181 = vmatpush1.bf16.msra.mxu1 %v9180_v43  ;;  %9055 = vmatprep.subr.bf16.mxu0 %v9054_v45  ;;  %v9198_v43 = vpack.c.bf16 %v1005_v35, %v981_v34  ;;  %v1004_v45 = vld [vmem:[#allocation5 + $0x1c30] sm:$0xff]  ;;  %v1197_v34 = vld [vmem:[#allocation5 + $0x2238] sm:$0xff] }
 0x241   :  { %9183 = vmatprep.subr.bf16.mxu1 %v9182_v49  ;;  %v1053_v49 = vld [vmem:[#allocation5 + $0x1db8] sm:$0xff]  ;;  %v9200_v52 = vpack.c.bf16 %v1004_v45, %v980_v42  ;;  %v9214_v42 = vpack.c.bf16 %v1197_v34, %v1173_v33  ;;  %v1219_v45 = vld [vmem:[#allocation5 + $0x22e8] sm:$0xff] }
 0x242   :  { %v1389_v33 = vld [vmem:[#allocation5 + $0x2838] sm:$0xff] }
 0x243   :  { %9057 = vmatpush1.bf16.msra.mxu0 %v9056_v58  ;;  %v1028_v58 = vld [vmem:[#allocation5 + $0x1cf0] sm:$0xff] }
 0x244   :  { %9185 = vmatpush1.bf16.msra.mxu1 %v9184_v60  ;;  %9059 = vmatprep.subr.bf16.mxu0 %v9058_v61  ;;  %v9202_v60 = vpack.c.bf16 %v1053_v49, %v1029_v48  ;;  %v1052_v61 = vld [vmem:[#allocation5 + $0x1db0] sm:$0xff]  ;;  %v1245_v48 = vld [vmem:[#allocation5 + $0x23b8] sm:$0xff] }
 0x245   :  { %9187 = vmatprep.subr.bf16.mxu1 %v9186_v2  ;;  %v1101_v2 = vld [vmem:[#allocation5 + $0x1f38] sm:$0xff]  ;;  %v9204_v4 = vpack.c.bf16 %v1052_v61, %v1028_v58  ;;  %v9218_v58 = vpack.c.bf16 %v1245_v48, %v1221_v47  ;;  %v1267_v61 = vld [vmem:[#allocation5 + $0x2468] sm:$0xff] }
 0x246   :  { %v1437_v47 = vld [vmem:[#allocation5 + $0x29b8] sm:$0xff] }
 0x247   :  { %9061 = vmatpush1.bf16.msra.mxu0 %v9060_v8  ;;  %v1076_v8 = vld [vmem:[#allocation5 + $0x1e70] sm:$0xff] }
 0x248   :  { %9189 = vmatpush1.bf16.msra.mxu1 %v9188_v9  ;;  %9063 = vmatprep.subr.bf16.mxu0 %v9062_v10  ;;  %v9206_v10 = vpack.c.bf16 %v1101_v2, %v1077_v1  ;;  %v1293_v1 = vld [vmem:[#allocation5 + $0x2538] sm:$0xff] }
 0x249   :  { %9191 = vmatprep.subr.bf16.mxu1 %v9190_v15 }
 0x24a   :  { %3111 = vmatmul.mubr.f32.vlgmr.msra.gmra.mrb[6].mxu0 %v11730_v25 }
 0x24b   :  { %9065 = vmatpush1.bf16.msra.mxu0 %v9064_v21  ;;  %3324 = vmatmul.mubr.f32.vlgmr.msra.gmra.mrb[6].mxu1 %v11730_v25  ;;  %v9208_v21 = vpack.c.bf16 %v1100_v12, %v1076_v8  ;;  %v9222_v8 = vpack.c.bf16 %v1293_v1, %v1269_v0  ;;  %v1315_v12 = vld [vmem:[#allocation5 + $0x25e8] sm:$0xff]  ;;  %v1485_v0 = vld [vmem:[#allocation5 + $0x2b38] sm:$0xff] }
 0x24c   :  { %9193 = vmatpush1.bf16.msra.mxu1 %v9192_v23  ;;  %9067 = vmatprep.subr.bf16.mxu0 %v9066_v24  ;;  %v9082_v23 = vpack.c.bf16 %v1147_v14, %v1123_v13  ;;  %v1122_v24 = vld [vmem:[#allocation5 + $0x1fe0] sm:$0xff]  ;;  %v1339_v13 = vld [vmem:[#allocation5 + $0x26a8] sm:$0xff]  ;;  %v1317_v14 = vld [vmem:[#allocation5 + $0x25f8] sm:$0xff] }
 0x24d   :  { %9195 = vmatprep.subr.bf16.mxu1 %v9194_v29  ;;  %3181 = vmatprep.mubr.f32.mxu0 %v11745_v39  ;;  %v1148_v29 = vld [vmem:[#allocation5 + $0x20b0] sm:$0xff]  ;;  %v9084_v35 = vpack.c.bf16 %v1146_v22, %v1122_v24  ;;  %v1338_v24 = vld [vmem:[#allocation5 + $0x26a0] sm:$0xff] }
 0x24e   :  { %3394 = vmatprep.mubr.f32.mxu1 %v11745_v39  ;;  %v1316_v22 = vld [vmem:[#allocation5 + $0x25f0] sm:$0xff] }
 0x24f   :  { %9069 = vmatpush1.bf16.msra.mxu0 %v9068_v36  ;;  %v9212_v36 = vpack.c.bf16 %v1148_v29, %v1124_v27  ;;  %v9226_v27 = vpack.c.bf16 %v1341_v17, %v1317_v14  ;;  %v1363_v29 = vld [vmem:[#allocation5 + $0x2768] sm:$0xff]  ;;  %v1533_v14 = vld [vmem:[#allocation5 + $0x2cb8] sm:$0xff] }
 0x250   :  { %9197 = vmatpush1.bf16.msra.mxu1 %v9196_v37  ;;  %9071 = vmatprep.subr.bf16.mxu0 %v9070_v38  ;;  %v9086_v37 = vpack.c.bf16 %v1195_v31, %v1171_v30  ;;  %v1170_v38 = vld [vmem:[#allocation5 + $0x2160] sm:$0xff]  ;;  %v1387_v30 = vld [vmem:[#allocation5 + $0x2828] sm:$0xff]  ;;  %v1365_v31 = vld [vmem:[#allocation5 + $0x2778] sm:$0xff] }
 0x251   :  { %9199 = vmatprep.subr.bf16.mxu1 %v9198_v43  ;;  %v1196_v43 = vld [vmem:[#allocation5 + $0x2230] sm:$0xff]  ;;  %v9088_v49 = vpack.c.bf16 %v1194_v40, %v1170_v38  ;;  %v1386_v38 = vld [vmem:[#allocation5 + $0x2820] sm:$0xff] }
 0x252   :  { %v1364_v40 = vld [vmem:[#allocation5 + $0x2770] sm:$0xff] }
 0x253   :  { %9073 = vmatpush1.bf16.msra.mxu0 %v9072_v51  ;;  %v9216_v51 = vpack.c.bf16 %v1196_v43, %v1172_v41  ;;  %v9230_v41 = vpack.c.bf16 %v1389_v33, %v1365_v31  ;;  %v1411_v43 = vld [vmem:[#allocation5 + $0x28e8] sm:$0xff]  ;;  %v1581_v31 = vld [vmem:[#allocation5 + $0x2e38] sm:$0xff] }
 0x254   :  { %9201 = vmatpush1.bf16.msra.mxu1 %v9200_v52  ;;  %9075 = vmatprep.subr.bf16.mxu0 %v9074_v53  ;;  %v9090_v52 = vpack.c.bf16 %v1243_v46, %v1219_v45  ;;  %v1218_v53 = vld [vmem:[#allocation5 + $0x22e0] sm:$0xff]  ;;  %v1435_v45 = vld [vmem:[#allocation5 + $0x29a8] sm:$0xff]  ;;  %v1413_v46 = vld [vmem:[#allocation5 + $0x28f8] sm:$0xff] }
 0x255   :  { %9203 = vmatprep.subr.bf16.mxu1 %v9202_v60  ;;  %v11807_v9 = vpop.f32.mrb[2].mxu0  ;;  %v1244_v60 = vld [vmem:[#allocation5 + $0x23b0] sm:$0xff]  ;;  %v9092_v2 = vpack.c.bf16 %v1242_v54, %v1218_v53  ;;  %v1434_v53 = vld [vmem:[#allocation5 + $0x29a0] sm:$0xff] }
 0x256   :  { %v11809_v15 = vpop.f32.mrb[2].mxu1  ;;  %v11811_v16 = vpop.f32.mrb[3].mxu0  ;;  %v1412_v54 = vld [vmem:[#allocation5 + $0x28f0] sm:$0xff] }
 0x257   :  { %9077 = vmatpush1.bf16.msra.mxu0 %v9076_v3  ;;  %v11813_v19 = vpop.f32.mrb[3].mxu1  ;;  %v9220_v3 = vpack.c.bf16 %v1244_v60, %v1220_v57  ;;  %v9234_v57 = vpack.c.bf16 %v1437_v47, %v1413_v46  ;;  %v1459_v60 = vld [vmem:[#allocation5 + $0x2a68] sm:$0xff]  ;;  %v1629_v46 = vld [vmem:[#allocation5 + $0x2fb8] sm:$0xff] }
 0x258   :  { %9205 = vmatpush1.bf16.msra.mxu1 %v9204_v4  ;;  %9079 = vmatprep.subr.bf16.mxu0 %v9078_v5  ;;  %v9094_v4 = vpack.c.bf16 %v1291_v63, %v1267_v61  ;;  %v1266_v5 = vld [vmem:[#allocation5 + $0x2460] sm:$0xff]  ;;  %v1483_v61 = vld [vmem:[#allocation5 + $0x2b28] sm:$0xff]  ;;  %v1461_v63 = vld [vmem:[#allocation5 + $0x2a78] sm:$0xff] }
 0x259   :  { %9207 = vmatprep.subr.bf16.mxu1 %v9206_v10  ;;  %v1292_v10 = vld [vmem:[#allocation5 + $0x2530] sm:$0xff]  ;;  %v9096_v18 = vpack.c.bf16 %v1290_v6, %v1266_v5  ;;  %v1482_v5 = vld [vmem:[#allocation5 + $0x2b20] sm:$0xff] }
 0x25a   :  { %v1460_v6 = vld [vmem:[#allocation5 + $0x2a70] sm:$0xff] }
 0x25b   :  { %9081 = vmatpush1.bf16.msra.mxu0 %v9080_v20  ;;  %v9224_v20 = vpack.c.bf16 %v1292_v10, %v1268_v7  ;;  %v9238_v7 = vpack.c.bf16 %v1485_v0, %v1461_v63  ;;  %v1507_v10 = vld [vmem:[#allocation5 + $0x2be8] sm:$0xff]  ;;  %v1653_v63 = vld [vmem:[#allocation5 + $0x3078] sm:$0x7] }
 0x25c   :  { %9209 = vmatpush1.bf16.msra.mxu1 %v9208_v21  ;;  %9083 = vmatprep.subr.bf16.mxu0 %v9082_v23  ;;  %v9098_v21 = vpack.c.bf16 %v1339_v13, %v1315_v12  ;;  %v1314_v23 = vld [vmem:[#allocation5 + $0x25e0] sm:$0xff]  ;;  %v1531_v12 = vld [vmem:[#allocation5 + $0x2ca8] sm:$0xff]  ;;  %v1509_v13 = vld [vmem:[#allocation5 + $0x2bf8] sm:$0xff] }
 0x25d   :  { %9211 = vmatprep.subr.bf16.mxu1 %v9210_v28  ;;  %v1340_v28 = vld [vmem:[#allocation5 + $0x26b0] sm:$0xff]  ;;  %v9100_v34 = vpack.c.bf16 %v1338_v24, %v1314_v23  ;;  %v1530_v23 = vld [vmem:[#allocation5 + $0x2ca0] sm:$0xff]  ;;  %v119_v0 = vld [vmem:[#allocation5 + $0x88] sm:$0xff] }
 0x25e   :  { %v1508_v24 = vld [vmem:[#allocation5 + $0x2bf0] sm:$0xff] }
 0x25f   :  { %9085 = vmatpush1.bf16.msra.mxu0 %v9084_v35  ;;  %v9228_v35 = vpack.c.bf16 %v1340_v28, %v1316_v22  ;;  %v9242_v22 = vpack.c.bf16 %v1533_v14, %v1509_v13  ;;  %v1555_v28 = vld [vmem:[#allocation5 + $0x2d68] sm:$0xff]  ;;  %v144_v13 = vld [vmem:[#allocation5 + $0x150] sm:$0xff] }
 0x260   :  { %9213 = vmatpush1.bf16.msra.mxu1 %v9212_v36  ;;  %9087 = vmatprep.subr.bf16.mxu0 %v9086_v37  ;;  %v9102_v36 = vpack.c.bf16 %v1387_v30, %v1363_v29  ;;  %v1362_v37 = vld [vmem:[#allocation5 + $0x2760] sm:$0xff]  ;;  %v1579_v29 = vld [vmem:[#allocation5 + $0x2e28] sm:$0xff]  ;;  %v1557_v30 = vld [vmem:[#allocation5 + $0x2d78] sm:$0xff] }
 0x261   :  { %9215 = vmatprep.subr.bf16.mxu1 %v9214_v42  ;;  %v1388_v42 = vld [vmem:[#allocation5 + $0x2830] sm:$0xff]  ;;  %v9104_v48 = vpack.c.bf16 %v1386_v38, %v1362_v37  ;;  %v1578_v37 = vld [vmem:[#allocation5 + $0x2e20] sm:$0xff]  ;;  %v167_v14 = vld [vmem:[#allocation5 + $0x208] sm:$0xff] }
 0x262   :  { %v1556_v38 = vld [vmem:[#allocation5 + $0x2d70] sm:$0xff] }
 0x263   :  { %9089 = vmatpush1.bf16.msra.mxu0 %v9088_v49  ;;  %v9232_v49 = vpack.c.bf16 %v1388_v42, %v1364_v40  ;;  %v9246_v40 = vpack.c.bf16 %v1581_v31, %v1557_v30  ;;  %v1603_v42 = vld [vmem:[#allocation5 + $0x2ee8] sm:$0xff]  ;;  %v192_v30 = vld [vmem:[#allocation5 + $0x2d0] sm:$0xff] }
 0x264   :  { %9217 = vmatpush1.bf16.msra.mxu1 %v9216_v51  ;;  %9091 = vmatprep.subr.bf16.mxu0 %v9090_v52  ;;  %v9106_v51 = vpack.c.bf16 %v1435_v45, %v1411_v43  ;;  %v1410_v52 = vld [vmem:[#allocation5 + $0x28e0] sm:$0xff]  ;;  %v1627_v43 = vld [vmem:[#allocation5 + $0x2fa8] sm:$0xff]  ;;  %v1605_v45 = vld [vmem:[#allocation5 + $0x2ef8] sm:$0xff] }
 0x265   :  { %9219 = vmatprep.subr.bf16.mxu1 %v9218_v58  ;;  %v1436_v58 = vld [vmem:[#allocation5 + $0x29b0] sm:$0xff]  ;;  %v9108_v1 = vpack.c.bf16 %v1434_v53, %v1410_v52  ;;  %v1626_v52 = vld [vmem:[#allocation5 + $0x2fa0] sm:$0xff]  ;;  %v9250_v53 = vpack.c.bf16 %v1629_v46, %v1605_v45  ;;  %v215_v31 = vld [vmem:[#allocation5 + $0x388] sm:$0xff] }
 0x266   :  { %v240_v46 = vld [vmem:[#allocation5 + $0x450] sm:$0xff] }
 0x267   :  { %9093 = vmatpush1.bf16.msra.mxu0 %v9092_v2  ;;  %v9236_v2 = vpack.c.bf16 %v1436_v58, %v1412_v54  ;;  %v1604_v54 = vld [vmem:[#allocation5 + $0x2ef0] sm:$0xff] }
 0x268   :  { %9221 = vmatpush1.bf16.msra.mxu1 %v9220_v3  ;;  %9095 = vmatprep.subr.bf16.mxu0 %v9094_v4  ;;  %v9110_v3 = vpack.c.bf16 %v1483_v61, %v1459_v60  ;;  %v1458_v4 = vld [vmem:[#allocation5 + $0x2a60] sm:$0xff]  ;;  %v1651_v61 = vld [vmem:[#allocation5 + $0x3068] sm:$0x7] }
 0x269   :  { %9223 = vmatprep.subr.bf16.mxu1 %v9222_v8  ;;  %v1484_v8 = vld [vmem:[#allocation5 + $0x2b30] sm:$0xff]  ;;  %v9112_v17 = vpack.c.bf16 %v1482_v5, %v1458_v4  ;;  %v1650_v4 = vld [vmem:[#allocation5 + $0x3060] sm:$0x7] }
 0x26a   :  { %v1652_v5 = vld [vmem:[#allocation5 + $0x3070] sm:$0x7] }
 0x26b   :  { %9097 = vmatpush1.bf16.msra.mxu0 %v9096_v18  ;;  %v9240_v18 = vpack.c.bf16 %v1484_v8, %v1460_v6  ;;  %v118_v8 = vld [vmem:[#allocation5 + $0x80] sm:$0xff] }
 0x26c   :  { %9225 = vmatpush1.bf16.msra.mxu1 %v9224_v20  ;;  %9099 = vmatprep.subr.bf16.mxu0 %v9098_v21  ;;  %v9114_v20 = vpack.c.bf16 %v1531_v12, %v1507_v10  ;;  %v1506_v21 = vld [vmem:[#allocation5 + $0x2be0] sm:$0xff]  ;;  %v120_v12 = vld [vmem:[#allocation5 + $0x90] sm:$0xff] }
 0x26d   :  { %9227 = vmatprep.subr.bf16.mxu1 %v9226_v27  ;;  %v1532_v27 = vld [vmem:[#allocation5 + $0x2cb0] sm:$0xff]  ;;  %v9116_v33 = vpack.c.bf16 %v1530_v23, %v1506_v21  ;;  %v142_v10 = vld [vmem:[#allocation5 + $0x140] sm:$0xff]  ;;  %v9384_v23 = vpack.c.bf16 %v144_v13, %v120_v12 }
 0x26e   :  { %v9256_v21 = vpack.c.bf16 %v142_v10, %v118_v8  ;;  %v334_v8 = vld [vmem:[#allocation5 + $0x740] sm:$0xff]  ;;  %v312_v10 = vld [vmem:[#allocation5 + $0x690] sm:$0xff] }
 0x26f   :  { %9101 = vmatpush1.bf16.msra.mxu0 %v9100_v34  ;;  %v9244_v34 = vpack.c.bf16 %v1532_v27, %v1508_v24  ;;  %v190_v27 = vld [vmem:[#allocation5 + $0x2c0] sm:$0xff]  ;;  %v336_v13 = vld [vmem:[#allocation5 + $0x750] sm:$0xff] }
 0x270   :  { %9229 = vmatpush1.bf16.msra.mxu1 %v9228_v35  ;;  %9103 = vmatprep.subr.bf16.mxu0 %v9102_v36  ;;  %v9118_v35 = vpack.c.bf16 %v1579_v29, %v1555_v28  ;;  %v1554_v36 = vld [vmem:[#allocation5 + $0x2d60] sm:$0xff]  ;;  %v168_v28 = vld [vmem:[#allocation5 + $0x210] sm:$0xff] }
 0x271   :  { %9231 = vmatprep.subr.bf16.mxu1 %v9230_v41  ;;  %v1580_v41 = vld [vmem:[#allocation5 + $0x2e30] sm:$0xff]  ;;  %v9120_v47 = vpack.c.bf16 %v1578_v37, %v1554_v36  ;;  %v241_v36 = vld [vmem:[#allocation5 + $0x458] sm:$0xff] }
 0x273   :  { %9105 = vmatpush1.bf16.msra.mxu0 %v9104_v48  ;;  %v9248_v48 = vpack.c.bf16 %v1580_v41, %v1556_v38  ;;  %v9388_v38 = vpack.c.bf16 %v192_v30, %v168_v28  ;;  %v214_v41 = vld [vmem:[#allocation5 + $0x380] sm:$0xff]  ;;  %v360_v28 = vld [vmem:[#allocation5 + $0x810] sm:$0xff] }
 0x274   :  { %9233 = vmatpush1.bf16.msra.mxu1 %v9232_v49  ;;  %9107 = vmatprep.subr.bf16.mxu0 %v9106_v51  ;;  %v9122_v49 = vpack.c.bf16 %v1627_v43, %v1603_v42  ;;  %v1602_v51 = vld [vmem:[#allocation5 + $0x2ee0] sm:$0xff]  ;;  %v216_v43 = vld [vmem:[#allocation5 + $0x390] sm:$0xff] }
 0x275   :  { %9235 = vmatprep.subr.bf16.mxu1 %v9234_v57  ;;  %v1628_v57 = vld [vmem:[#allocation5 + $0x2fb0] sm:$0xff]  ;;  %v9124_v58 = vpack.c.bf16 %v1626_v52, %v1602_v51  ;;  %v238_v42 = vld [vmem:[#allocation5 + $0x440] sm:$0xff]  ;;  %v289_v51 = vld [vmem:[#allocation5 + $0x5d8] sm:$0xff] }
 0x276   :  { %v9252_v60 = vpack.c.bf16 %v1628_v57, %v1604_v54  ;;  %v9264_v52 = vpack.c.bf16 %v238_v42, %v214_v41  ;;  %v262_v57 = vld [vmem:[#allocation5 + $0x500] sm:$0xff]  ;;  %v384_v30 = vld [vmem:[#allocation5 + $0x8d0] sm:$0xff] }
 0x277   :  { %9109 = vmatpush1.bf16.msra.mxu0 %v9108_v1  ;;  %v143_v1 = vld [vmem:[#allocation5 + $0x148] sm:$0xff]  ;;  %v430_v41 = vld [vmem:[#allocation5 + $0xa40] sm:$0xff]  ;;  %v408_v42 = vld [vmem:[#allocation5 + $0x990] sm:$0xff] }
 0x278   :  { %9237 = vmatpush1.bf16.msra.mxu1 %v9236_v2  ;;  %9111 = vmatprep.subr.bf16.mxu0 %v9110_v3  ;;  %v121_v2 = vld [vmem:[#allocation5 + $0x98] sm:$0xff]  ;;  %v9254_v6 = vpack.c.bf16 %v143_v1, %v119_v0  ;;  %v311_v0 = vld [vmem:[#allocation5 + $0x688] sm:$0xff] }
 0x279   :  { %9239 = vmatprep.subr.bf16.mxu1 %v9238_v7  ;;  %v145_v3 = vld [vmem:[#allocation5 + $0x158] sm:$0xff]  ;;  %v335_v1 = vld [vmem:[#allocation5 + $0x748] sm:$0xff] }
 0x27a   :  { %v9382_v7 = vpack.c.bf16 %v145_v3, %v121_v2  ;;  %v313_v2 = vld [vmem:[#allocation5 + $0x698] sm:$0xff] }
 0x27b   :  { %9113 = vmatpush1.bf16.msra.mxu0 %v9112_v17  ;;  %v191_v17 = vld [vmem:[#allocation5 + $0x2c8] sm:$0xff]  ;;  %v337_v3 = vld [vmem:[#allocation5 + $0x758] sm:$0xff] }
 0x27c   :  { %9241 = vmatpush1.bf16.msra.mxu1 %v9240_v18  ;;  %9115 = vmatprep.subr.bf16.mxu0 %v9114_v20  ;;  %v169_v18 = vld [vmem:[#allocation5 + $0x218] sm:$0xff]  ;;  %v9258_v24 = vpack.c.bf16 %v191_v17, %v167_v14  ;;  %v9398_v12 = vpack.c.bf16 %v337_v3, %v313_v2  ;;  %v359_v14 = vld [vmem:[#allocation5 + $0x808] sm:$0xff] }
 0x27d   :  { %9243 = vmatprep.subr.bf16.mxu1 %v9242_v22  ;;  %v193_v20 = vld [vmem:[#allocation5 + $0x2d8] sm:$0xff]  ;;  %v166_v22 = vld [vmem:[#allocation5 + $0x200] sm:$0xff]  ;;  %v383_v17 = vld [vmem:[#allocation5 + $0x8c8] sm:$0xff] }
 0x27e   :  { %v9386_v29 = vpack.c.bf16 %v193_v20, %v169_v18  ;;  %v9260_v37 = vpack.c.bf16 %v190_v27, %v166_v22  ;;  %v361_v18 = vld [vmem:[#allocation5 + $0x818] sm:$0xff]  ;;  %v358_v22 = vld [vmem:[#allocation5 + $0x800] sm:$0xff] }
 0x27f   :  { %9117 = vmatpush1.bf16.msra.mxu0 %v9116_v33  ;;  %v239_v33 = vld [vmem:[#allocation5 + $0x448] sm:$0xff]  ;;  %v385_v20 = vld [vmem:[#allocation5 + $0x8d8] sm:$0xff]  ;;  %v382_v27 = vld [vmem:[#allocation5 + $0x8c0] sm:$0xff] }
 0x280   :  { %9245 = vmatpush1.bf16.msra.mxu1 %v9244_v34  ;;  %9119 = vmatprep.subr.bf16.mxu0 %v9118_v35  ;;  %v11418_v34 = vld.sshfl [vmem:[#allocation2 + $0x8] sm:$0x3 pattern:$0x76325410] }
 0x281   :  { %9247 = vmatprep.subr.bf16.mxu1 %v9246_v40  ;;  %v217_v35 = vld [vmem:[#allocation5 + $0x398] sm:$0xff]  ;;  %v9262_v40 = vpack.c.bf16 %v239_v33, %v215_v31  ;;  %v407_v31 = vld [vmem:[#allocation5 + $0x988] sm:$0xff] }
 0x282   :  { %v9390_v45 = vpack.c.bf16 %v241_v36, %v217_v35  ;;  %v431_v33 = vld [vmem:[#allocation5 + $0xa48] sm:$0xff]  ;;  %v433_v35 = vld [vmem:[#allocation5 + $0xa58] sm:$0xff]  ;;  %v9276_v36 = vpack.c.bf16 %v382_v27, %v358_v22  ;;  %v574_v22 = vld [vmem:[#allocation5 + $0xec0] sm:$0xff] }
 0x283   :  { %9121 = vmatpush1.bf16.msra.mxu0 %v9120_v47  ;;  %v263_v47 = vld [vmem:[#allocation5 + $0x508] sm:$0xff]  ;;  %v529_v2 = vld [vmem:[#allocation5 + $0xd58] sm:$0xff]  ;;  %v552_v27 = vld [vmem:[#allocation5 + $0xe10] sm:$0xff] }
 0x284   :  { %9249 = vmatpush1.bf16.msra.mxu1 %v9248_v48  ;;  %9123 = vmatprep.subr.bf16.mxu0 %v9122_v49  ;;  %v287_v48 = vld [vmem:[#allocation5 + $0x5c8] sm:$0xff]  ;;  %v265_v49 = vld [vmem:[#allocation5 + $0x518] sm:$0xff] }
 0x285   :  { %9251 = vmatprep.subr.bf16.mxu1 %v9250_v53  ;;  %v9392_v53 = vpack.c.bf16 %v240_v46, %v216_v43  ;;  %v9266_v54 = vpack.c.bf16 %v287_v48, %v263_v47  ;;  %v455_v46 = vld [vmem:[#allocation5 + $0xb08] sm:$0xff]  ;;  %v457_v48 = vld [vmem:[#allocation5 + $0xb18] sm:$0xff] }
 0x286   :  { %v479_v47 = vld [vmem:[#allocation5 + $0xbc8] sm:$0xff] }
 0x287   :  { %9125 = vmatpush1.bf16.msra.mxu0 %v9124_v58  ;;  %v286_v58 = vld [vmem:[#allocation5 + $0x5c0] sm:$0xff] }
 0x288   :  { %9253 = vmatpush1.bf16.msra.mxu1 %v9252_v60  ;;  %8212 = vmatprep.subr.msk.mxu0 %vm1695_vm0, %v1651_v61  ;;  %v264_v60 = vld [vmem:[#allocation5 + $0x510] sm:$0xff]  ;;  %v9394_v61 = vpack.c.bf16 %v289_v51, %v265_v49  ;;  %v481_v49 = vld [vmem:[#allocation5 + $0xbd8] sm:$0xff] }
 0x289   :  { %8215 = vmatprep.subr.msk.mxu1 %vm1695_vm0, %v1653_v63  ;;  %v288_v63 = vld [vmem:[#allocation5 + $0x5d0] sm:$0xff] }
 0x28a   :  { %3182 = vmatmul.mubr.f32.vlgmr.msra.gmra.mrb[6].mxu0 %v11741_v26 }
 0x28b   :  { %3395 = vmatmul.mubr.f32.vlgmr.msra.gmra.mrb[6].mxu1 %v11741_v26  ;;  %8213 = vmatpush1.msk.msra.mxu0 %vm1695_vm0, %v1650_v4  ;;  %v9268_v4 = vpack.c.bf16 %v286_v58, %v262_v57  ;;  %v478_v57 = vld [vmem:[#allocation5 + $0xbc0] sm:$0xff]  ;;  %v456_v58 = vld [vmem:[#allocation5 + $0xb10] sm:$0xff] }
 0x28c   :  { %8216 = vmatpush1.msk.msra.mxu1 %vm1695_vm0, %v1652_v5  ;;  %3252 = vmatprep.mubr.f32.mxu0 %v11610_v44  ;;  %v9396_v5 = vpack.c.bf16 %v288_v63, %v264_v60  ;;  %v9410_v60 = vpack.c.bf16 %v481_v49, %v457_v48  ;;  %v503_v63 = vld [vmem:[#allocation5 + $0xc88] sm:$0xff]  ;;  %v673_v48 = vld [vmem:[#allocation5 + $0x11d8] sm:$0xff] }
 0x28d   :  { %3465 = vmatprep.mubr.f32.mxu1 %v11610_v44  ;;  %9255 = vmatprep.subr.bf16.mxu0 %v9254_v6  ;;  %v9270_v6 = vpack.c.bf16 %v335_v1, %v311_v0  ;;  %v527_v0 = vld [vmem:[#allocation5 + $0xd48] sm:$0xff]  ;;  %v505_v1 = vld [vmem:[#allocation5 + $0xc98] sm:$0xff] }
 0x28e   :  { %9383 = vmatprep.subr.bf16.mxu1 %v9382_v7  ;;  %v310_v7 = vld [vmem:[#allocation5 + $0x680] sm:$0xff] }
 0x292   :  { %8214 = vmatmul.mubr.msk.f32.vlgmr.msra.gmra.mrb[6].mxu0 %vm1692_vm1, %v11418_v34 }
 0x293   :  { %8217 = vmatmul.mubr.msk.f32.vlgmr.msra.gmra.mrb[6].mxu1 %vm1692_vm1, %v11418_v34  ;;  %9257 = vmatpush1.bf16.msra.mxu0 %v9256_v21  ;;  %v9272_v21 = vpack.c.bf16 %v334_v8, %v310_v7  ;;  %v409_v34 = vld [vmem:[#allocation5 + $0x998] sm:$0xff]  ;;  %v526_v7 = vld [vmem:[#allocation5 + $0xd40] sm:$0xff]  ;;  %v504_v8 = vld [vmem:[#allocation5 + $0xc90] sm:$0xff] }
 0x294   :  { %9385 = vmatpush1.bf16.msra.mxu1 %v9384_v23  ;;  %9259 = vmatprep.subr.bf16.mxu0 %v9258_v24  ;;  %v9400_v23 = vpack.c.bf16 %v336_v13, %v312_v10  ;;  %v9274_v24 = vpack.c.bf16 %v383_v17, %v359_v14  ;;  %v9406_v43 = vpack.c.bf16 %v433_v35, %v409_v34  ;;  %v551_v13 = vld [vmem:[#allocation5 + $0xe08] sm:$0xff]  ;;  %v553_v17 = vld [vmem:[#allocation5 + $0xe18] sm:$0xff] }
 0x295   :  { %9387 = vmatprep.subr.bf16.mxu1 %v9386_v29  ;;  %3536 = vmatprep.mubr.f32.mxu0 %v11734_v32  ;;  %v9402_v29 = vpack.c.bf16 %v385_v20, %v361_v18  ;;  %v9414_v10 = vpack.c.bf16 %v529_v2, %v505_v1  ;;  %v575_v14 = vld [vmem:[#allocation5 + $0xec8] sm:$0xff]  ;;  %v577_v18 = vld [vmem:[#allocation5 + $0xed8] sm:$0xff] }
 0x296   :  { %3749 = vmatprep.mubr.f32.mxu1 %v11734_v32  ;;  %v625_v34 = vld [vmem:[#allocation5 + $0x1058] sm:$0xff] }
 0x297   :  { %9261 = vmatpush1.bf16.msra.mxu0 %v9260_v37  ;;  %v9404_v37 = vpack.c.bf16 %v384_v30, %v360_v28  ;;  %v9418_v28 = vpack.c.bf16 %v577_v18, %v553_v17  ;;  %v599_v30 = vld [vmem:[#allocation5 + $0xf88] sm:$0xff]  ;;  %v721_v1 = vld [vmem:[#allocation5 + $0x1358] sm:$0xff] }
 0x298   :  { %9389 = vmatpush1.bf16.msra.mxu1 %v9388_v38  ;;  %9263 = vmatprep.subr.bf16.mxu0 %v9262_v40  ;;  %v9278_v38 = vpack.c.bf16 %v431_v33, %v407_v31  ;;  %v406_v40 = vld [vmem:[#allocation5 + $0x980] sm:$0xff]  ;;  %v623_v31 = vld [vmem:[#allocation5 + $0x1048] sm:$0xff]  ;;  %v601_v33 = vld [vmem:[#allocation5 + $0xf98] sm:$0xff] }
 0x299   :  { %9391 = vmatprep.subr.bf16.mxu1 %v9390_v45  ;;  %v432_v45 = vld [vmem:[#allocation5 + $0xa50] sm:$0xff]  ;;  %v9280_v51 = vpack.c.bf16 %v430_v41, %v406_v40  ;;  %v622_v40 = vld [vmem:[#allocation5 + $0x1040] sm:$0xff]  ;;  %v769_v17 = vld [vmem:[#allocation5 + $0x14d8] sm:$0xff] }
 0x29a   :  { %v600_v41 = vld [vmem:[#allocation5 + $0xf90] sm:$0xff] }
 0x29b   :  { %9265 = vmatpush1.bf16.msra.mxu0 %v9264_v52  ;;  %v9408_v52 = vpack.c.bf16 %v432_v45, %v408_v42  ;;  %v9422_v42 = vpack.c.bf16 %v625_v34, %v601_v33  ;;  %v647_v45 = vld [vmem:[#allocation5 + $0x1108] sm:$0xff]  ;;  %v817_v33 = vld [vmem:[#allocation5 + $0x1658] sm:$0xff] }
 0x29c   :  { %9393 = vmatpush1.bf16.msra.mxu1 %v9392_v53  ;;  %9267 = vmatprep.subr.bf16.mxu0 %v9266_v54  ;;  %v9282_v53 = vpack.c.bf16 %v479_v47, %v455_v46  ;;  %v454_v54 = vld [vmem:[#allocation5 + $0xb00] sm:$0xff]  ;;  %v671_v46 = vld [vmem:[#allocation5 + $0x11c8] sm:$0xff]  ;;  %v649_v47 = vld [vmem:[#allocation5 + $0x1118] sm:$0xff] }
 0x29d   :  { %9395 = vmatprep.subr.bf16.mxu1 %v9394_v61  ;;  %v480_v61 = vld [vmem:[#allocation5 + $0xbd0] sm:$0xff]  ;;  %v9284_v3 = vpack.c.bf16 %v478_v57, %v454_v54  ;;  %v670_v54 = vld [vmem:[#allocation5 + $0x11c0] sm:$0xff] }
 0x29e   :  { %v648_v57 = vld [vmem:[#allocation5 + $0x1110] sm:$0xff] }
 0x29f   :  { %9269 = vmatpush1.bf16.msra.mxu0 %v9268_v4  ;;  %v9412_v4 = vpack.c.bf16 %v480_v61, %v456_v58  ;;  %v9426_v58 = vpack.c.bf16 %v673_v48, %v649_v47  ;;  %v695_v61 = vld [vmem:[#allocation5 + $0x1288] sm:$0xff]  ;;  %v865_v47 = vld [vmem:[#allocation5 + $0x17d8] sm:$0xff] }
 0x2a0   :  { %9397 = vmatpush1.bf16.msra.mxu1 %v9396_v5  ;;  %9271 = vmatprep.subr.bf16.mxu0 %v9270_v6  ;;  %v9286_v5 = vpack.c.bf16 %v527_v0, %v503_v63  ;;  %v502_v6 = vld [vmem:[#allocation5 + $0xc80] sm:$0xff]  ;;  %v719_v63 = vld [vmem:[#allocation5 + $0x1348] sm:$0xff]  ;;  %v697_v0 = vld [vmem:[#allocation5 + $0x1298] sm:$0xff] }
 0x2a1   :  { %9399 = vmatprep.subr.bf16.mxu1 %v9398_v12  ;;  %v528_v12 = vld [vmem:[#allocation5 + $0xd50] sm:$0xff]  ;;  %v9288_v20 = vpack.c.bf16 %v526_v7, %v502_v6  ;;  %v718_v6 = vld [vmem:[#allocation5 + $0x1340] sm:$0xff] }
 0x2a2   :  { %v696_v7 = vld [vmem:[#allocation5 + $0x1290] sm:$0xff] }
 0x2a3   :  { %9273 = vmatpush1.bf16.msra.mxu0 %v9272_v21  ;;  %v9416_v21 = vpack.c.bf16 %v528_v12, %v504_v8  ;;  %v9430_v8 = vpack.c.bf16 %v721_v1, %v697_v0  ;;  %v743_v12 = vld [vmem:[#allocation5 + $0x1408] sm:$0xff]  ;;  %v913_v0 = vld [vmem:[#allocation5 + $0x1958] sm:$0xff] }
 0x2a4   :  { %9401 = vmatpush1.bf16.msra.mxu1 %v9400_v23  ;;  %9275 = vmatprep.subr.bf16.mxu0 %v9274_v24  ;;  %v9290_v23 = vpack.c.bf16 %v575_v14, %v551_v13  ;;  %v550_v24 = vld [vmem:[#allocation5 + $0xe00] sm:$0xff]  ;;  %v767_v13 = vld [vmem:[#allocation5 + $0x14c8] sm:$0xff]  ;;  %v745_v14 = vld [vmem:[#allocation5 + $0x1418] sm:$0xff] }
 0x2a5   :  { %9403 = vmatprep.subr.bf16.mxu1 %v9402_v29  ;;  %v576_v29 = vld [vmem:[#allocation5 + $0xed0] sm:$0xff]  ;;  %v9292_v35 = vpack.c.bf16 %v574_v22, %v550_v24  ;;  %v766_v24 = vld [vmem:[#allocation5 + $0x14c0] sm:$0xff] }
 0x2a6   :  { %v744_v22 = vld [vmem:[#allocation5 + $0x1410] sm:$0xff] }
 0x2a7   :  { %9277 = vmatpush1.bf16.msra.mxu0 %v9276_v36  ;;  %v9420_v36 = vpack.c.bf16 %v576_v29, %v552_v27  ;;  %v9434_v27 = vpack.c.bf16 %v769_v17, %v745_v14  ;;  %v791_v29 = vld [vmem:[#allocation5 + $0x1588] sm:$0xff]  ;;  %v961_v14 = vld [vmem:[#allocation5 + $0x1ad8] sm:$0xff] }
 0x2a8   :  { %9405 = vmatpush1.bf16.msra.mxu1 %v9404_v37  ;;  %9279 = vmatprep.subr.bf16.mxu0 %v9278_v38  ;;  %v9294_v37 = vpack.c.bf16 %v623_v31, %v599_v30  ;;  %v598_v38 = vld [vmem:[#allocation5 + $0xf80] sm:$0xff]  ;;  %v815_v30 = vld [vmem:[#allocation5 + $0x1648] sm:$0xff]  ;;  %v793_v31 = vld [vmem:[#allocation5 + $0x1598] sm:$0xff] }
 0x2a9   :  { %9407 = vmatprep.subr.bf16.mxu1 %v9406_v43  ;;  %v624_v43 = vld [vmem:[#allocation5 + $0x1050] sm:$0xff]  ;;  %v9296_v49 = vpack.c.bf16 %v622_v40, %v598_v38  ;;  %v814_v38 = vld [vmem:[#allocation5 + $0x1640] sm:$0xff] }
 0x2aa   :  { %v792_v40 = vld [vmem:[#allocation5 + $0x1590] sm:$0xff] }
 0x2ab   :  { %9281 = vmatpush1.bf16.msra.mxu0 %v9280_v51  ;;  %v9424_v51 = vpack.c.bf16 %v624_v43, %v600_v41  ;;  %v9438_v41 = vpack.c.bf16 %v817_v33, %v793_v31  ;;  %v839_v43 = vld [vmem:[#allocation5 + $0x1708] sm:$0xff]  ;;  %v1009_v31 = vld [vmem:[#allocation5 + $0x1c58] sm:$0xff] }
 0x2ac   :  { %9409 = vmatpush1.bf16.msra.mxu1 %v9408_v52  ;;  %9283 = vmatprep.subr.bf16.mxu0 %v9282_v53  ;;  %v9298_v52 = vpack.c.bf16 %v671_v46, %v647_v45  ;;  %v646_v53 = vld [vmem:[#allocation5 + $0x1100] sm:$0xff]  ;;  %v863_v45 = vld [vmem:[#allocation5 + $0x17c8] sm:$0xff]  ;;  %v841_v46 = vld [vmem:[#allocation5 + $0x1718] sm:$0xff] }
 0x2ad   :  { %9411 = vmatprep.subr.bf16.mxu1 %v9410_v60  ;;  %v672_v60 = vld [vmem:[#allocation5 + $0x11d0] sm:$0xff]  ;;  %v9300_v2 = vpack.c.bf16 %v670_v54, %v646_v53  ;;  %v862_v53 = vld [vmem:[#allocation5 + $0x17c0] sm:$0xff] }
 0x2ae   :  { %v840_v54 = vld [vmem:[#allocation5 + $0x1710] sm:$0xff] }
 0x2af   :  { %9285 = vmatpush1.bf16.msra.mxu0 %v9284_v3  ;;  %v9428_v3 = vpack.c.bf16 %v672_v60, %v648_v57  ;;  %v9442_v57 = vpack.c.bf16 %v865_v47, %v841_v46  ;;  %v887_v60 = vld [vmem:[#allocation5 + $0x1888] sm:$0xff]  ;;  %v1057_v46 = vld [vmem:[#allocation5 + $0x1dd8] sm:$0xff] }
 0x2b0   :  { %9413 = vmatpush1.bf16.msra.mxu1 %v9412_v4  ;;  %9287 = vmatprep.subr.bf16.mxu0 %v9286_v5  ;;  %v9302_v4 = vpack.c.bf16 %v719_v63, %v695_v61  ;;  %v694_v5 = vld [vmem:[#allocation5 + $0x1280] sm:$0xff]  ;;  %v911_v61 = vld [vmem:[#allocation5 + $0x1948] sm:$0xff]  ;;  %v889_v63 = vld [vmem:[#allocation5 + $0x1898] sm:$0xff] }
 0x2b1   :  { %9415 = vmatprep.subr.bf16.mxu1 %v9414_v10  ;;  %v720_v10 = vld [vmem:[#allocation5 + $0x1350] sm:$0xff]  ;;  %v9304_v18 = vpack.c.bf16 %v718_v6, %v694_v5  ;;  %v910_v5 = vld [vmem:[#allocation5 + $0x1940] sm:$0xff] }
 0x2b2   :  { %v888_v6 = vld [vmem:[#allocation5 + $0x1890] sm:$0xff] }
 0x2b3   :  { %9289 = vmatpush1.bf16.msra.mxu0 %v9288_v20  ;;  %v9432_v20 = vpack.c.bf16 %v720_v10, %v696_v7  ;;  %v9446_v7 = vpack.c.bf16 %v913_v0, %v889_v63  ;;  %v935_v10 = vld [vmem:[#allocation5 + $0x1a08] sm:$0xff]  ;;  %v1105_v63 = vld [vmem:[#allocation5 + $0x1f58] sm:$0xff] }
 0x2b4   :  { %9417 = vmatpush1.bf16.msra.mxu1 %v9416_v21  ;;  %9291 = vmatprep.subr.bf16.mxu0 %v9290_v23  ;;  %v9306_v21 = vpack.c.bf16 %v767_v13, %v743_v12  ;;  %v742_v23 = vld [vmem:[#allocation5 + $0x1400] sm:$0xff]  ;;  %v959_v12 = vld [vmem:[#allocation5 + $0x1ac8] sm:$0xff]  ;;  %v937_v13 = vld [vmem:[#allocation5 + $0x1a18] sm:$0xff] }
 0x2b5   :  { %9419 = vmatprep.subr.bf16.mxu1 %v9418_v28  ;;  %v768_v28 = vld [vmem:[#allocation5 + $0x14d0] sm:$0xff]  ;;  %v9308_v34 = vpack.c.bf16 %v766_v24, %v742_v23  ;;  %v958_v23 = vld [vmem:[#allocation5 + $0x1ac0] sm:$0xff] }
 0x2b6   :  { %v936_v24 = vld [vmem:[#allocation5 + $0x1a10] sm:$0xff] }
 0x2b7   :  { %9293 = vmatpush1.bf16.msra.mxu0 %v9292_v35  ;;  %v9436_v35 = vpack.c.bf16 %v768_v28, %v744_v22  ;;  %v9450_v22 = vpack.c.bf16 %v961_v14, %v937_v13  ;;  %v983_v28 = vld [vmem:[#allocation5 + $0x1b88] sm:$0xff] }
 0x2b8   :  { %9421 = vmatpush1.bf16.msra.mxu1 %v9420_v36  ;;  %9295 = vmatprep.subr.bf16.mxu0 %v9294_v37  ;;  %v9310_v36 = vpack.c.bf16 %v815_v30, %v791_v29  ;;  %v790_v37 = vld [vmem:[#allocation5 + $0x1580] sm:$0xff]  ;;  %v1007_v29 = vld [vmem:[#allocation5 + $0x1c48] sm:$0xff]  ;;  %v985_v30 = vld [vmem:[#allocation5 + $0x1b98] sm:$0xff] }
 0x2b9   :  { %9423 = vmatprep.subr.bf16.mxu1 %v9422_v42  ;;  %v816_v42 = vld [vmem:[#allocation5 + $0x1650] sm:$0xff]  ;;  %v9312_v48 = vpack.c.bf16 %v814_v38, %v790_v37  ;;  %v1006_v37 = vld [vmem:[#allocation5 + $0x1c40] sm:$0xff] }
 0x2ba   :  { %v984_v38 = vld [vmem:[#allocation5 + $0x1b90] sm:$0xff] }
 0x2bb   :  { %9297 = vmatpush1.bf16.msra.mxu0 %v9296_v49  ;;  %v9440_v49 = vpack.c.bf16 %v816_v42, %v792_v40  ;;  %v9454_v40 = vpack.c.bf16 %v1009_v31, %v985_v30  ;;  %v1031_v42 = vld [vmem:[#allocation5 + $0x1d08] sm:$0xff]  ;;  %v1152_v30 = vld [vmem:[#allocation5 + $0x20d0] sm:$0xff] }
 0x2bc   :  { %9425 = vmatpush1.bf16.msra.mxu1 %v9424_v51  ;;  %9299 = vmatprep.subr.bf16.mxu0 %v9298_v52  ;;  %v9314_v51 = vpack.c.bf16 %v863_v45, %v839_v43  ;;  %v838_v52 = vld [vmem:[#allocation5 + $0x1700] sm:$0xff]  ;;  %v1055_v43 = vld [vmem:[#allocation5 + $0x1dc8] sm:$0xff]  ;;  %v1033_v45 = vld [vmem:[#allocation5 + $0x1d18] sm:$0xff] }
 0x2bd   :  { %9427 = vmatprep.subr.bf16.mxu1 %v9426_v58  ;;  %v864_v58 = vld [vmem:[#allocation5 + $0x17d0] sm:$0xff]  ;;  %v9316_v1 = vpack.c.bf16 %v862_v53, %v838_v52  ;;  %v1054_v52 = vld [vmem:[#allocation5 + $0x1dc0] sm:$0xff]  ;;  %v1175_v31 = vld [vmem:[#allocation5 + $0x2188] sm:$0xff] }
 0x2be   :  { %v1032_v53 = vld [vmem:[#allocation5 + $0x1d10] sm:$0xff] }
 0x2bf   :  { %9301 = vmatpush1.bf16.msra.mxu0 %v9300_v2  ;;  %v9444_v2 = vpack.c.bf16 %v864_v58, %v840_v54  ;;  %v9458_v54 = vpack.c.bf16 %v1057_v46, %v1033_v45  ;;  %v1079_v58 = vld [vmem:[#allocation5 + $0x1e88] sm:$0xff]  ;;  %v1200_v45 = vld [vmem:[#allocation5 + $0x2250] sm:$0xff] }
 0x2c0   :  { %9429 = vmatpush1.bf16.msra.mxu1 %v9428_v3  ;;  %9303 = vmatprep.subr.bf16.mxu0 %v9302_v4  ;;  %v9318_v3 = vpack.c.bf16 %v911_v61, %v887_v60  ;;  %v886_v4 = vld [vmem:[#allocation5 + $0x1880] sm:$0xff]  ;;  %v1103_v60 = vld [vmem:[#allocation5 + $0x1f48] sm:$0xff]  ;;  %v1081_v61 = vld [vmem:[#allocation5 + $0x1e98] sm:$0xff] }
 0x2c1   :  { %9431 = vmatprep.subr.bf16.mxu1 %v9430_v8  ;;  %v912_v8 = vld [vmem:[#allocation5 + $0x1950] sm:$0xff]  ;;  %v9320_v17 = vpack.c.bf16 %v910_v5, %v886_v4  ;;  %v1102_v4 = vld [vmem:[#allocation5 + $0x1f40] sm:$0xff]  ;;  %v1223_v46 = vld [vmem:[#allocation5 + $0x2308] sm:$0xff] }
 0x2c2   :  { %v1080_v5 = vld [vmem:[#allocation5 + $0x1e90] sm:$0xff] }
 0x2c3   :  { %9305 = vmatpush1.bf16.msra.mxu0 %v9304_v18  ;;  %v9448_v18 = vpack.c.bf16 %v912_v8, %v888_v6  ;;  %v1104_v8 = vld [vmem:[#allocation5 + $0x1f50] sm:$0xff] }
 0x2c4   :  { %9433 = vmatpush1.bf16.msra.mxu1 %v9432_v20  ;;  %9307 = vmatprep.subr.bf16.mxu0 %v9306_v21  ;;  %v9322_v20 = vpack.c.bf16 %v959_v12, %v935_v10  ;;  %v934_v21 = vld [vmem:[#allocation5 + $0x1a00] sm:$0xff]  ;;  %v1127_v10 = vld [vmem:[#allocation5 + $0x2008] sm:$0xff] }
 0x2c5   :  { %9435 = vmatprep.subr.bf16.mxu1 %v9434_v27  ;;  %v960_v27 = vld [vmem:[#allocation5 + $0x1ad0] sm:$0xff]  ;;  %v9324_v33 = vpack.c.bf16 %v958_v23, %v934_v21  ;;  %v1151_v12 = vld [vmem:[#allocation5 + $0x20c8] sm:$0xff]  ;;  %v9464_v23 = vpack.c.bf16 %v1104_v8, %v1080_v5  ;;  %v1294_v8 = vld [vmem:[#allocation5 + $0x2540] sm:$0xff] }
 0x2c7   :  { %9309 = vmatpush1.bf16.msra.mxu0 %v9308_v34  ;;  %v9452_v34 = vpack.c.bf16 %v960_v27, %v936_v24  ;;  %v9338_v24 = vpack.c.bf16 %v1151_v12, %v1127_v10  ;;  %v1150_v27 = vld [vmem:[#allocation5 + $0x20c0] sm:$0xff]  ;;  %v1272_v10 = vld [vmem:[#allocation5 + $0x2490] sm:$0xff] }
 0x2c8   :  { %9437 = vmatpush1.bf16.msra.mxu1 %v9436_v35  ;;  %9311 = vmatprep.subr.bf16.mxu0 %v9310_v36  ;;  %v9326_v35 = vpack.c.bf16 %v1007_v29, %v983_v28  ;;  %v982_v36 = vld [vmem:[#allocation5 + $0x1b80] sm:$0xff]  ;;  %v1128_v28 = vld [vmem:[#allocation5 + $0x2010] sm:$0xff] }
 0x2c9   :  { %9439 = vmatprep.subr.bf16.mxu1 %v9438_v41  ;;  %v1008_v41 = vld [vmem:[#allocation5 + $0x1c50] sm:$0xff]  ;;  %v9328_v47 = vpack.c.bf16 %v1006_v37, %v982_v36  ;;  %v9468_v37 = vpack.c.bf16 %v1152_v30, %v1128_v28  ;;  %v1342_v30 = vld [vmem:[#allocation5 + $0x26c0] sm:$0xff] }
 0x2cb   :  { %9313 = vmatpush1.bf16.msra.mxu0 %v9312_v48  ;;  %v9456_v48 = vpack.c.bf16 %v1008_v41, %v984_v38  ;;  %v1198_v41 = vld [vmem:[#allocation5 + $0x2240] sm:$0xff] }
 0x2cc   :  { %9441 = vmatpush1.bf16.msra.mxu1 %v9440_v49  ;;  %9315 = vmatprep.subr.bf16.mxu0 %v9314_v51  ;;  %v9330_v49 = vpack.c.bf16 %v1055_v43, %v1031_v42  ;;  %v1030_v51 = vld [vmem:[#allocation5 + $0x1d00] sm:$0xff]  ;;  %v1176_v42 = vld [vmem:[#allocation5 + $0x2190] sm:$0xff] }
 0x2cd   :  { %9443 = vmatprep.subr.bf16.mxu1 %v9442_v57  ;;  %v1056_v57 = vld [vmem:[#allocation5 + $0x1dd0] sm:$0xff]  ;;  %v9332_v0 = vpack.c.bf16 %v1054_v52, %v1030_v51  ;;  %v9472_v52 = vpack.c.bf16 %v1200_v45, %v1176_v42  ;;  %v1390_v45 = vld [vmem:[#allocation5 + $0x2840] sm:$0xff] }
 0x2cf   :  { %9317 = vmatpush1.bf16.msra.mxu0 %v9316_v1  ;;  %v9460_v1 = vpack.c.bf16 %v1056_v57, %v1032_v53  ;;  %v1246_v57 = vld [vmem:[#allocation5 + $0x23c0] sm:$0xff] }
 0x2d0   :  { %9445 = vmatpush1.bf16.msra.mxu1 %v9444_v2  ;;  %9319 = vmatprep.subr.bf16.mxu0 %v9318_v3  ;;  %v9334_v2 = vpack.c.bf16 %v1103_v60, %v1079_v58  ;;  %v1078_v3 = vld [vmem:[#allocation5 + $0x1e80] sm:$0xff]  ;;  %v1224_v58 = vld [vmem:[#allocation5 + $0x2310] sm:$0xff] }
 0x2d1   :  { %9447 = vmatprep.subr.bf16.mxu1 %v9446_v7  ;;  %v9462_v7 = vpack.c.bf16 %v1105_v63, %v1081_v61  ;;  %v9336_v21 = vpack.c.bf16 %v1102_v4, %v1078_v3  ;;  %v1248_v61 = vld [vmem:[#allocation5 + $0x23d0] sm:$0xff]  ;;  %v1271_v63 = vld [vmem:[#allocation5 + $0x2488] sm:$0xff] }
 0x2d2   :  { %3537 = vmatmul.mubr.f32.vlgmr.msra.gmra.mrb[8].mxu0 %v11730_v25  ;;  %v9476_v4 = vpack.c.bf16 %v1248_v61, %v1224_v58  ;;  %v1438_v61 = vld [vmem:[#allocation5 + $0x29c0] sm:$0xff] }
 0x2d3   :  { %9321 = vmatpush1.bf16.msra.mxu0 %v9320_v17  ;;  %3750 = vmatmul.mubr.f32.vlgmr.msra.gmra.mrb[8].mxu1 %v11730_v25  ;;  %v1129_v17 = vld [vmem:[#allocation5 + $0x2018] sm:$0xff] }
 0x2d4   :  { %9449 = vmatpush1.bf16.msra.mxu1 %v9448_v18  ;;  %9323 = vmatprep.subr.bf16.mxu0 %v9322_v20  ;;  %v1153_v18 = vld [vmem:[#allocation5 + $0x20d8] sm:$0xff] }
 0x2d5   :  { %9451 = vmatprep.subr.bf16.mxu1 %v9450_v22  ;;  %3607 = vmatprep.mubr.f32.mxu0 %v11745_v39  ;;  %v1126_v22 = vld [vmem:[#allocation5 + $0x2000] sm:$0xff]  ;;  %v9466_v29 = vpack.c.bf16 %v1153_v18, %v1129_v17  ;;  %v1296_v17 = vld [vmem:[#allocation5 + $0x2550] sm:$0xff]  ;;  %v1319_v18 = vld [vmem:[#allocation5 + $0x2608] sm:$0xff] }
 0x2d6   :  { %3820 = vmatprep.mubr.f32.mxu1 %v11745_v39  ;;  %v9340_v36 = vpack.c.bf16 %v1150_v27, %v1126_v22  ;;  %v9480_v27 = vpack.c.bf16 %v1296_v17, %v1272_v10  ;;  %v1486_v17 = vld [vmem:[#allocation5 + $0x2b40] sm:$0xff] }
 0x2d7   :  { %9325 = vmatpush1.bf16.msra.mxu0 %v9324_v33  ;;  %v1199_v33 = vld [vmem:[#allocation5 + $0x2248] sm:$0xff] }
 0x2d8   :  { %9453 = vmatpush1.bf16.msra.mxu1 %v9452_v34  ;;  %9327 = vmatprep.subr.bf16.mxu0 %v9326_v35  ;;  %v1177_v34 = vld [vmem:[#allocation5 + $0x2198] sm:$0xff]  ;;  %v9342_v38 = vpack.c.bf16 %v1199_v33, %v1175_v31  ;;  %v1320_v31 = vld [vmem:[#allocation5 + $0x2610] sm:$0xff] }
 0x2d9   :  { %9455 = vmatprep.subr.bf16.mxu1 %v9454_v40  ;;  %v1201_v35 = vld [vmem:[#allocation5 + $0x2258] sm:$0xff]  ;;  %v1174_v40 = vld [vmem:[#allocation5 + $0x2180] sm:$0xff] }
 0x2da   :  { %v9470_v43 = vpack.c.bf16 %v1201_v35, %v1177_v34  ;;  %v9344_v51 = vpack.c.bf16 %v1198_v41, %v1174_v40  ;;  %v1344_v34 = vld [vmem:[#allocation5 + $0x26d0] sm:$0xff]  ;;  %v1367_v35 = vld [vmem:[#allocation5 + $0x2788] sm:$0xff] }
 0x2db   :  { %9329 = vmatpush1.bf16.msra.mxu0 %v9328_v47  ;;  %v1247_v47 = vld [vmem:[#allocation5 + $0x23c8] sm:$0xff]  ;;  %v9484_v41 = vpack.c.bf16 %v1344_v34, %v1320_v31  ;;  %v1534_v34 = vld [vmem:[#allocation5 + $0x2cc0] sm:$0xff] }
 0x2dc   :  { %9457 = vmatpush1.bf16.msra.mxu1 %v9456_v48  ;;  %9331 = vmatprep.subr.bf16.mxu0 %v9330_v49  ;;  %v1225_v48 = vld [vmem:[#allocation5 + $0x2318] sm:$0xff]  ;;  %v9346_v53 = vpack.c.bf16 %v1247_v47, %v1223_v46  ;;  %v1368_v46 = vld [vmem:[#allocation5 + $0x2790] sm:$0xff] }
 0x2dd   :  { %9459 = vmatprep.subr.bf16.mxu1 %v9458_v54  ;;  %v11831_v6 = vpop.f32.mrb[4].mxu0  ;;  %v1249_v49 = vld [vmem:[#allocation5 + $0x23d8] sm:$0xff]  ;;  %v1222_v54 = vld [vmem:[#allocation5 + $0x2300] sm:$0xff] }
 0x2de   :  { %v11833_v13 = vpop.f32.mrb[4].mxu1  ;;  %v11835_v14 = vpop.f32.mrb[5].mxu0  ;;  %v9474_v60 = vpack.c.bf16 %v1249_v49, %v1225_v48  ;;  %v9348_v3 = vpack.c.bf16 %v1246_v57, %v1222_v54  ;;  %v1392_v48 = vld [vmem:[#allocation5 + $0x2850] sm:$0xff]  ;;  %v1415_v49 = vld [vmem:[#allocation5 + $0x2908] sm:$0xff] }
 0x2df   :  { %9333 = vmatpush1.bf16.msra.mxu0 %v9332_v0  ;;  %v11837_v20 = vpop.f32.mrb[5].mxu1  ;;  %v1295_v0 = vld [vmem:[#allocation5 + $0x2548] sm:$0xff]  ;;  %v9488_v57 = vpack.c.bf16 %v1392_v48, %v1368_v46  ;;  %v1582_v48 = vld [vmem:[#allocation5 + $0x2e40] sm:$0xff] }
 0x2e0   :  { %9461 = vmatpush1.bf16.msra.mxu1 %v9460_v1  ;;  %9335 = vmatprep.subr.bf16.mxu0 %v9334_v2  ;;  %v1273_v1 = vld [vmem:[#allocation5 + $0x2498] sm:$0xff]  ;;  %v9350_v5 = vpack.c.bf16 %v1295_v0, %v1271_v63  ;;  %v1416_v63 = vld [vmem:[#allocation5 + $0x2910] sm:$0xff] }
 0x2e1   :  { %9463 = vmatprep.subr.bf16.mxu1 %v9462_v7  ;;  %v1297_v2 = vld [vmem:[#allocation5 + $0x2558] sm:$0xff]  ;;  %v1270_v7 = vld [vmem:[#allocation5 + $0x2480] sm:$0xff] }
 0x2e2   :  { %v9478_v12 = vpack.c.bf16 %v1297_v2, %v1273_v1  ;;  %v9352_v22 = vpack.c.bf16 %v1294_v8, %v1270_v7  ;;  %v1440_v1 = vld [vmem:[#allocation5 + $0x29d0] sm:$0xff]  ;;  %v1463_v2 = vld [vmem:[#allocation5 + $0x2a88] sm:$0xff] }
 0x2e3   :  { %9337 = vmatpush1.bf16.msra.mxu0 %v9336_v21  ;;  %v1343_v21 = vld [vmem:[#allocation5 + $0x26c8] sm:$0xff]  ;;  %v9492_v8 = vpack.c.bf16 %v1440_v1, %v1416_v63  ;;  %v1630_v1 = vld [vmem:[#allocation5 + $0x2fc0] sm:$0xff] }
 0x2e4   :  { %9465 = vmatpush1.bf16.msra.mxu1 %v9464_v23  ;;  %9339 = vmatprep.subr.bf16.mxu0 %v9338_v24  ;;  %v1321_v23 = vld [vmem:[#allocation5 + $0x2618] sm:$0xff]  ;;  %v9354_v28 = vpack.c.bf16 %v1343_v21, %v1319_v18  ;;  %v1464_v18 = vld [vmem:[#allocation5 + $0x2a90] sm:$0xff] }
 0x2e5   :  { %9467 = vmatprep.subr.bf16.mxu1 %v9466_v29  ;;  %v1345_v24 = vld [vmem:[#allocation5 + $0x26d8] sm:$0xff]  ;;  %v1318_v29 = vld [vmem:[#allocation5 + $0x2600] sm:$0xff] }
 0x2e6   :  { %v9482_v33 = vpack.c.bf16 %v1345_v24, %v1321_v23  ;;  %v9356_v40 = vpack.c.bf16 %v1342_v30, %v1318_v29  ;;  %v1488_v23 = vld [vmem:[#allocation5 + $0x2b50] sm:$0xff]  ;;  %v1511_v24 = vld [vmem:[#allocation5 + $0x2c08] sm:$0xff] }
 0x2e7   :  { %9341 = vmatpush1.bf16.msra.mxu0 %v9340_v36  ;;  %v1391_v36 = vld [vmem:[#allocation5 + $0x2848] sm:$0xff]  ;;  %v9496_v30 = vpack.c.bf16 %v1488_v23, %v1464_v18  ;;  %v125_v18 = vld [vmem:[#allocation5 + $0xb8] sm:$0xff]  ;;  %v1654_v23 = vld [vmem:[#allocation5 + $0x3080] sm:$0x7] }
 0x2e8   :  { %9469 = vmatpush1.bf16.msra.mxu1 %v9468_v37  ;;  %9343 = vmatprep.subr.bf16.mxu0 %v9342_v38  ;;  %v1369_v37 = vld [vmem:[#allocation5 + $0x2798] sm:$0xff]  ;;  %v9358_v42 = vpack.c.bf16 %v1391_v36, %v1367_v35  ;;  %v1512_v35 = vld [vmem:[#allocation5 + $0x2c10] sm:$0xff] }
 0x2e9   :  { %9471 = vmatprep.subr.bf16.mxu1 %v9470_v43  ;;  %v1393_v38 = vld [vmem:[#allocation5 + $0x2858] sm:$0xff]  ;;  %v1366_v43 = vld [vmem:[#allocation5 + $0x2780] sm:$0xff] }
 0x2ea   :  { %v9486_v47 = vpack.c.bf16 %v1393_v38, %v1369_v37  ;;  %v9360_v54 = vpack.c.bf16 %v1390_v45, %v1366_v43  ;;  %v1536_v37 = vld [vmem:[#allocation5 + $0x2cd0] sm:$0xff]  ;;  %v1559_v38 = vld [vmem:[#allocation5 + $0x2d88] sm:$0xff] }
 0x2eb   :  { %9345 = vmatpush1.bf16.msra.mxu0 %v9344_v51  ;;  %v1439_v51 = vld [vmem:[#allocation5 + $0x29c8] sm:$0xff]  ;;  %v9500_v45 = vpack.c.bf16 %v1536_v37, %v1512_v35  ;;  %v173_v35 = vld [vmem:[#allocation5 + $0x238] sm:$0xff] }
 0x2ec   :  { %9473 = vmatpush1.bf16.msra.mxu1 %v9472_v52  ;;  %9347 = vmatprep.subr.bf16.mxu0 %v9346_v53  ;;  %v1417_v52 = vld [vmem:[#allocation5 + $0x2918] sm:$0xff]  ;;  %v9362_v58 = vpack.c.bf16 %v1439_v51, %v1415_v49  ;;  %v1560_v49 = vld [vmem:[#allocation5 + $0x2d90] sm:$0xff] }
 0x2ed   :  { %9475 = vmatprep.subr.bf16.mxu1 %v9474_v60  ;;  %v1441_v53 = vld [vmem:[#allocation5 + $0x29d8] sm:$0xff]  ;;  %v1414_v60 = vld [vmem:[#allocation5 + $0x2900] sm:$0xff] }
 0x2ee   :  { %v9490_v0 = vpack.c.bf16 %v1441_v53, %v1417_v52  ;;  %v9364_v7 = vpack.c.bf16 %v1438_v61, %v1414_v60  ;;  %v1584_v52 = vld [vmem:[#allocation5 + $0x2e50] sm:$0xff]  ;;  %v1607_v53 = vld [vmem:[#allocation5 + $0x2f08] sm:$0xff] }
 0x2ef   :  { %9349 = vmatpush1.bf16.msra.mxu0 %v9348_v3  ;;  %v1487_v3 = vld [vmem:[#allocation5 + $0x2b48] sm:$0xff]  ;;  %v9504_v61 = vpack.c.bf16 %v1584_v52, %v1560_v49  ;;  %v11419_v49 = vld.sshfl [vmem:[#allocation2 + $0x8] sm:$0x3 pattern:$0x76325410] }
 0x2f0   :  { %9477 = vmatpush1.bf16.msra.mxu1 %v9476_v4  ;;  %9351 = vmatprep.subr.bf16.mxu0 %v9350_v5  ;;  %v1465_v4 = vld [vmem:[#allocation5 + $0x2a98] sm:$0xff]  ;;  %v9366_v10 = vpack.c.bf16 %v1487_v3, %v1463_v2  ;;  %v1608_v3 = vld [vmem:[#allocation5 + $0x2f10] sm:$0xff] }
 0x2f1   :  { %9479 = vmatprep.subr.bf16.mxu1 %v9478_v12  ;;  %v1489_v5 = vld [vmem:[#allocation5 + $0x2b58] sm:$0xff]  ;;  %v1462_v12 = vld [vmem:[#allocation5 + $0x2a80] sm:$0xff] }
 0x2f2   :  { %v9494_v21 = vpack.c.bf16 %v1489_v5, %v1465_v4  ;;  %v9368_v29 = vpack.c.bf16 %v1486_v17, %v1462_v12  ;;  %v1632_v4 = vld [vmem:[#allocation5 + $0x2fd0] sm:$0xff]  ;;  %v123_v12 = vld [vmem:[#allocation5 + $0xa8] sm:$0xff]  ;;  %v245_v52 = vld [vmem:[#allocation5 + $0x478] sm:$0xff] }
 0x2f3   :  { %9353 = vmatpush1.bf16.msra.mxu0 %v9352_v22  ;;  %v1535_v22 = vld [vmem:[#allocation5 + $0x2cc8] sm:$0xff] }
 0x2f4   :  { %9481 = vmatpush1.bf16.msra.mxu1 %v9480_v27  ;;  %9355 = vmatprep.subr.bf16.mxu0 %v9354_v28  ;;  %v1513_v27 = vld [vmem:[#allocation5 + $0x2c18] sm:$0xff]  ;;  %v9370_v31 = vpack.c.bf16 %v1535_v22, %v1511_v24  ;;  %v147_v17 = vld [vmem:[#allocation5 + $0x168] sm:$0xff]  ;;  %v1656_v24 = vld [vmem:[#allocation5 + $0x3090] sm:$0x7] }
 0x2f5   :  { %9483 = vmatprep.subr.bf16.mxu1 %v9482_v33  ;;  %v1537_v28 = vld [vmem:[#allocation5 + $0x2cd8] sm:$0xff]  ;;  %v1510_v33 = vld [vmem:[#allocation5 + $0x2c00] sm:$0xff]  ;;  %v9510_v22 = vpack.c.bf16 %v147_v17, %v123_v12  ;;  %v268_v17 = vld [vmem:[#allocation5 + $0x530] sm:$0xff] }
 0x2f6   :  { %v9498_v36 = vpack.c.bf16 %v1537_v28, %v1513_v27  ;;  %v9372_v43 = vpack.c.bf16 %v1534_v34, %v1510_v33  ;;  %v122_v28 = vld [vmem:[#allocation5 + $0xa0] sm:$0xff]  ;;  %v171_v33 = vld [vmem:[#allocation5 + $0x228] sm:$0xff] }
 0x2f7   :  { %9357 = vmatpush1.bf16.msra.mxu0 %v9356_v40  ;;  %v1583_v40 = vld [vmem:[#allocation5 + $0x2e48] sm:$0xff]  ;;  %v290_v12 = vld [vmem:[#allocation5 + $0x5e0] sm:$0xff] }
 0x2f8   :  { %9485 = vmatpush1.bf16.msra.mxu1 %v9484_v41  ;;  %9359 = vmatprep.subr.bf16.mxu0 %v9358_v42  ;;  %v1561_v41 = vld [vmem:[#allocation5 + $0x2d98] sm:$0xff]  ;;  %v9374_v46 = vpack.c.bf16 %v1583_v40, %v1559_v38  ;;  %v195_v34 = vld [vmem:[#allocation5 + $0x2e8] sm:$0xff] }
 0x2f9   :  { %9487 = vmatprep.subr.bf16.mxu1 %v9486_v47  ;;  %v1585_v42 = vld [vmem:[#allocation5 + $0x2e58] sm:$0xff]  ;;  %v1558_v47 = vld [vmem:[#allocation5 + $0x2d80] sm:$0xff]  ;;  %v9514_v40 = vpack.c.bf16 %v195_v34, %v171_v33  ;;  %v316_v33 = vld [vmem:[#allocation5 + $0x6b0] sm:$0xff] }
 0x2fa   :  { %v9502_v51 = vpack.c.bf16 %v1585_v42, %v1561_v41  ;;  %v9376_v60 = vpack.c.bf16 %v1582_v48, %v1558_v47  ;;  %v170_v41 = vld [vmem:[#allocation5 + $0x220] sm:$0xff]  ;;  %v219_v47 = vld [vmem:[#allocation5 + $0x3a8] sm:$0xff] }
 0x2fb   :  { %9361 = vmatpush1.bf16.msra.mxu0 %v9360_v54  ;;  %v1631_v54 = vld [vmem:[#allocation5 + $0x2fc8] sm:$0xff]  ;;  %v194_v42 = vld [vmem:[#allocation5 + $0x2e0] sm:$0xff] }
 0x2fc   :  { %9489 = vmatpush1.bf16.msra.mxu1 %v9488_v57  ;;  %9363 = vmatprep.subr.bf16.mxu0 %v9362_v58  ;;  %v1609_v57 = vld [vmem:[#allocation5 + $0x2f18] sm:$0xff]  ;;  %v9378_v63 = vpack.c.bf16 %v1631_v54, %v1607_v53  ;;  %v243_v48 = vld [vmem:[#allocation5 + $0x468] sm:$0xff]  ;;  %v9516_v53 = vpack.c.bf16 %v194_v42, %v170_v41 }
 0x2fd   :  { %9491 = vmatprep.subr.bf16.mxu1 %v9490_v0  ;;  %v1633_v58 = vld [vmem:[#allocation5 + $0x2fd8] sm:$0xff]  ;;  %v1606_v0 = vld [vmem:[#allocation5 + $0x2f00] sm:$0xff] }
 0x2fe   :  { %v9506_v2 = vpack.c.bf16 %v1633_v58, %v1609_v57  ;;  %v9380_v5 = vpack.c.bf16 %v1630_v1, %v1606_v0  ;;  %v9518_v57 = vpack.c.bf16 %v243_v48, %v219_v47  ;;  %v218_v58 = vld [vmem:[#allocation5 + $0x3a0] sm:$0xff]  ;;  %v244_v0 = vld [vmem:[#allocation5 + $0x470] sm:$0xff]  ;;  %v267_v1 = vld [vmem:[#allocation5 + $0x528] sm:$0xff] }
 0x2ff   :  { %9365 = vmatpush1.bf16.msra.mxu0 %v9364_v7  ;;  %v9508_v7 = vpack.c.bf16 %v1632_v4, %v1608_v3  ;;  %v269_v3 = vld [vmem:[#allocation5 + $0x538] sm:$0xff]  ;;  %v364_v47 = vld [vmem:[#allocation5 + $0x830] sm:$0xff] }
 0x300   :  { %9493 = vmatpush1.bf16.msra.mxu1 %v9492_v8  ;;  %9367 = vmatprep.subr.bf16.mxu0 %v9366_v10  ;;  %v1655_v8 = vld [vmem:[#allocation5 + $0x3088] sm:$0x7]  ;;  %v1657_v10 = vld [vmem:[#allocation5 + $0x3098] sm:$0x7] }
 0x301   :  { %9495 = vmatprep.subr.bf16.mxu1 %v9494_v21  ;;  %v149_v21 = vld [vmem:[#allocation5 + $0x178] sm:$0xff] }
 0x302   :  { %v9638_v27 = vpack.c.bf16 %v149_v21, %v125_v18  ;;  %v293_v4 = vld [vmem:[#allocation5 + $0x5f8] sm:$0xff]  ;;  %v292_v21 = vld [vmem:[#allocation5 + $0x5f0] sm:$0xff] }
 0x303   :  { %9369 = vmatpush1.bf16.msra.mxu0 %v9368_v29  ;;  %v146_v29 = vld [vmem:[#allocation5 + $0x160] sm:$0xff]  ;;  %v9650_v18 = vpack.c.bf16 %v293_v4, %v269_v3  ;;  %v459_v3 = vld [vmem:[#allocation5 + $0xb28] sm:$0xff] }
 0x304   :  { %9497 = vmatpush1.bf16.msra.mxu1 %v9496_v30  ;;  %9371 = vmatprep.subr.bf16.mxu0 %v9370_v31  ;;  %v124_v30 = vld [vmem:[#allocation5 + $0xb0] sm:$0xff]  ;;  %v9512_v37 = vpack.c.bf16 %v146_v29, %v122_v28  ;;  %v483_v4 = vld [vmem:[#allocation5 + $0xbe8] sm:$0xff] }
 0x305   :  { %9499 = vmatprep.subr.bf16.mxu1 %v9498_v36  ;;  %v148_v31 = vld [vmem:[#allocation5 + $0x170] sm:$0xff]  ;;  %v197_v36 = vld [vmem:[#allocation5 + $0x2f8] sm:$0xff] }
 0x306   :  { %v9640_v38 = vpack.c.bf16 %v148_v31, %v124_v30  ;;  %v314_v30 = vld [vmem:[#allocation5 + $0x6a0] sm:$0xff] }
 0x307   :  { %9373 = vmatpush1.bf16.msra.mxu0 %v9372_v43  ;;  %v172_v43 = vld [vmem:[#allocation5 + $0x230] sm:$0xff]  ;;  %v338_v31 = vld [vmem:[#allocation5 + $0x760] sm:$0xff] }
 0x308   :  { %9501 = vmatpush1.bf16.msra.mxu1 %v9500_v45  ;;  %9375 = vmatprep.subr.bf16.mxu0 %v9374_v46  ;;  %v9642_v45 = vpack.c.bf16 %v197_v36, %v173_v35  ;;  %v196_v46 = vld [vmem:[#allocation5 + $0x2f0] sm:$0xff]  ;;  %v363_v36 = vld [vmem:[#allocation5 + $0x828] sm:$0xff]  ;;  %v9528_v41 = vpack.c.bf16 %v338_v31, %v314_v30 }
 0x309   :  { %9503 = vmatprep.subr.bf16.mxu1 %v9502_v51  ;;  %v221_v51 = vld [vmem:[#allocation5 + $0x3b8] sm:$0xff]  ;;  %v9644_v54 = vpack.c.bf16 %v196_v46, %v172_v43  ;;  %v340_v35 = vld [vmem:[#allocation5 + $0x770] sm:$0xff]  ;;  %v386_v46 = vld [vmem:[#allocation5 + $0x8e0] sm:$0xff] }
 0x30a   :  { %v9656_v42 = vpack.c.bf16 %v340_v35, %v316_v33  ;;  %v506_v33 = vld [vmem:[#allocation5 + $0xca0] sm:$0xff]  ;;  %v508_v35 = vld [vmem:[#allocation5 + $0xcb0] sm:$0xff] }
 0x30b   :  { %9377 = vmatpush1.bf16.msra.mxu0 %v9376_v60  ;;  %v242_v60 = vld [vmem:[#allocation5 + $0x460] sm:$0xff] }
 0x30c   :  { %9505 = vmatpush1.bf16.msra.mxu1 %v9504_v61  ;;  %9379 = vmatprep.subr.bf16.mxu0 %v9378_v63  ;;  %v220_v61 = vld [vmem:[#allocation5 + $0x3b0] sm:$0xff]  ;;  %v9646_v63 = vpack.c.bf16 %v245_v52, %v221_v51  ;;  %v411_v51 = vld [vmem:[#allocation5 + $0x9a8] sm:$0xff] }
 0x30d   :  { %9507 = vmatprep.subr.bf16.mxu1 %v9506_v2  ;;  %v291_v2 = vld [vmem:[#allocation5 + $0x5e8] sm:$0xff] }
 0x30e   :  { %v435_v52 = vld [vmem:[#allocation5 + $0xa68] sm:$0xff] }
 0x30f   :  { %9381 = vmatpush1.bf16.msra.mxu0 %v9380_v5  ;;  %v9520_v5 = vpack.c.bf16 %v242_v60, %v218_v58  ;;  %v9534_v60 = vpack.c.bf16 %v435_v52, %v411_v51  ;;  %v580_v52 = vld [vmem:[#allocation5 + $0xef0] sm:$0xff] }
 0x310   :  { %9509 = vmatpush1.bf16.msra.mxu1 %v9508_v7  ;;  %8218 = vmatprep.subr.msk.mxu0 %vm1695_vm0, %v1655_v8  ;;  %v9648_v7 = vpack.c.bf16 %v244_v0, %v220_v61  ;;  %v9522_v8 = vpack.c.bf16 %v291_v2, %v267_v1  ;;  %v410_v61 = vld [vmem:[#allocation5 + $0x9a0] sm:$0xff]  ;;  %v412_v0 = vld [vmem:[#allocation5 + $0x9b0] sm:$0xff] }
 0x311   :  { %8221 = vmatprep.subr.msk.mxu1 %vm1695_vm0, %v1657_v10  ;;  %v266_v10 = vld [vmem:[#allocation5 + $0x520] sm:$0xff]  ;;  %v436_v2 = vld [vmem:[#allocation5 + $0xa70] sm:$0xff] }
 0x312   :  { %3608 = vmatmul.mubr.f32.vlgmr.msra.gmra.mrb[8].mxu0 %v11741_v26  ;;  %v9524_v28 = vpack.c.bf16 %v290_v12, %v266_v10  ;;  %v9664_v10 = vpack.c.bf16 %v436_v2, %v412_v0  ;;  %v9538_v12 = vpack.c.bf16 %v483_v4, %v459_v3  ;;  %v602_v0 = vld [vmem:[#allocation5 + $0xfa0] sm:$0xff]  ;;  %v604_v2 = vld [vmem:[#allocation5 + $0xfb0] sm:$0xff] }
 0x313   :  { %3821 = vmatmul.mubr.f32.vlgmr.msra.gmra.mrb[8].mxu1 %v11741_v26  ;;  %8219 = vmatpush1.msk.msra.mxu0 %vm1695_vm0, %v1654_v23  ;;  %v315_v23 = vld [vmem:[#allocation5 + $0x6a8] sm:$0xff]  ;;  %v628_v4 = vld [vmem:[#allocation5 + $0x1070] sm:$0xff] }
 0x314   :  { %8222 = vmatpush1.msk.msra.mxu1 %vm1695_vm0, %v1656_v24  ;;  %3678 = vmatprep.mubr.f32.mxu0 %v11610_v44  ;;  %v339_v24 = vld [vmem:[#allocation5 + $0x768] sm:$0xff] }
 0x315   :  { %3891 = vmatprep.mubr.f32.mxu1 %v11610_v44  ;;  %9511 = vmatprep.subr.bf16.mxu0 %v9510_v22  ;;  %v317_v22 = vld [vmem:[#allocation5 + $0x6b8] sm:$0xff]  ;;  %v9526_v29 = vpack.c.bf16 %v339_v24, %v315_v23  ;;  %v484_v24 = vld [vmem:[#allocation5 + $0xbf0] sm:$0xff] }
 0x316   :  { %9639 = vmatprep.subr.bf16.mxu1 %v9638_v27  ;;  %v341_v27 = vld [vmem:[#allocation5 + $0x778] sm:$0xff] }
 0x317   :  { %v9654_v34 = vpack.c.bf16 %v341_v27, %v317_v22  ;;  %v507_v22 = vld [vmem:[#allocation5 + $0xca8] sm:$0xff] }
 0x318   :  { %v531_v27 = vld [vmem:[#allocation5 + $0xd68] sm:$0xff] }
 0x319   :  { %v9542_v31 = vpack.c.bf16 %v531_v27, %v507_v22  ;;  %v676_v27 = vld [vmem:[#allocation5 + $0x11f0] sm:$0xff] }
 0x31a   :  { %8220 = vmatmul.mubr.msk.f32.vlgmr.msra.gmra.mrb[8].mxu0 %vm1692_vm1, %v11419_v49 }
 0x31b   :  { %8223 = vmatmul.mubr.msk.f32.vlgmr.msra.gmra.mrb[8].mxu1 %vm1692_vm1, %v11419_v49  ;;  %9513 = vmatpush1.bf16.msra.mxu0 %v9512_v37  ;;  %v387_v37 = vld [vmem:[#allocation5 + $0x8e8] sm:$0xff]  ;;  %v388_v49 = vld [vmem:[#allocation5 + $0x8f0] sm:$0xff] }
 0x31c   :  { %9641 = vmatpush1.bf16.msra.mxu1 %v9640_v38  ;;  %9515 = vmatprep.subr.bf16.mxu0 %v9514_v40  ;;  %v365_v38 = vld [vmem:[#allocation5 + $0x838] sm:$0xff]  ;;  %v9530_v43 = vpack.c.bf16 %v387_v37, %v363_v36  ;;  %v9660_v58 = vpack.c.bf16 %v388_v49, %v364_v47  ;;  %v532_v37 = vld [vmem:[#allocation5 + $0xd70] sm:$0xff]  ;;  %v554_v47 = vld [vmem:[#allocation5 + $0xe20] sm:$0xff] }
 0x31d   :  { %9643 = vmatprep.subr.bf16.mxu1 %v9642_v45  ;;  %3962 = vmatprep.mubr.f32.mxu0 %v11734_v32  ;;  %v389_v40 = vld [vmem:[#allocation5 + $0x8f8] sm:$0xff]  ;;  %v362_v45 = vld [vmem:[#allocation5 + $0x820] sm:$0xff]  ;;  %v556_v49 = vld [vmem:[#allocation5 + $0xe30] sm:$0xff] }
 0x31e   :  { %4175 = vmatprep.mubr.f32.mxu1 %v11734_v32  ;;  %v9652_v32 = vpack.c.bf16 %v292_v21, %v268_v17  ;;  %v9658_v48 = vpack.c.bf16 %v389_v40, %v365_v38  ;;  %v458_v17 = vld [vmem:[#allocation5 + $0xb20] sm:$0xff]  ;;  %v460_v21 = vld [vmem:[#allocation5 + $0xb30] sm:$0xff]  ;;  %v555_v38 = vld [vmem:[#allocation5 + $0xe28] sm:$0xff] }
 0x31f   :  { %9517 = vmatpush1.bf16.msra.mxu0 %v9516_v53  ;;  %v413_v53 = vld [vmem:[#allocation5 + $0x9b8] sm:$0xff]  ;;  %v9668_v30 = vpack.c.bf16 %v484_v24, %v460_v21  ;;  %v579_v40 = vld [vmem:[#allocation5 + $0xee8] sm:$0xff]  ;;  %v650_v21 = vld [vmem:[#allocation5 + $0x1120] sm:$0xff] }
 0x320   :  { %9645 = vmatpush1.bf16.msra.mxu1 %v9644_v54  ;;  %9519 = vmatprep.subr.bf16.mxu0 %v9518_v57  ;;  %v437_v54 = vld [vmem:[#allocation5 + $0xa78] sm:$0xff]  ;;  %v9532_v57 = vpack.c.bf16 %v386_v46, %v362_v45  ;;  %v9672_v45 = vpack.c.bf16 %v532_v37, %v508_v35  ;;  %v9546_v46 = vpack.c.bf16 %v579_v40, %v555_v38  ;;  %v652_v24 = vld [vmem:[#allocation5 + $0x1130] sm:$0xff]  ;;  %v698_v35 = vld [vmem:[#allocation5 + $0x12a0] sm:$0xff] }
 0x321   :  { %9647 = vmatprep.subr.bf16.mxu1 %v9646_v63  ;;  %v434_v63 = vld [vmem:[#allocation5 + $0xa60] sm:$0xff]  ;;  %v9662_v1 = vpack.c.bf16 %v437_v54, %v413_v53  ;;  %v603_v53 = vld [vmem:[#allocation5 + $0xfa8] sm:$0xff]  ;;  %v700_v37 = vld [vmem:[#allocation5 + $0x12b0] sm:$0xff] }
 0x322   :  { %v627_v54 = vld [vmem:[#allocation5 + $0x1068] sm:$0xff]  ;;  %v724_v40 = vld [vmem:[#allocation5 + $0x1370] sm:$0xff] }
 0x323   :  { %9521 = vmatpush1.bf16.msra.mxu0 %v9520_v5  ;;  %v461_v5 = vld [vmem:[#allocation5 + $0xb38] sm:$0xff] }
 0x324   :  { %9649 = vmatpush1.bf16.msra.mxu1 %v9648_v7  ;;  %9523 = vmatprep.subr.bf16.mxu0 %v9522_v8  ;;  %v485_v7 = vld [vmem:[#allocation5 + $0xbf8] sm:$0xff]  ;;  %v9536_v8 = vpack.c.bf16 %v434_v63, %v410_v61  ;;  %v9676_v61 = vpack.c.bf16 %v580_v52, %v556_v49  ;;  %v9550_v63 = vpack.c.bf16 %v627_v54, %v603_v53  ;;  %v746_v49 = vld [vmem:[#allocation5 + $0x1420] sm:$0xff]  ;;  %v748_v52 = vld [vmem:[#allocation5 + $0x1430] sm:$0xff] }
 0x325   :  { %9651 = vmatprep.subr.bf16.mxu1 %v9650_v18  ;;  %v482_v18 = vld [vmem:[#allocation5 + $0xbe0] sm:$0xff]  ;;  %v9666_v23 = vpack.c.bf16 %v485_v7, %v461_v5  ;;  %v651_v5 = vld [vmem:[#allocation5 + $0x1128] sm:$0xff]  ;;  %v772_v54 = vld [vmem:[#allocation5 + $0x14f0] sm:$0xff] }
 0x326   :  { %v675_v7 = vld [vmem:[#allocation5 + $0x11e8] sm:$0xff] }
 0x327   :  { %9525 = vmatpush1.bf16.msra.mxu0 %v9524_v28  ;;  %v509_v28 = vld [vmem:[#allocation5 + $0xcb8] sm:$0xff] }
 0x328   :  { %9653 = vmatpush1.bf16.msra.mxu1 %v9652_v32  ;;  %9527 = vmatprep.subr.bf16.mxu0 %v9526_v29  ;;  %v533_v32 = vld [vmem:[#allocation5 + $0xd78] sm:$0xff]  ;;  %v9540_v29 = vpack.c.bf16 %v482_v18, %v458_v17  ;;  %v9680_v17 = vpack.c.bf16 %v628_v4, %v604_v2  ;;  %v9554_v18 = vpack.c.bf16 %v675_v7, %v651_v5  ;;  %v794_v2 = vld [vmem:[#allocation5 + $0x15a0] sm:$0xff]  ;;  %v796_v4 = vld [vmem:[#allocation5 + $0x15b0] sm:$0xff] }
 0x329   :  { %9655 = vmatprep.subr.bf16.mxu1 %v9654_v34  ;;  %v530_v34 = vld [vmem:[#allocation5 + $0xd60] sm:$0xff]  ;;  %v9670_v36 = vpack.c.bf16 %v533_v32, %v509_v28  ;;  %v699_v28 = vld [vmem:[#allocation5 + $0x12a8] sm:$0xff]  ;;  %v820_v7 = vld [vmem:[#allocation5 + $0x1670] sm:$0xff] }
 0x32a   :  { %v723_v32 = vld [vmem:[#allocation5 + $0x1368] sm:$0xff] }
 0x32b   :  { %9529 = vmatpush1.bf16.msra.mxu0 %v9528_v41  ;;  %v557_v41 = vld [vmem:[#allocation5 + $0xe38] sm:$0xff] }
 0x32c   :  { %9657 = vmatpush1.bf16.msra.mxu1 %v9656_v42  ;;  %9531 = vmatprep.subr.bf16.mxu0 %v9530_v43  ;;  %v581_v42 = vld [vmem:[#allocation5 + $0xef8] sm:$0xff]  ;;  %v9544_v43 = vpack.c.bf16 %v530_v34, %v506_v33  ;;  %v9684_v33 = vpack.c.bf16 %v676_v27, %v652_v24  ;;  %v9558_v34 = vpack.c.bf16 %v723_v32, %v699_v28  ;;  %v842_v24 = vld [vmem:[#allocation5 + $0x1720] sm:$0xff]  ;;  %v844_v27 = vld [vmem:[#allocation5 + $0x1730] sm:$0xff] }
 0x32d   :  { %9659 = vmatprep.subr.bf16.mxu1 %v9658_v48  ;;  %v578_v48 = vld [vmem:[#allocation5 + $0xee0] sm:$0xff]  ;;  %v9674_v51 = vpack.c.bf16 %v581_v42, %v557_v41  ;;  %v747_v41 = vld [vmem:[#allocation5 + $0x1428] sm:$0xff]  ;;  %v868_v32 = vld [vmem:[#allocation5 + $0x17f0] sm:$0xff] }
 0x32e   :  { %v771_v42 = vld [vmem:[#allocation5 + $0x14e8] sm:$0xff] }
 0x32f   :  { %9533 = vmatpush1.bf16.msra.mxu0 %v9532_v57  ;;  %v605_v57 = vld [vmem:[#allocation5 + $0xfb8] sm:$0xff] }
 0x330   :  { %9661 = vmatpush1.bf16.msra.mxu1 %v9660_v58  ;;  %9535 = vmatprep.subr.bf16.mxu0 %v9534_v60  ;;  %v629_v58 = vld [vmem:[#allocation5 + $0x1078] sm:$0xff]  ;;  %v9548_v60 = vpack.c.bf16 %v578_v48, %v554_v47  ;;  %v9688_v47 = vpack.c.bf16 %v724_v40, %v700_v37  ;;  %v9562_v48 = vpack.c.bf16 %v771_v42, %v747_v41  ;;  %v890_v37 = vld [vmem:[#allocation5 + $0x18a0] sm:$0xff]  ;;  %v892_v40 = vld [vmem:[#allocation5 + $0x18b0] sm:$0xff] }
 0x331   :  { %9663 = vmatprep.subr.bf16.mxu1 %v9662_v1  ;;  %v626_v1 = vld [vmem:[#allocation5 + $0x1060] sm:$0xff]  ;;  %v9678_v3 = vpack.c.bf16 %v629_v58, %v605_v57  ;;  %v795_v57 = vld [vmem:[#allocation5 + $0x15a8] sm:$0xff]  ;;  %v916_v42 = vld [vmem:[#allocation5 + $0x1970] sm:$0xff] }
 0x332   :  { %v819_v58 = vld [vmem:[#allocation5 + $0x1668] sm:$0xff] }
 0x333   :  { %9537 = vmatpush1.bf16.msra.mxu0 %v9536_v8  ;;  %v653_v8 = vld [vmem:[#allocation5 + $0x1138] sm:$0xff] }
 0x334   :  { %9665 = vmatpush1.bf16.msra.mxu1 %v9664_v10  ;;  %9539 = vmatprep.subr.bf16.mxu0 %v9538_v12  ;;  %v677_v10 = vld [vmem:[#allocation5 + $0x11f8] sm:$0xff]  ;;  %v9552_v12 = vpack.c.bf16 %v626_v1, %v602_v0  ;;  %v9692_v0 = vpack.c.bf16 %v772_v54, %v748_v52  ;;  %v9566_v1 = vpack.c.bf16 %v819_v58, %v795_v57  ;;  %v938_v52 = vld [vmem:[#allocation5 + $0x1a20] sm:$0xff]  ;;  %v940_v54 = vld [vmem:[#allocation5 + $0x1a30] sm:$0xff] }
 0x335   :  { %9667 = vmatprep.subr.bf16.mxu1 %v9666_v23  ;;  %v674_v23 = vld [vmem:[#allocation5 + $0x11e0] sm:$0xff]  ;;  %v9682_v22 = vpack.c.bf16 %v677_v10, %v653_v8  ;;  %v843_v8 = vld [vmem:[#allocation5 + $0x1728] sm:$0xff]  ;;  %v964_v58 = vld [vmem:[#allocation5 + $0x1af0] sm:$0xff] }
 0x336   :  { %v867_v10 = vld [vmem:[#allocation5 + $0x17e8] sm:$0xff] }
 0x337   :  { %9541 = vmatpush1.bf16.msra.mxu0 %v9540_v29  ;;  %v701_v29 = vld [vmem:[#allocation5 + $0x12b8] sm:$0xff] }
 0x338   :  { %9669 = vmatpush1.bf16.msra.mxu1 %v9668_v30  ;;  %9543 = vmatprep.subr.bf16.mxu0 %v9542_v31  ;;  %v725_v30 = vld [vmem:[#allocation5 + $0x1378] sm:$0xff]  ;;  %v9556_v31 = vpack.c.bf16 %v674_v23, %v650_v21  ;;  %v9696_v21 = vpack.c.bf16 %v820_v7, %v796_v4  ;;  %v9570_v23 = vpack.c.bf16 %v867_v10, %v843_v8  ;;  %v986_v4 = vld [vmem:[#allocation5 + $0x1ba0] sm:$0xff]  ;;  %v988_v7 = vld [vmem:[#allocation5 + $0x1bb0] sm:$0xff] }
 0x339   :  { %9671 = vmatprep.subr.bf16.mxu1 %v9670_v36  ;;  %v722_v36 = vld [vmem:[#allocation5 + $0x1360] sm:$0xff]  ;;  %v9686_v38 = vpack.c.bf16 %v725_v30, %v701_v29  ;;  %v891_v29 = vld [vmem:[#allocation5 + $0x18a8] sm:$0xff]  ;;  %v1012_v10 = vld [vmem:[#allocation5 + $0x1c70] sm:$0xff] }
 0x33a   :  { %v915_v30 = vld [vmem:[#allocation5 + $0x1968] sm:$0xff] }
 0x33b   :  { %9545 = vmatpush1.bf16.msra.mxu0 %v9544_v43  ;;  %v749_v43 = vld [vmem:[#allocation5 + $0x1438] sm:$0xff] }
 0x33c   :  { %9673 = vmatpush1.bf16.msra.mxu1 %v9672_v45  ;;  %9547 = vmatprep.subr.bf16.mxu0 %v9546_v46  ;;  %v773_v45 = vld [vmem:[#allocation5 + $0x14f8] sm:$0xff]  ;;  %v9560_v46 = vpack.c.bf16 %v722_v36, %v698_v35  ;;  %v9700_v35 = vpack.c.bf16 %v868_v32, %v844_v27  ;;  %v9574_v36 = vpack.c.bf16 %v915_v30, %v891_v29  ;;  %v1058_v27 = vld [vmem:[#allocation5 + $0x1de0] sm:$0xff]  ;;  %v1060_v29 = vld [vmem:[#allocation5 + $0x1df0] sm:$0xff] }
 0x33d   :  { %9675 = vmatprep.subr.bf16.mxu1 %v9674_v51  ;;  %v770_v51 = vld [vmem:[#allocation5 + $0x14e0] sm:$0xff]  ;;  %v9690_v53 = vpack.c.bf16 %v773_v45, %v749_v43  ;;  %v939_v43 = vld [vmem:[#allocation5 + $0x1a28] sm:$0xff] }
 0x33e   :  { %v963_v45 = vld [vmem:[#allocation5 + $0x1ae8] sm:$0xff] }
 0x33f   :  { %9549 = vmatpush1.bf16.msra.mxu0 %v9548_v60  ;;  %v797_v60 = vld [vmem:[#allocation5 + $0x15b8] sm:$0xff]  ;;  %v1083_v30 = vld [vmem:[#allocation5 + $0x1ea8] sm:$0xff] }
 0x340   :  { %9677 = vmatpush1.bf16.msra.mxu1 %v9676_v61  ;;  %9551 = vmatprep.subr.bf16.mxu0 %v9550_v63  ;;  %v821_v61 = vld [vmem:[#allocation5 + $0x1678] sm:$0xff]  ;;  %v9564_v63 = vpack.c.bf16 %v770_v51, %v746_v49  ;;  %v9704_v49 = vpack.c.bf16 %v916_v42, %v892_v40  ;;  %v9578_v51 = vpack.c.bf16 %v963_v45, %v939_v43  ;;  %v1084_v40 = vld [vmem:[#allocation5 + $0x1eb0] sm:$0xff]  ;;  %v1131_v45 = vld [vmem:[#allocation5 + $0x2028] sm:$0xff] }
 0x341   :  { %9679 = vmatprep.subr.bf16.mxu1 %v9678_v3  ;;  %v818_v3 = vld [vmem:[#allocation5 + $0x1660] sm:$0xff]  ;;  %v9694_v5 = vpack.c.bf16 %v821_v61, %v797_v60  ;;  %v987_v60 = vld [vmem:[#allocation5 + $0x1ba8] sm:$0xff]  ;;  %v1108_v43 = vld [vmem:[#allocation5 + $0x1f70] sm:$0xff] }
 0x342   :  { %v1011_v61 = vld [vmem:[#allocation5 + $0x1c68] sm:$0xff] }
 0x343   :  { %9553 = vmatpush1.bf16.msra.mxu0 %v9552_v12  ;;  %v845_v12 = vld [vmem:[#allocation5 + $0x1738] sm:$0xff] }
 0x344   :  { %9681 = vmatpush1.bf16.msra.mxu1 %v9680_v17  ;;  %9555 = vmatprep.subr.bf16.mxu0 %v9554_v18  ;;  %v869_v17 = vld [vmem:[#allocation5 + $0x17f8] sm:$0xff]  ;;  %v9568_v18 = vpack.c.bf16 %v818_v3, %v794_v2  ;;  %v9708_v2 = vpack.c.bf16 %v964_v58, %v940_v54  ;;  %v9582_v3 = vpack.c.bf16 %v1011_v61, %v987_v60  ;;  %v1130_v58 = vld [vmem:[#allocation5 + $0x2020] sm:$0xff]  ;;  %v1132_v61 = vld [vmem:[#allocation5 + $0x2030] sm:$0xff] }
 0x345   :  { %9683 = vmatprep.subr.bf16.mxu1 %v9682_v22  ;;  %v866_v22 = vld [vmem:[#allocation5 + $0x17e0] sm:$0xff]  ;;  %v9698_v28 = vpack.c.bf16 %v869_v17, %v845_v12  ;;  %v1035_v12 = vld [vmem:[#allocation5 + $0x1d28] sm:$0xff]  ;;  %v9720_v54 = vpack.c.bf16 %v1108_v43, %v1084_v40 }
 0x346   :  { %v1059_v17 = vld [vmem:[#allocation5 + $0x1de8] sm:$0xff]  ;;  %v1154_v60 = vld [vmem:[#allocation5 + $0x20e0] sm:$0xff] }
 0x347   :  { %9557 = vmatpush1.bf16.msra.mxu0 %v9556_v31  ;;  %v893_v31 = vld [vmem:[#allocation5 + $0x18b8] sm:$0xff]  ;;  %v1274_v43 = vld [vmem:[#allocation5 + $0x24a0] sm:$0xff] }
 0x348   :  { %9685 = vmatpush1.bf16.msra.mxu1 %v9684_v33  ;;  %9559 = vmatprep.subr.bf16.mxu0 %v9558_v34  ;;  %v917_v33 = vld [vmem:[#allocation5 + $0x1978] sm:$0xff]  ;;  %v9572_v34 = vpack.c.bf16 %v866_v22, %v842_v24  ;;  %v9586_v24 = vpack.c.bf16 %v1059_v17, %v1035_v12  ;;  %v1034_v22 = vld [vmem:[#allocation5 + $0x1d20] sm:$0xff]  ;;  %v1180_v17 = vld [vmem:[#allocation5 + $0x21b0] sm:$0xff] }
 0x349   :  { %9687 = vmatprep.subr.bf16.mxu1 %v9686_v38  ;;  %v914_v38 = vld [vmem:[#allocation5 + $0x1960] sm:$0xff]  ;;  %v9702_v41 = vpack.c.bf16 %v917_v33, %v893_v31  ;;  %v1107_v31 = vld [vmem:[#allocation5 + $0x1f68] sm:$0xff]  ;;  %v1085_v33 = vld [vmem:[#allocation5 + $0x1eb8] sm:$0xff] }
 0x34a   :  { %v1202_v12 = vld [vmem:[#allocation5 + $0x2260] sm:$0xff] }
 0x34b   :  { %9561 = vmatpush1.bf16.msra.mxu0 %v9560_v46  ;;  %v941_v46 = vld [vmem:[#allocation5 + $0x1a38] sm:$0xff] }
 0x34c   :  { %9689 = vmatpush1.bf16.msra.mxu1 %v9688_v47  ;;  %9563 = vmatprep.subr.bf16.mxu0 %v9562_v48  ;;  %v965_v47 = vld [vmem:[#allocation5 + $0x1af8] sm:$0xff]  ;;  %v9576_v48 = vpack.c.bf16 %v914_v38, %v890_v37  ;;  %v1082_v37 = vld [vmem:[#allocation5 + $0x1ea0] sm:$0xff] }
 0x34d   :  { %9691 = vmatprep.subr.bf16.mxu1 %v9690_v53  ;;  %v962_v53 = vld [vmem:[#allocation5 + $0x1ae0] sm:$0xff]  ;;  %v9706_v57 = vpack.c.bf16 %v965_v47, %v941_v46  ;;  %v1155_v46 = vld [vmem:[#allocation5 + $0x20e8] sm:$0xff] }
 0x34e   :  { %v1106_v38 = vld [vmem:[#allocation5 + $0x1f60] sm:$0xff] }
 0x34f   :  { %9565 = vmatpush1.bf16.msra.mxu0 %v9564_v63  ;;  %v989_v63 = vld [vmem:[#allocation5 + $0x1bb8] sm:$0xff] }
 0x350   :  { %9693 = vmatpush1.bf16.msra.mxu1 %v9692_v0  ;;  %9567 = vmatprep.subr.bf16.mxu0 %v9566_v1  ;;  %v1013_v0 = vld [vmem:[#allocation5 + $0x1c78] sm:$0xff]  ;;  %v9580_v1 = vpack.c.bf16 %v962_v53, %v938_v52  ;;  %v9592_v53 = vpack.c.bf16 %v1106_v38, %v1082_v37 }
 0x351   :  { %9695 = vmatprep.subr.bf16.mxu1 %v9694_v5  ;;  %v1010_v5 = vld [vmem:[#allocation5 + $0x1c60] sm:$0xff]  ;;  %v9710_v8 = vpack.c.bf16 %v1013_v0, %v989_v63  ;;  %v1156_v0 = vld [vmem:[#allocation5 + $0x20f0] sm:$0xff]  ;;  %v1301_v37 = vld [vmem:[#allocation5 + $0x2578] sm:$0xff] }
 0x353   :  { %9569 = vmatpush1.bf16.msra.mxu0 %v9568_v18  ;;  %v1037_v18 = vld [vmem:[#allocation5 + $0x1d38] sm:$0xff] }
 0x354   :  { %9697 = vmatpush1.bf16.msra.mxu1 %v9696_v21  ;;  %9571 = vmatprep.subr.bf16.mxu0 %v9570_v23  ;;  %v1061_v21 = vld [vmem:[#allocation5 + $0x1df8] sm:$0xff]  ;;  %v9712_v23 = vpack.c.bf16 %v1012_v10, %v988_v7  ;;  %v9724_v7 = vpack.c.bf16 %v1156_v0, %v1132_v61  ;;  %v1178_v10 = vld [vmem:[#allocation5 + $0x21a0] sm:$0xff] }
 0x355   :  { %9699 = vmatprep.subr.bf16.mxu1 %v9698_v28  ;;  %v1036_v28 = vld [vmem:[#allocation5 + $0x1d30] sm:$0xff]  ;;  %v9714_v32 = vpack.c.bf16 %v1061_v21, %v1037_v18  ;;  %v1322_v0 = vld [vmem:[#allocation5 + $0x2620] sm:$0xff] }
 0x356   :  { %v1204_v21 = vld [vmem:[#allocation5 + $0x2270] sm:$0xff] }
 0x357   :  { %9573 = vmatpush1.bf16.msra.mxu0 %v9572_v34  ;;  %v1109_v34 = vld [vmem:[#allocation5 + $0x1f78] sm:$0xff] }
 0x358   :  { %9701 = vmatpush1.bf16.msra.mxu1 %v9700_v35  ;;  %9575 = vmatprep.subr.bf16.mxu0 %v9574_v36  ;;  %v9588_v35 = vpack.c.bf16 %v1058_v27, %v1034_v22  ;;  %v9590_v36 = vpack.c.bf16 %v1107_v31, %v1083_v30  ;;  %v9718_v42 = vpack.c.bf16 %v1109_v34, %v1085_v33  ;;  %v1253_v22 = vld [vmem:[#allocation5 + $0x23f8] sm:$0xff]  ;;  %v1250_v30 = vld [vmem:[#allocation5 + $0x23e0] sm:$0xff]  ;;  %v1228_v31 = vld [vmem:[#allocation5 + $0x2330] sm:$0xff] }
 0x359   :  { %9703 = vmatprep.subr.bf16.mxu1 %v9702_v41  ;;  %v9600_v27 = vpack.c.bf16 %v1202_v12, %v1178_v10  ;;  %v1252_v34 = vld [vmem:[#allocation5 + $0x23f0] sm:$0xff]  ;;  %v1397_v10 = vld [vmem:[#allocation5 + $0x2878] sm:$0xff] }
 0x35a   :  { %3963 = vmatmul.mubr.f32.vlgmr.msra.gmra.mrb[10].mxu0 %v11730_v25  ;;  %v9732_v40 = vpack.c.bf16 %v1252_v34, %v1228_v31  ;;  %v1418_v34 = vld [vmem:[#allocation5 + $0x2920] sm:$0xff] }
 0x35b   :  { %9577 = vmatpush1.bf16.msra.mxu0 %v9576_v48  ;;  %4176 = vmatmul.mubr.f32.vlgmr.msra.gmra.mrb[10].mxu1 %v11730_v25  ;;  %v9584_v25 = vpack.c.bf16 %v1010_v5, %v986_v4  ;;  %v1205_v4 = vld [vmem:[#allocation5 + $0x2278] sm:$0xff]  ;;  %v9596_v5 = vpack.c.bf16 %v1154_v60, %v1130_v58 }
 0x35c   :  { %9705 = vmatpush1.bf16.msra.mxu1 %v9704_v49  ;;  %9579 = vmatprep.subr.bf16.mxu0 %v9578_v51  ;;  %v1133_v49 = vld [vmem:[#allocation5 + $0x2038] sm:$0xff] }
 0x35d   :  { %9707 = vmatprep.subr.bf16.mxu1 %v9706_v57  ;;  %4033 = vmatprep.mubr.f32.mxu0 %v11745_v39  ;;  %v1157_v51 = vld [vmem:[#allocation5 + $0x20f8] sm:$0xff]  ;;  %v9594_v57 = vpack.c.bf16 %v1155_v46, %v1131_v45  ;;  %v1298_v45 = vld [vmem:[#allocation5 + $0x2560] sm:$0xff]  ;;  %v1276_v46 = vld [vmem:[#allocation5 + $0x24b0] sm:$0xff] }
 0x35e   :  { %4246 = vmatprep.mubr.f32.mxu1 %v11745_v39  ;;  %v9716_v39 = vpack.c.bf16 %v1060_v29, %v1036_v28  ;;  %v9722_v63 = vpack.c.bf16 %v1157_v51, %v1133_v49  ;;  %v9728_v28 = vpack.c.bf16 %v1204_v21, %v1180_v17  ;;  %v1226_v29 = vld [vmem:[#allocation5 + $0x2320] sm:$0xff]  ;;  %v1300_v51 = vld [vmem:[#allocation5 + $0x2570] sm:$0xff]  ;;  %v1349_v58 = vld [vmem:[#allocation5 + $0x26f8] sm:$0xff]  ;;  %v9608_v60 = vpack.c.bf16 %v1298_v45, %v1274_v43 }
 0x35f   :  { %9581 = vmatpush1.bf16.msra.mxu0 %v9580_v1  ;;  %v1179_v1 = vld [vmem:[#allocation5 + $0x21a8] sm:$0xff]  ;;  %v9604_v38 = vpack.c.bf16 %v1250_v30, %v1226_v29  ;;  %v9736_v61 = vpack.c.bf16 %v1300_v51, %v1276_v46  ;;  %v1370_v21 = vld [vmem:[#allocation5 + $0x27a0] sm:$0xff]  ;;  %v1445_v29 = vld [vmem:[#allocation5 + $0x29f8] sm:$0xff] }
 0x360   :  { %9709 = vmatpush1.bf16.msra.mxu1 %v9708_v2  ;;  %9583 = vmatprep.subr.bf16.mxu0 %v9582_v3  ;;  %v1203_v2 = vld [vmem:[#allocation5 + $0x2268] sm:$0xff]  ;;  %v1181_v3 = vld [vmem:[#allocation5 + $0x21b8] sm:$0xff]  ;;  %v1466_v51 = vld [vmem:[#allocation5 + $0x2aa0] sm:$0xff] }
 0x361   :  { %9711 = vmatprep.subr.bf16.mxu1 %v9710_v8  ;;  %v9598_v8 = vpack.c.bf16 %v1203_v2, %v1179_v1  ;;  %v9726_v18 = vpack.c.bf16 %v1205_v4, %v1181_v3  ;;  %v1346_v1 = vld [vmem:[#allocation5 + $0x26e0] sm:$0xff]  ;;  %v1324_v2 = vld [vmem:[#allocation5 + $0x2630] sm:$0xff]  ;;  %v1493_v43 = vld [vmem:[#allocation5 + $0x2b78] sm:$0xff] }
 0x362   :  { %v1348_v4 = vld [vmem:[#allocation5 + $0x26f0] sm:$0xff]  ;;  %v9612_v12 = vpack.c.bf16 %v1346_v1, %v1322_v0  ;;  %v1541_v0 = vld [vmem:[#allocation5 + $0x2cf8] sm:$0xff] }
 0x363   :  { %9585 = vmatpush1.bf16.msra.mxu0 %v9584_v25  ;;  %v1227_v25 = vld [vmem:[#allocation5 + $0x2328] sm:$0xff]  ;;  %v9740_v17 = vpack.c.bf16 %v1348_v4, %v1324_v2  ;;  %v1514_v4 = vld [vmem:[#allocation5 + $0x2c20] sm:$0xff] }
 0x364   :  { %9713 = vmatpush1.bf16.msra.mxu1 %v9712_v23  ;;  %9587 = vmatprep.subr.bf16.mxu0 %v9586_v24  ;;  %v1251_v23 = vld [vmem:[#allocation5 + $0x23e8] sm:$0xff]  ;;  %v1229_v24 = vld [vmem:[#allocation5 + $0x2338] sm:$0xff] }
 0x365   :  { %9715 = vmatprep.subr.bf16.mxu1 %v9714_v32  ;;  %v11855_v41 = vpop.f32.mrb[6].mxu0  ;;  %v9602_v32 = vpack.c.bf16 %v1251_v23, %v1227_v25  ;;  %v9730_v33 = vpack.c.bf16 %v1253_v22, %v1229_v24  ;;  %v1394_v25 = vld [vmem:[#allocation5 + $0x2860] sm:$0xff]  ;;  %v1372_v23 = vld [vmem:[#allocation5 + $0x27b0] sm:$0xff] }
 0x366   :  { %v11857_v47 = vpop.f32.mrb[6].mxu1  ;;  %v11859_v48 = vpop.f32.mrb[7].mxu0  ;;  %v1396_v22 = vld [vmem:[#allocation5 + $0x2870] sm:$0xff]  ;;  %v9616_v30 = vpack.c.bf16 %v1394_v25, %v1370_v21  ;;  %v1589_v21 = vld [vmem:[#allocation5 + $0x2e78] sm:$0xff] }
 0x367   :  { %9589 = vmatpush1.bf16.msra.mxu0 %v9588_v35  ;;  %v11861_v52 = vpop.f32.mrb[7].mxu1  ;;  %v1275_v35 = vld [vmem:[#allocation5 + $0x24a8] sm:$0xff]  ;;  %v9744_v31 = vpack.c.bf16 %v1396_v22, %v1372_v23  ;;  %v1562_v22 = vld [vmem:[#allocation5 + $0x2da0] sm:$0xff] }
 0x368   :  { %9717 = vmatpush1.bf16.msra.mxu1 %v9716_v39  ;;  %9591 = vmatprep.subr.bf16.mxu0 %v9590_v36  ;;  %v1299_v39 = vld [vmem:[#allocation5 + $0x2568] sm:$0xff]  ;;  %v1277_v36 = vld [vmem:[#allocation5 + $0x24b8] sm:$0xff] }
 0x369   :  { %9719 = vmatprep.subr.bf16.mxu1 %v9718_v42  ;;  %v9606_v42 = vpack.c.bf16 %v1299_v39, %v1275_v35  ;;  %v9734_v49 = vpack.c.bf16 %v1301_v37, %v1277_v36  ;;  %v1442_v35 = vld [vmem:[#allocation5 + $0x29e0] sm:$0xff]  ;;  %v1420_v39 = vld [vmem:[#allocation5 + $0x2930] sm:$0xff] }
 0x36a   :  { %v1444_v37 = vld [vmem:[#allocation5 + $0x29f0] sm:$0xff]  ;;  %v9620_v45 = vpack.c.bf16 %v1442_v35, %v1418_v34  ;;  %v1637_v34 = vld [vmem:[#allocation5 + $0x2ff8] sm:$0xff] }
 0x36b   :  { %9593 = vmatpush1.bf16.msra.mxu0 %v9592_v53  ;;  %v1323_v53 = vld [vmem:[#allocation5 + $0x2628] sm:$0xff]  ;;  %v9748_v46 = vpack.c.bf16 %v1444_v37, %v1420_v39  ;;  %v1610_v37 = vld [vmem:[#allocation5 + $0x2f20] sm:$0xff] }
 0x36c   :  { %9721 = vmatpush1.bf16.msra.mxu1 %v9720_v54  ;;  %9595 = vmatprep.subr.bf16.mxu0 %v9594_v57  ;;  %v1347_v54 = vld [vmem:[#allocation5 + $0x26e8] sm:$0xff]  ;;  %v1325_v57 = vld [vmem:[#allocation5 + $0x2638] sm:$0xff] }
 0x36d   :  { %9723 = vmatprep.subr.bf16.mxu1 %v9722_v63  ;;  %v9610_v63 = vpack.c.bf16 %v1347_v54, %v1323_v53  ;;  %v9738_v3 = vpack.c.bf16 %v1349_v58, %v1325_v57  ;;  %v1490_v53 = vld [vmem:[#allocation5 + $0x2b60] sm:$0xff]  ;;  %v1468_v54 = vld [vmem:[#allocation5 + $0x2ab0] sm:$0xff] }
 0x36e   :  { %v1492_v58 = vld [vmem:[#allocation5 + $0x2b70] sm:$0xff]  ;;  %v9624_v1 = vpack.c.bf16 %v1490_v53, %v1466_v51  ;;  %v1659_v53 = vld [vmem:[#allocation5 + $0x30a8] sm:$0x7] }
 0x36f   :  { %9597 = vmatpush1.bf16.msra.mxu0 %v9596_v5  ;;  %v1371_v5 = vld [vmem:[#allocation5 + $0x27a8] sm:$0xff]  ;;  %v9752_v2 = vpack.c.bf16 %v1492_v58, %v1468_v54  ;;  %v4649_v58 = vld [vmem:[#allocation10 + $0x8] sm:$0xff] }
 0x370   :  { %9725 = vmatpush1.bf16.msra.mxu1 %v9724_v7  ;;  %9599 = vmatprep.subr.bf16.mxu0 %v9598_v8  ;;  %v1395_v7 = vld [vmem:[#allocation5 + $0x2868] sm:$0xff]  ;;  %v1373_v8 = vld [vmem:[#allocation5 + $0x27b8] sm:$0xff] }
 0x371   :  { %9727 = vmatprep.subr.bf16.mxu1 %v9726_v18  ;;  %v9614_v18 = vpack.c.bf16 %v1395_v7, %v1371_v5  ;;  %v9742_v24 = vpack.c.bf16 %v1397_v10, %v1373_v8  ;;  %v1538_v5 = vld [vmem:[#allocation5 + $0x2ce0] sm:$0xff]  ;;  %v1516_v7 = vld [vmem:[#allocation5 + $0x2c30] sm:$0xff] }
 0x372   :  { %v1540_v10 = vld [vmem:[#allocation5 + $0x2cf0] sm:$0xff]  ;;  %v9628_v25 = vpack.c.bf16 %v1538_v5, %v1514_v4 }
 0x373   :  { %9601 = vmatpush1.bf16.msra.mxu0 %v9600_v27  ;;  %v1419_v27 = vld [vmem:[#allocation5 + $0x2928] sm:$0xff]  ;;  %v9756_v23 = vpack.c.bf16 %v1540_v10, %v1516_v7  ;;  %v4652_v10 = vld [vmem:[#allocation10 + $0x20] sm:$0xff] }
 0x374   :  { %9729 = vmatpush1.bf16.msra.mxu1 %v9728_v28  ;;  %9603 = vmatprep.subr.bf16.mxu0 %v9602_v32  ;;  %v1443_v28 = vld [vmem:[#allocation5 + $0x29e8] sm:$0xff]  ;;  %v1421_v32 = vld [vmem:[#allocation5 + $0x2938] sm:$0xff] }
 0x375   :  { %9731 = vmatprep.subr.bf16.mxu1 %v9730_v33  ;;  %v9618_v33 = vpack.c.bf16 %v1443_v28, %v1419_v27  ;;  %v9746_v36 = vpack.c.bf16 %v1445_v29, %v1421_v32  ;;  %v1586_v27 = vld [vmem:[#allocation5 + $0x2e60] sm:$0xff]  ;;  %v1564_v28 = vld [vmem:[#allocation5 + $0x2db0] sm:$0xff] }
 0x376   :  { %v1588_v29 = vld [vmem:[#allocation5 + $0x2e70] sm:$0xff]  ;;  %v9632_v35 = vpack.c.bf16 %v1586_v27, %v1562_v22 }
 0x377   :  { %9605 = vmatpush1.bf16.msra.mxu0 %v9604_v38  ;;  %v1467_v38 = vld [vmem:[#allocation5 + $0x2aa8] sm:$0xff]  ;;  %v9760_v39 = vpack.c.bf16 %v1588_v29, %v1564_v28  ;;  %v4656_v22 = vld [vmem:[#allocation10 + $0x40] sm:$0xff]  ;;  %v4658_v28 = vld [vmem:[#allocation10 + $0x50] sm:$0xff] }
 0x378   :  { %9733 = vmatpush1.bf16.msra.mxu1 %v9732_v40  ;;  %9607 = vmatprep.subr.bf16.mxu0 %v9606_v42  ;;  %v1491_v40 = vld [vmem:[#allocation5 + $0x2b68] sm:$0xff]  ;;  %v1469_v42 = vld [vmem:[#allocation5 + $0x2ab8] sm:$0xff]  ;;  %v4660_v27 = vld [vmem:[#allocation10 + $0x60] sm:$0xff] }
 0x379   :  { %9735 = vmatprep.subr.bf16.mxu1 %v9734_v49  ;;  %v9622_v49 = vpack.c.bf16 %v1491_v40, %v1467_v38  ;;  %v9750_v57 = vpack.c.bf16 %v1493_v43, %v1469_v42  ;;  %v1634_v38 = vld [vmem:[#allocation5 + $0x2fe0] sm:$0xff]  ;;  %v1612_v42 = vld [vmem:[#allocation5 + $0x2f30] sm:$0xff] }
 0x37a   :  { %v1636_v43 = vld [vmem:[#allocation5 + $0x2ff0] sm:$0xff]  ;;  %v4662_v29 = vld [vmem:[#allocation10 + $0x70] sm:$0xff] }
 0x37b   :  { %9609 = vmatpush1.bf16.msra.mxu0 %v9608_v60  ;;  %v1515_v60 = vld [vmem:[#allocation5 + $0x2c28] sm:$0xff]  ;;  %v9764_v51 = vpack.c.bf16 %v1636_v43, %v1612_v42  ;;  %v4668_v42 = vld [vmem:[#allocation10 + $0xa0] sm:$0xff]  ;;  %v4666_v43 = vld [vmem:[#allocation10 + $0x90] sm:$0xff] }
 0x37c   :  { %9737 = vmatpush1.bf16.msra.mxu1 %v9736_v61  ;;  %9611 = vmatprep.subr.bf16.mxu0 %v9610_v63  ;;  %v1539_v61 = vld [vmem:[#allocation5 + $0x2ce8] sm:$0xff]  ;;  %v1517_v63 = vld [vmem:[#allocation5 + $0x2c38] sm:$0xff] }
 0x37d   :  { %9739 = vmatprep.subr.bf16.mxu1 %v9738_v3  ;;  %v9626_v3 = vpack.c.bf16 %v1539_v61, %v1515_v60  ;;  %v9754_v8 = vpack.c.bf16 %v1541_v0, %v1517_v63  ;;  %v4653_v60 = vld [vmem:[#allocation10 + $0x28] sm:$0xff]  ;;  %v4651_v63 = vld [vmem:[#allocation10 + $0x18] sm:$0xff] }
 0x37e   :  { %v11870_v61 = vld [vmem:[#allocation8] sm:$0xff]  ;;  %v4655_v0 = vld [vmem:[#allocation10 + $0x38] sm:$0xff] }
 0x37f   :  { %9613 = vmatpush1.bf16.msra.mxu0 %v9612_v12  ;;  %v1563_v12 = vld [vmem:[#allocation5 + $0x2da8] sm:$0xff]  ;;  %v9894_v7 = vpack.c.bf16 %v4655_v0, %v4651_v63 }
 0x380   :  { %9741 = vmatpush1.bf16.msra.mxu1 %v9740_v17  ;;  %9615 = vmatprep.subr.bf16.mxu0 %v9614_v18  ;;  %v1587_v17 = vld [vmem:[#allocation5 + $0x2e68] sm:$0xff]  ;;  %v1565_v18 = vld [vmem:[#allocation5 + $0x2db8] sm:$0xff] }
 0x381   :  { %9743 = vmatprep.subr.bf16.mxu1 %v9742_v24  ;;  %v9630_v24 = vpack.c.bf16 %v1587_v17, %v1563_v12  ;;  %v9758_v32 = vpack.c.bf16 %v1589_v21, %v1565_v18  ;;  %v4654_v12 = vld [vmem:[#allocation10 + $0x30] sm:$0xff]  ;;  %v4657_v18 = vld [vmem:[#allocation10 + $0x48] sm:$0xff] }
 0x382   :  { %v4661_v21 = vld [vmem:[#allocation10 + $0x68] sm:$0xff] }
 0x383   :  { %9617 = vmatpush1.bf16.msra.mxu0 %v9616_v30  ;;  %v1611_v30 = vld [vmem:[#allocation5 + $0x2f28] sm:$0xff] }
 0x384   :  { %9745 = vmatpush1.bf16.msra.mxu1 %v9744_v31  ;;  %9619 = vmatprep.subr.bf16.mxu0 %v9618_v33  ;;  %v1635_v31 = vld [vmem:[#allocation5 + $0x2fe8] sm:$0xff]  ;;  %v1613_v33 = vld [vmem:[#allocation5 + $0x2f38] sm:$0xff] }
 0x385   :  { %9747 = vmatprep.subr.bf16.mxu1 %v9746_v36  ;;  %v9634_v36 = vpack.c.bf16 %v1635_v31, %v1611_v30  ;;  %v9762_v40 = vpack.c.bf16 %v1637_v34, %v1613_v33  ;;  %v4665_v30 = vld [vmem:[#allocation10 + $0x88] sm:$0xff] }
 0x386   :  { %v4669_v31 = vld [vmem:[#allocation10 + $0xa8] sm:$0xff] }
 0x387   :  { %9621 = vmatpush1.bf16.msra.mxu0 %v9620_v45  ;;  %v11864_v45 = vsub.s32 1, %v11721_v62 }
 0x388   :  { %9749 = vmatpush1.bf16.msra.mxu1 %v9748_v46  ;;  %9623 = vmatprep.subr.bf16.mxu0 %v9622_v49  ;;  %v11866_v46 = vld [vmem:[#allocation7] sm:$0xff]  ;;  %v9636_v49 = vpack.c.bf16 %v1634_v38, %v1610_v37  ;;  %v9900_v37 = vpack.c.bf16 %v4662_v29, %v4658_v28  ;;  %v9774_v38 = vpack.c.bf16 %v4669_v31, %v4665_v30  ;;  %v4691_v28 = vld [vmem:[#allocation10 + $0x158] sm:$0xff] }
 0x389   :  { %9751 = vmatprep.subr.bf16.mxu1 %v9750_v57  ;;  %v4337_v54 = vrot.slane %v11866_v46, %v11864_v45  ;;  %v1661_v57 = vld [vmem:[#allocation5 + $0x30b8] sm:$0x7]  ;;  %v4487_v5 = vrot.slane %v11870_v61, %v11864_v45 }
 0x38b   :  { %9625 = vmatpush1.bf16.msra.mxu0 %v9624_v1  ;;  %v1658_v1 = vld [vmem:[#allocation5 + $0x30a0] sm:$0x7]  ;;  %v4451_v4 = vmul.f32 %v4337_v54, %v11787_v56  ;;  %v4677_v54 = vld [vmem:[#allocation10 + $0xe8] sm:$0xff] }
 0x38c   :  { %9753 = vmatpush1.bf16.msra.mxu1 %v9752_v2  ;;  %9627 = vmatprep.subr.bf16.mxu0 %v9626_v3  ;;  %v1660_v2 = vld [vmem:[#allocation5 + $0x30b0] sm:$0x7]  ;;  %v9766_v3 = vpack.c.bf16 %v4653_v60, %v4649_v58  ;;  %v4650_v56 = vld [vmem:[#allocation10 + $0x10] sm:$0xff]  ;;  %v4679_v58 = vld [vmem:[#allocation10 + $0xf8] sm:$0xff] }
 0x38d   :  { %9755 = vmatprep.subr.bf16.mxu1 %v9754_v8  ;;  %v4648_v8 = vld [vmem:[#allocation10] sm:$0xff]  ;;  %v4601_v17 = vadd.f32 %v4487_v5, %v4451_v4  ;;  %v4678_v5 = vld [vmem:[#allocation10 + $0xf0] sm:$0xff] }
 0x38f   :  { %9629 = vmatpush1.bf16.msra.mxu0 %v9628_v25  ;;  %v9768_v25 = vpack.c.bf16 %v4652_v10, %v4648_v8  ;;  %v4625_v33 = vmax.f32 %v4601_v17, 0.0  ;;  %v4685_v8 = vld [vmem:[#allocation10 + $0x128] sm:$0xff]  ;;  %v4683_v10 = vld [vmem:[#allocation10 + $0x118] sm:$0xff] }
 0x390   :  { %9757 = vmatpush1.bf16.msra.mxu1 %v9756_v23  ;;  %9631 = vmatprep.subr.bf16.mxu0 %v9630_v24  ;;  %v4659_v23 = vld [vmem:[#allocation10 + $0x58] sm:$0xff]  ;;  %v9896_v24 = vpack.c.bf16 %v4654_v12, %v4650_v56 }
 0x391   :  { %9759 = vmatprep.subr.bf16.mxu1 %v9758_v32  ;;  %v9770_v32 = vpack.c.bf16 %v4661_v21, %v4657_v18  ;;  %v4687_v56 = vld [vmem:[#allocation10 + $0x138] sm:$0xff]  ;;  %v4680_v21 = vld [vmem:[#allocation10 + $0x100] sm:$0xff] }
 0x393   :  { %9633 = vmatpush1.bf16.msra.mxu0 %v9632_v35  ;;  %v4667_v35 = vld [vmem:[#allocation10 + $0x98] sm:$0xff] }
 0x394   :  { %9761 = vmatpush1.bf16.msra.mxu1 %v9760_v39  ;;  %9635 = vmatprep.subr.bf16.mxu0 %v9634_v36  ;;  %v4671_v39 = vld [vmem:[#allocation10 + $0xb8] sm:$0xff]  ;;  %v9772_v36 = vpack.c.bf16 %v4660_v27, %v4656_v22  ;;  %v4689_v22 = vld [vmem:[#allocation10 + $0x148] sm:$0xff] }
 0x395   :  { %9763 = vmatprep.subr.bf16.mxu1 %v9762_v40  ;;  %v4664_v40 = vld [vmem:[#allocation10 + $0x80] sm:$0xff]  ;;  %v4693_v27 = vld [vmem:[#allocation10 + $0x168] sm:$0xff] }
 0x396   :  { %v9776_v60 = vpack.c.bf16 %v4668_v42, %v4664_v40  ;;  %v9786_v31 = vpack.c.bf16 %v4693_v27, %v4689_v22  ;;  %v4703_v40 = vld [vmem:[#allocation10 + $0x1b8] sm:$0xff]  ;;  %v4716_v22 = vld [vmem:[#allocation10 + $0x220] sm:$0xff]  ;;  %v4714_v27 = vld [vmem:[#allocation10 + $0x210] sm:$0xff] }
 0x397   :  { %9637 = vmatpush1.bf16.msra.mxu0 %v9636_v49  ;;  %v9902_v49 = vpack.c.bf16 %v4671_v39, %v4667_v35  ;;  %v4694_v39 = vld [vmem:[#allocation10 + $0x170] sm:$0xff] }
 0x398   :  { %9765 = vmatpush1.bf16.msra.mxu1 %v9764_v51  ;;  %8224 = vmatprep.subr.msk.mxu0 %vm1695_vm0, %v1659_v53  ;;  %v4670_v51 = vld [vmem:[#allocation10 + $0xb0] sm:$0xff]  ;;  %v4673_v53 = vld [vmem:[#allocation10 + $0xc8] sm:$0xff] }
 0x399   :  { %8227 = vmatprep.subr.msk.mxu1 %vm1695_vm0, %v1661_v57  ;;  %v4675_v57 = vld [vmem:[#allocation10 + $0xd8] sm:$0xff]  ;;  %v9904_v63 = vpack.c.bf16 %v4670_v51, %v4666_v43  ;;  %v9778_v0 = vpack.c.bf16 %v4677_v54, %v4673_v53  ;;  %v4696_v51 = vld [vmem:[#allocation10 + $0x180] sm:$0xff]  ;;  %v4698_v54 = vld [vmem:[#allocation10 + $0x190] sm:$0xff] }
 0x39a   :  { %4034 = vmatmul.mubr.f32.vlgmr.msra.gmra.mrb[10].mxu0 %v11741_v26  ;;  %v9906_v4 = vpack.c.bf16 %v4679_v58, %v4675_v57  ;;  %v4700_v53 = vld [vmem:[#allocation10 + $0x1a0] sm:$0xff]  ;;  %v4702_v58 = vld [vmem:[#allocation10 + $0x1b0] sm:$0xff] }
 0x39b   :  { %4247 = vmatmul.mubr.f32.vlgmr.msra.gmra.mrb[10].mxu1 %v11741_v26  ;;  %8225 = vmatpush1.msk.msra.mxu0 %vm1695_vm0, %v1658_v1  ;;  %v4663_v26 = vld [vmem:[#allocation10 + $0x78] sm:$0xff]  ;;  %v4672_v1 = vld [vmem:[#allocation10 + $0xc0] sm:$0xff] }
 0x39c   :  { %8228 = vmatpush1.msk.msra.mxu1 %vm1695_vm0, %v1660_v2  ;;  %4104 = vmatprep.mubr.f32.mxu0 %v11610_v44  ;;  %v9898_v34 = vpack.c.bf16 %v4663_v26, %v4659_v23  ;;  %v4676_v2 = vld [vmem:[#allocation10 + $0xe0] sm:$0xff]  ;;  %v4682_v23 = vld [vmem:[#allocation10 + $0x110] sm:$0xff]  ;;  %v9910_v26 = vpack.c.bf16 %v4687_v56, %v4683_v10 }
 0x39d   :  { %4317 = vmatprep.mubr.f32.mxu1 %v11610_v44  ;;  %9767 = vmatprep.subr.bf16.mxu0 %v9766_v3  ;;  %v11420_v44 = vld.sshfl [vmem:[#allocation2 + $0x8] sm:$0x3 pattern:$0x76325410]  ;;  %v4674_v3 = vld [vmem:[#allocation10 + $0xd0] sm:$0xff]  ;;  %v9780_v12 = vpack.c.bf16 %v4676_v2, %v4672_v1  ;;  %v4711_v1 = vld [vmem:[#allocation10 + $0x1f8] sm:$0xff]  ;;  %v9792_v2 = vpack.c.bf16 %v4700_v53, %v4696_v51 }
 0x39e   :  { %9895 = vmatprep.subr.bf16.mxu1 %v9894_v7  ;;  %v4681_v7 = vld [vmem:[#allocation10 + $0x108] sm:$0xff]  ;;  %v9908_v17 = vpack.c.bf16 %v4678_v5, %v4674_v3  ;;  %v9920_v3 = vpack.c.bf16 %v4702_v58, %v4698_v54  ;;  %v4704_v5 = vld [vmem:[#allocation10 + $0x1c0] sm:$0xff]  ;;  %v4710_v56 = vld [vmem:[#allocation10 + $0x1f0] sm:$0xff] }
 0x39f   :  { %v9782_v18 = vpack.c.bf16 %v4685_v8, %v4681_v7  ;;  %v4708_v7 = vld [vmem:[#allocation10 + $0x1e0] sm:$0xff]  ;;  %v4706_v8 = vld [vmem:[#allocation10 + $0x1d0] sm:$0xff]  ;;  %v4735_v51 = vld [vmem:[#allocation10 + $0x2b8] sm:$0xff] }
 0x3a0   :  { %v4728_v58 = vld [vmem:[#allocation10 + $0x280] sm:$0xff] }
 0x3a2   :  { %8226 = vmatmul.mubr.msk.f32.vlgmr.msra.gmra.mrb[10].mxu0 %vm1692_vm1, %v11420_v44 }
 0x3a3   :  { %8229 = vmatmul.mubr.msk.f32.vlgmr.msra.gmra.mrb[10].mxu1 %vm1692_vm1, %v11420_v44  ;;  %9769 = vmatpush1.bf16.msra.mxu0 %v9768_v25  ;;  %v4684_v25 = vld [vmem:[#allocation10 + $0x120] sm:$0xff] }
 0x3a4   :  { %9897 = vmatpush1.bf16.msra.mxu1 %v9896_v24  ;;  %4990 = vmatprep.mubr.f32.mxu0 %v4625_v33  ;;  %v4686_v24 = vld [vmem:[#allocation10 + $0x130] sm:$0xff]  ;;  %v9784_v29 = vpack.c.bf16 %v4684_v25, %v4680_v21  ;;  %v4692_v44 = vld [vmem:[#allocation10 + $0x160] sm:$0xff]  ;;  %v4719_v21 = vld [vmem:[#allocation10 + $0x238] sm:$0xff]  ;;  %v9796_v25 = vpack.c.bf16 %v4708_v7, %v4704_v5 }
 0x3a5   :  { %5132 = vmatprep.mubr.f32.mxu1 %v4625_v33  ;;  %9771 = vmatprep.subr.bf16.mxu0 %v9770_v32  ;;  %v4695_v32 = vld [vmem:[#allocation10 + $0x178] sm:$0xff]  ;;  %v9912_v30 = vpack.c.bf16 %v4686_v24, %v4682_v23  ;;  %v4688_v33 = vld [vmem:[#allocation10 + $0x140] sm:$0xff]  ;;  %v9924_v23 = vpack.c.bf16 %v4710_v56, %v4706_v8 }
 0x3a6   :  { %9899 = vmatprep.subr.bf16.mxu1 %v9898_v34  ;;  %v4690_v34 = vld [vmem:[#allocation10 + $0x150] sm:$0xff]  ;;  %v9914_v35 = vpack.c.bf16 %v4695_v32, %v4691_v28  ;;  %v9788_v42 = vpack.c.bf16 %v4692_v44, %v4688_v33  ;;  %v4712_v24 = vld [vmem:[#allocation10 + $0x200] sm:$0xff]  ;;  %v4727_v33 = vld [vmem:[#allocation10 + $0x278] sm:$0xff] }
 0x3a7   :  { %9773 = vmatpush1.bf16.msra.mxu0 %v9772_v36  ;;  %v4697_v36 = vld [vmem:[#allocation10 + $0x188] sm:$0xff]  ;;  %v9916_v43 = vpack.c.bf16 %v4694_v39, %v4690_v34  ;;  %v4718_v32 = vld [vmem:[#allocation10 + $0x230] sm:$0xff]  ;;  %v9800_v44 = vpack.c.bf16 %v4716_v22, %v4712_v24  ;;  %v4720_v39 = vld [vmem:[#allocation10 + $0x240] sm:$0xff] }
 0x3a8   :  { %9901 = vmatpush1.bf16.msra.mxu1 %v9900_v37  ;;  %9775 = vmatprep.subr.bf16.mxu0 %v9774_v38  ;;  %v4701_v37 = vld [vmem:[#allocation10 + $0x1a8] sm:$0xff]  ;;  %v4699_v38 = vld [vmem:[#allocation10 + $0x198] sm:$0xff]  ;;  %v9928_v34 = vpack.c.bf16 %v4718_v32, %v4714_v27  ;;  %v4736_v56 = vld [vmem:[#allocation10 + $0x2c0] sm:$0xff] }
 0x3a9   :  { %9903 = vmatprep.subr.bf16.mxu1 %v9902_v49  ;;  %v9790_v49 = vpack.c.bf16 %v4701_v37, %v4697_v36  ;;  %v9918_v57 = vpack.c.bf16 %v4703_v40, %v4699_v38  ;;  %v4724_v36 = vld [vmem:[#allocation10 + $0x260] sm:$0xff]  ;;  %v4722_v37 = vld [vmem:[#allocation10 + $0x250] sm:$0xff]  ;;  %v4743_v5 = vld [vmem:[#allocation10 + $0x2f8] sm:$0xff] }
 0x3aa   :  { %v4726_v40 = vld [vmem:[#allocation10 + $0x270] sm:$0xff]  ;;  %v9804_v53 = vpack.c.bf16 %v4724_v36, %v4720_v39  ;;  %v4751_v24 = vld [vmem:[#allocation10 + $0x338] sm:$0xff]  ;;  %v4744_v32 = vld [vmem:[#allocation10 + $0x300] sm:$0xff] }
 0x3ab   :  { %9777 = vmatpush1.bf16.msra.mxu0 %v9776_v60  ;;  %v4705_v60 = vld [vmem:[#allocation10 + $0x1c8] sm:$0xff]  ;;  %v9932_v54 = vpack.c.bf16 %v4726_v40, %v4722_v37  ;;  %v4759_v39 = vld [vmem:[#allocation10 + $0x378] sm:$0xff]  ;;  %v11886_v37 = vsub.s32 0, %v11721_v62 }
 0x3ac   :  { %9905 = vmatpush1.bf16.msra.mxu1 %v9904_v63  ;;  %9779 = vmatprep.subr.bf16.mxu0 %v9778_v0  ;;  %v4709_v63 = vld [vmem:[#allocation10 + $0x1e8] sm:$0xff]  ;;  %v4707_v0 = vld [vmem:[#allocation10 + $0x1d8] sm:$0xff] }
 0x3ad   :  { %9907 = vmatprep.subr.bf16.mxu1 %v9906_v4  ;;  %v9794_v4 = vpack.c.bf16 %v4709_v63, %v4705_v60  ;;  %v9922_v10 = vpack.c.bf16 %v4711_v1, %v4707_v0  ;;  %v4732_v60 = vld [vmem:[#allocation10 + $0x2a0] sm:$0xff]  ;;  %v4730_v63 = vld [vmem:[#allocation10 + $0x290] sm:$0xff] }
 0x3ae   :  { %v4734_v1 = vld [vmem:[#allocation10 + $0x2b0] sm:$0xff]  ;;  %v9808_v7 = vpack.c.bf16 %v4732_v60, %v4728_v58  ;;  %v11889_v58 = vsub.s32 3, %v11721_v62  ;;  %v4763_v60 = vld [vmem:[#allocation10 + $0x398] sm:$0xff] }
 0x3af   :  { %9781 = vmatpush1.bf16.msra.mxu0 %v9780_v12  ;;  %v4713_v12 = vld [vmem:[#allocation10 + $0x208] sm:$0xff]  ;;  %v9936_v8 = vpack.c.bf16 %v4734_v1, %v4730_v63  ;;  %v4767_v63 = vld [vmem:[#allocation10 + $0x3b8] sm:$0xff]  ;;  %v4333_v1 = vrot.slane %v11866_v46, %v11886_v37 }
 0x3b0   :  { %9909 = vmatpush1.bf16.msra.mxu1 %v9908_v17  ;;  %9783 = vmatprep.subr.bf16.mxu0 %v9782_v18  ;;  %v4717_v17 = vld [vmem:[#allocation10 + $0x228] sm:$0xff]  ;;  %v4715_v18 = vld [vmem:[#allocation10 + $0x218] sm:$0xff] }
 0x3b1   :  { %9911 = vmatprep.subr.bf16.mxu1 %v9910_v26  ;;  %v9798_v26 = vpack.c.bf16 %v4717_v17, %v4713_v12  ;;  %v9926_v28 = vpack.c.bf16 %v4719_v21, %v4715_v18  ;;  %v4740_v12 = vld [vmem:[#allocation10 + $0x2e0] sm:$0xff]  ;;  %v4738_v17 = vld [vmem:[#allocation10 + $0x2d0] sm:$0xff] }
 0x3b2   :  { %v4742_v21 = vld [vmem:[#allocation10 + $0x2f0] sm:$0xff]  ;;  %v9812_v22 = vpack.c.bf16 %v4740_v12, %v4736_v56  ;;  %v4769_v56 = vld [vmem:[#allocation10 + $0x3c8] sm:$0xff] }
 0x3b3   :  { %9785 = vmatpush1.bf16.msra.mxu0 %v9784_v29  ;;  %v4721_v29 = vld [vmem:[#allocation10 + $0x248] sm:$0xff]  ;;  %v9940_v27 = vpack.c.bf16 %v4742_v21, %v4738_v17  ;;  %v4345_v17 = vrot.slane %v11866_v46, %v11889_v58  ;;  %v4775_v21 = vld [vmem:[#allocation10 + $0x3f8] sm:$0xff] }
 0x3b4   :  { %9913 = vmatpush1.bf16.msra.mxu1 %v9912_v30  ;;  %9787 = vmatprep.subr.bf16.mxu0 %v9786_v31  ;;  %v4725_v30 = vld [vmem:[#allocation10 + $0x268] sm:$0xff]  ;;  %v4723_v31 = vld [vmem:[#allocation10 + $0x258] sm:$0xff] }
 0x3b5   :  { %9915 = vmatprep.subr.bf16.mxu1 %v9914_v35  ;;  %v9802_v35 = vpack.c.bf16 %v4725_v30, %v4721_v29  ;;  %v9930_v38 = vpack.c.bf16 %v4727_v33, %v4723_v31  ;;  %v4748_v29 = vld [vmem:[#allocation10 + $0x320] sm:$0xff]  ;;  %v4746_v30 = vld [vmem:[#allocation10 + $0x310] sm:$0xff]  ;;  %v4773_v12 = vld [vmem:[#allocation10 + $0x3e8] sm:$0xff] }
 0x3b6   :  { %v4750_v33 = vld [vmem:[#allocation10 + $0x330] sm:$0xff]  ;;  %v9816_v36 = vpack.c.bf16 %v4748_v29, %v4744_v32  ;;  %v4777_v46 = vld [vmem:[#allocation10 + $0x408] sm:$0xff] }
 0x3b7   :  { %9789 = vmatpush1.bf16.msra.mxu0 %v9788_v42  ;;  %v4729_v42 = vld [vmem:[#allocation10 + $0x288] sm:$0xff]  ;;  %v4770_v32 = vld [vmem:[#allocation10 + $0x3d0] sm:$0xff] }
 0x3b8   :  { %9917 = vmatpush1.bf16.msra.mxu1 %v9916_v43  ;;  %9791 = vmatprep.subr.bf16.mxu0 %v9790_v49  ;;  %v4733_v43 = vld [vmem:[#allocation10 + $0x2a8] sm:$0xff]  ;;  %v4731_v49 = vld [vmem:[#allocation10 + $0x298] sm:$0xff] }
 0x3b9   :  { %9919 = vmatprep.subr.bf16.mxu1 %v9918_v57  ;;  %v9806_v57 = vpack.c.bf16 %v4733_v43, %v4729_v42  ;;  %v9934_v0 = vpack.c.bf16 %v4735_v51, %v4731_v49  ;;  %v4752_v42 = vld [vmem:[#allocation10 + $0x340] sm:$0xff]  ;;  %v4754_v49 = vld [vmem:[#allocation10 + $0x350] sm:$0xff] }
 0x3ba   :  { %v4756_v43 = vld [vmem:[#allocation10 + $0x360] sm:$0xff] }
 0x3bb   :  { %9793 = vmatpush1.bf16.msra.mxu0 %v9792_v2  ;;  %v4737_v2 = vld [vmem:[#allocation10 + $0x2c8] sm:$0xff] }
 0x3bc   :  { %9921 = vmatpush1.bf16.msra.mxu1 %v9920_v3  ;;  %9795 = vmatprep.subr.bf16.mxu0 %v9794_v4  ;;  %v4741_v3 = vld [vmem:[#allocation10 + $0x2e8] sm:$0xff]  ;;  %v4739_v4 = vld [vmem:[#allocation10 + $0x2d8] sm:$0xff] }
 0x3bd   :  { %9923 = vmatprep.subr.bf16.mxu1 %v9922_v10  ;;  %v9810_v10 = vpack.c.bf16 %v4741_v3, %v4737_v2  ;;  %v9938_v18 = vpack.c.bf16 %v4743_v5, %v4739_v4  ;;  %v4760_v4 = vld [vmem:[#allocation10 + $0x380] sm:$0xff] }
 0x3be   :  { %v4764_v5 = vld [vmem:[#allocation10 + $0x3a0] sm:$0xff] }
 0x3bf   :  { %9797 = vmatpush1.bf16.msra.mxu0 %v9796_v25  ;;  %v4745_v25 = vld [vmem:[#allocation10 + $0x308] sm:$0xff] }
 0x3c0   :  { %9925 = vmatpush1.bf16.msra.mxu1 %v9924_v23  ;;  %9799 = vmatprep.subr.bf16.mxu0 %v9798_v26  ;;  %v4749_v23 = vld [vmem:[#allocation10 + $0x328] sm:$0xff]  ;;  %v4747_v26 = vld [vmem:[#allocation10 + $0x318] sm:$0xff] }
 0x3c1   :  { %9927 = vmatprep.subr.bf16.mxu1 %v9926_v28  ;;  %v9814_v28 = vpack.c.bf16 %v4749_v23, %v4745_v25  ;;  %v9942_v31 = vpack.c.bf16 %v4751_v24, %v4747_v26  ;;  %v4483_v25 = vrot.slane %v11870_v61, %v11886_v37  ;;  %v9824_v23 = vpack.c.bf16 %v4764_v5, %v4760_v4  ;;  %v4790_v5 = vld [vmem:[#allocation10 + $0x470] sm:$0xff] }
 0x3c2   :  { %v4450_v26 = vmul.f32 %v4333_v1, %v11783_v50  ;;  %v4784_v1 = vld [vmem:[#allocation10 + $0x440] sm:$0xff] }
 0x3c3   :  { %9801 = vmatpush1.bf16.msra.mxu0 %v9800_v44  ;;  %v4753_v44 = vld [vmem:[#allocation10 + $0x348] sm:$0xff] }
 0x3c4   :  { %9929 = vmatpush1.bf16.msra.mxu1 %v9928_v34  ;;  %9803 = vmatprep.subr.bf16.mxu0 %v9802_v35  ;;  %v4757_v34 = vld [vmem:[#allocation10 + $0x368] sm:$0xff]  ;;  %v4755_v35 = vld [vmem:[#allocation10 + $0x358] sm:$0xff] }
 0x3c5   :  { %9931 = vmatprep.subr.bf16.mxu1 %v9930_v38  ;;  %v9944_v38 = vpack.c.bf16 %v4750_v33, %v4746_v30  ;;  %v9818_v40 = vpack.c.bf16 %v4757_v34, %v4753_v44  ;;  %v9946_v51 = vpack.c.bf16 %v4759_v39, %v4755_v35  ;;  %v4774_v30 = vld [vmem:[#allocation10 + $0x3f0] sm:$0xff]  ;;  %v4453_v33 = vmul.f32 %v4345_v17, %v11789_v59  ;;  %v4779_v34 = vld [vmem:[#allocation10 + $0x418] sm:$0xff]  ;;  %v4785_v59 = vld [vmem:[#allocation10 + $0x448] sm:$0xff] }
 0x3c6   :  { %v4495_v44 = vrot.slane %v11870_v61, %v11889_v58  ;;  %v4783_v35 = vld [vmem:[#allocation10 + $0x438] sm:$0xff]  ;;  %v4600_v39 = vadd.f32 %v4483_v25, %v4450_v26  ;;  %v4796_v26 = vld [vmem:[#allocation10 + $0x4a0] sm:$0xff] }
 0x3c7   :  { %9805 = vmatpush1.bf16.msra.mxu0 %v9804_v53  ;;  %v4758_v53 = vld [vmem:[#allocation10 + $0x370] sm:$0xff]  ;;  %v4799_v17 = vld [vmem:[#allocation10 + $0x4b8] sm:$0xff] }
 0x3c8   :  { %9933 = vmatpush1.bf16.msra.mxu1 %v9932_v54  ;;  %9807 = vmatprep.subr.bf16.mxu0 %v9806_v57  ;;  %v4761_v54 = vld [vmem:[#allocation10 + $0x388] sm:$0xff]  ;;  %v9948_v2 = vpack.c.bf16 %v4758_v53, %v4754_v49  ;;  %v4778_v49 = vld [vmem:[#allocation10 + $0x410] sm:$0xff]  ;;  %v4603_v53 = vadd.f32 %v4495_v44, %v4453_v33  ;;  %v4800_v44 = vld [vmem:[#allocation10 + $0x4c0] sm:$0xff] }
 0x3c9   :  { %9935 = vmatprep.subr.bf16.mxu1 %v9934_v0  ;;  %v4765_v57 = vld [vmem:[#allocation10 + $0x3a8] sm:$0xff]  ;;  %v9820_v0 = vpack.c.bf16 %v4756_v43, %v4752_v42  ;;  %v4780_v42 = vld [vmem:[#allocation10 + $0x420] sm:$0xff]  ;;  %v9958_v43 = vpack.c.bf16 %v4783_v35, %v4779_v34  ;;  %v4802_v35 = vld [vmem:[#allocation10 + $0x4d0] sm:$0xff] }
 0x3ca   :  { %v9822_v3 = vpack.c.bf16 %v4765_v57, %v4761_v54  ;;  %v4789_v54 = vld [vmem:[#allocation10 + $0x468] sm:$0xff]  ;;  %v4787_v57 = vld [vmem:[#allocation10 + $0x458] sm:$0xff]  ;;  %v4804_v34 = vld [vmem:[#allocation10 + $0x4e0] sm:$0xff] }
 0x3cb   :  { %9809 = vmatpush1.bf16.msra.mxu0 %v9808_v7  ;;  %v4762_v7 = vld [vmem:[#allocation10 + $0x390] sm:$0xff]  ;;  %v9834_v4 = vpack.c.bf16 %v4789_v54, %v4785_v59  ;;  %v4812_v59 = vld [vmem:[#allocation10 + $0x520] sm:$0xff] }
 0x3cc   :  { %9937 = vmatpush1.bf16.msra.mxu1 %v9936_v8  ;;  %9811 = vmatprep.subr.bf16.mxu0 %v9810_v10  ;;  %v9950_v8 = vpack.c.bf16 %v4767_v63, %v4763_v60  ;;  %v4766_v10 = vld [vmem:[#allocation10 + $0x3b0] sm:$0xff]  ;;  %v4791_v60 = vld [vmem:[#allocation10 + $0x478] sm:$0xff]  ;;  %v4624_v63 = vmax.f32 %v4600_v39, 0.0 }
 0x3cd   :  { %9939 = vmatprep.subr.bf16.mxu1 %v9938_v18  ;;  %v4771_v18 = vld [vmem:[#allocation10 + $0x3d8] sm:$0xff]  ;;  %v9952_v24 = vpack.c.bf16 %v4766_v10, %v4762_v7  ;;  %v4793_v7 = vld [vmem:[#allocation10 + $0x488] sm:$0xff]  ;;  %v4627_v10 = vmax.f32 %v4603_v53, 0.0  ;;  %v4806_v39 = vld [vmem:[#allocation10 + $0x4f0] sm:$0xff] }
 0x3ce   :  { %v9954_v29 = vpack.c.bf16 %v4775_v21, %v4771_v18  ;;  %v4808_v53 = vld [vmem:[#allocation10 + $0x500] sm:$0xff]  ;;  %v4810_v54 = vld [vmem:[#allocation10 + $0x510] sm:$0xff] }
 0x3cf   :  { %9813 = vmatpush1.bf16.msra.mxu0 %v9812_v22  ;;  %v9826_v22 = vpack.c.bf16 %v4773_v12, %v4769_v56  ;;  %v9962_v56 = vpack.c.bf16 %v4791_v60, %v4787_v57  ;;  %v4795_v12 = vld [vmem:[#allocation10 + $0x498] sm:$0xff]  ;;  %v4814_v60 = vld [vmem:[#allocation10 + $0x530] sm:$0xff] }
 0x3d0   :  { %9941 = vmatpush1.bf16.msra.mxu1 %v9940_v27  ;;  %9815 = vmatprep.subr.bf16.mxu0 %v9814_v28  ;;  %v4768_v27 = vld [vmem:[#allocation10 + $0x3c0] sm:$0xff] }
 0x3d1   :  { %9943 = vmatprep.subr.bf16.mxu1 %v9942_v31  ;;  %v4772_v28 = vld [vmem:[#allocation10 + $0x3e0] sm:$0xff]  ;;  %v4781_v31 = vld [vmem:[#allocation10 + $0x428] sm:$0xff] }
 0x3d2   :  { %v9828_v50 = vpack.c.bf16 %v4772_v28, %v4768_v27  ;;  %v4798_v27 = vld [vmem:[#allocation10 + $0x4b0] sm:$0xff]  ;;  %v4801_v28 = vld [vmem:[#allocation10 + $0x4c8] sm:$0xff] }
 0x3d3   :  { %9817 = vmatpush1.bf16.msra.mxu0 %v9816_v36  ;;  %v9956_v36 = vpack.c.bf16 %v4774_v30, %v4770_v32  ;;  %v4805_v32 = vld [vmem:[#allocation10 + $0x4e8] sm:$0xff]  ;;  %v4807_v30 = vld [vmem:[#allocation10 + $0x4f8] sm:$0xff] }
 0x3d4   :  { %9945 = vmatpush1.bf16.msra.mxu1 %v9944_v38  ;;  %9819 = vmatprep.subr.bf16.mxu0 %v9818_v40  ;;  %v9830_v38 = vpack.c.bf16 %v4781_v31, %v4777_v46  ;;  %v4776_v40 = vld [vmem:[#allocation10 + $0x400] sm:$0xff]  ;;  %v9842_v33 = vpack.c.bf16 %v4805_v32, %v4801_v28 }
 0x3d5   :  { %9947 = vmatprep.subr.bf16.mxu1 %v9946_v51  ;;  %v4782_v51 = vld [vmem:[#allocation10 + $0x430] sm:$0xff]  ;;  %v9832_v61 = vpack.c.bf16 %v4780_v42, %v4776_v40  ;;  %v4811_v40 = vld [vmem:[#allocation10 + $0x518] sm:$0xff]  ;;  %v4824_v32 = vld [vmem:[#allocation10 + $0x580] sm:$0xff] }
 0x3d6   :  { %v4815_v42 = vld [vmem:[#allocation10 + $0x538] sm:$0xff] }
 0x3d7   :  { %9821 = vmatpush1.bf16.msra.mxu0 %v9820_v0  ;;  %v9960_v0 = vpack.c.bf16 %v4782_v51, %v4778_v49  ;;  %v9972_v49 = vpack.c.bf16 %v4806_v39, %v4802_v35  ;;  %v9974_v57 = vpack.c.bf16 %v4815_v42, %v4811_v40  ;;  %v4839_v35 = vld [vmem:[#allocation10 + $0x5f8] sm:$0xff]  ;;  %v4836_v40 = vld [vmem:[#allocation10 + $0x5e0] sm:$0xff]  ;;  %v4834_v42 = vld [vmem:[#allocation10 + $0x5d0] sm:$0xff] }
 0x3d8   :  { %9949 = vmatpush1.bf16.msra.mxu1 %v9948_v2  ;;  %9823 = vmatprep.subr.bf16.mxu0 %v9822_v3  ;;  %v4788_v2 = vld [vmem:[#allocation10 + $0x460] sm:$0xff]  ;;  %v4786_v3 = vld [vmem:[#allocation10 + $0x450] sm:$0xff] }
 0x3d9   :  { %9951 = vmatprep.subr.bf16.mxu1 %v9950_v8  ;;  %v4797_v8 = vld [vmem:[#allocation10 + $0x4a8] sm:$0xff]  ;;  %v9836_v18 = vpack.c.bf16 %v4788_v2, %v4784_v1  ;;  %v9964_v21 = vpack.c.bf16 %v4790_v5, %v4786_v3  ;;  %v4819_v3 = vld [vmem:[#allocation10 + $0x558] sm:$0xff] }
 0x3da   :  { %v9838_v25 = vpack.c.bf16 %v4797_v8, %v4793_v7  ;;  %v9848_v7 = vpack.c.bf16 %v4812_v59, %v4808_v53  ;;  %v9976_v8 = vpack.c.bf16 %v4814_v60, %v4810_v54  ;;  %v4845_v53 = vld [vmem:[#allocation10 + $0x628] sm:$0xff]  ;;  %v4843_v59 = vld [vmem:[#allocation10 + $0x618] sm:$0xff] }
 0x3db   :  { %9825 = vmatpush1.bf16.msra.mxu0 %v9824_v23  ;;  %v4792_v23 = vld [vmem:[#allocation10 + $0x480] sm:$0xff]  ;;  %v4847_v54 = vld [vmem:[#allocation10 + $0x638] sm:$0xff] }
 0x3dc   :  { %9953 = vmatpush1.bf16.msra.mxu1 %v9952_v24  ;;  %9827 = vmatprep.subr.bf16.mxu0 %v9826_v22  ;;  %v4794_v24 = vld [vmem:[#allocation10 + $0x490] sm:$0xff]  ;;  %v9966_v22 = vpack.c.bf16 %v4799_v17, %v4795_v12  ;;  %v9840_v46 = vpack.c.bf16 %v4796_v26, %v4792_v23  ;;  %v4820_v12 = vld [vmem:[#allocation10 + $0x560] sm:$0xff]  ;;  %v4829_v23 = vld [vmem:[#allocation10 + $0x5a8] sm:$0xff] }
 0x3dd   :  { %9955 = vmatprep.subr.bf16.mxu1 %v9954_v29  ;;  %v4803_v29 = vld [vmem:[#allocation10 + $0x4d8] sm:$0xff]  ;;  %v9968_v31 = vpack.c.bf16 %v4798_v27, %v4794_v24  ;;  %v4818_v17 = vld [vmem:[#allocation10 + $0x550] sm:$0xff] }
 0x3de   :  { %v4827_v26 = vld [vmem:[#allocation10 + $0x598] sm:$0xff] }
 0x3df   :  { %9829 = vmatpush1.bf16.msra.mxu0 %v9828_v50  ;;  %v9970_v50 = vpack.c.bf16 %v4807_v30, %v4803_v29  ;;  %v4831_v24 = vld [vmem:[#allocation10 + $0x5b8] sm:$0xff]  ;;  %v4828_v29 = vld [vmem:[#allocation10 + $0x5a0] sm:$0xff]  ;;  %v4826_v30 = vld [vmem:[#allocation10 + $0x590] sm:$0xff] }
 0x3e0   :  { %9957 = vmatpush1.bf16.msra.mxu1 %v9956_v36  ;;  %9831 = vmatprep.subr.bf16.mxu0 %v9830_v38  ;;  %v4809_v36 = vld [vmem:[#allocation10 + $0x508] sm:$0xff] }
 0x3e1   :  { %9959 = vmatprep.subr.bf16.mxu1 %v9958_v43  ;;  %v4813_v38 = vld [vmem:[#allocation10 + $0x528] sm:$0xff]  ;;  %v9844_v43 = vpack.c.bf16 %v4804_v34, %v4800_v44  ;;  %v4835_v34 = vld [vmem:[#allocation10 + $0x5d8] sm:$0xff] }
 0x3e2   :  { %4991 = vmatmul.mubr.f32.vlgmr.msra.gmra.mrb[12].mxu0 %v4624_v63  ;;  %v9846_v51 = vpack.c.bf16 %v4813_v38, %v4809_v36  ;;  %v4837_v44 = vld [vmem:[#allocation10 + $0x5e8] sm:$0xff]  ;;  %v4832_v38 = vld [vmem:[#allocation10 + $0x5c0] sm:$0xff] }
 0x3e3   :  { %5133 = vmatmul.mubr.f32.vlgmr.msra.gmra.mrb[12].mxu1 %v4624_v63  ;;  %9833 = vmatpush1.bf16.msra.mxu0 %v9832_v61  ;;  %v4817_v63 = vld [vmem:[#allocation10 + $0x548] sm:$0xff] }
 0x3e4   :  { %5061 = vmatprep.mubr.f32.mxu0 %v4627_v10  ;;  %9961 = vmatpush1.bf16.msra.mxu1 %v9960_v0  ;;  %v4821_v0 = vld [vmem:[#allocation10 + $0x568] sm:$0xff] }
 0x3e5   :  { %5203 = vmatprep.mubr.f32.mxu1 %v4627_v10  ;;  %9835 = vmatprep.subr.bf16.mxu0 %v9834_v4  ;;  %v4823_v4 = vld [vmem:[#allocation10 + $0x578] sm:$0xff]  ;;  %v9850_v10 = vpack.c.bf16 %v4821_v0, %v4817_v63  ;;  %v4840_v0 = vld [vmem:[#allocation10 + $0x600] sm:$0xff] }
 0x3e6   :  { %9963 = vmatprep.subr.bf16.mxu1 %v9962_v56  ;;  %v4816_v56 = vld [vmem:[#allocation10 + $0x540] sm:$0xff] }
 0x3e7   :  { %9837 = vmatpush1.bf16.msra.mxu0 %v9836_v18  ;;  %v9978_v18 = vpack.c.bf16 %v4823_v4, %v4819_v3  ;;  %v4844_v3 = vld [vmem:[#allocation10 + $0x620] sm:$0xff]  ;;  %v4842_v4 = vld [vmem:[#allocation10 + $0x610] sm:$0xff] }
 0x3e8   :  { %9965 = vmatpush1.bf16.msra.mxu1 %v9964_v21  ;;  %9839 = vmatprep.subr.bf16.mxu0 %v9838_v25  ;;  %v4822_v21 = vld [vmem:[#allocation10 + $0x570] sm:$0xff]  ;;  %v4825_v25 = vld [vmem:[#allocation10 + $0x588] sm:$0xff] }
 0x3e9   :  { %9967 = vmatprep.subr.bf16.mxu1 %v9966_v22  ;;  %v9852_v22 = vpack.c.bf16 %v4820_v12, %v4816_v56  ;;  %v9980_v27 = vpack.c.bf16 %v4822_v21, %v4818_v17  ;;  %v9854_v28 = vpack.c.bf16 %v4829_v23, %v4825_v25  ;;  %v4853_v56 = vld [vmem:[#allocation10 + $0x668] sm:$0xff]  ;;  %v4851_v12 = vld [vmem:[#allocation10 + $0x658] sm:$0xff]  ;;  %v4848_v23 = vld [vmem:[#allocation10 + $0x640] sm:$0xff] }
 0x3ea   :  { %v4855_v17 = vld [vmem:[#allocation10 + $0x678] sm:$0xff] }
 0x3eb   :  { %9841 = vmatpush1.bf16.msra.mxu0 %v9840_v46  ;;  %v9982_v46 = vpack.c.bf16 %v4831_v24, %v4827_v26  ;;  %v4852_v26 = vld [vmem:[#allocation10 + $0x660] sm:$0xff]  ;;  %v4850_v24 = vld [vmem:[#allocation10 + $0x650] sm:$0xff] }
 0x3ec   :  { %9969 = vmatpush1.bf16.msra.mxu1 %v9968_v31  ;;  %9843 = vmatprep.subr.bf16.mxu0 %v9842_v33  ;;  %v4830_v31 = vld [vmem:[#allocation10 + $0x5b0] sm:$0xff]  ;;  %v4833_v33 = vld [vmem:[#allocation10 + $0x5c8] sm:$0xff] }
 0x3ed   :  { %9971 = vmatprep.subr.bf16.mxu1 %v9970_v50  ;;  %v11901_v61 = vpop.f32.mrb[8].mxu0  ;;  %v9856_v50 = vpack.c.bf16 %v4828_v29, %v4824_v32  ;;  %v9984_v39 = vpack.c.bf16 %v4830_v31, %v4826_v30  ;;  %v9858_v36 = vpack.c.bf16 %v4837_v44, %v4833_v33  ;;  %v4861_v32 = vld [vmem:[#allocation10 + $0x6a8] sm:$0xff]  ;;  %v4859_v29 = vld [vmem:[#allocation10 + $0x698] sm:$0xff]  ;;  %v4856_v44 = vld [vmem:[#allocation10 + $0x680] sm:$0xff] }
 0x3ee   :  { %v11903_v1 = vpop.f32.mrb[8].mxu1  ;;  %v11905_v2 = vpop.f32.mrb[9].mxu0  ;;  %v4863_v30 = vld [vmem:[#allocation10 + $0x6b8] sm:$0xff] }
 0x3ef   :  { %9845 = vmatpush1.bf16.msra.mxu0 %v9844_v43  ;;  %v11907_v5 = vpop.f32.mrb[9].mxu1  ;;  %v9986_v43 = vpack.c.bf16 %v4839_v35, %v4835_v34  ;;  %v4860_v34 = vld [vmem:[#allocation10 + $0x6a0] sm:$0xff]  ;;  %v4858_v35 = vld [vmem:[#allocation10 + $0x690] sm:$0xff] }
 0x3f0   :  { %9973 = vmatpush1.bf16.msra.mxu1 %v9972_v49  ;;  %9847 = vmatprep.subr.bf16.mxu0 %v9846_v51  ;;  %v4838_v49 = vld [vmem:[#allocation10 + $0x5f0] sm:$0xff]  ;;  %v4841_v51 = vld [vmem:[#allocation10 + $0x608] sm:$0xff] }
 0x3f1   :  { %9975 = vmatprep.subr.bf16.mxu1 %v9974_v57  ;;  %v9860_v57 = vpack.c.bf16 %v4836_v40, %v4832_v38  ;;  %v9988_v60 = vpack.c.bf16 %v4838_v49, %v4834_v42  ;;  %v9862_v63 = vpack.c.bf16 %v4845_v53, %v4841_v51  ;;  %v4869_v38 = vld [vmem:[#allocation10 + $0x6e8] sm:$0xff]  ;;  %v4867_v40 = vld [vmem:[#allocation10 + $0x6d8] sm:$0xff]  ;;  %v4864_v53 = vld [vmem:[#allocation10 + $0x6c0] sm:$0xff] }
 0x3f2   :  { %v4871_v42 = vld [vmem:[#allocation10 + $0x6f8] sm:$0xff] }
 0x3f3   :  { %9849 = vmatpush1.bf16.msra.mxu0 %v9848_v7  ;;  %v9990_v7 = vpack.c.bf16 %v4847_v54, %v4843_v59  ;;  %v4868_v59 = vld [vmem:[#allocation10 + $0x6e0] sm:$0xff]  ;;  %v4866_v54 = vld [vmem:[#allocation10 + $0x6d0] sm:$0xff] }
 0x3f4   :  { %9977 = vmatpush1.bf16.msra.mxu1 %v9976_v8  ;;  %9851 = vmatprep.subr.bf16.mxu0 %v9850_v10  ;;  %v4846_v8 = vld [vmem:[#allocation10 + $0x630] sm:$0xff]  ;;  %v4849_v10 = vld [vmem:[#allocation10 + $0x648] sm:$0xff] }
 0x3f5   :  { %9979 = vmatprep.subr.bf16.mxu1 %v9978_v18  ;;  %v9864_v18 = vpack.c.bf16 %v4844_v3, %v4840_v0  ;;  %v9992_v21 = vpack.c.bf16 %v4846_v8, %v4842_v4  ;;  %v9866_v25 = vpack.c.bf16 %v4853_v56, %v4849_v10  ;;  %v4877_v0 = vld [vmem:[#allocation10 + $0x728] sm:$0xff]  ;;  %v4875_v3 = vld [vmem:[#allocation10 + $0x718] sm:$0xff]  ;;  %v4872_v56 = vld [vmem:[#allocation10 + $0x700] sm:$0xff] }
 0x3f6   :  { %v4879_v4 = vld [vmem:[#allocation10 + $0x738] sm:$0xff] }
 0x3f7   :  { %9853 = vmatpush1.bf16.msra.mxu0 %v9852_v22  ;;  %v9994_v22 = vpack.c.bf16 %v4855_v17, %v4851_v12  ;;  %v4876_v12 = vld [vmem:[#allocation10 + $0x720] sm:$0xff]  ;;  %v4874_v17 = vld [vmem:[#allocation10 + $0x710] sm:$0xff] }
 0x3f8   :  { %9981 = vmatpush1.bf16.msra.mxu1 %v9980_v27  ;;  %9855 = vmatprep.subr.bf16.mxu0 %v9854_v28  ;;  %v4854_v27 = vld [vmem:[#allocation10 + $0x670] sm:$0xff]  ;;  %v4857_v28 = vld [vmem:[#allocation10 + $0x688] sm:$0xff] }
 0x3f9   :  { %9983 = vmatprep.subr.bf16.mxu1 %v9982_v46  ;;  %v9868_v46 = vpack.c.bf16 %v4852_v26, %v4848_v23  ;;  %v9996_v31 = vpack.c.bf16 %v4854_v27, %v4850_v24  ;;  %v9870_v33 = vpack.c.bf16 %v4861_v32, %v4857_v28  ;;  %v4885_v23 = vld [vmem:[#allocation10 + $0x768] sm:$0xff]  ;;  %v4883_v26 = vld [vmem:[#allocation10 + $0x758] sm:$0xff]  ;;  %v11910_v27 = vsub.s32 2, %v11721_v62 }
 0x3fa   :  { %v4887_v24 = vld [vmem:[#allocation10 + $0x778] sm:$0xff] }
 0x3fb   :  { %9857 = vmatpush1.bf16.msra.mxu0 %v9856_v50  ;;  %v9998_v50 = vpack.c.bf16 %v4863_v30, %v4859_v29  ;;  %v4880_v29 = vld [vmem:[#allocation10 + $0x740] sm:$0xff] }
 0x3fc   :  { %9985 = vmatpush1.bf16.msra.mxu1 %v9984_v39  ;;  %9859 = vmatprep.subr.bf16.mxu0 %v9858_v36  ;;  %v4862_v39 = vld [vmem:[#allocation10 + $0x6b0] sm:$0xff]  ;;  %v4865_v36 = vld [vmem:[#allocation10 + $0x6c8] sm:$0xff]  ;;  %v4884_v30 = vld [vmem:[#allocation10 + $0x760] sm:$0xff] }
 0x3fd   :  { %9987 = vmatprep.subr.bf16.mxu1 %v9986_v43  ;;  %v9872_v43 = vpack.c.bf16 %v4860_v34, %v4856_v44  ;;  %v10000_v49 = vpack.c.bf16 %v4862_v39, %v4858_v35  ;;  %v9874_v51 = vpack.c.bf16 %v4869_v38, %v4865_v36  ;;  %v4889_v44 = vld [vmem:[#allocation10 + $0x788] sm:$0xff]  ;;  %v11913_v35 = vsub.s32 5, %v11721_v62  ;;  %v4895_v39 = vld [vmem:[#allocation10 + $0x7b8] sm:$0xff]  ;;  %v11915_v38 = vld [vmem:[#allocation7] sm:$0xff] }
 0x3fe   :  { %v4893_v34 = vld [vmem:[#allocation10 + $0x7a8] sm:$0xff]  ;;  %v9884_v36 = vpack.c.bf16 %v4884_v30, %v4880_v29  ;;  %v5241_v29 = vld [vmem:[#allocation10 + $0x838] sm:$0xff] }
 0x3ff   :  { %9861 = vmatpush1.bf16.msra.mxu0 %v9860_v57  ;;  %v10002_v57 = vpack.c.bf16 %v4871_v42, %v4867_v40  ;;  %v4341_v40 = vrot.slane %v11915_v38, %v11910_v27 }
 0x400   :  { %9989 = vmatpush1.bf16.msra.mxu1 %v9988_v60  ;;  %9863 = vmatprep.subr.bf16.mxu0 %v9862_v63  ;;  %v4870_v60 = vld [vmem:[#allocation10 + $0x6f0] sm:$0xff]  ;;  %v4873_v63 = vld [vmem:[#allocation10 + $0x708] sm:$0xff] }
 0x401   :  { %9991 = vmatprep.subr.bf16.mxu1 %v9990_v7  ;;  %v9876_v7 = vpack.c.bf16 %v4868_v59, %v4864_v53  ;;  %v10004_v8 = vpack.c.bf16 %v4870_v60, %v4866_v54  ;;  %v9878_v10 = vpack.c.bf16 %v4877_v0, %v4873_v63  ;;  %v4890_v53 = vld [vmem:[#allocation10 + $0x790] sm:$0xff]  ;;  %v4901_v60 = vld [vmem:[#allocation10 + $0x7e8] sm:$0xff]  ;;  %v4353_v63 = vrot.slane %v11915_v38, %v11913_v35  ;;  %v4899_v0 = vld [vmem:[#allocation10 + $0x7d8] sm:$0xff] }
 0x402   :  { %v4894_v54 = vld [vmem:[#allocation10 + $0x7b0] sm:$0xff] }
 0x403   :  { %9865 = vmatpush1.bf16.msra.mxu0 %v9864_v18  ;;  %v10006_v18 = vpack.c.bf16 %v4879_v4, %v4875_v3  ;;  %v4903_v3 = vld [vmem:[#allocation10 + $0x7f8] sm:$0xff]  ;;  %v11921_v4 = vld [vmem:[#allocation8] sm:$0xff] }
 0x404   :  { %9993 = vmatpush1.bf16.msra.mxu1 %v9992_v21  ;;  %9867 = vmatprep.subr.bf16.mxu0 %v9866_v25  ;;  %v4878_v21 = vld [vmem:[#allocation10 + $0x730] sm:$0xff]  ;;  %v4881_v25 = vld [vmem:[#allocation10 + $0x748] sm:$0xff] }
 0x405   :  { %9995 = vmatprep.subr.bf16.mxu1 %v9994_v22  ;;  %v9880_v22 = vpack.c.bf16 %v4876_v12, %v4872_v56  ;;  %v10008_v28 = vpack.c.bf16 %v4878_v21, %v4874_v17  ;;  %v9882_v32 = vpack.c.bf16 %v4885_v23, %v4881_v25  ;;  %v10016_v56 = vpack.c.bf16 %v4894_v54, %v4890_v53  ;;  %v4896_v17 = vld [vmem:[#allocation10 + $0x7c0] sm:$0xff]  ;;  %v4898_v21 = vld [vmem:[#allocation10 + $0x7d0] sm:$0xff] }
 0x406   :  { %v10018_v25 = vpack.c.bf16 %v4903_v3, %v4899_v0  ;;  %v4902_v23 = vld [vmem:[#allocation10 + $0x7f0] sm:$0xff]  ;;  %v5246_v54 = vld [vmem:[#allocation10 + $0x860] sm:$0xff]  ;;  %v5251_v0 = vld [vmem:[#allocation10 + $0x888] sm:$0xff] }
 0x407   :  { %9869 = vmatpush1.bf16.msra.mxu0 %v9868_v46  ;;  %v4882_v46 = vld [vmem:[#allocation10 + $0x750] sm:$0xff]  ;;  %v5255_v3 = vld [vmem:[#allocation10 + $0x8a8] sm:$0xff] }
 0x408   :  { %9997 = vmatpush1.bf16.msra.mxu1 %v9996_v31  ;;  %9871 = vmatprep.subr.bf16.mxu0 %v9870_v33  ;;  %v10010_v31 = vpack.c.bf16 %v4887_v24, %v4883_v26  ;;  %v4886_v33 = vld [vmem:[#allocation10 + $0x770] sm:$0xff]  ;;  %v5235_v26 = vld [vmem:[#allocation10 + $0x808] sm:$0xff] }
 0x409   :  { %9999 = vmatprep.subr.bf16.mxu1 %v9998_v50  ;;  %v4891_v50 = vld [vmem:[#allocation10 + $0x798] sm:$0xff]  ;;  %v10012_v42 = vpack.c.bf16 %v4886_v33, %v4882_v46  ;;  %v5239_v24 = vld [vmem:[#allocation10 + $0x828] sm:$0xff]  ;;  %v10020_v46 = vpack.c.bf16 %v4902_v23, %v4898_v21  ;;  %v5234_v33 = vld [vmem:[#allocation10 + $0x800] sm:$0xff] }
 0x40a   :  { %v10014_v59 = vpack.c.bf16 %v4895_v39, %v4891_v50  ;;  %v5236_v50 = vld [vmem:[#allocation10 + $0x810] sm:$0xff]  ;;  %v5250_v21 = vld [vmem:[#allocation10 + $0x880] sm:$0xff] }
 0x40b   :  { %9873 = vmatpush1.bf16.msra.mxu0 %v9872_v43  ;;  %v9886_v43 = vpack.c.bf16 %v4893_v34, %v4889_v44  ;;  %v5238_v44 = vld [vmem:[#allocation10 + $0x820] sm:$0xff]  ;;  %v5240_v39 = vld [vmem:[#allocation10 + $0x830] sm:$0xff] }
 0x40c   :  { %10001 = vmatpush1.bf16.msra.mxu1 %v10000_v49  ;;  %9875 = vmatprep.subr.bf16.mxu0 %v9874_v51  ;;  %v4888_v49 = vld [vmem:[#allocation10 + $0x780] sm:$0xff]  ;;  %v10152_v53 = vpack.c.bf16 %v5240_v39, %v5236_v50  ;;  %v5252_v23 = vld [vmem:[#allocation10 + $0x890] sm:$0xff]  ;;  %v5267_v39 = vld [vmem:[#allocation10 + $0x908] sm:$0xff] }
 0x40d   :  { %10003 = vmatprep.subr.bf16.mxu1 %v10002_v57  ;;  %v4892_v51 = vld [vmem:[#allocation10 + $0x7a0] sm:$0xff]  ;;  %v4897_v57 = vld [vmem:[#allocation10 + $0x7c8] sm:$0xff]  ;;  %v5264_v50 = vld [vmem:[#allocation10 + $0x8f0] sm:$0xff] }
 0x40e   :  { %v9890_v12 = vpack.c.bf16 %v4901_v60, %v4897_v57  ;;  %v5244_v57 = vld [vmem:[#allocation10 + $0x850] sm:$0xff] }
 0x40f   :  { %9877 = vmatpush1.bf16.msra.mxu0 %v9876_v7  ;;  %v4491_v7 = vrot.slane %v11921_v4, %v11910_v27 }
 0x410   :  { %10005 = vmatpush1.bf16.msra.mxu1 %v10004_v8  ;;  %9879 = vmatprep.subr.bf16.mxu0 %v9878_v10  ;;  %v9888_v8 = vpack.c.bf16 %v4892_v51, %v4888_v49  ;;  %v4452_v10 = vmul.f32 %v4341_v40, %v11785_v55  ;;  %v5247_v40 = vld [vmem:[#allocation10 + $0x868] sm:$0xff]  ;;  %v5249_v49 = vld [vmem:[#allocation10 + $0x878] sm:$0xff] }
 0x411   :  { %10007 = vmatprep.subr.bf16.mxu1 %v10006_v18  ;;  %v4900_v18 = vld [vmem:[#allocation10 + $0x7e0] sm:$0xff] }
 0x412   :  { %v9892_v55 = vpack.c.bf16 %v4900_v18, %v4896_v17  ;;  %v4602_v30 = vadd.f32 %v4491_v7, %v4452_v10  ;;  %v5253_v10 = vld [vmem:[#allocation10 + $0x898] sm:$0xff]  ;;  %v10030_v18 = vpack.c.bf16 %v5255_v3, %v5251_v0 }
 0x413   :  { %9881 = vmatpush1.bf16.msra.mxu0 %v9880_v22  ;;  %v4455_v22 = vmul.f32 %v4353_v63, %v11811_v16  ;;  %v5243_v16 = vld [vmem:[#allocation10 + $0x848] sm:$0xff]  ;;  %v5248_v63 = vld [vmem:[#allocation10 + $0x870] sm:$0xff]  ;;  %v5277_v0 = vld [vmem:[#allocation10 + $0x958] sm:$0xff] }
 0x414   :  { %10009 = vmatpush1.bf16.msra.mxu1 %v10008_v28  ;;  %9883 = vmatprep.subr.bf16.mxu0 %v9882_v32  ;;  %v4503_v28 = vrot.slane %v11921_v4, %v11913_v35  ;;  %v5237_v32 = vld [vmem:[#allocation10 + $0x818] sm:$0xff]  ;;  %v4626_v51 = vmax.f32 %v4602_v30, 0.0  ;;  %v10026_v60 = vpack.c.bf16 %v5247_v40, %v5243_v16  ;;  %v10156_v17 = vpack.c.bf16 %v5248_v63, %v5244_v57  ;;  %v5272_v57 = vld [vmem:[#allocation10 + $0x930] sm:$0xff]  ;;  %v5279_v63 = vld [vmem:[#allocation10 + $0x968] sm:$0xff] }
 0x415   :  { %10011 = vmatprep.subr.bf16.mxu1 %v10010_v31  ;;  %v10022_v31 = vpack.c.bf16 %v5239_v24, %v5235_v26  ;;  %v10150_v34 = vpack.c.bf16 %v5241_v29, %v5237_v32  ;;  %v5256_v24 = vld [vmem:[#allocation10 + $0x8b0] sm:$0xff]  ;;  %v5261_v32 = vld [vmem:[#allocation10 + $0x8d8] sm:$0xff] }
 0x416   :  { %v5265_v29 = vld [vmem:[#allocation10 + $0x8f8] sm:$0xff]  ;;  %v10160_v30 = vpack.c.bf16 %v5256_v24, %v5252_v23  ;;  %v5287_v23 = vld [vmem:[#allocation10 + $0x9a8] sm:$0xff] }
 0x417   :  { %9885 = vmatpush1.bf16.msra.mxu0 %v9884_v36  ;;  %v4605_v36 = vadd.f32 %v4503_v28, %v4455_v22  ;;  %v5259_v22 = vld [vmem:[#allocation10 + $0x8c8] sm:$0xff]  ;;  %v5269_v16 = vld [vmem:[#allocation10 + $0x918] sm:$0xff] }
 0x418   :  { %10013 = vmatpush1.bf16.msra.mxu1 %v10012_v42  ;;  %9887 = vmatprep.subr.bf16.mxu0 %v9886_v43  ;;  %v10024_v42 = vpack.c.bf16 %v5238_v44, %v5234_v33  ;;  %v5245_v43 = vld [vmem:[#allocation10 + $0x858] sm:$0xff]  ;;  %v5263_v28 = vld [vmem:[#allocation10 + $0x8e8] sm:$0xff]  ;;  %v5262_v33 = vld [vmem:[#allocation10 + $0x8e0] sm:$0xff] }
 0x419   :  { %10015 = vmatprep.subr.bf16.mxu1 %v10014_v59  ;;  %v5242_v59 = vld [vmem:[#allocation10 + $0x840] sm:$0xff]  ;;  %v4629_v7 = vmax.f32 %v4605_v36, 0.0  ;;  %v5260_v44 = vld [vmem:[#allocation10 + $0x8d0] sm:$0xff]  ;;  %v5271_v36 = vld [vmem:[#allocation10 + $0x928] sm:$0xff] }
 0x41a   :  { %v5273_v40 = vld [vmem:[#allocation10 + $0x938] sm:$0xff] }
 0x41b   :  { %9889 = vmatpush1.bf16.msra.mxu0 %v9888_v8  ;;  %v10154_v8 = vpack.c.bf16 %v5249_v49, %v5245_v43  ;;  %v10164_v43 = vpack.c.bf16 %v5264_v50, %v5260_v44  ;;  %v10038_v49 = vpack.c.bf16 %v5271_v36, %v5267_v39  ;;  %v5281_v3 = vld [vmem:[#allocation10 + $0x978] sm:$0xff]  ;;  %v5295_v44 = vld [vmem:[#allocation10 + $0x9e8] sm:$0xff] }
 0x41c   :  { %10017 = vmatpush1.bf16.msra.mxu1 %v10016_v56  ;;  %9891 = vmatprep.subr.bf16.mxu0 %v9890_v12  ;;  %v5257_v56 = vld [vmem:[#allocation10 + $0x8b8] sm:$0xff]  ;;  %v10028_v12 = vpack.c.bf16 %v5246_v54, %v5242_v59  ;;  %v5268_v59 = vld [vmem:[#allocation10 + $0x910] sm:$0xff]  ;;  %v10166_v54 = vpack.c.bf16 %v5273_v40, %v5269_v16  ;;  %v5290_v40 = vld [vmem:[#allocation10 + $0x9c0] sm:$0xff] }
 0x41d   :  { %10019 = vmatprep.subr.bf16.mxu1 %v10018_v25  ;;  %v5254_v25 = vld [vmem:[#allocation10 + $0x8a0] sm:$0xff]  ;;  %v10158_v26 = vpack.c.bf16 %v5257_v56, %v5253_v10  ;;  %v5289_v24 = vld [vmem:[#allocation10 + $0x9b8] sm:$0xff] }
 0x41e   :  { %v5274_v56 = vld [vmem:[#allocation10 + $0x940] sm:$0xff]  ;;  %v5297_v50 = vld [vmem:[#allocation10 + $0x9f8] sm:$0xff] }
 0x41f   :  { %9893 = vmatpush1.bf16.msra.mxu0 %v9892_v55  ;;  %v10032_v55 = vpack.c.bf16 %v5254_v25, %v5250_v21  ;;  %v5280_v21 = vld [vmem:[#allocation10 + $0x970] sm:$0xff]  ;;  %v5283_v25 = vld [vmem:[#allocation10 + $0x988] sm:$0xff] }
 0x420   :  { %10021 = vmatpush1.bf16.msra.mxu1 %v10020_v46  ;;  %10023 = vmatprep.subr.bf16.mxu0 %v10022_v31  ;;  %v10034_v46 = vpack.c.bf16 %v5263_v28, %v5259_v22  ;;  %v5258_v31 = vld [vmem:[#allocation10 + $0x8c0] sm:$0xff] }
 0x421   :  { %10151 = vmatprep.subr.bf16.mxu1 %v10150_v34  ;;  %v10162_v34 = vpack.c.bf16 %v5265_v29, %v5261_v32  ;;  %v10046_v32 = vpack.c.bf16 %v5287_v23, %v5283_v25  ;;  %v5282_v29 = vld [vmem:[#allocation10 + $0x980] sm:$0xff] }
 0x422   :  { %5062 = vmatmul.mubr.f32.vlgmr.msra.gmra.mrb[12].mxu0 %v4626_v51 }
 0x423   :  { %5204 = vmatmul.mubr.f32.vlgmr.msra.gmra.mrb[12].mxu1 %v4626_v51  ;;  %10025 = vmatpush1.bf16.msra.mxu0 %v10024_v42  ;;  %v10036_v42 = vpack.c.bf16 %v5262_v33, %v5258_v31  ;;  %v5266_v51 = vld [vmem:[#allocation10 + $0x900] sm:$0xff]  ;;  %v5288_v31 = vld [vmem:[#allocation10 + $0x9b0] sm:$0xff]  ;;  %v5291_v33 = vld [vmem:[#allocation10 + $0x9c8] sm:$0xff] }
 0x424   :  { %5577 = vmatprep.mubr.f32.mxu0 %v4629_v7  ;;  %10153 = vmatpush1.bf16.msra.mxu1 %v10152_v53  ;;  %v5270_v53 = vld [vmem:[#allocation10 + $0x920] sm:$0xff]  ;;  %v10050_v16 = vpack.c.bf16 %v5295_v44, %v5291_v33 }
 0x425   :  { %5719 = vmatprep.mubr.f32.mxu1 %v4629_v7  ;;  %10027 = vmatprep.subr.bf16.mxu0 %v10026_v60  ;;  %v5275_v60 = vld [vmem:[#allocation10 + $0x948] sm:$0xff]  ;;  %v10040_v7 = vpack.c.bf16 %v5270_v53, %v5266_v51  ;;  %v5296_v51 = vld [vmem:[#allocation10 + $0x9f0] sm:$0xff] }
 0x426   :  { %10155 = vmatprep.subr.bf16.mxu1 %v10154_v8  ;;  %v10168_v8 = vpack.c.bf16 %v5272_v57, %v5268_v59  ;;  %v10042_v10 = vpack.c.bf16 %v5279_v63, %v5275_v60  ;;  %v5299_v53 = vld [vmem:[#allocation10 + $0xa08] sm:$0xff]  ;;  %v5305_v57 = vld [vmem:[#allocation10 + $0xa38] sm:$0xff] }
 0x427   :  { %10029 = vmatpush1.bf16.msra.mxu0 %v10028_v12  ;;  %v5278_v12 = vld [vmem:[#allocation10 + $0x960] sm:$0xff]  ;;  %v5303_v59 = vld [vmem:[#allocation10 + $0xa28] sm:$0xff] }
 0x428   :  { %10157 = vmatpush1.bf16.msra.mxu1 %v10156_v17  ;;  %10031 = vmatprep.subr.bf16.mxu0 %v10030_v18  ;;  %v5276_v17 = vld [vmem:[#allocation10 + $0x950] sm:$0xff]  ;;  %v10170_v18 = vpack.c.bf16 %v5281_v3, %v5277_v0  ;;  %v10044_v22 = vpack.c.bf16 %v5278_v12, %v5274_v56  ;;  %v10054_v0 = vpack.c.bf16 %v5303_v59, %v5299_v53  ;;  %v5298_v3 = vld [vmem:[#allocation10 + $0xa00] sm:$0xff]  ;;  %v5307_v12 = vld [vmem:[#allocation10 + $0xa48] sm:$0xff] }
 0x429   :  { %10159 = vmatprep.subr.bf16.mxu1 %v10158_v26  ;;  %v5285_v26 = vld [vmem:[#allocation10 + $0x998] sm:$0xff]  ;;  %v10172_v28 = vpack.c.bf16 %v5280_v21, %v5276_v17  ;;  %v5304_v56 = vld [vmem:[#allocation10 + $0xa30] sm:$0xff]  ;;  %v5311_v17 = vld [vmem:[#allocation10 + $0xa68] sm:$0xff] }
 0x42a   :  { %v5313_v21 = vld [vmem:[#allocation10 + $0xa78] sm:$0xff] }
 0x42b   :  { %10033 = vmatpush1.bf16.msra.mxu0 %v10032_v55  ;;  %v5286_v55 = vld [vmem:[#allocation10 + $0x9a0] sm:$0xff] }
 0x42c   :  { %10161 = vmatpush1.bf16.msra.mxu1 %v10160_v30  ;;  %10035 = vmatprep.subr.bf16.mxu0 %v10034_v46  ;;  %v5284_v30 = vld [vmem:[#allocation10 + $0x990] sm:$0xff]  ;;  %v10174_v46 = vpack.c.bf16 %v5289_v24, %v5285_v26  ;;  %v10048_v39 = vpack.c.bf16 %v5286_v55, %v5282_v29  ;;  %v10058_v26 = vpack.c.bf16 %v5311_v17, %v5307_v12  ;;  %v5306_v24 = vld [vmem:[#allocation10 + $0xa40] sm:$0xff]  ;;  %v5315_v55 = vld [vmem:[#allocation10 + $0xa88] sm:$0xff] }
 0x42d   :  { %10163 = vmatprep.subr.bf16.mxu1 %v10162_v34  ;;  %v5293_v34 = vld [vmem:[#allocation10 + $0x9d8] sm:$0xff]  ;;  %v10176_v36 = vpack.c.bf16 %v5288_v31, %v5284_v30  ;;  %v5312_v29 = vld [vmem:[#allocation10 + $0xa70] sm:$0xff]  ;;  %v5319_v30 = vld [vmem:[#allocation10 + $0xaa8] sm:$0xff] }
 0x42e   :  { %v5321_v31 = vld [vmem:[#allocation10 + $0xab8] sm:$0xff] }
 0x42f   :  { %10037 = vmatpush1.bf16.msra.mxu0 %v10036_v42  ;;  %v5294_v42 = vld [vmem:[#allocation10 + $0x9e0] sm:$0xff] }
 0x430   :  { %10165 = vmatpush1.bf16.msra.mxu1 %v10164_v43  ;;  %10039 = vmatprep.subr.bf16.mxu0 %v10038_v49  ;;  %v5292_v43 = vld [vmem:[#allocation10 + $0x9d0] sm:$0xff]  ;;  %v10178_v49 = vpack.c.bf16 %v5297_v50, %v5293_v34  ;;  %v10052_v60 = vpack.c.bf16 %v5294_v42, %v5290_v40  ;;  %v10062_v34 = vpack.c.bf16 %v5319_v30, %v5315_v55  ;;  %v5314_v50 = vld [vmem:[#allocation10 + $0xa80] sm:$0xff]  ;;  %v5323_v42 = vld [vmem:[#allocation10 + $0xac8] sm:$0xff]  ;;  %v11930_v30 = vsub.s32 4, %v11721_v62 }
 0x431   :  { %10167 = vmatprep.subr.bf16.mxu1 %v10166_v54  ;;  %v5301_v54 = vld [vmem:[#allocation10 + $0xa18] sm:$0xff]  ;;  %v10180_v63 = vpack.c.bf16 %v5296_v51, %v5292_v43  ;;  %v5320_v40 = vld [vmem:[#allocation10 + $0xab0] sm:$0xff]  ;;  %v5327_v43 = vld [vmem:[#allocation10 + $0xae8] sm:$0xff] }
 0x432   :  { %v5329_v51 = vld [vmem:[#allocation10 + $0xaf8] sm:$0xff] }
 0x433   :  { %10041 = vmatpush1.bf16.msra.mxu0 %v10040_v7  ;;  %v5302_v7 = vld [vmem:[#allocation10 + $0xa20] sm:$0xff] }
 0x434   :  { %10169 = vmatpush1.bf16.msra.mxu1 %v10168_v8  ;;  %10043 = vmatprep.subr.bf16.mxu0 %v10042_v10  ;;  %v5300_v8 = vld [vmem:[#allocation10 + $0xa10] sm:$0xff]  ;;  %v10182_v10 = vpack.c.bf16 %v5305_v57, %v5301_v54  ;;  %v10056_v25 = vpack.c.bf16 %v5302_v7, %v5298_v3  ;;  %v10066_v54 = vpack.c.bf16 %v5327_v43, %v5323_v42  ;;  %v5322_v57 = vld [vmem:[#allocation10 + $0xac0] sm:$0xff]  ;;  %v5331_v7 = vld [vmem:[#allocation10 + $0xb08] sm:$0xff] }
 0x435   :  { %10171 = vmatprep.subr.bf16.mxu1 %v10170_v18  ;;  %v5309_v18 = vld [vmem:[#allocation10 + $0xa58] sm:$0xff]  ;;  %v10184_v23 = vpack.c.bf16 %v5304_v56, %v5300_v8  ;;  %v5328_v3 = vld [vmem:[#allocation10 + $0xaf0] sm:$0xff]  ;;  %v5335_v8 = vld [vmem:[#allocation10 + $0xb28] sm:$0xff] }
 0x436   :  { %v5337_v56 = vld [vmem:[#allocation10 + $0xb38] sm:$0xff] }
 0x437   :  { %10045 = vmatpush1.bf16.msra.mxu0 %v10044_v22  ;;  %v5310_v22 = vld [vmem:[#allocation10 + $0xa60] sm:$0xff]  ;;  %v5349_v42 = vld [vmem:[#allocation10 + $0xb98] sm:$0xff] }
 0x438   :  { %10173 = vmatpush1.bf16.msra.mxu1 %v10172_v28  ;;  %10047 = vmatprep.subr.bf16.mxu0 %v10046_v32  ;;  %v5308_v28 = vld [vmem:[#allocation10 + $0xa50] sm:$0xff]  ;;  %v10186_v32 = vpack.c.bf16 %v5313_v21, %v5309_v18  ;;  %v10060_v33 = vpack.c.bf16 %v5310_v22, %v5306_v24  ;;  %v10070_v18 = vpack.c.bf16 %v5335_v8, %v5331_v7  ;;  %v5330_v21 = vld [vmem:[#allocation10 + $0xb00] sm:$0xff]  ;;  %v5339_v22 = vld [vmem:[#allocation10 + $0xb48] sm:$0xff] }
 0x439   :  { %10175 = vmatprep.subr.bf16.mxu1 %v10174_v46  ;;  %v5317_v46 = vld [vmem:[#allocation10 + $0xa98] sm:$0xff]  ;;  %v10188_v44 = vpack.c.bf16 %v5312_v29, %v5308_v28  ;;  %v5336_v24 = vld [vmem:[#allocation10 + $0xb30] sm:$0xff]  ;;  %v5343_v28 = vld [vmem:[#allocation10 + $0xb68] sm:$0xff] }
 0x43a   :  { %v5345_v29 = vld [vmem:[#allocation10 + $0xb78] sm:$0xff]  ;;  %v5359_v7 = vld [vmem:[#allocation10 + $0xbe8] sm:$0xff] }
 0x43b   :  { %10049 = vmatpush1.bf16.msra.mxu0 %v10048_v39  ;;  %v5318_v39 = vld [vmem:[#allocation10 + $0xaa0] sm:$0xff]  ;;  %v5353_v43 = vld [vmem:[#allocation10 + $0xbb8] sm:$0xff] }
 0x43c   :  { %10177 = vmatpush1.bf16.msra.mxu1 %v10176_v36  ;;  %10051 = vmatprep.subr.bf16.mxu0 %v10050_v16  ;;  %v5316_v36 = vld [vmem:[#allocation10 + $0xa90] sm:$0xff]  ;;  %v10190_v16 = vpack.c.bf16 %v5321_v31, %v5317_v46  ;;  %v10064_v53 = vpack.c.bf16 %v5318_v39, %v5314_v50  ;;  %v10074_v31 = vpack.c.bf16 %v5343_v28, %v5339_v22 }
 0x43d   :  { %10179 = vmatprep.subr.bf16.mxu1 %v10178_v49  ;;  %v5325_v49 = vld [vmem:[#allocation10 + $0xad8] sm:$0xff]  ;;  %v10192_v59 = vpack.c.bf16 %v5320_v40, %v5316_v36  ;;  %v5344_v39 = vld [vmem:[#allocation10 + $0xb70] sm:$0xff]  ;;  %v5347_v36 = vld [vmem:[#allocation10 + $0xb88] sm:$0xff]  ;;  %v11933_v40 = vsub.s32 7, %v11721_v62 }
 0x43e   :  { %v5360_v28 = vld [vmem:[#allocation10 + $0xbf0] sm:$0xff] }
 0x43f   :  { %10053 = vmatpush1.bf16.msra.mxu0 %v10052_v60  ;;  %v5326_v60 = vld [vmem:[#allocation10 + $0xae0] sm:$0xff]  ;;  %v4361_v8 = vrot.slane %v11915_v38, %v11933_v40 }
 0x440   :  { %10181 = vmatpush1.bf16.msra.mxu1 %v10180_v63  ;;  %10055 = vmatprep.subr.bf16.mxu0 %v10054_v0  ;;  %v5324_v63 = vld [vmem:[#allocation10 + $0xad0] sm:$0xff]  ;;  %v10194_v0 = vpack.c.bf16 %v5329_v51, %v5325_v49  ;;  %v10068_v12 = vpack.c.bf16 %v5326_v60, %v5322_v57  ;;  %v4349_v51 = vrot.slane %v11915_v38, %v11930_v30  ;;  %v5350_v57 = vld [vmem:[#allocation10 + $0xba0] sm:$0xff]  ;;  %v5363_v38 = vld [vmem:[#allocation10 + $0xc08] sm:$0xff] }
 0x441   :  { %10183 = vmatprep.subr.bf16.mxu1 %v10182_v10  ;;  %v5333_v10 = vld [vmem:[#allocation10 + $0xb18] sm:$0xff]  ;;  %v10196_v17 = vpack.c.bf16 %v5328_v3, %v5324_v63  ;;  %v5348_v60 = vld [vmem:[#allocation10 + $0xb90] sm:$0xff]  ;;  %v10206_v63 = vpack.c.bf16 %v5353_v43, %v5349_v42  ;;  %v5355_v3 = vld [vmem:[#allocation10 + $0xbc8] sm:$0xff] }
 0x442   :  { %v5368_v42 = vld [vmem:[#allocation10 + $0xc30] sm:$0xff] }
 0x443   :  { %10057 = vmatpush1.bf16.msra.mxu0 %v10056_v25  ;;  %v5334_v25 = vld [vmem:[#allocation10 + $0xb20] sm:$0xff] }
 0x444   :  { %10185 = vmatpush1.bf16.msra.mxu1 %v10184_v23  ;;  %10059 = vmatprep.subr.bf16.mxu0 %v10058_v26  ;;  %v5332_v23 = vld [vmem:[#allocation10 + $0xb10] sm:$0xff]  ;;  %v10198_v26 = vpack.c.bf16 %v5337_v56, %v5333_v10  ;;  %v10072_v55 = vpack.c.bf16 %v5334_v25, %v5330_v21  ;;  %v5357_v10 = vld [vmem:[#allocation10 + $0xbd8] sm:$0xff]  ;;  %v10082_v25 = vpack.c.bf16 %v5359_v7, %v5355_v3  ;;  %v5379_v7 = vld [vmem:[#allocation10 + $0xc88] sm:$0xff] }
 0x445   :  { %10187 = vmatprep.subr.bf16.mxu1 %v10186_v32  ;;  %v5341_v32 = vld [vmem:[#allocation10 + $0xb58] sm:$0xff]  ;;  %v10200_v46 = vpack.c.bf16 %v5336_v24, %v5332_v23  ;;  %v5354_v23 = vld [vmem:[#allocation10 + $0xbc0] sm:$0xff]  ;;  %v5356_v24 = vld [vmem:[#allocation10 + $0xbd0] sm:$0xff] }
 0x446   :  { %v10202_v50 = vpack.c.bf16 %v5345_v29, %v5341_v32  ;;  %v5361_v56 = vld [vmem:[#allocation10 + $0xbf8] sm:$0xff]  ;;  %v5367_v32 = vld [vmem:[#allocation10 + $0xc28] sm:$0xff]  ;;  %v4457_v29 = vmul.f32 %v4361_v8, %v11813_v19  ;;  %v5376_v3 = vld [vmem:[#allocation10 + $0xc70] sm:$0xff] }
 0x447   :  { %10061 = vmatpush1.bf16.msra.mxu0 %v10060_v33  ;;  %v5338_v33 = vld [vmem:[#allocation10 + $0xb40] sm:$0xff]  ;;  %v10210_v22 = vpack.c.bf16 %v5361_v56, %v5357_v10  ;;  %v5371_v19 = vld [vmem:[#allocation10 + $0xc48] sm:$0xff] }
 0x448   :  { %10189 = vmatpush1.bf16.msra.mxu1 %v10188_v44  ;;  %10063 = vmatprep.subr.bf16.mxu0 %v10062_v34  ;;  %v5342_v44 = vld [vmem:[#allocation10 + $0xb60] sm:$0xff]  ;;  %v5340_v34 = vld [vmem:[#allocation10 + $0xb50] sm:$0xff]  ;;  %v5383_v8 = vld [vmem:[#allocation10 + $0xca8] sm:$0xff] }
 0x449   :  { %10191 = vmatprep.subr.bf16.mxu1 %v10190_v16  ;;  %v5351_v16 = vld [vmem:[#allocation10 + $0xba8] sm:$0xff]  ;;  %v10076_v49 = vpack.c.bf16 %v5342_v44, %v5338_v33  ;;  %v10212_v44 = vpack.c.bf16 %v5360_v28, %v5356_v24  ;;  %v5380_v24 = vld [vmem:[#allocation10 + $0xc90] sm:$0xff] }
 0x44a   :  { %v5384_v28 = vld [vmem:[#allocation10 + $0xcb0] sm:$0xff] }
 0x44b   :  { %10065 = vmatpush1.bf16.msra.mxu0 %v10064_v53  ;;  %v10204_v53 = vpack.c.bf16 %v5344_v39, %v5340_v34  ;;  %v10086_v34 = vpack.c.bf16 %v5367_v32, %v5363_v38  ;;  %v5366_v39 = vld [vmem:[#allocation10 + $0xc20] sm:$0xff]  ;;  %v5387_v38 = vld [vmem:[#allocation10 + $0xcc8] sm:$0xff] }
 0x44c   :  { %10193 = vmatpush1.bf16.msra.mxu1 %v10192_v59  ;;  %10067 = vmatprep.subr.bf16.mxu0 %v10066_v54  ;;  %v10078_v59 = vpack.c.bf16 %v5351_v16, %v5347_v36  ;;  %v5346_v54 = vld [vmem:[#allocation10 + $0xb80] sm:$0xff]  ;;  %v5364_v16 = vld [vmem:[#allocation10 + $0xc10] sm:$0xff]  ;;  %v5391_v32 = vld [vmem:[#allocation10 + $0xce8] sm:$0xff] }
 0x44d   :  { %10195 = vmatprep.subr.bf16.mxu1 %v10194_v0  ;;  %v5352_v0 = vld [vmem:[#allocation10 + $0xbb0] sm:$0xff] }
 0x44e   :  { %v10208_v21 = vpack.c.bf16 %v5352_v0, %v5348_v60  ;;  %v5374_v60 = vld [vmem:[#allocation10 + $0xc60] sm:$0xff] }
 0x44f   :  { %10069 = vmatpush1.bf16.msra.mxu0 %v10068_v12  ;;  %v4499_v12 = vrot.slane %v11921_v4, %v11930_v30 }
 0x450   :  { %10197 = vmatpush1.bf16.msra.mxu1 %v10196_v17  ;;  %10071 = vmatprep.subr.bf16.mxu0 %v10070_v18  ;;  %v10080_v17 = vpack.c.bf16 %v5350_v57, %v5346_v54  ;;  %v4454_v18 = vmul.f32 %v4349_v51, %v11807_v9  ;;  %v5373_v51 = vld [vmem:[#allocation10 + $0xc58] sm:$0xff]  ;;  %v10216_v54 = vpack.c.bf16 %v5368_v42, %v5364_v16  ;;  %v5370_v57 = vld [vmem:[#allocation10 + $0xc40] sm:$0xff]  ;;  %v5399_v16 = vld [vmem:[#allocation10 + $0xd28] sm:$0xff] }
 0x451   :  { %10199 = vmatprep.subr.bf16.mxu1 %v10198_v26  ;;  %v5358_v26 = vld [vmem:[#allocation10 + $0xbe0] sm:$0xff]  ;;  %v5397_v42 = vld [vmem:[#allocation10 + $0xd18] sm:$0xff] }
 0x452   :  { %v10084_v9 = vpack.c.bf16 %v5358_v26, %v5354_v23  ;;  %v4604_v33 = vadd.f32 %v4499_v12, %v4454_v18  ;;  %v5381_v12 = vld [vmem:[#allocation10 + $0xc98] sm:$0xff]  ;;  %v10092_v18 = vpack.c.bf16 %v5374_v60, %v5370_v57  ;;  %v5378_v23 = vld [vmem:[#allocation10 + $0xc80] sm:$0xff]  ;;  %v5400_v57 = vld [vmem:[#allocation10 + $0xd30] sm:$0xff] }
 0x453   :  { %10073 = vmatpush1.bf16.msra.mxu0 %v10072_v55  ;;  %v4511_v55 = vrot.slane %v11921_v4, %v11933_v40  ;;  %v5382_v26 = vld [vmem:[#allocation10 + $0xca0] sm:$0xff]  ;;  %v5403_v60 = vld [vmem:[#allocation10 + $0xd48] sm:$0xff] }
 0x454   :  { %10201 = vmatpush1.bf16.msra.mxu1 %v10200_v46  ;;  %10075 = vmatprep.subr.bf16.mxu0 %v10074_v31  ;;  %v5365_v46 = vld [vmem:[#allocation10 + $0xc18] sm:$0xff] }
 0x455   :  { %10203 = vmatprep.subr.bf16.mxu1 %v10202_v50  ;;  %v5369_v31 = vld [vmem:[#allocation10 + $0xc38] sm:$0xff]  ;;  %v5362_v50 = vld [vmem:[#allocation10 + $0xc00] sm:$0xff]  ;;  %v4607_v43 = vadd.f32 %v4511_v55, %v4457_v29 }
 0x456   :  { %v10214_v36 = vpack.c.bf16 %v5369_v31, %v5365_v46  ;;  %v10088_v4 = vpack.c.bf16 %v5366_v39, %v5362_v50  ;;  %v5389_v29 = vld [vmem:[#allocation10 + $0xcd8] sm:$0xff]  ;;  %v10096_v46 = vpack.c.bf16 %v5382_v26, %v5378_v23  ;;  %v10224_v31 = vpack.c.bf16 %v5384_v28, %v5380_v24  ;;  %v5392_v39 = vld [vmem:[#allocation10 + $0xcf0] sm:$0xff]  ;;  %v5415_v23 = vld [vmem:[#allocation10 + $0xda8] sm:$0xff] }
 0x457   :  { %10077 = vmatpush1.bf16.msra.mxu0 %v10076_v49  ;;  %v5375_v49 = vld [vmem:[#allocation10 + $0xc68] sm:$0xff]  ;;  %v4631_v10 = vmax.f32 %v4607_v43, 0.0  ;;  %v5393_v55 = vld [vmem:[#allocation10 + $0xcf8] sm:$0xff] }
 0x458   :  { %10205 = vmatpush1.bf16.msra.mxu1 %v10204_v53  ;;  %10079 = vmatprep.subr.bf16.mxu0 %v10078_v59  ;;  %v5377_v53 = vld [vmem:[#allocation10 + $0xc78] sm:$0xff]  ;;  %v4628_v59 = vmax.f32 %v4604_v33, 0.0  ;;  %v10090_v0 = vpack.c.bf16 %v5375_v49, %v5371_v19  ;;  %v5386_v33 = vld [vmem:[#allocation10 + $0xcc0] sm:$0xff]  ;;  %v10226_v50 = vpack.c.bf16 %v5393_v55, %v5389_v29  ;;  %v5412_v55 = vld [vmem:[#allocation10 + $0xd90] sm:$0xff] }
 0x459   :  { %10207 = vmatprep.subr.bf16.mxu1 %v10206_v63  ;;  %v5372_v63 = vld [vmem:[#allocation10 + $0xc50] sm:$0xff]  ;;  %v10218_v56 = vpack.c.bf16 %v5377_v53, %v5373_v51  ;;  %v5401_v43 = vld [vmem:[#allocation10 + $0xd38] sm:$0xff]  ;;  %v5394_v51 = vld [vmem:[#allocation10 + $0xd00] sm:$0xff] }
 0x45a   :  { %v5398_v53 = vld [vmem:[#allocation10 + $0xd20] sm:$0xff]  ;;  %v5413_v26 = vld [vmem:[#allocation10 + $0xd98] sm:$0xff] }
 0x45b   :  { %10081 = vmatpush1.bf16.msra.mxu0 %v10080_v17  ;;  %v5385_v17 = vld [vmem:[#allocation10 + $0xcb8] sm:$0xff]  ;;  %v5414_v29 = vld [vmem:[#allocation10 + $0xda0] sm:$0xff] }
 0x45c   :  { %10209 = vmatpush1.bf16.msra.mxu1 %v10208_v21  ;;  %10083 = vmatprep.subr.bf16.mxu0 %v10082_v25  ;;  %v10220_v21 = vpack.c.bf16 %v5376_v3, %v5372_v63  ;;  %v10094_v25 = vpack.c.bf16 %v5383_v8, %v5379_v7  ;;  %v5407_v63 = vld [vmem:[#allocation10 + $0xd68] sm:$0xff]  ;;  %v5409_v3 = vld [vmem:[#allocation10 + $0xd78] sm:$0xff]  ;;  %v10104_v7 = vpack.c.bf16 %v5398_v53, %v5394_v51  ;;  %v5420_v51 = vld [vmem:[#allocation10 + $0xdd0] sm:$0xff] }
 0x45d   :  { %10211 = vmatprep.subr.bf16.mxu1 %v10210_v22  ;;  %v10222_v22 = vpack.c.bf16 %v5385_v17, %v5381_v12  ;;  %v5406_v12 = vld [vmem:[#allocation10 + $0xd60] sm:$0xff]  ;;  %v5404_v17 = vld [vmem:[#allocation10 + $0xd50] sm:$0xff]  ;;  %v5417_v24 = vld [vmem:[#allocation10 + $0xdb8] sm:$0xff] }
 0x45f   :  { %10085 = vmatpush1.bf16.msra.mxu0 %v10084_v9  ;;  %v10098_v9 = vpack.c.bf16 %v5391_v32, %v5387_v38  ;;  %v5410_v32 = vld [vmem:[#allocation10 + $0xd80] sm:$0xff] }
 0x460   :  { %10213 = vmatpush1.bf16.msra.mxu1 %v10212_v44  ;;  %10087 = vmatprep.subr.bf16.mxu0 %v10086_v34  ;;  %v5390_v44 = vld [vmem:[#allocation10 + $0xce0] sm:$0xff]  ;;  %v5388_v34 = vld [vmem:[#allocation10 + $0xcd0] sm:$0xff] }
 0x461   :  { %10215 = vmatprep.subr.bf16.mxu1 %v10214_v36  ;;  %v5395_v36 = vld [vmem:[#allocation10 + $0xd08] sm:$0xff]  ;;  %v10100_v19 = vpack.c.bf16 %v5390_v44, %v5386_v33  ;;  %v10228_v49 = vpack.c.bf16 %v5392_v39, %v5388_v34  ;;  %v5421_v39 = vld [vmem:[#allocation10 + $0xdd8] sm:$0xff] }
 0x462   :  { %5578 = vmatmul.mubr.f32.vlgmr.msra.gmra.mrb[14].mxu0 %v4628_v59  ;;  %v5419_v33 = vld [vmem:[#allocation10 + $0xdc8] sm:$0xff] }
 0x463   :  { %5720 = vmatmul.mubr.f32.vlgmr.msra.gmra.mrb[14].mxu1 %v4628_v59  ;;  %10089 = vmatpush1.bf16.msra.mxu0 %v10088_v4  ;;  %v10102_v4 = vpack.c.bf16 %v5399_v16, %v5395_v36  ;;  %v5396_v59 = vld [vmem:[#allocation10 + $0xd10] sm:$0xff]  ;;  %v5423_v44 = vld [vmem:[#allocation10 + $0xde8] sm:$0xff]  ;;  %v5425_v36 = vld [vmem:[#allocation10 + $0xdf8] sm:$0xff] }
 0x464   :  { %5648 = vmatprep.mubr.f32.mxu0 %v4631_v10  ;;  %10217 = vmatpush1.bf16.msra.mxu1 %v10216_v54  ;;  %v10230_v54 = vpack.c.bf16 %v5401_v43, %v5397_v42  ;;  %v10232_v8 = vpack.c.bf16 %v5400_v57, %v5396_v59  ;;  %v10112_v42 = vpack.c.bf16 %v5414_v29, %v5410_v32  ;;  %v5424_v59 = vld [vmem:[#allocation10 + $0xdf0] sm:$0xff]  ;;  %v5431_v57 = vld [vmem:[#allocation10 + $0xe28] sm:$0xff] }
 0x465   :  { %5790 = vmatprep.mubr.f32.mxu1 %v4631_v10  ;;  %10091 = vmatprep.subr.bf16.mxu0 %v10090_v0  ;;  %v5405_v0 = vld [vmem:[#allocation10 + $0xd58] sm:$0xff]  ;;  %v10106_v10 = vpack.c.bf16 %v5407_v63, %v5403_v60  ;;  %v10242_v53 = vpack.c.bf16 %v5425_v36, %v5421_v39  ;;  %v5436_v32 = vld [vmem:[#allocation10 + $0xe50] sm:$0xff] }
 0x466   :  { %10219 = vmatprep.subr.bf16.mxu1 %v10218_v56  ;;  %v5402_v56 = vld [vmem:[#allocation10 + $0xd40] sm:$0xff]  ;;  %v5429_v60 = vld [vmem:[#allocation10 + $0xe18] sm:$0xff] }
 0x467   :  { %10093 = vmatpush1.bf16.msra.mxu0 %v10092_v18  ;;  %v10234_v18 = vpack.c.bf16 %v5409_v3, %v5405_v0  ;;  %v5433_v63 = vld [vmem:[#allocation10 + $0xe38] sm:$0xff]  ;;  %v10244_v3 = vpack.c.bf16 %v5424_v59, %v5420_v51  ;;  %v5448_v51 = vld [vmem:[#allocation10 + $0xeb0] sm:$0xff]  ;;  %v5455_v59 = vld [vmem:[#allocation10 + $0xee8] sm:$0xff] }
 0x468   :  { %10221 = vmatpush1.bf16.msra.mxu1 %v10220_v21  ;;  %10095 = vmatprep.subr.bf16.mxu0 %v10094_v25  ;;  %v5408_v21 = vld [vmem:[#allocation10 + $0xd70] sm:$0xff]  ;;  %v5411_v25 = vld [vmem:[#allocation10 + $0xd88] sm:$0xff] }
 0x469   :  { %10223 = vmatprep.subr.bf16.mxu1 %v10222_v22  ;;  %v10108_v22 = vpack.c.bf16 %v5406_v12, %v5402_v56  ;;  %v10236_v28 = vpack.c.bf16 %v5408_v21, %v5404_v17  ;;  %v10110_v38 = vpack.c.bf16 %v5415_v23, %v5411_v25  ;;  %v5428_v56 = vld [vmem:[#allocation10 + $0xe10] sm:$0xff]  ;;  %v10246_v12 = vpack.c.bf16 %v5433_v63, %v5429_v60  ;;  %v5439_v21 = vld [vmem:[#allocation10 + $0xe68] sm:$0xff]  ;;  %v5437_v25 = vld [vmem:[#allocation10 + $0xe58] sm:$0xff] }
 0x46a   :  { %v5432_v17 = vld [vmem:[#allocation10 + $0xe30] sm:$0xff]  ;;  %v5441_v23 = vld [vmem:[#allocation10 + $0xe78] sm:$0xff] }
 0x46b   :  { %10097 = vmatpush1.bf16.msra.mxu0 %v10096_v46  ;;  %v10250_v29 = vpack.c.bf16 %v5441_v23, %v5437_v25 }
 0x46c   :  { %10225 = vmatpush1.bf16.msra.mxu1 %v10224_v31  ;;  %10099 = vmatprep.subr.bf16.mxu0 %v10098_v9  ;;  %v10238_v31 = vpack.c.bf16 %v5417_v24, %v5413_v26  ;;  %v5416_v9 = vld [vmem:[#allocation10 + $0xdb0] sm:$0xff]  ;;  %v10248_v24 = vpack.c.bf16 %v5432_v17, %v5428_v56  ;;  %v5463_v17 = vld [vmem:[#allocation10 + $0xf28] sm:$0xff] }
 0x46d   :  { %10227 = vmatprep.subr.bf16.mxu1 %v10226_v50  ;;  %v10240_v43 = vpack.c.bf16 %v5416_v9, %v5412_v55  ;;  %v5440_v55 = vld [vmem:[#allocation10 + $0xe70] sm:$0xff]  ;;  %v5447_v9 = vld [vmem:[#allocation10 + $0xea8] sm:$0xff] }
 0x46e   :  { %v10252_v36 = vpack.c.bf16 %v5440_v55, %v5436_v32  ;;  %v5456_v56 = vld [vmem:[#allocation10 + $0xef0] sm:$0xff]  ;;  %v5471_v55 = vld [vmem:[#allocation10 + $0xf68] sm:$0xff] }
 0x46f   :  { %10101 = vmatpush1.bf16.msra.mxu0 %v10100_v19  ;;  %v10114_v19 = vpack.c.bf16 %v5423_v44, %v5419_v33  ;;  %v5445_v33 = vld [vmem:[#allocation10 + $0xe98] sm:$0xff]  ;;  %v5464_v32 = vld [vmem:[#allocation10 + $0xf30] sm:$0xff] }
 0x470   :  { %10229 = vmatpush1.bf16.msra.mxu1 %v10228_v49  ;;  %10103 = vmatprep.subr.bf16.mxu0 %v10102_v4  ;;  %v5418_v49 = vld [vmem:[#allocation10 + $0xdc0] sm:$0xff]  ;;  %v5449_v44 = vld [vmem:[#allocation10 + $0xeb8] sm:$0xff] }
 0x471   :  { %10231 = vmatprep.subr.bf16.mxu1 %v10230_v54  ;;  %v5422_v4 = vld [vmem:[#allocation10 + $0xde0] sm:$0xff]  ;;  %v5427_v54 = vld [vmem:[#allocation10 + $0xe08] sm:$0xff] }
 0x472   :  { %v10116_v0 = vpack.c.bf16 %v5422_v4, %v5418_v49  ;;  %v5444_v49 = vld [vmem:[#allocation10 + $0xe90] sm:$0xff]  ;;  %v10254_v4 = vpack.c.bf16 %v5449_v44, %v5445_v33  ;;  %v11954_v44 = vsub.s32 6, %v11721_v62 }
 0x473   :  { %10105 = vmatpush1.bf16.msra.mxu0 %v10104_v7  ;;  %v10118_v7 = vpack.c.bf16 %v5431_v57, %v5427_v54  ;;  %v5453_v54 = vld [vmem:[#allocation10 + $0xed8] sm:$0xff]  ;;  %v10256_v63 = vpack.c.bf16 %v5448_v51, %v5444_v49  ;;  %v5475_v51 = vld [vmem:[#allocation10 + $0xf88] sm:$0xff]  ;;  %v11423_v62 = vld [vmem:[#allocation7] sm:$0xff] }
 0x474   :  { %10233 = vmatpush1.bf16.msra.mxu1 %v10232_v8  ;;  %10107 = vmatprep.subr.bf16.mxu0 %v10106_v10  ;;  %v5426_v8 = vld [vmem:[#allocation10 + $0xe00] sm:$0xff]  ;;  %v5457_v57 = vld [vmem:[#allocation10 + $0xef8] sm:$0xff] }
 0x475   :  { %v11945_v46 = vpop.f32.mrb[10].mxu0  ;;  %10235 = vmatprep.subr.bf16.mxu1 %v10234_v18  ;;  %v5430_v10 = vld [vmem:[#allocation10 + $0xe20] sm:$0xff]  ;;  %v5435_v18 = vld [vmem:[#allocation10 + $0xe48] sm:$0xff] }
 0x476   :  { %v11947_v34 = vpop.f32.mrb[10].mxu1  ;;  %v11949_v50 = vpop.f32.mrb[11].mxu0  ;;  %v10120_v26 = vpack.c.bf16 %v5430_v10, %v5426_v8  ;;  %v5452_v8 = vld [vmem:[#allocation10 + $0xed0] sm:$0xff]  ;;  %v10258_v10 = vpack.c.bf16 %v5457_v57, %v5453_v54  ;;  %v5481_v54 = vld [vmem:[#allocation10 + $0xfb8] sm:$0xff] }
 0x477   :  { %v11951_v16 = vpop.f32.mrb[11].mxu1  ;;  %10109 = vmatpush1.bf16.msra.mxu0 %v10108_v22  ;;  %v10122_v22 = vpack.c.bf16 %v5439_v21, %v5435_v18  ;;  %v5461_v18 = vld [vmem:[#allocation10 + $0xf18] sm:$0xff]  ;;  %v10260_v23 = vpack.c.bf16 %v5456_v56, %v5452_v8  ;;  %v5478_v8 = vld [vmem:[#allocation10 + $0xfa0] sm:$0xff] }
 0x478   :  { %10237 = vmatpush1.bf16.msra.mxu1 %v10236_v28  ;;  %10111 = vmatprep.subr.bf16.mxu0 %v10110_v38  ;;  %v5434_v28 = vld [vmem:[#allocation10 + $0xe40] sm:$0xff]  ;;  %v5465_v21 = vld [vmem:[#allocation10 + $0xf38] sm:$0xff] }
 0x479   :  { %10239 = vmatprep.subr.bf16.mxu1 %v10238_v31  ;;  %v5438_v38 = vld [vmem:[#allocation10 + $0xe60] sm:$0xff]  ;;  %v5443_v31 = vld [vmem:[#allocation10 + $0xe88] sm:$0xff]  ;;  %v11956_v57 = vld [vmem:[#allocation7 + $0x8] sm:$0xff] }
 0x47a   :  { %v10124_v39 = vpack.c.bf16 %v5438_v38, %v5434_v28  ;;  %v5460_v28 = vld [vmem:[#allocation10 + $0xf10] sm:$0xff]  ;;  %v10262_v38 = vpack.c.bf16 %v5465_v21, %v5461_v18  ;;  %v5487_v18 = vld [vmem:[#allocation10 + $0xfe8] sm:$0xff]  ;;  %v4369_v21 = vrot.slane %v11956_v57, %v11864_v45 }
 0x47b   :  { %10113 = vmatpush1.bf16.msra.mxu0 %v10112_v42  ;;  %v10126_v42 = vpack.c.bf16 %v5447_v9, %v5443_v31  ;;  %v5469_v31 = vld [vmem:[#allocation10 + $0xf58] sm:$0xff] }
 0x47c   :  { %10241 = vmatpush1.bf16.msra.mxu1 %v10240_v43  ;;  %10115 = vmatprep.subr.bf16.mxu0 %v10114_v19  ;;  %v5442_v43 = vld [vmem:[#allocation10 + $0xe80] sm:$0xff]  ;;  %v5473_v9 = vld [vmem:[#allocation10 + $0xf78] sm:$0xff] }
 0x47d   :  { %10243 = vmatprep.subr.bf16.mxu1 %v10242_v53  ;;  %v5446_v19 = vld [vmem:[#allocation10 + $0xea0] sm:$0xff]  ;;  %v5451_v53 = vld [vmem:[#allocation10 + $0xec8] sm:$0xff]  ;;  %v10266_v49 = vpack.c.bf16 %v5473_v9, %v5469_v31  ;;  %v5484_v9 = vld [vmem:[#allocation10 + $0xfd0] sm:$0xff] }
 0x47e   :  { %v10128_v60 = vpack.c.bf16 %v5446_v19, %v5442_v43  ;;  %v5470_v43 = vld [vmem:[#allocation10 + $0xf60] sm:$0xff]  ;;  %v5468_v19 = vld [vmem:[#allocation10 + $0xf50] sm:$0xff] }
 0x47f   :  { %10117 = vmatpush1.bf16.msra.mxu0 %v10116_v0  ;;  %v10130_v0 = vpack.c.bf16 %v5455_v59, %v5451_v53  ;;  %v5479_v53 = vld [vmem:[#allocation10 + $0xfa8] sm:$0xff]  ;;  %v5477_v59 = vld [vmem:[#allocation10 + $0xf98] sm:$0xff]  ;;  %v5486_v31 = vld [vmem:[#allocation10 + $0xfe0] sm:$0xff] }
 0x480   :  { %10245 = vmatpush1.bf16.msra.mxu1 %v10244_v3  ;;  %10119 = vmatprep.subr.bf16.mxu0 %v10118_v7  ;;  %v5450_v3 = vld [vmem:[#allocation10 + $0xec0] sm:$0xff]  ;;  %v10270_v56 = vpack.c.bf16 %v5481_v54, %v5477_v59 }
 0x481   :  { %10247 = vmatprep.subr.bf16.mxu1 %v10246_v12  ;;  %v5454_v7 = vld [vmem:[#allocation10 + $0xee0] sm:$0xff]  ;;  %v5459_v12 = vld [vmem:[#allocation10 + $0xf08] sm:$0xff] }
 0x482   :  { %v10132_v25 = vpack.c.bf16 %v5454_v7, %v5450_v3  ;;  %v10142_v3 = vpack.c.bf16 %v5479_v53, %v5475_v51  ;;  %v5474_v7 = vld [vmem:[#allocation10 + $0xf80] sm:$0xff] }
 0x483   :  { %10121 = vmatpush1.bf16.msra.mxu0 %v10120_v26  ;;  %v10134_v26 = vpack.c.bf16 %v5463_v17, %v5459_v12  ;;  %v5480_v12 = vld [vmem:[#allocation10 + $0xfb0] sm:$0xff]  ;;  %v5483_v17 = vld [vmem:[#allocation10 + $0xfc8] sm:$0xff]  ;;  %v5822_v54 = vld [vmem:[#allocation10 + $0x1000] sm:$0xff] }
 0x484   :  { %10249 = vmatpush1.bf16.msra.mxu1 %v10248_v24  ;;  %10123 = vmatprep.subr.bf16.mxu0 %v10122_v22  ;;  %v5458_v24 = vld [vmem:[#allocation10 + $0xf00] sm:$0xff] }
 0x485   :  { %10251 = vmatprep.subr.bf16.mxu1 %v10250_v29  ;;  %v5462_v22 = vld [vmem:[#allocation10 + $0xf20] sm:$0xff]  ;;  %v5467_v29 = vld [vmem:[#allocation10 + $0xf48] sm:$0xff] }
 0x486   :  { %v10136_v33 = vpack.c.bf16 %v5462_v22, %v5458_v24  ;;  %v11962_v22 = vld [vmem:[#allocation8 + $0x8] sm:$0xff] }
 0x487   :  { %10125 = vmatpush1.bf16.msra.mxu0 %v10124_v39  ;;  %v10264_v39 = vpack.c.bf16 %v5464_v32, %v5460_v28  ;;  %v10144_v28 = vpack.c.bf16 %v5478_v8, %v5474_v7  ;;  %v5835_v7 = vld [vmem:[#allocation10 + $0x1068] sm:$0xff] }
 0x488   :  { %10253 = vmatpush1.bf16.msra.mxu1 %v10252_v36  ;;  %10127 = vmatprep.subr.bf16.mxu0 %v10126_v42  ;;  %v10138_v36 = vpack.c.bf16 %v5471_v55, %v5467_v29  ;;  %v5466_v42 = vld [vmem:[#allocation10 + $0xf40] sm:$0xff]  ;;  %v10146_v29 = vpack.c.bf16 %v5487_v18, %v5483_v17 }
 0x489   :  { %10255 = vmatprep.subr.bf16.mxu1 %v10254_v4  ;;  %v5472_v4 = vld [vmem:[#allocation10 + $0xf70] sm:$0xff]  ;;  %v5482_v55 = vld [vmem:[#allocation10 + $0xfc0] sm:$0xff] }
 0x48a   :  { %v5830_v18 = vld [vmem:[#allocation10 + $0x1040] sm:$0xff] }
 0x48b   :  { %10129 = vmatpush1.bf16.msra.mxu0 %v10128_v60  ;;  %v10140_v60 = vpack.c.bf16 %v5470_v43, %v5466_v42  ;;  %v5827_v42 = vld [vmem:[#allocation10 + $0x1028] sm:$0xff]  ;;  %v4459_v43 = vmul.f32 %v4369_v21, %v11835_v14  ;;  %v5834_v21 = vld [vmem:[#allocation10 + $0x1060] sm:$0xff] }
 0x48c   :  { %10257 = vmatpush1.bf16.msra.mxu1 %v10256_v63  ;;  %10131 = vmatprep.subr.bf16.mxu0 %v10130_v0  ;;  %v4357_v63 = vrot.slane %v11423_v62, %v11954_v44  ;;  %v10268_v0 = vpack.c.bf16 %v5472_v4, %v5468_v19  ;;  %v4519_v19 = vrot.slane %v11962_v22, %v11864_v45  ;;  %v5829_v4 = vld [vmem:[#allocation10 + $0x1038] sm:$0xff]  ;;  %v5831_v14 = vld [vmem:[#allocation10 + $0x1048] sm:$0xff] }
 0x48d   :  { %10259 = vmatprep.subr.bf16.mxu1 %v10258_v10  ;;  %v5476_v10 = vld [vmem:[#allocation10 + $0xf90] sm:$0xff] }
 0x48e   :  { %v10272_v32 = vpack.c.bf16 %v5480_v12, %v5476_v10  ;;  %v5833_v10 = vld [vmem:[#allocation10 + $0x1058] sm:$0xff] }
 0x48f   :  { %10133 = vmatpush1.bf16.msra.mxu0 %v10132_v25  ;;  %v5485_v25 = vld [vmem:[#allocation10 + $0xfd8] sm:$0xff] }
 0x490   :  { %10261 = vmatpush1.bf16.msra.mxu1 %v10260_v23  ;;  %10135 = vmatprep.subr.bf16.mxu0 %v10134_v26  ;;  %v5489_v23 = vld [vmem:[#allocation10 + $0xff8] sm:$0xff]  ;;  %v11424_v26 = vld [vmem:[#allocation8] sm:$0xff] }
 0x491   :  { %10263 = vmatprep.subr.bf16.mxu1 %v10262_v38  ;;  %v4507_v24 = vrot.slane %v11424_v26, %v11954_v44  ;;  %v4456_v38 = vmul.f32 %v4357_v63, %v11809_v15  ;;  %v10148_v15 = vpack.c.bf16 %v5486_v31, %v5482_v55  ;;  %v5824_v63 = vld [vmem:[#allocation10 + $0x1010] sm:$0xff]  ;;  %v5845_v55 = vld [vmem:[#allocation10 + $0x10b8] sm:$0xff]  ;;  %v10284_v31 = vpack.c.bf16 %v5834_v21, %v5830_v18  ;;  %v5854_v18 = vld [vmem:[#allocation10 + $0x1100] sm:$0xff] }
 0x492   :  { %v5836_v26 = vld [vmem:[#allocation10 + $0x1070] sm:$0xff]  ;;  %v5858_v21 = vld [vmem:[#allocation10 + $0x1120] sm:$0xff] }
 0x493   :  { %10137 = vmatpush1.bf16.msra.mxu0 %v10136_v33  ;;  %v10274_v33 = vpack.c.bf16 %v5489_v23, %v5485_v25  ;;  %v4606_v51 = vadd.f32 %v4507_v24, %v4456_v38  ;;  %v5832_v25 = vld [vmem:[#allocation10 + $0x1050] sm:$0xff]  ;;  %v10282_v23 = vpack.c.bf16 %v5835_v7, %v5831_v14  ;;  %v5839_v24 = vld [vmem:[#allocation10 + $0x1088] sm:$0xff] }
 0x494   :  { %10265 = vmatpush1.bf16.msra.mxu1 %v10264_v39  ;;  %10139 = vmatprep.subr.bf16.mxu0 %v10138_v36  ;;  %v5488_v39 = vld [vmem:[#allocation10 + $0xff0] sm:$0xff]  ;;  %v5823_v36 = vld [vmem:[#allocation10 + $0x1008] sm:$0xff] }
 0x495   :  { %10267 = vmatprep.subr.bf16.mxu1 %v10266_v49  ;;  %v5825_v49 = vld [vmem:[#allocation10 + $0x1018] sm:$0xff]  ;;  %v10276_v53 = vpack.c.bf16 %v5488_v39, %v5484_v9  ;;  %v10278_v59 = vpack.c.bf16 %v5827_v42, %v5823_v36  ;;  %v4630_v12 = vmax.f32 %v4606_v51, 0.0  ;;  %v10412_v9 = vpack.c.bf16 %v5836_v26, %v5832_v25  ;;  %v5838_v39 = vld [vmem:[#allocation10 + $0x1080] sm:$0xff]  ;;  %v5840_v42 = vld [vmem:[#allocation10 + $0x1090] sm:$0xff] }
 0x496   :  { %v10406_v62 = vpack.c.bf16 %v5829_v4, %v5825_v49  ;;  %v5842_v36 = vld [vmem:[#allocation10 + $0x10a0] sm:$0xff]  ;;  %v5847_v49 = vld [vmem:[#allocation10 + $0x10c8] sm:$0xff]  ;;  %v5853_v51 = vld [vmem:[#allocation10 + $0x10f8] sm:$0xff] }
 0x497   :  { %10141 = vmatpush1.bf16.msra.mxu0 %v10140_v60  ;;  %v5826_v60 = vld [vmem:[#allocation10 + $0x1020] sm:$0xff]  ;;  %v5851_v4 = vld [vmem:[#allocation10 + $0x10e8] sm:$0xff]  ;;  %v5856_v25 = vld [vmem:[#allocation10 + $0x1110] sm:$0xff] }
 0x498   :  { %10269 = vmatpush1.bf16.msra.mxu1 %v10268_v0  ;;  %10143 = vmatprep.subr.bf16.mxu0 %v10142_v3  ;;  %v5828_v0 = vld [vmem:[#allocation10 + $0x1030] sm:$0xff]  ;;  %v4609_v3 = vadd.f32 %v4519_v19, %v4459_v43  ;;  %v10280_v8 = vpack.c.bf16 %v5826_v60, %v5822_v54  ;;  %v10290_v54 = vpack.c.bf16 %v5851_v4, %v5847_v49  ;;  %v5846_v60 = vld [vmem:[#allocation10 + $0x10c0] sm:$0xff]  ;;  %v5855_v14 = vld [vmem:[#allocation10 + $0x1108] sm:$0xff] }
 0x499   :  { %10271 = vmatprep.subr.bf16.mxu1 %v10270_v56  ;;  %v5837_v56 = vld [vmem:[#allocation10 + $0x1078] sm:$0xff]  ;;  %v10408_v17 = vpack.c.bf16 %v5828_v0, %v5824_v63  ;;  %v5844_v19 = vld [vmem:[#allocation10 + $0x10b0] sm:$0xff]  ;;  %v5859_v7 = vld [vmem:[#allocation10 + $0x1128] sm:$0xff] }
 0x49a   :  { %v4633_v38 = vmax.f32 %v4609_v3, 0.0  ;;  %v5848_v63 = vld [vmem:[#allocation10 + $0x10d0] sm:$0xff]  ;;  %v5873_v49 = vld [vmem:[#allocation10 + $0x1198] sm:$0xff] }
 0x49b   :  { %10145 = vmatpush1.bf16.msra.mxu0 %v10144_v28  ;;  %v5843_v28 = vld [vmem:[#allocation10 + $0x10a8] sm:$0xff]  ;;  %v5852_v3 = vld [vmem:[#allocation10 + $0x10f0] sm:$0xff]  ;;  %v5877_v4 = vld [vmem:[#allocation10 + $0x11b8] sm:$0xff] }
 0x49c   :  { %10273 = vmatpush1.bf16.msra.mxu1 %v10272_v32  ;;  %10147 = vmatprep.subr.bf16.mxu0 %v10146_v29  ;;  %v10410_v32 = vpack.c.bf16 %v5837_v56, %v5833_v10  ;;  %v5841_v29 = vld [vmem:[#allocation10 + $0x1098] sm:$0xff]  ;;  %v5860_v26 = vld [vmem:[#allocation10 + $0x1130] sm:$0xff] }
 0x49d   :  { %10275 = vmatprep.subr.bf16.mxu1 %v10274_v33  ;;  %v10286_v33 = vpack.c.bf16 %v5843_v28, %v5839_v24  ;;  %v10414_v43 = vpack.c.bf16 %v5845_v55, %v5841_v29  ;;  %v5861_v10 = vld [vmem:[#allocation10 + $0x1138] sm:$0xff]  ;;  %v5863_v24 = vld [vmem:[#allocation10 + $0x1148] sm:$0xff]  ;;  %v10296_v29 = vpack.c.bf16 %v5858_v21, %v5854_v18  ;;  %v10424_v55 = vpack.c.bf16 %v5860_v26, %v5856_v25  ;;  %v5880_v18 = vld [vmem:[#allocation10 + $0x11d0] sm:$0xff] }
 0x49e   :  { %v5867_v28 = vld [vmem:[#allocation10 + $0x1168] sm:$0xff]  ;;  %v5884_v25 = vld [vmem:[#allocation10 + $0x11f0] sm:$0xff] }
 0x49f   :  { %10149 = vmatpush1.bf16.msra.mxu0 %v10148_v15  ;;  %v5849_v15 = vld [vmem:[#allocation10 + $0x10d8] sm:$0xff]  ;;  %v5891_v26 = vld [vmem:[#allocation10 + $0x1228] sm:$0xff] }
 0x4a0   :  { %10277 = vmatpush1.bf16.msra.mxu1 %v10276_v53  ;;  %10279 = vmatprep.subr.bf16.mxu0 %v10278_v59  ;;  %v10288_v53 = vpack.c.bf16 %v5842_v36, %v5838_v39  ;;  %v10416_v59 = vpack.c.bf16 %v5844_v19, %v5840_v42  ;;  %v10418_v0 = vpack.c.bf16 %v5853_v51, %v5849_v15  ;;  %v5864_v39 = vld [vmem:[#allocation10 + $0x1150] sm:$0xff]  ;;  %v5875_v19 = vld [vmem:[#allocation10 + $0x11a8] sm:$0xff] }
 0x4a1   :  { %10407 = vmatprep.subr.bf16.mxu1 %v10406_v62  ;;  %v5850_v62 = vld [vmem:[#allocation10 + $0x10e0] sm:$0xff]  ;;  %v5868_v42 = vld [vmem:[#allocation10 + $0x1170] sm:$0xff] }
 0x4a2   :  { %5649 = vmatmul.mubr.f32.vlgmr.msra.gmra.mrb[14].mxu0 %v4630_v12  ;;  %v10292_v56 = vpack.c.bf16 %v5850_v62, %v5846_v60  ;;  %v10428_v51 = vpack.c.bf16 %v5868_v42, %v5864_v39  ;;  %v5872_v60 = vld [vmem:[#allocation10 + $0x1190] sm:$0xff]  ;;  %v10430_v62 = vpack.c.bf16 %v5877_v4, %v5873_v49  ;;  %v5899_v42 = vld [vmem:[#allocation10 + $0x1268] sm:$0xff] }
 0x4a3   :  { %5791 = vmatmul.mubr.f32.vlgmr.msra.gmra.mrb[14].mxu1 %v4630_v12  ;;  %10281 = vmatpush1.bf16.msra.mxu0 %v10280_v8  ;;  %v5857_v8 = vld [vmem:[#allocation10 + $0x1118] sm:$0xff]  ;;  %v10420_v12 = vpack.c.bf16 %v5852_v3, %v5848_v63  ;;  %v5876_v63 = vld [vmem:[#allocation10 + $0x11b0] sm:$0xff]  ;;  %v5883_v3 = vld [vmem:[#allocation10 + $0x11e8] sm:$0xff] }
 0x4a4   :  { %6165 = vmatprep.mubr.f32.mxu0 %v4633_v38  ;;  %10409 = vmatpush1.bf16.msra.mxu1 %v10408_v17  ;;  %v10294_v17 = vpack.c.bf16 %v5859_v7, %v5855_v14  ;;  %v5881_v14 = vld [vmem:[#allocation10 + $0x11d8] sm:$0xff]  ;;  %v5892_v39 = vld [vmem:[#allocation10 + $0x1230] sm:$0xff] }
 0x4a5   :  { %6307 = vmatprep.mubr.f32.mxu1 %v4633_v38  ;;  %10283 = vmatprep.subr.bf16.mxu0 %v10282_v23  ;;  %v10422_v23 = vpack.c.bf16 %v5861_v10, %v5857_v8  ;;  %v5865_v38 = vld [vmem:[#allocation10 + $0x1158] sm:$0xff]  ;;  %v10432_v10 = vpack.c.bf16 %v5876_v63, %v5872_v60  ;;  %v5900_v60 = vld [vmem:[#allocation10 + $0x1270] sm:$0xff]  ;;  %v5907_v63 = vld [vmem:[#allocation10 + $0x12a8] sm:$0xff] }
 0x4a6   :  { %10411 = vmatprep.subr.bf16.mxu1 %v10410_v32  ;;  %v5869_v32 = vld [vmem:[#allocation10 + $0x1178] sm:$0xff] }
 0x4a7   :  { %10285 = vmatpush1.bf16.msra.mxu0 %v10284_v31  ;;  %v10298_v31 = vpack.c.bf16 %v5867_v28, %v5863_v24  ;;  %v10426_v36 = vpack.c.bf16 %v5869_v32, %v5865_v38  ;;  %v5885_v7 = vld [vmem:[#allocation10 + $0x11f8] sm:$0xff]  ;;  %v10436_v32 = vpack.c.bf16 %v5884_v25, %v5880_v18  ;;  %v5908_v18 = vld [vmem:[#allocation10 + $0x12b0] sm:$0xff]  ;;  %v5915_v25 = vld [vmem:[#allocation10 + $0x12e8] sm:$0xff] }
 0x4a8   :  { %10413 = vmatpush1.bf16.msra.mxu1 %v10412_v9  ;;  %10287 = vmatprep.subr.bf16.mxu0 %v10286_v33  ;;  %v5862_v9 = vld [vmem:[#allocation10 + $0x1140] sm:$0xff]  ;;  %v10434_v21 = vpack.c.bf16 %v5885_v7, %v5881_v14  ;;  %v5889_v24 = vld [vmem:[#allocation10 + $0x1218] sm:$0xff] }
 0x4a9   :  { %10415 = vmatprep.subr.bf16.mxu1 %v10414_v43  ;;  %v5866_v33 = vld [vmem:[#allocation10 + $0x1160] sm:$0xff]  ;;  %v5871_v43 = vld [vmem:[#allocation10 + $0x1188] sm:$0xff]  ;;  %v5893_v28 = vld [vmem:[#allocation10 + $0x1238] sm:$0xff] }
 0x4aa   :  { %v10300_v15 = vpack.c.bf16 %v5866_v33, %v5862_v9  ;;  %v5888_v9 = vld [vmem:[#allocation10 + $0x1210] sm:$0xff]  ;;  %v10438_v33 = vpack.c.bf16 %v5893_v28, %v5889_v24 }
 0x4ab   :  { %10289 = vmatpush1.bf16.msra.mxu0 %v10288_v53  ;;  %v10302_v53 = vpack.c.bf16 %v5875_v19, %v5871_v43  ;;  %v5897_v43 = vld [vmem:[#allocation10 + $0x1258] sm:$0xff]  ;;  %v10440_v4 = vpack.c.bf16 %v5892_v39, %v5888_v9  ;;  %v5916_v9 = vld [vmem:[#allocation10 + $0x12f0] sm:$0xff]  ;;  %v5923_v39 = vld [vmem:[#allocation10 + $0x1328] sm:$0xff] }
 0x4ac   :  { %10417 = vmatpush1.bf16.msra.mxu1 %v10416_v59  ;;  %10291 = vmatprep.subr.bf16.mxu0 %v10290_v54  ;;  %v5870_v59 = vld [vmem:[#allocation10 + $0x1180] sm:$0xff]  ;;  %v5901_v19 = vld [vmem:[#allocation10 + $0x1278] sm:$0xff] }
 0x4ad   :  { %10419 = vmatprep.subr.bf16.mxu1 %v10418_v0  ;;  %v5874_v54 = vld [vmem:[#allocation10 + $0x11a0] sm:$0xff]  ;;  %v5879_v0 = vld [vmem:[#allocation10 + $0x11c8] sm:$0xff] }
 0x4ae   :  { %v10304_v8 = vpack.c.bf16 %v5874_v54, %v5870_v59  ;;  %v5896_v59 = vld [vmem:[#allocation10 + $0x1250] sm:$0xff]  ;;  %v10442_v54 = vpack.c.bf16 %v5901_v19, %v5897_v43 }
 0x4af   :  { %10293 = vmatpush1.bf16.msra.mxu0 %v10292_v56  ;;  %v10306_v56 = vpack.c.bf16 %v5883_v3, %v5879_v0  ;;  %v5905_v0 = vld [vmem:[#allocation10 + $0x1298] sm:$0xff]  ;;  %v10444_v7 = vpack.c.bf16 %v5900_v60, %v5896_v59  ;;  %v5924_v59 = vld [vmem:[#allocation10 + $0x1330] sm:$0xff]  ;;  %v5931_v60 = vld [vmem:[#allocation10 + $0x1368] sm:$0xff] }
 0x4b0   :  { %10421 = vmatpush1.bf16.msra.mxu1 %v10420_v12  ;;  %10295 = vmatprep.subr.bf16.mxu0 %v10294_v17  ;;  %v5878_v12 = vld [vmem:[#allocation10 + $0x11c0] sm:$0xff]  ;;  %v5909_v3 = vld [vmem:[#allocation10 + $0x12b8] sm:$0xff] }
 0x4b1   :  { %10423 = vmatprep.subr.bf16.mxu1 %v10422_v23  ;;  %v5882_v17 = vld [vmem:[#allocation10 + $0x11e0] sm:$0xff]  ;;  %v5887_v23 = vld [vmem:[#allocation10 + $0x1208] sm:$0xff] }
 0x4b2   :  { %v10308_v38 = vpack.c.bf16 %v5882_v17, %v5878_v12  ;;  %v5904_v12 = vld [vmem:[#allocation10 + $0x1290] sm:$0xff]  ;;  %v10446_v17 = vpack.c.bf16 %v5909_v3, %v5905_v0 }
 0x4b3   :  { %10297 = vmatpush1.bf16.msra.mxu0 %v10296_v29  ;;  %v10310_v29 = vpack.c.bf16 %v5891_v26, %v5887_v23  ;;  %v5913_v23 = vld [vmem:[#allocation10 + $0x12d8] sm:$0xff]  ;;  %v10448_v28 = vpack.c.bf16 %v5908_v18, %v5904_v12  ;;  %v5932_v12 = vld [vmem:[#allocation10 + $0x1370] sm:$0xff]  ;;  %v5939_v18 = vld [vmem:[#allocation10 + $0x13a8] sm:$0xff] }
 0x4b4   :  { %10425 = vmatpush1.bf16.msra.mxu1 %v10424_v55  ;;  %10299 = vmatprep.subr.bf16.mxu0 %v10298_v31  ;;  %v5886_v55 = vld [vmem:[#allocation10 + $0x1200] sm:$0xff]  ;;  %v5917_v26 = vld [vmem:[#allocation10 + $0x12f8] sm:$0xff] }
 0x4b5   :  { %10427 = vmatprep.subr.bf16.mxu1 %v10426_v36  ;;  %v5890_v31 = vld [vmem:[#allocation10 + $0x1220] sm:$0xff]  ;;  %v5895_v36 = vld [vmem:[#allocation10 + $0x1248] sm:$0xff] }
 0x4b6   :  { %v10312_v49 = vpack.c.bf16 %v5890_v31, %v5886_v55  ;;  %v5912_v55 = vld [vmem:[#allocation10 + $0x12d0] sm:$0xff]  ;;  %v10450_v31 = vpack.c.bf16 %v5917_v26, %v5913_v23  ;;  %v4365_v26 = vrot.slane %v11956_v57, %v11886_v37 }
 0x4b7   :  { %10301 = vmatpush1.bf16.msra.mxu0 %v10300_v15  ;;  %v10314_v15 = vpack.c.bf16 %v5899_v42, %v5895_v36  ;;  %v5921_v36 = vld [vmem:[#allocation10 + $0x1318] sm:$0xff]  ;;  %v10452_v19 = vpack.c.bf16 %v5916_v9, %v5912_v55  ;;  %v5943_v9 = vld [vmem:[#allocation10 + $0x13c8] sm:$0xff] }
 0x4b8   :  { %10429 = vmatpush1.bf16.msra.mxu1 %v10428_v51  ;;  %10303 = vmatprep.subr.bf16.mxu0 %v10302_v53  ;;  %v5894_v51 = vld [vmem:[#allocation10 + $0x1240] sm:$0xff]  ;;  %v5925_v42 = vld [vmem:[#allocation10 + $0x1338] sm:$0xff] }
 0x4b9   :  { %10431 = vmatprep.subr.bf16.mxu1 %v10430_v62  ;;  %v5898_v53 = vld [vmem:[#allocation10 + $0x1260] sm:$0xff]  ;;  %v5903_v62 = vld [vmem:[#allocation10 + $0x1288] sm:$0xff] }
 0x4ba   :  { %v10316_v14 = vpack.c.bf16 %v5898_v53, %v5894_v51  ;;  %v5920_v51 = vld [vmem:[#allocation10 + $0x1310] sm:$0xff]  ;;  %v10454_v53 = vpack.c.bf16 %v5925_v42, %v5921_v36  ;;  %v5945_v36 = vld [vmem:[#allocation10 + $0x13d8] sm:$0xff] }
 0x4bb   :  { %10305 = vmatpush1.bf16.msra.mxu0 %v10304_v8  ;;  %v10318_v8 = vpack.c.bf16 %v5907_v63, %v5903_v62  ;;  %v5929_v62 = vld [vmem:[#allocation10 + $0x1358] sm:$0xff]  ;;  %v10456_v3 = vpack.c.bf16 %v5924_v59, %v5920_v51  ;;  %v5942_v51 = vld [vmem:[#allocation10 + $0x13c0] sm:$0xff]  ;;  %v5944_v59 = vld [vmem:[#allocation10 + $0x13d0] sm:$0xff] }
 0x4bc   :  { %10433 = vmatpush1.bf16.msra.mxu1 %v10432_v10  ;;  %10307 = vmatprep.subr.bf16.mxu0 %v10306_v56  ;;  %v5902_v10 = vld [vmem:[#allocation10 + $0x1280] sm:$0xff]  ;;  %v5933_v63 = vld [vmem:[#allocation10 + $0x1378] sm:$0xff] }
 0x4bd   :  { %10435 = vmatprep.subr.bf16.mxu1 %v10434_v21  ;;  %v5906_v56 = vld [vmem:[#allocation10 + $0x12a0] sm:$0xff]  ;;  %v5911_v21 = vld [vmem:[#allocation10 + $0x12c8] sm:$0xff]  ;;  %v5949_v42 = vld [vmem:[#allocation10 + $0x13f8] sm:$0xff] }
 0x4be   :  { %v10320_v24 = vpack.c.bf16 %v5906_v56, %v5902_v10  ;;  %v5928_v10 = vld [vmem:[#allocation10 + $0x1350] sm:$0xff]  ;;  %v10458_v56 = vpack.c.bf16 %v5933_v63, %v5929_v62  ;;  %v5955_v62 = vld [vmem:[#allocation10 + $0x1428] sm:$0xff] }
 0x4bf   :  { %10309 = vmatpush1.bf16.msra.mxu0 %v10308_v38  ;;  %v10322_v38 = vpack.c.bf16 %v5915_v25, %v5911_v21  ;;  %v5937_v21 = vld [vmem:[#allocation10 + $0x1398] sm:$0xff] }
 0x4c0   :  { %10437 = vmatpush1.bf16.msra.mxu1 %v10436_v32  ;;  %10311 = vmatprep.subr.bf16.mxu0 %v10310_v29  ;;  %v5910_v32 = vld [vmem:[#allocation10 + $0x12c0] sm:$0xff]  ;;  %v5941_v25 = vld [vmem:[#allocation10 + $0x13b8] sm:$0xff] }
 0x4c1   :  { %10439 = vmatprep.subr.bf16.mxu1 %v10438_v33  ;;  %v5914_v29 = vld [vmem:[#allocation10 + $0x12e0] sm:$0xff]  ;;  %v5919_v33 = vld [vmem:[#allocation10 + $0x1308] sm:$0xff]  ;;  %v10462_v55 = vpack.c.bf16 %v5941_v25, %v5937_v21  ;;  %v5956_v21 = vld [vmem:[#allocation10 + $0x1430] sm:$0xff] }
 0x4c2   :  { %v10324_v43 = vpack.c.bf16 %v5914_v29, %v5910_v32  ;;  %v5938_v32 = vld [vmem:[#allocation10 + $0x13a0] sm:$0xff]  ;;  %v5936_v29 = vld [vmem:[#allocation10 + $0x1390] sm:$0xff] }
 0x4c3   :  { %10313 = vmatpush1.bf16.msra.mxu0 %v10312_v49  ;;  %v10326_v49 = vpack.c.bf16 %v5923_v39, %v5919_v33  ;;  %v5947_v33 = vld [vmem:[#allocation10 + $0x13e8] sm:$0xff]  ;;  %v4377_v39 = vrot.slane %v11956_v57, %v11889_v58 }
 0x4c4   :  { %10441 = vmatpush1.bf16.msra.mxu1 %v10440_v4  ;;  %10315 = vmatprep.subr.bf16.mxu0 %v10314_v15  ;;  %v5918_v4 = vld [vmem:[#allocation10 + $0x1300] sm:$0xff]  ;;  %v5951_v57 = vld [vmem:[#allocation10 + $0x1408] sm:$0xff] }
 0x4c5   :  { %10443 = vmatprep.subr.bf16.mxu1 %v10442_v54  ;;  %v5922_v15 = vld [vmem:[#allocation10 + $0x1320] sm:$0xff]  ;;  %v5927_v54 = vld [vmem:[#allocation10 + $0x1348] sm:$0xff]  ;;  %v4461_v63 = vmul.f32 %v4377_v39, %v11837_v20 }
 0x4c6   :  { %v10328_v0 = vpack.c.bf16 %v5922_v15, %v5918_v4  ;;  %v10338_v15 = vpack.c.bf16 %v5947_v33, %v5943_v9  ;;  %v5959_v20 = vld [vmem:[#allocation10 + $0x1448] sm:$0xff]  ;;  %v5964_v9 = vld [vmem:[#allocation10 + $0x1470] sm:$0xff] }
 0x4c7   :  { %10317 = vmatpush1.bf16.msra.mxu0 %v10316_v14  ;;  %v10330_v14 = vpack.c.bf16 %v5931_v60, %v5927_v54  ;;  %v10466_v54 = vpack.c.bf16 %v5949_v42, %v5945_v36  ;;  %v5948_v60 = vld [vmem:[#allocation10 + $0x13f0] sm:$0xff]  ;;  %v5967_v33 = vld [vmem:[#allocation10 + $0x1488] sm:$0xff] }
 0x4c8   :  { %10445 = vmatpush1.bf16.msra.mxu1 %v10444_v7  ;;  %10319 = vmatprep.subr.bf16.mxu0 %v10318_v8  ;;  %v5926_v7 = vld [vmem:[#allocation10 + $0x1340] sm:$0xff]  ;;  %v5971_v39 = vld [vmem:[#allocation10 + $0x14a8] sm:$0xff] }
 0x4c9   :  { %10447 = vmatprep.subr.bf16.mxu1 %v10446_v17  ;;  %v5930_v8 = vld [vmem:[#allocation10 + $0x1360] sm:$0xff]  ;;  %v5935_v17 = vld [vmem:[#allocation10 + $0x1388] sm:$0xff] }
 0x4ca   :  { %v10332_v23 = vpack.c.bf16 %v5930_v8, %v5926_v7  ;;  %v10468_v8 = vpack.c.bf16 %v5948_v60, %v5944_v59  ;;  %v5968_v59 = vld [vmem:[#allocation10 + $0x1490] sm:$0xff] }
 0x4cb   :  { %10321 = vmatpush1.bf16.msra.mxu0 %v10320_v24  ;;  %v10460_v24 = vpack.c.bf16 %v5932_v12, %v5928_v10  ;;  %v10342_v10 = vpack.c.bf16 %v5955_v62, %v5951_v57  ;;  %v5954_v12 = vld [vmem:[#allocation10 + $0x1420] sm:$0xff]  ;;  %v5972_v60 = vld [vmem:[#allocation10 + $0x14b0] sm:$0xff]  ;;  %v5975_v57 = vld [vmem:[#allocation10 + $0x14c8] sm:$0xff] }
 0x4cc   :  { %10449 = vmatpush1.bf16.msra.mxu1 %v10448_v28  ;;  %10323 = vmatprep.subr.bf16.mxu0 %v10322_v38  ;;  %v10334_v28 = vpack.c.bf16 %v5939_v18, %v5935_v17  ;;  %v5934_v38 = vld [vmem:[#allocation10 + $0x1380] sm:$0xff]  ;;  %v5952_v18 = vld [vmem:[#allocation10 + $0x1410] sm:$0xff]  ;;  %v5979_v62 = vld [vmem:[#allocation10 + $0x14e8] sm:$0xff] }
 0x4cd   :  { %10451 = vmatprep.subr.bf16.mxu1 %v10450_v31  ;;  %v5940_v31 = vld [vmem:[#allocation10 + $0x13b0] sm:$0xff] }
 0x4ce   :  { %v10464_v4 = vpack.c.bf16 %v5940_v31, %v5936_v29  ;;  %v5962_v29 = vld [vmem:[#allocation10 + $0x1460] sm:$0xff] }
 0x4cf   :  { %10325 = vmatpush1.bf16.msra.mxu0 %v10324_v43  ;;  %v4515_v43 = vrot.slane %v11962_v22, %v11886_v37 }
 0x4d0   :  { %10453 = vmatpush1.bf16.msra.mxu1 %v10452_v19  ;;  %10327 = vmatprep.subr.bf16.mxu0 %v10326_v49  ;;  %v10336_v19 = vpack.c.bf16 %v5938_v32, %v5934_v38  ;;  %v4458_v49 = vmul.f32 %v4365_v26, %v11831_v6  ;;  %v5961_v26 = vld [vmem:[#allocation10 + $0x1458] sm:$0xff]  ;;  %v10472_v38 = vpack.c.bf16 %v5956_v21, %v5952_v18  ;;  %v5958_v32 = vld [vmem:[#allocation10 + $0x1440] sm:$0xff]  ;;  %v5987_v18 = vld [vmem:[#allocation10 + $0x1528] sm:$0xff] }
 0x4d1   :  { %10455 = vmatprep.subr.bf16.mxu1 %v10454_v53  ;;  %v5946_v53 = vld [vmem:[#allocation10 + $0x13e0] sm:$0xff]  ;;  %v5985_v21 = vld [vmem:[#allocation10 + $0x1518] sm:$0xff] }
 0x4d2   :  { %v10340_v6 = vpack.c.bf16 %v5946_v53, %v5942_v51  ;;  %v4608_v7 = vadd.f32 %v4515_v43, %v4458_v49  ;;  %v5969_v43 = vld [vmem:[#allocation10 + $0x1498] sm:$0xff]  ;;  %v10348_v49 = vpack.c.bf16 %v5962_v29, %v5958_v32  ;;  %v5966_v51 = vld [vmem:[#allocation10 + $0x1480] sm:$0xff]  ;;  %v5988_v32 = vld [vmem:[#allocation10 + $0x1530] sm:$0xff] }
 0x4d3   :  { %10329 = vmatpush1.bf16.msra.mxu0 %v10328_v0  ;;  %v4527_v0 = vrot.slane %v11962_v22, %v11889_v58  ;;  %v5970_v53 = vld [vmem:[#allocation10 + $0x14a0] sm:$0xff]  ;;  %v5991_v29 = vld [vmem:[#allocation10 + $0x1548] sm:$0xff] }
 0x4d4   :  { %10457 = vmatpush1.bf16.msra.mxu1 %v10456_v3  ;;  %10331 = vmatprep.subr.bf16.mxu0 %v10330_v14  ;;  %v5953_v3 = vld [vmem:[#allocation10 + $0x1418] sm:$0xff] }
 0x4d5   :  { %10459 = vmatprep.subr.bf16.mxu1 %v10458_v56  ;;  %v5957_v14 = vld [vmem:[#allocation10 + $0x1438] sm:$0xff]  ;;  %v5950_v56 = vld [vmem:[#allocation10 + $0x1400] sm:$0xff]  ;;  %v4611_v25 = vadd.f32 %v4527_v0, %v4461_v63 }
 0x4d6   :  { %v10470_v17 = vpack.c.bf16 %v5957_v14, %v5953_v3  ;;  %v10344_v22 = vpack.c.bf16 %v5954_v12, %v5950_v56  ;;  %v5977_v63 = vld [vmem:[#allocation10 + $0x14d8] sm:$0xff]  ;;  %v10352_v3 = vpack.c.bf16 %v5970_v53, %v5966_v51  ;;  %v10480_v14 = vpack.c.bf16 %v5972_v60, %v5968_v59  ;;  %v5980_v12 = vld [vmem:[#allocation10 + $0x14f0] sm:$0xff]  ;;  %v5999_v51 = vld [vmem:[#allocation10 + $0x1588] sm:$0xff] }
 0x4d7   :  { %10333 = vmatpush1.bf16.msra.mxu0 %v10332_v23  ;;  %v5963_v23 = vld [vmem:[#allocation10 + $0x1468] sm:$0xff]  ;;  %v4635_v36 = vmax.f32 %v4611_v25, 0.0  ;;  %v5981_v0 = vld [vmem:[#allocation10 + $0x14f8] sm:$0xff] }
 0x4d8   :  { %10461 = vmatpush1.bf16.msra.mxu1 %v10460_v24  ;;  %10335 = vmatprep.subr.bf16.mxu0 %v10334_v28  ;;  %v5965_v24 = vld [vmem:[#allocation10 + $0x1478] sm:$0xff]  ;;  %v4632_v28 = vmax.f32 %v4608_v7, 0.0  ;;  %v10346_v31 = vpack.c.bf16 %v5963_v23, %v5959_v20  ;;  %v5974_v7 = vld [vmem:[#allocation10 + $0x14c0] sm:$0xff]  ;;  %v10482_v56 = vpack.c.bf16 %v5981_v0, %v5977_v63  ;;  %v6003_v53 = vld [vmem:[#allocation10 + $0x15a8] sm:$0xff] }
 0x4d9   :  { %10463 = vmatprep.subr.bf16.mxu1 %v10462_v55  ;;  %v5960_v55 = vld [vmem:[#allocation10 + $0x1450] sm:$0xff]  ;;  %v10474_v42 = vpack.c.bf16 %v5965_v24, %v5961_v26  ;;  %v5989_v25 = vld [vmem:[#allocation10 + $0x1538] sm:$0xff]  ;;  %v5982_v26 = vld [vmem:[#allocation10 + $0x1500] sm:$0xff] }
 0x4da   :  { %v5986_v24 = vld [vmem:[#allocation10 + $0x1520] sm:$0xff]  ;;  %v6005_v60 = vld [vmem:[#allocation10 + $0x15b8] sm:$0xff] }
 0x4db   :  { %10337 = vmatpush1.bf16.msra.mxu0 %v10336_v19  ;;  %v5973_v19 = vld [vmem:[#allocation10 + $0x14b8] sm:$0xff] }
 0x4dc   :  { %10465 = vmatpush1.bf16.msra.mxu1 %v10464_v4  ;;  %10339 = vmatprep.subr.bf16.mxu0 %v10338_v15  ;;  %v10476_v4 = vpack.c.bf16 %v5964_v9, %v5960_v55  ;;  %v10350_v15 = vpack.c.bf16 %v5971_v39, %v5967_v33  ;;  %v5995_v55 = vld [vmem:[#allocation10 + $0x1568] sm:$0xff]  ;;  %v5997_v9 = vld [vmem:[#allocation10 + $0x1578] sm:$0xff]  ;;  %v10360_v33 = vpack.c.bf16 %v5986_v24, %v5982_v26  ;;  %v4904_v39 = vld [vmem:[#allocation11] sm:$0xf] }
 0x4dd   :  { %10467 = vmatprep.subr.bf16.mxu1 %v10466_v54  ;;  %v10478_v54 = vpack.c.bf16 %v5973_v19, %v5969_v43  ;;  %v5990_v43 = vld [vmem:[#allocation10 + $0x1540] sm:$0xff]  ;;  %v4909_v59 = vrot.slane %v4904_v39, %v11886_v37  ;;  %v4921_v0 = vrot.slane %v4904_v39, %v11889_v58 }
 0x4de   :  { %v5994_v19 = vld [vmem:[#allocation10 + $0x1560] sm:$0xff] }
 0x4df   :  { %10341 = vmatpush1.bf16.msra.mxu0 %v10340_v6  ;;  %v10354_v6 = vpack.c.bf16 %v5979_v62, %v5975_v57  ;;  %v4917_v57 = vrot.slane %v4904_v39, %v11910_v27  ;;  %v4913_v62 = vrot.slane %v4904_v39, %v11864_v45  ;;  %v10364_v63 = vpack.c.bf16 %v5994_v19, %v5990_v43  ;;  %v6015_v43 = vld [vmem:[#allocation10 + $0x1608] sm:$0xff] }
 0x4e0   :  { %10469 = vmatpush1.bf16.msra.mxu1 %v10468_v8  ;;  %10343 = vmatprep.subr.bf16.mxu0 %v10342_v10  ;;  %v5978_v8 = vld [vmem:[#allocation10 + $0x14e0] sm:$0xff]  ;;  %v5976_v10 = vld [vmem:[#allocation10 + $0x14d0] sm:$0xff]  ;;  %v6019_v19 = vld [vmem:[#allocation10 + $0x1628] sm:$0xff] }
 0x4e1   :  { %10471 = vmatprep.subr.bf16.mxu1 %v10470_v17  ;;  %v5983_v17 = vld [vmem:[#allocation10 + $0x1508] sm:$0xff]  ;;  %v10356_v20 = vpack.c.bf16 %v5978_v8, %v5974_v7  ;;  %v10484_v23 = vpack.c.bf16 %v5980_v12, %v5976_v10  ;;  %v6002_v7 = vld [vmem:[#allocation10 + $0x15a0] sm:$0xff]  ;;  %v6000_v8 = vld [vmem:[#allocation10 + $0x1590] sm:$0xff] }
 0x4e2   :  { %6166 = vmatmul.mubr.f32.vlgmr.msra.gmra.mrb[16].mxu0 %v4632_v28  ;;  %v6004_v12 = vld [vmem:[#allocation10 + $0x15b0] sm:$0xff] }
 0x4e3   :  { %6308 = vmatmul.mubr.f32.vlgmr.msra.gmra.mrb[16].mxu1 %v4632_v28  ;;  %10345 = vmatpush1.bf16.msra.mxu0 %v10344_v22  ;;  %v10358_v22 = vpack.c.bf16 %v5987_v18, %v5983_v17  ;;  %v5984_v28 = vld [vmem:[#allocation10 + $0x1510] sm:$0xff]  ;;  %v6007_v17 = vld [vmem:[#allocation10 + $0x15c8] sm:$0xff] }
 0x4e4   :  { %6236 = vmatprep.mubr.f32.mxu0 %v4635_v36  ;;  %10473 = vmatpush1.bf16.msra.mxu1 %v10472_v38  ;;  %v10486_v38 = vpack.c.bf16 %v5989_v25, %v5985_v21  ;;  %v6011_v18 = vld [vmem:[#allocation10 + $0x15e8] sm:$0xff] }
 0x4e5   :  { %6378 = vmatprep.mubr.f32.mxu1 %v4635_v36  ;;  %10347 = vmatprep.subr.bf16.mxu0 %v10346_v31  ;;  %v5993_v31 = vld [vmem:[#allocation10 + $0x1558] sm:$0xff]  ;;  %v10488_v36 = vpack.c.bf16 %v5988_v32, %v5984_v28 }
 0x4e6   :  { %10475 = vmatprep.subr.bf16.mxu1 %v10474_v42  ;;  %v10362_v42 = vpack.c.bf16 %v5995_v55, %v5991_v29  ;;  %v10496_v29 = vpack.c.bf16 %v6004_v12, %v6000_v8  ;;  %v10370_v55 = vpack.c.bf16 %v6011_v18, %v6007_v17  ;;  %v6025_v8 = vld [vmem:[#allocation10 + $0x1658] sm:$0xff]  ;;  %v6022_v18 = vld [vmem:[#allocation10 + $0x1640] sm:$0xff] }
 0x4e7   :  { %10349 = vmatpush1.bf16.msra.mxu0 %v10348_v49  ;;  %v5992_v49 = vld [vmem:[#allocation10 + $0x1550] sm:$0xff] }
 0x4e8   :  { %10477 = vmatpush1.bf16.msra.mxu1 %v10476_v4  ;;  %10351 = vmatprep.subr.bf16.mxu0 %v10350_v15  ;;  %v10490_v4 = vpack.c.bf16 %v5997_v9, %v5993_v31  ;;  %v5996_v15 = vld [vmem:[#allocation10 + $0x1570] sm:$0xff]  ;;  %v6006_v31 = vld [vmem:[#allocation10 + $0x15c0] sm:$0xff] }
 0x4e9   :  { %10479 = vmatprep.subr.bf16.mxu1 %v10478_v54  ;;  %v6001_v54 = vld [vmem:[#allocation10 + $0x1598] sm:$0xff]  ;;  %v6010_v9 = vld [vmem:[#allocation10 + $0x15e0] sm:$0xff] }
 0x4eb   :  { %10353 = vmatpush1.bf16.msra.mxu0 %v10352_v3  ;;  %v10492_v3 = vpack.c.bf16 %v5996_v15, %v5992_v49  ;;  %v6021_v15 = vld [vmem:[#allocation10 + $0x1638] sm:$0xff] }
 0x4ec   :  { %10481 = vmatpush1.bf16.msra.mxu1 %v10480_v14  ;;  %10355 = vmatprep.subr.bf16.mxu0 %v10354_v6  ;;  %v10366_v14 = vpack.c.bf16 %v6003_v53, %v5999_v51  ;;  %v5998_v6 = vld [vmem:[#allocation10 + $0x1580] sm:$0xff]  ;;  %v10372_v53 = vpack.c.bf16 %v6010_v9, %v6006_v31  ;;  %v6032_v9 = vld [vmem:[#allocation10 + $0x1690] sm:$0xff] }
 0x4ed   :  { %10483 = vmatprep.subr.bf16.mxu1 %v10482_v56  ;;  %v10494_v56 = vpack.c.bf16 %v6005_v60, %v6001_v54  ;;  %v10374_v60 = vpack.c.bf16 %v6019_v19, %v6015_v43  ;;  %v6034_v31 = vld [vmem:[#allocation10 + $0x16a0] sm:$0xff]  ;;  %v6041_v43 = vld [vmem:[#allocation10 + $0x16d8] sm:$0xff] }
 0x4ee   :  { %v6045_v19 = vld [vmem:[#allocation10 + $0x16f8] sm:$0xff] }
 0x4ef   :  { %10357 = vmatpush1.bf16.msra.mxu0 %v10356_v20 }
 0x4f0   :  { %10485 = vmatpush1.bf16.msra.mxu1 %v10484_v23  ;;  %10359 = vmatprep.subr.bf16.mxu0 %v10358_v22  ;;  %v6009_v23 = vld [vmem:[#allocation10 + $0x15d8] sm:$0xff] }
 0x4f1   :  { %10487 = vmatprep.subr.bf16.mxu1 %v10486_v38  ;;  %v6013_v22 = vld [vmem:[#allocation10 + $0x15f8] sm:$0xff]  ;;  %v10368_v38 = vpack.c.bf16 %v6002_v7, %v5998_v6  ;;  %v6027_v6 = vld [vmem:[#allocation10 + $0x1668] sm:$0xff] }
 0x4f3   :  { %10361 = vmatpush1.bf16.msra.mxu0 %v10360_v33  ;;  %v6008_v33 = vld [vmem:[#allocation10 + $0x15d0] sm:$0xff] }
 0x4f4   :  { %10489 = vmatpush1.bf16.msra.mxu1 %v10488_v36  ;;  %10363 = vmatprep.subr.bf16.mxu0 %v10362_v42  ;;  %v10498_v36 = vpack.c.bf16 %v6013_v22, %v6009_v23  ;;  %v6012_v42 = vld [vmem:[#allocation10 + $0x15f0] sm:$0xff]  ;;  %v6031_v22 = vld [vmem:[#allocation10 + $0x1688] sm:$0xff] }
 0x4f5   :  { %v5063_v10 = vpop.f32.mrb[12].mxu0  ;;  %10491 = vmatprep.subr.bf16.mxu1 %v10490_v4  ;;  %v6017_v4 = vld [vmem:[#allocation10 + $0x1618] sm:$0xff]  ;;  %v10500_v54 = vpack.c.bf16 %v6012_v42, %v6008_v33  ;;  %v6028_v23 = vld [vmem:[#allocation10 + $0x1670] sm:$0xff]  ;;  %v6043_v42 = vld [vmem:[#allocation10 + $0x16e8] sm:$0xff] }
 0x4f6   :  { %v11302_v21 = vadd.f32 %v5063_v10, %v4909_v59  ;;  %v5205_v25 = vpop.f32.mrb[12].mxu1  ;;  %v5065_v20 = vpop.f32.mrb[13].mxu0  ;;  %v6029_v10 = vld [vmem:[#allocation10 + $0x1678] sm:$0xff] }
 0x4f7   :  { %v11304_v26 = vadd.f32 %v5205_v25, %v4917_v57  ;;  %v11303_v24 = vadd.f32 %v5065_v20, %v4913_v62  ;;  %v5207_v28 = vpop.f32.mrb[13].mxu1  ;;  %10365 = vmatpush1.bf16.msra.mxu0 %v10364_v63  ;;  %v6014_v57 = vld [vmem:[#allocation10 + $0x1600] sm:$0xff]  ;;  %v6016_v63 = vld [vmem:[#allocation10 + $0x1610] sm:$0xff]  ;;  %v10506_v20 = vpack.c.bf16 %v6029_v10, %v6025_v8 }
 0x4f8   :  { %v11305_v32 = vadd.f32 %v5207_v28, %v4921_v0  ;;  %10493 = vmatpush1.bf16.msra.mxu1 %v10492_v3  ;;  %10367 = vmatprep.subr.bf16.mxu0 %v10366_v14  ;;  %v6018_v62 = vld [vmem:[#allocation10 + $0x1620] sm:$0xff]  ;;  %v10502_v0 = vpack.c.bf16 %v6021_v15, %v6017_v4  ;;  %v6020_v3 = vld [vmem:[#allocation10 + $0x1630] sm:$0xff]  ;;  %v6023_v14 = vld [vmem:[#allocation10 + $0x1648] sm:$0xff] }
 0x4f9   :  { %v5214_v39 = vcombine.low %v11302_v21, %v11303_v24  ;;  %10495 = vmatprep.subr.bf16.mxu1 %v10494_v56  ;;  %v10376_v56 = vpack.c.bf16 %v6018_v62, %v6014_v57  ;;  %v10504_v12 = vpack.c.bf16 %v6020_v3, %v6016_v63  ;;  %v10378_v17 = vpack.c.bf16 %v6027_v6, %v6023_v14  ;;  %v6026_v21 = vld [vmem:[#allocation10 + $0x1660] sm:$0xff]  ;;  %v6024_v25 = vld [vmem:[#allocation10 + $0x1650] sm:$0xff]  ;;  %v6033_v24 = vld [vmem:[#allocation10 + $0x1698] sm:$0xff] }
 0x4fa   :  { %v5215_v49 = vcombine.low %v11304_v26, %v11305_v32  ;;  %v6035_v26 = vld [vmem:[#allocation10 + $0x16a8] sm:$0xff]  ;;  %v6037_v28 = vld [vmem:[#allocation10 + $0x16b8] sm:$0xff]  ;;  %v10508_v32 = vpack.c.bf16 %v6028_v23, %v6024_v25  ;;  %v6050_v8 = vld [vmem:[#allocation10 + $0x1720] sm:$0xff] }
 0x4fb   :  { %v5222_v51 = vrot.slane %v5214_v39, %v11724_v11  ;;  %10369 = vmatpush1.bf16.msra.mxu0 %v10368_v38  ;;  %v10380_v38 = vpack.c.bf16 %v6026_v21, %v6022_v18  ;;  %v10510_v33 = vpack.c.bf16 %v6037_v28, %v6033_v24  ;;  %v6036_v39 = vld [vmem:[#allocation10 + $0x16b0] sm:$0xff]  ;;  %v6047_v57 = vld [vmem:[#allocation10 + $0x1708] sm:$0xff]  ;;  %v6049_v63 = vld [vmem:[#allocation10 + $0x1718] sm:$0xff] }
 0x4fc   :  { %v5229_v59 = vrot.slane %v5215_v49, %v11724_v11  ;;  %10497 = vmatpush1.bf16.msra.mxu1 %v10496_v29  ;;  %10371 = vmatprep.subr.bf16.mxu0 %v10370_v55  ;;  %v10382_v29 = vpack.c.bf16 %v6035_v26, %v6031_v22  ;;  %v6030_v55 = vld [vmem:[#allocation10 + $0x1680] sm:$0xff]  ;;  %v10512_v4 = vpack.c.bf16 %v6036_v39, %v6032_v9  ;;  %v6051_v62 = vld [vmem:[#allocation10 + $0x1728] sm:$0xff]  ;;  %v6048_v10 = vld [vmem:[#allocation10 + $0x1710] sm:$0xff] }
 0x4fd   :  { %10499 = vmatprep.subr.bf16.mxu1 %v10498_v36  ;;  %v6039_v36 = vld [vmem:[#allocation10 + $0x16c8] sm:$0xff]  ;;  %v10384_v49 = vpack.c.bf16 %v6034_v31, %v6030_v55  ;;  %v10390_v6 = vpack.c.bf16 %v6051_v62, %v6047_v57  ;;  %v6057_v21 = vld [vmem:[#allocation10 + $0x1758] sm:$0xff]  ;;  %v6054_v26 = vld [vmem:[#allocation10 + $0x1740] sm:$0xff] }
 0x4fe   :  { %v5230_v7 = vcombine.low %v5222_v51, %v5229_v59  ;;  %v10386_v15 = vpack.c.bf16 %v6043_v42, %v6039_v36  ;;  %v6038_v51 = vld [vmem:[#allocation10 + $0x16c0] sm:$0xff]  ;;  %v6040_v59 = vld [vmem:[#allocation10 + $0x16d0] sm:$0xff]  ;;  %v6059_v18 = vld [vmem:[#allocation10 + $0x1768] sm:$0xff] }
 0x4ff   :  { %10373 = vmatpush1.bf16.msra.mxu0 %v10372_v53  ;;  %v6042_v53 = vld [vmem:[#allocation10 + $0x16e0] sm:$0xff]  ;;  %v6061_v25 = vld [vmem:[#allocation10 + $0x1778] sm:$0xff]  ;;  %v6056_v28 = vld [vmem:[#allocation10 + $0x1750] sm:$0xff] }
 0x500   :  { %5232 = vst [vmem:[#allocation13] sm:$0xff] %v5230_v7  ;;  %10501 = vmatpush1.bf16.msra.mxu1 %v10500_v54  ;;  %10375 = vmatprep.subr.bf16.mxu0 %v10374_v60  ;;  %v10514_v54 = vpack.c.bf16 %v6045_v19, %v6041_v43  ;;  %v6044_v60 = vld [vmem:[#allocation10 + $0x16f0] sm:$0xff]  ;;  %v10388_v3 = vpack.c.bf16 %v6042_v53, %v6038_v51  ;;  %v6046_v7 = vld [vmem:[#allocation10 + $0x1700] sm:$0xff]  ;;  %v6067_v55 = vld [vmem:[#allocation10 + $0x17a8] sm:$0xff] }
 0x501   :  { %10503 = vmatprep.subr.bf16.mxu1 %v10502_v0  ;;  %v6053_v0 = vld [vmem:[#allocation10 + $0x1738] sm:$0xff]  ;;  %v10516_v14 = vpack.c.bf16 %v6044_v60, %v6040_v59  ;;  %v6058_v24 = vld [vmem:[#allocation10 + $0x1760] sm:$0xff]  ;;  %v6068_v51 = vld [vmem:[#allocation10 + $0x17b0] sm:$0xff] }
 0x502   :  { %v6065_v31 = vld [vmem:[#allocation10 + $0x1798] sm:$0xff]  ;;  %v6062_v19 = vld [vmem:[#allocation10 + $0x1780] sm:$0xff]  ;;  %v6071_v53 = vld [vmem:[#allocation10 + $0x17c8] sm:$0xff] }
 0x503   :  { %10377 = vmatpush1.bf16.msra.mxu0 %v10376_v56  ;;  %v10518_v56 = vpack.c.bf16 %v6053_v0, %v6049_v63  ;;  %v6069_v9 = vld [vmem:[#allocation10 + $0x17b8] sm:$0xff]  ;;  %v6075_v59 = vld [vmem:[#allocation10 + $0x17e8] sm:$0xff]  ;;  %v11990_v62 = vld [vmem:[#allocation8 + $0x8] sm:$0xff] }
 0x504   :  { %10505 = vmatpush1.bf16.msra.mxu1 %v10504_v12  ;;  %10379 = vmatprep.subr.bf16.mxu0 %v10378_v17  ;;  %v6052_v12 = vld [vmem:[#allocation10 + $0x1730] sm:$0xff]  ;;  %v6055_v17 = vld [vmem:[#allocation10 + $0x1748] sm:$0xff]  ;;  %v11984_v39 = vld [vmem:[#allocation7 + $0x8] sm:$0xff]  ;;  %v4523_v63 = vrot.slane %v11990_v62, %v11910_v27 }
 0x505   :  { %10507 = vmatprep.subr.bf16.mxu1 %v10506_v20  ;;  %v10392_v20 = vpack.c.bf16 %v6050_v8, %v6046_v7  ;;  %v10520_v23 = vpack.c.bf16 %v6052_v12, %v6048_v10  ;;  %v10394_v22 = vpack.c.bf16 %v6059_v18, %v6055_v17  ;;  %v4373_v36 = vrot.slane %v11984_v39, %v11910_v27  ;;  %v6073_v60 = vld [vmem:[#allocation10 + $0x17d8] sm:$0xff]  ;;  %v6070_v7 = vld [vmem:[#allocation10 + $0x17c0] sm:$0xff]  ;;  %v6072_v10 = vld [vmem:[#allocation10 + $0x17d0] sm:$0xff] }
 0x506   :  { %v6077_v57 = vld [vmem:[#allocation10 + $0x17f8] sm:$0xff]  ;;  %v6074_v8 = vld [vmem:[#allocation10 + $0x17e0] sm:$0xff]  ;;  %v6076_v12 = vld [vmem:[#allocation10 + $0x17f0] sm:$0xff] }
 0x507   :  { %10381 = vmatpush1.bf16.msra.mxu0 %v10380_v38  ;;  %v10522_v38 = vpack.c.bf16 %v6061_v25, %v6057_v21  ;;  %v6411_v17 = vld [vmem:[#allocation10 + $0x1808] sm:$0xff]  ;;  %v4535_v25 = vrot.slane %v11990_v62, %v11913_v35 }
 0x508   :  { %10509 = vmatpush1.bf16.msra.mxu1 %v10508_v32  ;;  %10383 = vmatprep.subr.bf16.mxu0 %v10382_v29  ;;  %v6060_v32 = vld [vmem:[#allocation10 + $0x1770] sm:$0xff]  ;;  %v6063_v29 = vld [vmem:[#allocation10 + $0x1788] sm:$0xff] }
 0x509   :  { %10511 = vmatprep.subr.bf16.mxu1 %v10510_v33  ;;  %v10396_v33 = vpack.c.bf16 %v6058_v24, %v6054_v26  ;;  %v10524_v42 = vpack.c.bf16 %v6060_v32, %v6056_v28  ;;  %v10398_v43 = vpack.c.bf16 %v6067_v55, %v6063_v29  ;;  %v6415_v18 = vld [vmem:[#allocation10 + $0x1828] sm:$0xff]  ;;  %v10532_v26 = vpack.c.bf16 %v6076_v12, %v6072_v10  ;;  %v6410_v28 = vld [vmem:[#allocation10 + $0x1800] sm:$0xff]  ;;  %v6412_v29 = vld [vmem:[#allocation10 + $0x1810] sm:$0xff] }
 0x50a   :  { %v10534_v24 = vpack.c.bf16 %v6415_v18, %v6411_v17  ;;  %v6416_v55 = vld [vmem:[#allocation10 + $0x1830] sm:$0xff]  ;;  %v6435_v17 = vld [vmem:[#allocation10 + $0x18c8] sm:$0xff] }
 0x50b   :  { %10385 = vmatpush1.bf16.msra.mxu0 %v10384_v49  ;;  %v6066_v49 = vld [vmem:[#allocation10 + $0x17a0] sm:$0xff]  ;;  %v6428_v10 = vld [vmem:[#allocation10 + $0x1890] sm:$0xff]  ;;  %v6439_v18 = vld [vmem:[#allocation10 + $0x18e8] sm:$0xff] }
 0x50c   :  { %10513 = vmatpush1.bf16.msra.mxu1 %v10512_v4  ;;  %10387 = vmatprep.subr.bf16.mxu0 %v10386_v15  ;;  %v6064_v4 = vld [vmem:[#allocation10 + $0x1790] sm:$0xff]  ;;  %v10526_v15 = vpack.c.bf16 %v6069_v9, %v6065_v31  ;;  %v10400_v0 = vpack.c.bf16 %v6066_v49, %v6062_v19  ;;  %v6423_v9 = vld [vmem:[#allocation10 + $0x1868] sm:$0xff]  ;;  %v10664_v19 = vpack.c.bf16 %v6416_v55, %v6412_v29  ;;  %v6418_v49 = vld [vmem:[#allocation10 + $0x1840] sm:$0xff] }
 0x50d   :  { %10515 = vmatprep.subr.bf16.mxu1 %v10514_v54  ;;  %v4385_v54 = vrot.slane %v11984_v39, %v11913_v35  ;;  %v6432_v12 = vld [vmem:[#allocation10 + $0x18b0] sm:$0xff]  ;;  %v6447_v29 = vld [vmem:[#allocation10 + $0x1928] sm:$0xff]  ;;  %v6445_v55 = vld [vmem:[#allocation10 + $0x1918] sm:$0xff] }
 0x50f   :  { %10389 = vmatpush1.bf16.msra.mxu0 %v10388_v3  ;;  %v4460_v3 = vmul.f32 %v4373_v36, %v11833_v13  ;;  %v4463_v21 = vmul.f32 %v4385_v54, %v11859_v48  ;;  %v10404_v13 = vpack.c.bf16 %v6074_v8, %v6070_v7  ;;  %v6419_v48 = vld [vmem:[#allocation10 + $0x1848] sm:$0xff]  ;;  %v6421_v36 = vld [vmem:[#allocation10 + $0x1858] sm:$0xff]  ;;  %v6426_v7 = vld [vmem:[#allocation10 + $0x1880] sm:$0xff] }
 0x510   :  { %10517 = vmatpush1.bf16.msra.mxu1 %v10516_v14  ;;  %10391 = vmatprep.subr.bf16.mxu0 %v10390_v6  ;;  %v10528_v14 = vpack.c.bf16 %v6068_v51, %v6064_v4  ;;  %v10402_v6 = vpack.c.bf16 %v6075_v59, %v6071_v53  ;;  %v6422_v4 = vld [vmem:[#allocation10 + $0x1860] sm:$0xff]  ;;  %v10538_v51 = vpack.c.bf16 %v6423_v9, %v6419_v48  ;;  %v6424_v53 = vld [vmem:[#allocation10 + $0x1870] sm:$0xff]  ;;  %v6427_v59 = vld [vmem:[#allocation10 + $0x1888] sm:$0xff] }
 0x511   :  { %10519 = vmatprep.subr.bf16.mxu1 %v10518_v56  ;;  %v10530_v56 = vpack.c.bf16 %v6077_v57, %v6073_v60  ;;  %v4613_v31 = vadd.f32 %v4535_v25, %v4463_v21  ;;  %v6431_v54 = vld [vmem:[#allocation10 + $0x18a8] sm:$0xff]  ;;  %v6430_v8 = vld [vmem:[#allocation10 + $0x18a0] sm:$0xff]  ;;  %v6437_v21 = vld [vmem:[#allocation10 + $0x18d8] sm:$0xff] }
 0x512   :  { %v6441_v25 = vld [vmem:[#allocation10 + $0x18f8] sm:$0xff] }
 0x513   :  { %10393 = vmatpush1.bf16.msra.mxu0 %v10392_v20  ;;  %v6413_v20 = vld [vmem:[#allocation10 + $0x1818] sm:$0xff]  ;;  %v4637_v60 = vmax.f32 %v4613_v31, 0.0 }
 0x514   :  { %10521 = vmatpush1.bf16.msra.mxu1 %v10520_v23  ;;  %10395 = vmatprep.subr.bf16.mxu0 %v10394_v22  ;;  %v6417_v23 = vld [vmem:[#allocation10 + $0x1838] sm:$0xff]  ;;  %v4610_v22 = vadd.f32 %v4523_v63, %v4460_v3  ;;  %v10540_v3 = vpack.c.bf16 %v6422_v4, %v6418_v49  ;;  %v6448_v49 = vld [vmem:[#allocation10 + $0x1930] sm:$0xff]  ;;  %v6451_v4 = vld [vmem:[#allocation10 + $0x1948] sm:$0xff] }
 0x515   :  { %10523 = vmatprep.subr.bf16.mxu1 %v10522_v38  ;;  %v6414_v38 = vld [vmem:[#allocation10 + $0x1820] sm:$0xff]  ;;  %v10662_v32 = vpack.c.bf16 %v6417_v23, %v6413_v20  ;;  %v6429_v63 = vld [vmem:[#allocation10 + $0x1898] sm:$0xff]  ;;  %v10544_v20 = vpack.c.bf16 %v6430_v8, %v6426_v7  ;;  %v10672_v23 = vpack.c.bf16 %v6432_v12, %v6428_v10  ;;  %v6463_v7 = vld [vmem:[#allocation10 + $0x19a8] sm:$0xff] }
 0x516   :  { %v6449_v31 = vld [vmem:[#allocation10 + $0x1938] sm:$0xff] }
 0x517   :  { %10397 = vmatpush1.bf16.msra.mxu0 %v10396_v33  ;;  %v10536_v33 = vpack.c.bf16 %v6414_v38, %v6410_v28  ;;  %v10674_v28 = vpack.c.bf16 %v6441_v25, %v6437_v21  ;;  %v6440_v38 = vld [vmem:[#allocation10 + $0x18f0] sm:$0xff]  ;;  %v6461_v8 = vld [vmem:[#allocation10 + $0x1998] sm:$0xff]  ;;  %v6462_v21 = vld [vmem:[#allocation10 + $0x19a0] sm:$0xff] }
 0x518   :  { %10525 = vmatpush1.bf16.msra.mxu1 %v10524_v42  ;;  %10399 = vmatprep.subr.bf16.mxu0 %v10398_v43  ;;  %v6425_v42 = vld [vmem:[#allocation10 + $0x1878] sm:$0xff]  ;;  %v4634_v43 = vmax.f32 %v4610_v22, 0.0  ;;  %v6434_v22 = vld [vmem:[#allocation10 + $0x18c0] sm:$0xff]  ;;  %v6460_v25 = vld [vmem:[#allocation10 + $0x1990] sm:$0xff] }
 0x519   :  { %10527 = vmatprep.subr.bf16.mxu1 %v10526_v15  ;;  %v6420_v15 = vld [vmem:[#allocation10 + $0x1850] sm:$0xff]  ;;  %v10666_v57 = vpack.c.bf16 %v6425_v42, %v6421_v36  ;;  %v6442_v36 = vld [vmem:[#allocation10 + $0x1900] sm:$0xff]  ;;  %v6465_v10 = vld [vmem:[#allocation10 + $0x19b8] sm:$0xff] }
 0x51a   :  { %v6446_v42 = vld [vmem:[#allocation10 + $0x1920] sm:$0xff] }
 0x51b   :  { %10401 = vmatpush1.bf16.msra.mxu0 %v10400_v0  ;;  %v6433_v0 = vld [vmem:[#allocation10 + $0x18b8] sm:$0xff] }
 0x51c   :  { %10529 = vmatpush1.bf16.msra.mxu1 %v10528_v14  ;;  %10403 = vmatprep.subr.bf16.mxu0 %v10402_v6  ;;  %v10668_v14 = vpack.c.bf16 %v6424_v53, %v6420_v15  ;;  %v10542_v6 = vpack.c.bf16 %v6431_v54, %v6427_v59  ;;  %v6455_v15 = vld [vmem:[#allocation10 + $0x1968] sm:$0xff]  ;;  %v6457_v53 = vld [vmem:[#allocation10 + $0x1978] sm:$0xff]  ;;  %v10552_v59 = vpack.c.bf16 %v6446_v42, %v6442_v36 }
 0x51d   :  { %10531 = vmatprep.subr.bf16.mxu1 %v10530_v56  ;;  %v10670_v56 = vpack.c.bf16 %v6433_v0, %v6429_v63  ;;  %v6454_v63 = vld [vmem:[#allocation10 + $0x1960] sm:$0xff]  ;;  %v6452_v0 = vld [vmem:[#allocation10 + $0x1950] sm:$0xff]  ;;  %v6479_v36 = vld [vmem:[#allocation10 + $0x1a28] sm:$0xff] }
 0x51e   :  { %v6477_v42 = vld [vmem:[#allocation10 + $0x1a18] sm:$0xff] }
 0x51f   :  { %10405 = vmatpush1.bf16.msra.mxu0 %v10404_v13  ;;  %v10546_v13 = vpack.c.bf16 %v6439_v18, %v6435_v17  ;;  %v6458_v18 = vld [vmem:[#allocation10 + $0x1980] sm:$0xff] }
 0x520   :  { %10533 = vmatpush1.bf16.msra.mxu1 %v10532_v26  ;;  %10535 = vmatprep.subr.bf16.mxu0 %v10534_v24  ;;  %v6438_v26 = vld [vmem:[#allocation10 + $0x18e0] sm:$0xff]  ;;  %v6436_v24 = vld [vmem:[#allocation10 + $0x18d0] sm:$0xff] }
 0x521   :  { %10663 = vmatprep.subr.bf16.mxu1 %v10662_v32  ;;  %v6443_v32 = vld [vmem:[#allocation10 + $0x1908] sm:$0xff]  ;;  %v10548_v48 = vpack.c.bf16 %v6438_v26, %v6434_v22  ;;  %v10676_v9 = vpack.c.bf16 %v6440_v38, %v6436_v24  ;;  %v6469_v26 = vld [vmem:[#allocation10 + $0x19d8] sm:$0xff] }
 0x522   :  { %6237 = vmatmul.mubr.f32.vlgmr.msra.gmra.mrb[16].mxu0 %v4634_v43  ;;  %v6471_v22 = vld [vmem:[#allocation10 + $0x19e8] sm:$0xff]  ;;  %v6473_v24 = vld [vmem:[#allocation10 + $0x19f8] sm:$0xff] }
 0x523   :  { %6379 = vmatmul.mubr.f32.vlgmr.msra.gmra.mrb[16].mxu1 %v4634_v43  ;;  %10537 = vmatpush1.bf16.msra.mxu0 %v10536_v33  ;;  %v10550_v33 = vpack.c.bf16 %v6447_v29, %v6443_v32  ;;  %v6444_v43 = vld [vmem:[#allocation10 + $0x1910] sm:$0xff]  ;;  %v6466_v29 = vld [vmem:[#allocation10 + $0x19c0] sm:$0xff] }
 0x524   :  { %6753 = vmatprep.mubr.f32.mxu0 %v4637_v60  ;;  %10665 = vmatpush1.bf16.msra.mxu1 %v10664_v19  ;;  %v10678_v19 = vpack.c.bf16 %v6449_v31, %v6445_v55  ;;  %v10680_v54 = vpack.c.bf16 %v6448_v49, %v6444_v43  ;;  %v6470_v55 = vld [vmem:[#allocation10 + $0x19e0] sm:$0xff]  ;;  %v6468_v31 = vld [vmem:[#allocation10 + $0x19d0] sm:$0xff]  ;;  %v6481_v43 = vld [vmem:[#allocation10 + $0x1a38] sm:$0xff] }
 0x525   :  { %6895 = vmatprep.mubr.f32.mxu1 %v4637_v60  ;;  %10539 = vmatprep.subr.bf16.mxu0 %v10538_v51  ;;  %v6453_v51 = vld [vmem:[#allocation10 + $0x1958] sm:$0xff]  ;;  %v10554_v60 = vpack.c.bf16 %v6455_v15, %v6451_v4  ;;  %v6474_v15 = vld [vmem:[#allocation10 + $0x1a00] sm:$0xff] }
 0x526   :  { %10667 = vmatprep.subr.bf16.mxu1 %v10666_v57  ;;  %v6450_v57 = vld [vmem:[#allocation10 + $0x1940] sm:$0xff] }
 0x527   :  { %10541 = vmatpush1.bf16.msra.mxu0 %v10540_v3  ;;  %v10682_v3 = vpack.c.bf16 %v6457_v53, %v6453_v51  ;;  %v6478_v51 = vld [vmem:[#allocation10 + $0x1a20] sm:$0xff]  ;;  %v6476_v53 = vld [vmem:[#allocation10 + $0x1a10] sm:$0xff] }
 0x528   :  { %10669 = vmatpush1.bf16.msra.mxu1 %v10668_v14  ;;  %10543 = vmatprep.subr.bf16.mxu0 %v10542_v6  ;;  %v6456_v14 = vld [vmem:[#allocation10 + $0x1970] sm:$0xff]  ;;  %v6459_v6 = vld [vmem:[#allocation10 + $0x1988] sm:$0xff] }
 0x529   :  { %10671 = vmatprep.subr.bf16.mxu1 %v10670_v56  ;;  %v10556_v56 = vpack.c.bf16 %v6454_v63, %v6450_v57  ;;  %v10684_v12 = vpack.c.bf16 %v6456_v14, %v6452_v0  ;;  %v10558_v17 = vpack.c.bf16 %v6463_v7, %v6459_v6  ;;  %v6487_v57 = vld [vmem:[#allocation10 + $0x1a68] sm:$0xff]  ;;  %v6485_v63 = vld [vmem:[#allocation10 + $0x1a58] sm:$0xff]  ;;  %v6482_v7 = vld [vmem:[#allocation10 + $0x1a40] sm:$0xff] }
 0x52a   :  { %v6489_v0 = vld [vmem:[#allocation10 + $0x1a78] sm:$0xff] }
 0x52b   :  { %10545 = vmatpush1.bf16.msra.mxu0 %v10544_v20  ;;  %v10686_v20 = vpack.c.bf16 %v6465_v10, %v6461_v8  ;;  %v6486_v8 = vld [vmem:[#allocation10 + $0x1a60] sm:$0xff]  ;;  %v6484_v10 = vld [vmem:[#allocation10 + $0x1a50] sm:$0xff] }
 0x52c   :  { %10673 = vmatpush1.bf16.msra.mxu1 %v10672_v23  ;;  %10547 = vmatprep.subr.bf16.mxu0 %v10546_v13  ;;  %v6464_v23 = vld [vmem:[#allocation10 + $0x19b0] sm:$0xff]  ;;  %v6467_v13 = vld [vmem:[#allocation10 + $0x19c8] sm:$0xff] }
 0x52d   :  { %10675 = vmatprep.subr.bf16.mxu1 %v10674_v28  ;;  %v10560_v28 = vpack.c.bf16 %v6462_v21, %v6458_v18  ;;  %v10688_v38 = vpack.c.bf16 %v6464_v23, %v6460_v25  ;;  %v10562_v32 = vpack.c.bf16 %v6471_v22, %v6467_v13  ;;  %v6495_v18 = vld [vmem:[#allocation10 + $0x1aa8] sm:$0xff]  ;;  %v6493_v21 = vld [vmem:[#allocation10 + $0x1a98] sm:$0xff]  ;;  %v6490_v22 = vld [vmem:[#allocation10 + $0x1a80] sm:$0xff] }
 0x52e   :  { %v6497_v25 = vld [vmem:[#allocation10 + $0x1ab8] sm:$0xff] }
 0x52f   :  { %10549 = vmatpush1.bf16.msra.mxu0 %v10548_v48  ;;  %v10690_v48 = vpack.c.bf16 %v6473_v24, %v6469_v26  ;;  %v6494_v26 = vld [vmem:[#allocation10 + $0x1aa0] sm:$0xff]  ;;  %v6492_v24 = vld [vmem:[#allocation10 + $0x1a90] sm:$0xff] }
 0x530   :  { %10677 = vmatpush1.bf16.msra.mxu1 %v10676_v9  ;;  %10551 = vmatprep.subr.bf16.mxu0 %v10550_v33  ;;  %v6472_v9 = vld [vmem:[#allocation10 + $0x19f0] sm:$0xff]  ;;  %v6475_v33 = vld [vmem:[#allocation10 + $0x1a08] sm:$0xff] }
 0x531   :  { %10679 = vmatprep.subr.bf16.mxu1 %v10678_v19  ;;  %v10564_v19 = vpack.c.bf16 %v6470_v55, %v6466_v29  ;;  %v10692_v49 = vpack.c.bf16 %v6472_v9, %v6468_v31  ;;  %v10566_v4 = vpack.c.bf16 %v6479_v36, %v6475_v33  ;;  %v6503_v29 = vld [vmem:[#allocation10 + $0x1ae8] sm:$0xff]  ;;  %v6501_v55 = vld [vmem:[#allocation10 + $0x1ad8] sm:$0xff]  ;;  %v6498_v36 = vld [vmem:[#allocation10 + $0x1ac0] sm:$0xff] }
 0x532   :  { %v6505_v31 = vld [vmem:[#allocation10 + $0x1af8] sm:$0xff] }
 0x533   :  { %10553 = vmatpush1.bf16.msra.mxu0 %v10552_v59  ;;  %v10694_v59 = vpack.c.bf16 %v6481_v43, %v6477_v42  ;;  %v6502_v42 = vld [vmem:[#allocation10 + $0x1ae0] sm:$0xff]  ;;  %v6500_v43 = vld [vmem:[#allocation10 + $0x1ad0] sm:$0xff] }
 0x534   :  { %10681 = vmatpush1.bf16.msra.mxu1 %v10680_v54  ;;  %10555 = vmatprep.subr.bf16.mxu0 %v10554_v60  ;;  %v6480_v54 = vld [vmem:[#allocation10 + $0x1a30] sm:$0xff]  ;;  %v6483_v60 = vld [vmem:[#allocation10 + $0x1a48] sm:$0xff] }
 0x535   :  { %10683 = vmatprep.subr.bf16.mxu1 %v10682_v3  ;;  %v10568_v3 = vpack.c.bf16 %v6478_v51, %v6474_v15  ;;  %v10696_v14 = vpack.c.bf16 %v6480_v54, %v6476_v53  ;;  %v10570_v6 = vpack.c.bf16 %v6487_v57, %v6483_v60  ;;  %v6511_v15 = vld [vmem:[#allocation10 + $0x1b28] sm:$0xff]  ;;  %v6509_v51 = vld [vmem:[#allocation10 + $0x1b18] sm:$0xff]  ;;  %v6506_v57 = vld [vmem:[#allocation10 + $0x1b00] sm:$0xff] }
 0x536   :  { %v6513_v53 = vld [vmem:[#allocation10 + $0x1b38] sm:$0xff] }
 0x537   :  { %10557 = vmatpush1.bf16.msra.mxu0 %v10556_v56  ;;  %v10698_v56 = vpack.c.bf16 %v6489_v0, %v6485_v63  ;;  %v6510_v63 = vld [vmem:[#allocation10 + $0x1b20] sm:$0xff]  ;;  %v6508_v0 = vld [vmem:[#allocation10 + $0x1b10] sm:$0xff] }
 0x538   :  { %10685 = vmatpush1.bf16.msra.mxu1 %v10684_v12  ;;  %10559 = vmatprep.subr.bf16.mxu0 %v10558_v17  ;;  %v6488_v12 = vld [vmem:[#allocation10 + $0x1a70] sm:$0xff]  ;;  %v6491_v17 = vld [vmem:[#allocation10 + $0x1a88] sm:$0xff] }
 0x539   :  { %10687 = vmatprep.subr.bf16.mxu1 %v10686_v20  ;;  %v10572_v20 = vpack.c.bf16 %v6486_v8, %v6482_v7  ;;  %v10700_v23 = vpack.c.bf16 %v6488_v12, %v6484_v10  ;;  %v10574_v13 = vpack.c.bf16 %v6495_v18, %v6491_v17  ;;  %v6519_v7 = vld [vmem:[#allocation10 + $0x1b68] sm:$0xff]  ;;  %v6517_v8 = vld [vmem:[#allocation10 + $0x1b58] sm:$0xff]  ;;  %v6514_v18 = vld [vmem:[#allocation10 + $0x1b40] sm:$0xff] }
 0x53a   :  { %v6521_v10 = vld [vmem:[#allocation10 + $0x1b78] sm:$0xff] }
 0x53b   :  { %10561 = vmatpush1.bf16.msra.mxu0 %v10560_v28  ;;  %v10702_v28 = vpack.c.bf16 %v6497_v25, %v6493_v21  ;;  %v6518_v21 = vld [vmem:[#allocation10 + $0x1b60] sm:$0xff]  ;;  %v6516_v25 = vld [vmem:[#allocation10 + $0x1b50] sm:$0xff] }
 0x53c   :  { %10689 = vmatpush1.bf16.msra.mxu1 %v10688_v38  ;;  %10563 = vmatprep.subr.bf16.mxu0 %v10562_v32  ;;  %v6496_v38 = vld [vmem:[#allocation10 + $0x1ab0] sm:$0xff]  ;;  %v6499_v32 = vld [vmem:[#allocation10 + $0x1ac8] sm:$0xff] }
 0x53d   :  { %10691 = vmatprep.subr.bf16.mxu1 %v10690_v48  ;;  %v10576_v48 = vpack.c.bf16 %v6494_v26, %v6490_v22  ;;  %v10704_v9 = vpack.c.bf16 %v6496_v38, %v6492_v24  ;;  %v10578_v33 = vpack.c.bf16 %v6503_v29, %v6499_v32  ;;  %v6527_v22 = vld [vmem:[#allocation10 + $0x1ba8] sm:$0xff]  ;;  %v6525_v26 = vld [vmem:[#allocation10 + $0x1b98] sm:$0xff]  ;;  %v4381_v38 = vrot.slane %v11984_v39, %v11930_v30 }
 0x53e   :  { %v6529_v24 = vld [vmem:[#allocation10 + $0x1bb8] sm:$0xff] }
 0x53f   :  { %10565 = vmatpush1.bf16.msra.mxu0 %v10564_v19  ;;  %v10706_v19 = vpack.c.bf16 %v6505_v31, %v6501_v55  ;;  %v6522_v55 = vld [vmem:[#allocation10 + $0x1b80] sm:$0xff] }
 0x540   :  { %10693 = vmatpush1.bf16.msra.mxu1 %v10692_v49  ;;  %10567 = vmatprep.subr.bf16.mxu0 %v10566_v4  ;;  %v6504_v49 = vld [vmem:[#allocation10 + $0x1af0] sm:$0xff]  ;;  %v6507_v4 = vld [vmem:[#allocation10 + $0x1b08] sm:$0xff]  ;;  %v6526_v31 = vld [vmem:[#allocation10 + $0x1ba0] sm:$0xff] }
 0x541   :  { %10695 = vmatprep.subr.bf16.mxu1 %v10694_v59  ;;  %v10580_v59 = vpack.c.bf16 %v6502_v42, %v6498_v36  ;;  %v10708_v54 = vpack.c.bf16 %v6504_v49, %v6500_v43  ;;  %v10582_v60 = vpack.c.bf16 %v6511_v15, %v6507_v4  ;;  %v6531_v36 = vld [vmem:[#allocation10 + $0x1bc8] sm:$0xff]  ;;  %v4393_v43 = vrot.slane %v11984_v39, %v11933_v40  ;;  %v6537_v49 = vld [vmem:[#allocation10 + $0x1bf8] sm:$0xff] }
 0x542   :  { %v6535_v42 = vld [vmem:[#allocation10 + $0x1be8] sm:$0xff]  ;;  %v4531_v4 = vrot.slane %v11990_v62, %v11930_v30  ;;  %v10592_v15 = vpack.c.bf16 %v6526_v31, %v6522_v55  ;;  %v6552_v31 = vld [vmem:[#allocation10 + $0x1c70] sm:$0xff] }
 0x543   :  { %10569 = vmatpush1.bf16.msra.mxu0 %v10568_v3  ;;  %v10710_v3 = vpack.c.bf16 %v6513_v53, %v6509_v51  ;;  %v4462_v51 = vmul.f32 %v4381_v38, %v11855_v41  ;;  %v6539_v39 = vld [vmem:[#allocation10 + $0x1c08] sm:$0xff]  ;;  %v6546_v38 = vld [vmem:[#allocation10 + $0x1c40] sm:$0xff] }
 0x544   :  { %10697 = vmatpush1.bf16.msra.mxu1 %v10696_v14  ;;  %10571 = vmatprep.subr.bf16.mxu0 %v10570_v6  ;;  %v6512_v14 = vld [vmem:[#allocation10 + $0x1b30] sm:$0xff]  ;;  %v6515_v6 = vld [vmem:[#allocation10 + $0x1b48] sm:$0xff] }
 0x545   :  { %10699 = vmatprep.subr.bf16.mxu1 %v10698_v56  ;;  %v10584_v56 = vpack.c.bf16 %v6510_v63, %v6506_v57  ;;  %v10712_v12 = vpack.c.bf16 %v6512_v14, %v6508_v0  ;;  %v10586_v17 = vpack.c.bf16 %v6519_v7, %v6515_v6  ;;  %v6532_v57 = vld [vmem:[#allocation10 + $0x1bd0] sm:$0xff]  ;;  %v4465_v14 = vmul.f32 %v4393_v43, %v11861_v52  ;;  %v6541_v7 = vld [vmem:[#allocation10 + $0x1c18] sm:$0xff]  ;;  %v6547_v52 = vld [vmem:[#allocation10 + $0x1c48] sm:$0xff] }
 0x546   :  { %v6536_v0 = vld [vmem:[#allocation10 + $0x1bf0] sm:$0xff]  ;;  %v4543_v6 = vrot.slane %v11990_v62, %v11933_v40  ;;  %v6561_v43 = vld [vmem:[#allocation10 + $0x1cb8] sm:$0xff] }
 0x547   :  { %10573 = vmatpush1.bf16.msra.mxu0 %v10572_v20  ;;  %v10714_v20 = vpack.c.bf16 %v6521_v10, %v6517_v8  ;;  %v6545_v8 = vld [vmem:[#allocation10 + $0x1c38] sm:$0xff]  ;;  %v4612_v10 = vadd.f32 %v4531_v4, %v4462_v51  ;;  %v6558_v51 = vld [vmem:[#allocation10 + $0x1ca0] sm:$0xff] }
 0x548   :  { %10701 = vmatpush1.bf16.msra.mxu1 %v10700_v23  ;;  %10575 = vmatprep.subr.bf16.mxu0 %v10574_v13  ;;  %v6520_v23 = vld [vmem:[#allocation10 + $0x1b70] sm:$0xff]  ;;  %v6523_v13 = vld [vmem:[#allocation10 + $0x1b88] sm:$0xff] }
 0x549   :  { %10703 = vmatprep.subr.bf16.mxu1 %v10702_v28  ;;  %v10588_v28 = vpack.c.bf16 %v6518_v21, %v6514_v18  ;;  %v10716_v32 = vpack.c.bf16 %v6520_v23, %v6516_v25  ;;  %v10590_v29 = vpack.c.bf16 %v6527_v22, %v6523_v13  ;;  %v6542_v18 = vld [vmem:[#allocation10 + $0x1c20] sm:$0xff]  ;;  %v10726_v21 = vpack.c.bf16 %v6545_v8, %v6541_v7  ;;  %v6540_v25 = vld [vmem:[#allocation10 + $0x1c10] sm:$0xff]  ;;  %v6551_v13 = vld [vmem:[#allocation10 + $0x1c68] sm:$0xff] }
 0x54a   :  { %v4615_v23 = vadd.f32 %v4543_v6, %v4465_v14  ;;  %v6549_v22 = vld [vmem:[#allocation10 + $0x1c58] sm:$0xff]  ;;  %v10602_v55 = vpack.c.bf16 %v6551_v13, %v6547_v52  ;;  %v6562_v6 = vld [vmem:[#allocation10 + $0x1cc0] sm:$0xff]  ;;  %v6564_v8 = vld [vmem:[#allocation10 + $0x1cd0] sm:$0xff] }
 0x54b   :  { %10577 = vmatpush1.bf16.msra.mxu0 %v10576_v48  ;;  %v6524_v48 = vld [vmem:[#allocation10 + $0x1b90] sm:$0xff]  ;;  %v6566_v7 = vld [vmem:[#allocation10 + $0x1ce0] sm:$0xff] }
 0x54c   :  { %10705 = vmatpush1.bf16.msra.mxu1 %v10704_v9  ;;  %10579 = vmatprep.subr.bf16.mxu0 %v10578_v33  ;;  %v10718_v9 = vpack.c.bf16 %v6529_v24, %v6525_v26  ;;  %v6528_v33 = vld [vmem:[#allocation10 + $0x1bb0] sm:$0xff]  ;;  %v6553_v26 = vld [vmem:[#allocation10 + $0x1c78] sm:$0xff]  ;;  %v4636_v24 = vmax.f32 %v4612_v10, 0.0  ;;  %v6574_v52 = vld [vmem:[#allocation10 + $0x1d20] sm:$0xff] }
 0x54d   :  { %10707 = vmatprep.subr.bf16.mxu1 %v10706_v19  ;;  %v6533_v19 = vld [vmem:[#allocation10 + $0x1bd8] sm:$0xff]  ;;  %v10720_v53 = vpack.c.bf16 %v6528_v33, %v6524_v48  ;;  %v6555_v48 = vld [vmem:[#allocation10 + $0x1c88] sm:$0xff]  ;;  %v4639_v33 = vmax.f32 %v4615_v23, 0.0  ;;  %v6568_v10 = vld [vmem:[#allocation10 + $0x1cf0] sm:$0xff] }
 0x54e   :  { %v10722_v63 = vpack.c.bf16 %v6537_v49, %v6533_v19  ;;  %v6570_v23 = vld [vmem:[#allocation10 + $0x1d00] sm:$0xff]  ;;  %v6572_v13 = vld [vmem:[#allocation10 + $0x1d10] sm:$0xff] }
 0x54f   :  { %10581 = vmatpush1.bf16.msra.mxu0 %v10580_v59  ;;  %v10594_v59 = vpack.c.bf16 %v6535_v42, %v6531_v36  ;;  %v10730_v36 = vpack.c.bf16 %v6553_v26, %v6549_v22  ;;  %v6557_v42 = vld [vmem:[#allocation10 + $0x1c98] sm:$0xff]  ;;  %v6576_v22 = vld [vmem:[#allocation10 + $0x1d30] sm:$0xff]  ;;  %v6579_v26 = vld [vmem:[#allocation10 + $0x1d48] sm:$0xff] }
 0x550   :  { %10709 = vmatpush1.bf16.msra.mxu1 %v10708_v54  ;;  %10583 = vmatprep.subr.bf16.mxu0 %v10582_v60  ;;  %v6530_v54 = vld [vmem:[#allocation10 + $0x1bc0] sm:$0xff] }
 0x551   :  { %10711 = vmatprep.subr.bf16.mxu1 %v10710_v3  ;;  %v6534_v60 = vld [vmem:[#allocation10 + $0x1be0] sm:$0xff]  ;;  %v6543_v3 = vld [vmem:[#allocation10 + $0x1c28] sm:$0xff] }
 0x552   :  { %v10596_v41 = vpack.c.bf16 %v6534_v60, %v6530_v54  ;;  %v6560_v54 = vld [vmem:[#allocation10 + $0x1cb0] sm:$0xff]  ;;  %v6563_v60 = vld [vmem:[#allocation10 + $0x1cc8] sm:$0xff] }
 0x553   :  { %10585 = vmatpush1.bf16.msra.mxu0 %v10584_v56  ;;  %v10724_v56 = vpack.c.bf16 %v6536_v0, %v6532_v57  ;;  %v6567_v57 = vld [vmem:[#allocation10 + $0x1ce8] sm:$0xff]  ;;  %v6569_v0 = vld [vmem:[#allocation10 + $0x1cf8] sm:$0xff] }
 0x554   :  { %10713 = vmatpush1.bf16.msra.mxu1 %v10712_v12  ;;  %10587 = vmatprep.subr.bf16.mxu0 %v10586_v17  ;;  %v10598_v12 = vpack.c.bf16 %v6543_v3, %v6539_v39  ;;  %v6538_v17 = vld [vmem:[#allocation10 + $0x1c00] sm:$0xff]  ;;  %v10610_v14 = vpack.c.bf16 %v6567_v57, %v6563_v60 }
 0x555   :  { %10715 = vmatprep.subr.bf16.mxu1 %v10714_v20  ;;  %v6544_v20 = vld [vmem:[#allocation10 + $0x1c30] sm:$0xff]  ;;  %v10600_v62 = vpack.c.bf16 %v6542_v18, %v6538_v17  ;;  %v6573_v17 = vld [vmem:[#allocation10 + $0x1d18] sm:$0xff] }
 0x556   :  { %v6577_v18 = vld [vmem:[#allocation10 + $0x1d38] sm:$0xff] }
 0x557   :  { %10589 = vmatpush1.bf16.msra.mxu0 %v10588_v28  ;;  %v10728_v28 = vpack.c.bf16 %v6544_v20, %v6540_v25  ;;  %v10740_v25 = vpack.c.bf16 %v6568_v10, %v6564_v8  ;;  %v6599_v8 = vld [vmem:[#allocation10 + $0x1de8] sm:$0xff] }
 0x558   :  { %10717 = vmatpush1.bf16.msra.mxu1 %v10716_v32  ;;  %10591 = vmatprep.subr.bf16.mxu0 %v10590_v29  ;;  %v6550_v32 = vld [vmem:[#allocation10 + $0x1c60] sm:$0xff]  ;;  %v6548_v29 = vld [vmem:[#allocation10 + $0x1c50] sm:$0xff] }
 0x559   :  { %10719 = vmatprep.subr.bf16.mxu1 %v10718_v9  ;;  %v6559_v9 = vld [vmem:[#allocation10 + $0x1ca8] sm:$0xff]  ;;  %v10604_v19 = vpack.c.bf16 %v6550_v32, %v6546_v38  ;;  %v10732_v49 = vpack.c.bf16 %v6552_v31, %v6548_v29  ;;  %v6585_v38 = vld [vmem:[#allocation10 + $0x1d78] sm:$0xff]  ;;  %v10616_v32 = vpack.c.bf16 %v6574_v52, %v6570_v23  ;;  %v5491_v29 = vld [vmem:[#allocation11 + $0x4] sm:$0xf] }
 0x55a   :  { %v10606_v4 = vpack.c.bf16 %v6559_v9, %v6555_v48  ;;  %v6578_v48 = vld [vmem:[#allocation10 + $0x1d40] sm:$0xff] }
 0x55b   :  { %10593 = vmatpush1.bf16.msra.mxu0 %v10592_v15  ;;  %v6554_v15 = vld [vmem:[#allocation10 + $0x1c80] sm:$0xff] }
 0x55c   :  { %10721 = vmatpush1.bf16.msra.mxu1 %v10720_v53  ;;  %10595 = vmatprep.subr.bf16.mxu0 %v10594_v59  ;;  %v6556_v53 = vld [vmem:[#allocation10 + $0x1c90] sm:$0xff]  ;;  %v10734_v59 = vpack.c.bf16 %v6561_v43, %v6557_v42  ;;  %v10608_v39 = vpack.c.bf16 %v6558_v51, %v6554_v15  ;;  %v6582_v9 = vld [vmem:[#allocation10 + $0x1d60] sm:$0xff]  ;;  %v6587_v43 = vld [vmem:[#allocation10 + $0x1d88] sm:$0xff]  ;;  %v5504_v51 = vrot.slane %v5491_v29, %v11910_v27 }
 0x55d   :  { %10723 = vmatprep.subr.bf16.mxu1 %v10722_v63  ;;  %v6565_v63 = vld [vmem:[#allocation10 + $0x1cd8] sm:$0xff]  ;;  %v10736_v3 = vpack.c.bf16 %v6560_v54, %v6556_v53  ;;  %v6584_v42 = vld [vmem:[#allocation10 + $0x1d70] sm:$0xff]  ;;  %v5500_v53 = vrot.slane %v5491_v29, %v11864_v45  ;;  %v5508_v54 = vrot.slane %v5491_v29, %v11889_v58 }
 0x55e   :  { %v6593_v15 = vld [vmem:[#allocation10 + $0x1db8] sm:$0xff] }
 0x55f   :  { %10597 = vmatpush1.bf16.msra.mxu0 %v10596_v41  ;;  %v10738_v41 = vpack.c.bf16 %v6569_v0, %v6565_v63  ;;  %v6586_v63 = vld [vmem:[#allocation10 + $0x1d80] sm:$0xff] }
 0x560   :  { %10725 = vmatpush1.bf16.msra.mxu1 %v10724_v56  ;;  %10599 = vmatprep.subr.bf16.mxu0 %v10598_v12  ;;  %v6571_v56 = vld [vmem:[#allocation10 + $0x1d08] sm:$0xff]  ;;  %v6590_v0 = vld [vmem:[#allocation10 + $0x1da0] sm:$0xff] }
 0x561   :  { %10727 = vmatprep.subr.bf16.mxu1 %v10726_v21  ;;  %v6575_v12 = vld [vmem:[#allocation10 + $0x1d28] sm:$0xff]  ;;  %v10612_v21 = vpack.c.bf16 %v6566_v7, %v6562_v6  ;;  %v6592_v6 = vld [vmem:[#allocation10 + $0x1db0] sm:$0xff] }
 0x562   :  { %6754 = vmatmul.mubr.f32.vlgmr.msra.gmra.mrb[18].mxu0 %v4636_v24  ;;  %v10614_v20 = vpack.c.bf16 %v6575_v12, %v6571_v56  ;;  %v6595_v7 = vld [vmem:[#allocation10 + $0x1dc8] sm:$0xff]  ;;  %v6597_v12 = vld [vmem:[#allocation10 + $0x1dd8] sm:$0xff] }
 0x563   :  { %6896 = vmatmul.mubr.f32.vlgmr.msra.gmra.mrb[18].mxu1 %v4636_v24  ;;  %10601 = vmatpush1.bf16.msra.mxu0 %v10600_v62  ;;  %v10742_v62 = vpack.c.bf16 %v6577_v18, %v6573_v17  ;;  %v6583_v24 = vld [vmem:[#allocation10 + $0x1d68] sm:$0xff]  ;;  %v6601_v17 = vld [vmem:[#allocation10 + $0x1df8] sm:$0xff] }
 0x564   :  { %6824 = vmatprep.mubr.f32.mxu0 %v4639_v33  ;;  %10729 = vmatpush1.bf16.msra.mxu1 %v10728_v28  ;;  %v6581_v28 = vld [vmem:[#allocation10 + $0x1d58] sm:$0xff]  ;;  %v10618_v31 = vpack.c.bf16 %v6583_v24, %v6579_v26  ;;  %v6596_v26 = vld [vmem:[#allocation10 + $0x1dd0] sm:$0xff] }
 0x565   :  { %6966 = vmatprep.mubr.f32.mxu1 %v4639_v33  ;;  %10603 = vmatprep.subr.bf16.mxu0 %v10602_v55  ;;  %v10744_v55 = vpack.c.bf16 %v6576_v22, %v6572_v13  ;;  %v6580_v33 = vld [vmem:[#allocation10 + $0x1d50] sm:$0xff]  ;;  %v10626_v13 = vpack.c.bf16 %v6599_v8, %v6595_v7  ;;  %v6598_v22 = vld [vmem:[#allocation10 + $0x1de0] sm:$0xff] }
 0x566   :  { %10731 = vmatprep.subr.bf16.mxu1 %v10730_v36  ;;  %v10746_v36 = vpack.c.bf16 %v6585_v38, %v6581_v28  ;;  %v10748_v60 = vpack.c.bf16 %v6584_v42, %v6580_v33  ;;  %v10754_v28 = vpack.c.bf16 %v6601_v17, %v6597_v12  ;;  %v6600_v38 = vld [vmem:[#allocation10 + $0x1df0] sm:$0xff]  ;;  %v6625_v12 = vld [vmem:[#allocation10 + $0x1eb8] sm:$0xff] }
 0x567   :  { %10605 = vmatpush1.bf16.msra.mxu0 %v10604_v19  ;;  %v6591_v19 = vld [vmem:[#allocation10 + $0x1da8] sm:$0xff]  ;;  %v10756_v42 = vpack.c.bf16 %v6600_v38, %v6596_v26  ;;  %v6616_v8 = vld [vmem:[#allocation10 + $0x1e70] sm:$0xff]  ;;  %v6629_v26 = vld [vmem:[#allocation10 + $0x1ed8] sm:$0xff] }
 0x568   :  { %10733 = vmatpush1.bf16.msra.mxu1 %v10732_v49  ;;  %10607 = vmatprep.subr.bf16.mxu0 %v10606_v4  ;;  %v5496_v49 = vrot.slane %v5491_v29, %v11886_v37  ;;  %v6589_v4 = vld [vmem:[#allocation10 + $0x1d98] sm:$0xff]  ;;  %v10622_v57 = vpack.c.bf16 %v6591_v19, %v6587_v43  ;;  %v6607_v29 = vld [vmem:[#allocation10 + $0x1e28] sm:$0xff]  ;;  %v6602_v19 = vld [vmem:[#allocation10 + $0x1e00] sm:$0xff] }
 0x569   :  { %10735 = vmatprep.subr.bf16.mxu1 %v10734_v59  ;;  %v10620_v59 = vpack.c.bf16 %v6582_v9, %v6578_v48  ;;  %v6609_v48 = vld [vmem:[#allocation10 + $0x1e38] sm:$0xff] }
 0x56b   :  { %10609 = vmatpush1.bf16.msra.mxu0 %v10608_v39  ;;  %v6588_v39 = vld [vmem:[#allocation10 + $0x1d90] sm:$0xff] }
 0x56c   :  { %10737 = vmatpush1.bf16.msra.mxu1 %v10736_v3  ;;  %10611 = vmatprep.subr.bf16.mxu0 %v10610_v14  ;;  %v10750_v14 = vpack.c.bf16 %v6593_v15, %v6589_v4  ;;  %v10752_v52 = vpack.c.bf16 %v6592_v6, %v6588_v39  ;;  %v6604_v4 = vld [vmem:[#allocation10 + $0x1e10] sm:$0xff] }
 0x56d   :  { %10739 = vmatprep.subr.bf16.mxu1 %v10738_v41  ;;  %v6612_v6 = vld [vmem:[#allocation10 + $0x1e50] sm:$0xff] }
 0x56f   :  { %10613 = vmatpush1.bf16.msra.mxu0 %v10612_v21 }
 0x570   :  { %10741 = vmatpush1.bf16.msra.mxu1 %v10740_v25  ;;  %10615 = vmatprep.subr.bf16.mxu0 %v10614_v20  ;;  %v10624_v20 = vpack.c.bf16 %v6590_v0, %v6586_v63 }
 0x571   :  { %10743 = vmatprep.subr.bf16.mxu1 %v10742_v62  ;;  %v6594_v62 = vld [vmem:[#allocation10 + $0x1dc0] sm:$0xff] }
 0x572   :  { %v10628_v33 = vpack.c.bf16 %v6598_v22, %v6594_v62  ;;  %v6627_v62 = vld [vmem:[#allocation10 + $0x1ec8] sm:$0xff] }
 0x573   :  { %10617 = vmatpush1.bf16.msra.mxu0 %v10616_v32  ;;  %v6603_v32 = vld [vmem:[#allocation10 + $0x1e08] sm:$0xff] }
 0x574   :  { %10745 = vmatpush1.bf16.msra.mxu1 %v10744_v55  ;;  %10619 = vmatprep.subr.bf16.mxu0 %v10618_v31  ;;  %v6605_v31 = vld [vmem:[#allocation10 + $0x1e18] sm:$0xff]  ;;  %v10630_v43 = vpack.c.bf16 %v6607_v29, %v6603_v32  ;;  %v6631_v22 = vld [vmem:[#allocation10 + $0x1ee8] sm:$0xff]  ;;  %v6626_v29 = vld [vmem:[#allocation10 + $0x1ec0] sm:$0xff] }
 0x575   :  { %v5650_v3 = vpop.f32.mrb[14].mxu0  ;;  %10747 = vmatprep.subr.bf16.mxu1 %v10746_v36  ;;  %v10758_v15 = vpack.c.bf16 %v6609_v48, %v6605_v31  ;;  %v10642_v32 = vpack.c.bf16 %v6631_v22, %v6627_v62  ;;  %v6628_v31 = vld [vmem:[#allocation10 + $0x1ed0] sm:$0xff]  ;;  %v6650_v62 = vld [vmem:[#allocation10 + $0x1f80] sm:$0xff] }
 0x576   :  { %v11306_v41 = vadd.f32 %v5650_v3, %v5496_v49  ;;  %v5792_v10 = vpop.f32.mrb[14].mxu1  ;;  %v5652_v56 = vpop.f32.mrb[15].mxu0  ;;  %v6606_v49 = vld [vmem:[#allocation10 + $0x1e20] sm:$0xff] }
 0x577   :  { %v11308_v18 = vadd.f32 %v5792_v10, %v5504_v51  ;;  %v11307_v21 = vadd.f32 %v5652_v56, %v5500_v53  ;;  %v5794_v25 = vpop.f32.mrb[15].mxu1  ;;  %10621 = vmatpush1.bf16.msra.mxu0 %v10620_v59  ;;  %v6608_v51 = vld [vmem:[#allocation10 + $0x1e30] sm:$0xff]  ;;  %v6611_v53 = vld [vmem:[#allocation10 + $0x1e48] sm:$0xff]  ;;  %v10632_v63 = vpack.c.bf16 %v6606_v49, %v6602_v19  ;;  %v6610_v3 = vld [vmem:[#allocation10 + $0x1e40] sm:$0xff] }
 0x578   :  { %v11309_v23 = vadd.f32 %v5794_v25, %v5508_v54  ;;  %10749 = vmatpush1.bf16.msra.mxu1 %v10748_v60  ;;  %10623 = vmatprep.subr.bf16.mxu0 %v10622_v57  ;;  %v6615_v59 = vld [vmem:[#allocation10 + $0x1e68] sm:$0xff]  ;;  %v6613_v60 = vld [vmem:[#allocation10 + $0x1e58] sm:$0xff]  ;;  %v10760_v0 = vpack.c.bf16 %v6608_v51, %v6604_v4  ;;  %v6618_v25 = vld [vmem:[#allocation10 + $0x1e80] sm:$0xff] }
 0x579   :  { %v5801_v24 = vcombine.low %v11306_v41, %v11307_v21  ;;  %10751 = vmatprep.subr.bf16.mxu1 %v10750_v14  ;;  %v6617_v57 = vld [vmem:[#allocation10 + $0x1e78] sm:$0xff]  ;;  %v10634_v39 = vpack.c.bf16 %v6615_v59, %v6611_v53  ;;  %v6614_v14 = vld [vmem:[#allocation10 + $0x1e60] sm:$0xff]  ;;  %v6619_v41 = vld [vmem:[#allocation10 + $0x1e88] sm:$0xff] }
 0x57a   :  { %v5802_v55 = vcombine.low %v11308_v18, %v11309_v23  ;;  %v10762_v7 = vpack.c.bf16 %v6617_v57, %v6613_v60  ;;  %v6623_v10 = vld [vmem:[#allocation10 + $0x1ea8] sm:$0xff]  ;;  %v6621_v56 = vld [vmem:[#allocation10 + $0x1e98] sm:$0xff]  ;;  %v10636_v17 = vpack.c.bf16 %v6614_v14, %v6610_v3  ;;  %v10764_v18 = vpack.c.bf16 %v6616_v8, %v6612_v6  ;;  %v6620_v23 = vld [vmem:[#allocation10 + $0x1e90] sm:$0xff] }
 0x57b   :  { %v5809_v9 = vrot.slane %v5801_v24, %v11724_v11  ;;  %10625 = vmatpush1.bf16.msra.mxu0 %v10624_v20  ;;  %v10638_v21 = vpack.c.bf16 %v6623_v10, %v6619_v41  ;;  %v6622_v20 = vld [vmem:[#allocation10 + $0x1ea0] sm:$0xff]  ;;  %v6633_v24 = vld [vmem:[#allocation10 + $0x1ef8] sm:$0xff]  ;;  %v6636_v53 = vld [vmem:[#allocation10 + $0x1f10] sm:$0xff] }
 0x57c   :  { %v5816_v36 = vrot.slane %v5802_v55, %v11724_v11  ;;  %10753 = vmatpush1.bf16.msra.mxu1 %v10752_v52  ;;  %10627 = vmatprep.subr.bf16.mxu0 %v10626_v13  ;;  %v10766_v52 = vpack.c.bf16 %v6625_v12, %v6621_v56  ;;  %v6624_v13 = vld [vmem:[#allocation10 + $0x1eb0] sm:$0xff]  ;;  %v6630_v55 = vld [vmem:[#allocation10 + $0x1ee0] sm:$0xff]  ;;  %v10770_v48 = vpack.c.bf16 %v6633_v24, %v6629_v26  ;;  %v6643_v60 = vld [vmem:[#allocation10 + $0x1f48] sm:$0xff] }
 0x57d   :  { %10755 = vmatprep.subr.bf16.mxu1 %v10754_v28  ;;  %v10640_v28 = vpack.c.bf16 %v6622_v20, %v6618_v25  ;;  %v10768_v38 = vpack.c.bf16 %v6624_v13, %v6620_v23  ;;  %v10644_v19 = vpack.c.bf16 %v6630_v55, %v6626_v29  ;;  %v6638_v51 = vld [vmem:[#allocation10 + $0x1f20] sm:$0xff]  ;;  %v6647_v57 = vld [vmem:[#allocation10 + $0x1f68] sm:$0xff]  ;;  %v6644_v8 = vld [vmem:[#allocation10 + $0x1f50] sm:$0xff] }
 0x57e   :  { %v5817_v54 = vcombine.low %v5809_v9, %v5816_v36  ;;  %v6632_v9 = vld [vmem:[#allocation10 + $0x1ef0] sm:$0xff]  ;;  %v6639_v36 = vld [vmem:[#allocation10 + $0x1f28] sm:$0xff]  ;;  %v10650_v14 = vpack.c.bf16 %v6647_v57, %v6643_v60  ;;  %v6642_v6 = vld [vmem:[#allocation10 + $0x1f40] sm:$0xff] }
 0x57f   :  { %10629 = vmatpush1.bf16.msra.mxu0 %v10628_v33  ;;  %v6635_v33 = vld [vmem:[#allocation10 + $0x1f08] sm:$0xff]  ;;  %v10772_v49 = vpack.c.bf16 %v6632_v9, %v6628_v31  ;;  %v6648_v10 = vld [vmem:[#allocation10 + $0x1f70] sm:$0xff]  ;;  %v11427_v20 = vld [vmem:[#allocation7 + $0x8] sm:$0xff] }
 0x580   :  { %5820 = vst [vmem:[#allocation13 + $0x8] sm:$0xff] %v5817_v54  ;;  %10757 = vmatpush1.bf16.msra.mxu1 %v10756_v42  ;;  %10631 = vmatprep.subr.bf16.mxu0 %v10630_v43  ;;  %v6637_v42 = vld [vmem:[#allocation10 + $0x1f18] sm:$0xff]  ;;  %v10646_v4 = vpack.c.bf16 %v6639_v36, %v6635_v33  ;;  %v6640_v54 = vld [vmem:[#allocation10 + $0x1f30] sm:$0xff]  ;;  %v6651_v56 = vld [vmem:[#allocation10 + $0x1f88] sm:$0xff]  ;;  %v4389_v23 = vrot.slane %v11427_v20, %v11954_v44 }
 0x581   :  { %10759 = vmatprep.subr.bf16.mxu1 %v10758_v15  ;;  %v6641_v43 = vld [vmem:[#allocation10 + $0x1f38] sm:$0xff]  ;;  %v6634_v15 = vld [vmem:[#allocation10 + $0x1f00] sm:$0xff]  ;;  %v10776_v3 = vpack.c.bf16 %v6640_v54, %v6636_v53  ;;  %v6655_v12 = vld [vmem:[#allocation10 + $0x1fa8] sm:$0xff] }
 0x582   :  { %v10774_v59 = vpack.c.bf16 %v6641_v43, %v6637_v42  ;;  %v10654_v13 = vpack.c.bf16 %v6655_v12, %v6651_v56  ;;  %v6654_v22 = vld [vmem:[#allocation10 + $0x1fa0] sm:$0xff]  ;;  %v6652_v26 = vld [vmem:[#allocation10 + $0x1f90] sm:$0xff]  ;;  %v6661_v55 = vld [vmem:[#allocation10 + $0x1fd8] sm:$0xff]  ;;  %v4464_v42 = vmul.f32 %v4389_v23, %v11857_v47 }
 0x583   :  { %10633 = vmatpush1.bf16.msra.mxu0 %v10632_v63  ;;  %v6645_v63 = vld [vmem:[#allocation10 + $0x1f58] sm:$0xff]  ;;  %v10656_v36 = vpack.c.bf16 %v6654_v22, %v6650_v62  ;;  %v6664_v53 = vld [vmem:[#allocation10 + $0x1ff0] sm:$0xff]  ;;  %v7003_v54 = vld [vmem:[#allocation10 + $0x2028] sm:$0xff] }
 0x584   :  { %10761 = vmatpush1.bf16.msra.mxu1 %v10760_v0  ;;  %10635 = vmatprep.subr.bf16.mxu0 %v10634_v39  ;;  %v6649_v0 = vld [vmem:[#allocation10 + $0x1f78] sm:$0xff]  ;;  %v10648_v39 = vpack.c.bf16 %v6638_v51, %v6634_v15  ;;  %v6660_v15 = vld [vmem:[#allocation10 + $0x1fd0] sm:$0xff]  ;;  %v7011_v12 = vld [vmem:[#allocation10 + $0x2068] sm:$0xff] }
 0x585   :  { %10763 = vmatprep.subr.bf16.mxu1 %v10762_v7  ;;  %v6646_v7 = vld [vmem:[#allocation10 + $0x1f60] sm:$0xff]  ;;  %v10778_v41 = vpack.c.bf16 %v6649_v0, %v6645_v63  ;;  %v6665_v31 = vld [vmem:[#allocation10 + $0x1ff8] sm:$0xff]  ;;  %v7008_v62 = vld [vmem:[#allocation10 + $0x2050] sm:$0xff] }
 0x586   :  { %v10652_v25 = vpack.c.bf16 %v6646_v7, %v6642_v6  ;;  %v12020_v33 = vld [vmem:[#allocation8 + $0x10] sm:$0xff]  ;;  %v10786_v51 = vpack.c.bf16 %v6665_v31, %v6661_v55  ;;  %v6998_v6 = vld [vmem:[#allocation10 + $0x2000] sm:$0xff] }
 0x587   :  { %10637 = vmatpush1.bf16.msra.mxu0 %v10636_v17  ;;  %v6653_v17 = vld [vmem:[#allocation10 + $0x1f98] sm:$0xff]  ;;  %v4551_v57 = vrot.slane %v12020_v33, %v11864_v45  ;;  %v7002_v7 = vld [vmem:[#allocation10 + $0x2020] sm:$0xff] }
 0x588   :  { %10765 = vmatpush1.bf16.msra.mxu1 %v10764_v18  ;;  %10639 = vmatprep.subr.bf16.mxu0 %v10638_v21  ;;  %v6657_v18 = vld [vmem:[#allocation10 + $0x1fb8] sm:$0xff]  ;;  %v12014_v21 = vld [vmem:[#allocation7 + $0x10] sm:$0xff] }
 0x589   :  { %10767 = vmatprep.subr.bf16.mxu1 %v10766_v52  ;;  %v10780_v52 = vpack.c.bf16 %v6648_v10, %v6644_v8  ;;  %v10782_v24 = vpack.c.bf16 %v6657_v18, %v6653_v17  ;;  %v4401_v29 = vrot.slane %v12014_v21, %v11864_v45  ;;  %v7001_v63 = vld [vmem:[#allocation10 + $0x2018] sm:$0xff]  ;;  %v7004_v10 = vld [vmem:[#allocation10 + $0x2030] sm:$0xff]  ;;  %v10792_v17 = vpack.c.bf16 %v7002_v7, %v6998_v6 }
 0x58a   :  { %v7005_v0 = vld [vmem:[#allocation10 + $0x2038] sm:$0xff] }
 0x58b   :  { %10641 = vmatpush1.bf16.msra.mxu0 %v10640_v28  ;;  %v6656_v28 = vld [vmem:[#allocation10 + $0x1fb0] sm:$0xff]  ;;  %v4467_v60 = vmul.f32 %v4401_v29, %v11905_v2  ;;  %v10918_v8 = vpack.c.bf16 %v7005_v0, %v7001_v63  ;;  %v7007_v2 = vld [vmem:[#allocation10 + $0x2048] sm:$0xff]  ;;  %v7009_v18 = vld [vmem:[#allocation10 + $0x2058] sm:$0xff] }
 0x58c   :  { %10769 = vmatpush1.bf16.msra.mxu1 %v10768_v38  ;;  %10643 = vmatprep.subr.bf16.mxu0 %v10642_v32  ;;  %v6659_v38 = vld [vmem:[#allocation10 + $0x1fc8] sm:$0xff]  ;;  %v10784_v43 = vpack.c.bf16 %v6656_v28, %v6652_v26  ;;  %v10794_v22 = vpack.c.bf16 %v7011_v12, %v7007_v2  ;;  %v7012_v26 = vld [vmem:[#allocation10 + $0x2070] sm:$0xff]  ;;  %v7017_v29 = vld [vmem:[#allocation10 + $0x2098] sm:$0xff] }
 0x58d   :  { %10771 = vmatprep.subr.bf16.mxu1 %v10770_v48  ;;  %v6663_v32 = vld [vmem:[#allocation10 + $0x1fe8] sm:$0xff]  ;;  %v11428_v48 = vld [vmem:[#allocation8 + $0x8] sm:$0xff]  ;;  %v4617_v56 = vadd.f32 %v4551_v57, %v4467_v60  ;;  %v7021_v55 = vld [vmem:[#allocation10 + $0x20b8] sm:$0xff] }
 0x58e   :  { %v4539_v9 = vrot.slane %v11428_v48, %v11954_v44  ;;  %v7019_v28 = vld [vmem:[#allocation10 + $0x20a8] sm:$0xff]  ;;  %v10924_v48 = vpack.c.bf16 %v7012_v26, %v7008_v62  ;;  %v7022_v57 = vld [vmem:[#allocation10 + $0x20c0] sm:$0xff]  ;;  %v7024_v0 = vld [vmem:[#allocation10 + $0x20d0] sm:$0xff] }
 0x58f   :  { %10645 = vmatpush1.bf16.msra.mxu0 %v10644_v19  ;;  %v10658_v19 = vpack.c.bf16 %v6663_v32, %v6659_v38  ;;  %v4641_v38 = vmax.f32 %v4617_v56, 0.0  ;;  %v7026_v63 = vld [vmem:[#allocation10 + $0x20e0] sm:$0xff]  ;;  %v7033_v6 = vld [vmem:[#allocation10 + $0x2118] sm:$0xff]  ;;  %v7032_v12 = vld [vmem:[#allocation10 + $0x2110] sm:$0xff] }
 0x590   :  { %10773 = vmatpush1.bf16.msra.mxu1 %v10772_v49  ;;  %10647 = vmatprep.subr.bf16.mxu0 %v10646_v4  ;;  %v6658_v49 = vld [vmem:[#allocation10 + $0x1fc0] sm:$0xff]  ;;  %v7037_v7 = vld [vmem:[#allocation10 + $0x2138] sm:$0xff] }
 0x591   :  { %10775 = vmatprep.subr.bf16.mxu1 %v10774_v59  ;;  %v6662_v4 = vld [vmem:[#allocation10 + $0x1fe0] sm:$0xff]  ;;  %v6999_v59 = vld [vmem:[#allocation10 + $0x2008] sm:$0xff] }
 0x592   :  { %v10660_v47 = vpack.c.bf16 %v6662_v4, %v6658_v49  ;;  %v7020_v49 = vld [vmem:[#allocation10 + $0x20b0] sm:$0xff]  ;;  %v7023_v4 = vld [vmem:[#allocation10 + $0x20c8] sm:$0xff]  ;;  %v7030_v56 = vld [vmem:[#allocation10 + $0x2100] sm:$0xff] }
 0x593   :  { %10649 = vmatpush1.bf16.msra.mxu0 %v10648_v39  ;;  %v4614_v39 = vadd.f32 %v4539_v9, %v4464_v42  ;;  %v7018_v42 = vld [vmem:[#allocation10 + $0x20a0] sm:$0xff] }
 0x594   :  { %10777 = vmatpush1.bf16.msra.mxu1 %v10776_v3  ;;  %10651 = vmatprep.subr.bf16.mxu0 %v10650_v14  ;;  %v10788_v3 = vpack.c.bf16 %v6664_v53, %v6660_v15  ;;  %v10790_v14 = vpack.c.bf16 %v7003_v54, %v6999_v59  ;;  %v7027_v15 = vld [vmem:[#allocation10 + $0x20e8] sm:$0xff]  ;;  %v7029_v53 = vld [vmem:[#allocation10 + $0x20f8] sm:$0xff]  ;;  %v7034_v2 = vld [vmem:[#allocation10 + $0x2120] sm:$0xff] }
 0x595   :  { %10779 = vmatprep.subr.bf16.mxu1 %v10778_v41  ;;  %v7000_v41 = vld [vmem:[#allocation10 + $0x2010] sm:$0xff]  ;;  %v4638_v20 = vmax.f32 %v4614_v39, 0.0  ;;  %v10802_v60 = vpack.c.bf16 %v7027_v15, %v7023_v4  ;;  %v7038_v26 = vld [vmem:[#allocation10 + $0x2140] sm:$0xff] }
 0x596   :  { %v10920_v23 = vpack.c.bf16 %v7004_v10, %v7000_v41  ;;  %v7028_v39 = vld [vmem:[#allocation10 + $0x20f0] sm:$0xff] }
 0x597   :  { %10653 = vmatpush1.bf16.msra.mxu0 %v10652_v25  ;;  %v7013_v25 = vld [vmem:[#allocation10 + $0x2078] sm:$0xff]  ;;  %v10932_v41 = vpack.c.bf16 %v7028_v39, %v7024_v0  ;;  %v7052_v15 = vld [vmem:[#allocation10 + $0x21b0] sm:$0xff]  ;;  %v7054_v0 = vld [vmem:[#allocation10 + $0x21c0] sm:$0xff] }
 0x598   :  { %10781 = vmatpush1.bf16.msra.mxu1 %v10780_v52  ;;  %10655 = vmatprep.subr.bf16.mxu0 %v10654_v13  ;;  %v7006_v52 = vld [vmem:[#allocation10 + $0x2040] sm:$0xff]  ;;  %v10922_v32 = vpack.c.bf16 %v7013_v25, %v7009_v18  ;;  %v7036_v18 = vld [vmem:[#allocation10 + $0x2130] sm:$0xff]  ;;  %v7039_v25 = vld [vmem:[#allocation10 + $0x2148] sm:$0xff] }
 0x599   :  { %10783 = vmatprep.subr.bf16.mxu1 %v10782_v24  ;;  %v7010_v13 = vld [vmem:[#allocation10 + $0x2060] sm:$0xff]  ;;  %v7015_v24 = vld [vmem:[#allocation10 + $0x2088] sm:$0xff]  ;;  %v10936_v62 = vpack.c.bf16 %v7036_v18, %v7032_v12  ;;  %v7056_v39 = vld [vmem:[#allocation10 + $0x21d0] sm:$0xff] }
 0x59a   :  { %v10796_v31 = vpack.c.bf16 %v7010_v13, %v7006_v52  ;;  %v10798_v9 = vpack.c.bf16 %v7019_v28, %v7015_v24  ;;  %v7045_v52 = vld [vmem:[#allocation10 + $0x2178] sm:$0xff]  ;;  %v10808_v13 = vpack.c.bf16 %v7034_v2, %v7030_v56  ;;  %v7042_v24 = vld [vmem:[#allocation10 + $0x2160] sm:$0xff]  ;;  %v7040_v28 = vld [vmem:[#allocation10 + $0x2150] sm:$0xff] }
 0x59b   :  { %10657 = vmatpush1.bf16.msra.mxu0 %v10656_v36  ;;  %v7014_v36 = vld [vmem:[#allocation10 + $0x2080] sm:$0xff]  ;;  %v7064_v18 = vld [vmem:[#allocation10 + $0x2210] sm:$0xff] }
 0x59c   :  { %10785 = vmatpush1.bf16.msra.mxu1 %v10784_v43  ;;  %10659 = vmatprep.subr.bf16.mxu0 %v10658_v19  ;;  %v7016_v43 = vld [vmem:[#allocation10 + $0x2090] sm:$0xff]  ;;  %v10926_v19 = vpack.c.bf16 %v7021_v55, %v7017_v29  ;;  %v10800_v59 = vpack.c.bf16 %v7018_v42, %v7014_v36  ;;  %v7047_v29 = vld [vmem:[#allocation10 + $0x2188] sm:$0xff]  ;;  %v7062_v12 = vld [vmem:[#allocation10 + $0x2200] sm:$0xff] }
 0x59d   :  { %10787 = vmatprep.subr.bf16.mxu1 %v10786_v51  ;;  %v7025_v51 = vld [vmem:[#allocation10 + $0x20d8] sm:$0xff]  ;;  %v10928_v54 = vpack.c.bf16 %v7020_v49, %v7016_v43  ;;  %v7051_v55 = vld [vmem:[#allocation10 + $0x21a8] sm:$0xff]  ;;  %v7046_v43 = vld [vmem:[#allocation10 + $0x2180] sm:$0xff] }
 0x59e   :  { %v10814_v42 = vpack.c.bf16 %v7051_v55, %v7047_v29  ;;  %v7048_v49 = vld [vmem:[#allocation10 + $0x2190] sm:$0xff] }
 0x59f   :  { %10661 = vmatpush1.bf16.msra.mxu0 %v10660_v47  ;;  %v10930_v47 = vpack.c.bf16 %v7029_v53, %v7025_v51  ;;  %v7055_v51 = vld [vmem:[#allocation10 + $0x21c8] sm:$0xff]  ;;  %v7076_v55 = vld [vmem:[#allocation10 + $0x2270] sm:$0xff] }
 0x5a0   :  { %10789 = vmatpush1.bf16.msra.mxu1 %v10788_v3  ;;  %10791 = vmatprep.subr.bf16.mxu0 %v10790_v14  ;;  %v7031_v3 = vld [vmem:[#allocation10 + $0x2108] sm:$0xff] }
 0x5a1   :  { %10919 = vmatprep.subr.bf16.mxu1 %v10918_v8  ;;  %v7035_v14 = vld [vmem:[#allocation10 + $0x2128] sm:$0xff]  ;;  %v10804_v8 = vpack.c.bf16 %v7026_v63, %v7022_v57  ;;  %v10944_v57 = vpack.c.bf16 %v7052_v15, %v7048_v49  ;;  %v7078_v49 = vld [vmem:[#allocation10 + $0x2280] sm:$0xff]  ;;  %v7080_v15 = vld [vmem:[#allocation10 + $0x2290] sm:$0xff] }
 0x5a2   :  { %6825 = vmatmul.mubr.f32.vlgmr.msra.gmra.mrb[18].mxu0 %v4638_v20  ;;  %v10806_v10 = vpack.c.bf16 %v7035_v14, %v7031_v3  ;;  %v7059_v53 = vld [vmem:[#allocation10 + $0x21e8] sm:$0xff]  ;;  %v7060_v14 = vld [vmem:[#allocation10 + $0x21f0] sm:$0xff] }
 0x5a3   :  { %6967 = vmatmul.mubr.f32.vlgmr.msra.gmra.mrb[18].mxu1 %v4638_v20  ;;  %10793 = vmatpush1.bf16.msra.mxu0 %v10792_v17  ;;  %v10934_v17 = vpack.c.bf16 %v7037_v7, %v7033_v6  ;;  %v7043_v20 = vld [vmem:[#allocation10 + $0x2168] sm:$0xff]  ;;  %v10818_v63 = vpack.c.bf16 %v7059_v53, %v7055_v51  ;;  %v10948_v56 = vpack.c.bf16 %v7060_v14, %v7056_v39  ;;  %v7084_v53 = vld [vmem:[#allocation10 + $0x22b0] sm:$0xff]  ;;  %v7086_v39 = vld [vmem:[#allocation10 + $0x22c0] sm:$0xff] }
 0x5a4   :  { %7341 = vmatprep.mubr.f32.mxu0 %v4641_v38  ;;  %10921 = vmatpush1.bf16.msra.mxu1 %v10920_v23  ;;  %v7041_v23 = vld [vmem:[#allocation10 + $0x2158] sm:$0xff]  ;;  %v7063_v6 = vld [vmem:[#allocation10 + $0x2208] sm:$0xff]  ;;  %v7088_v14 = vld [vmem:[#allocation10 + $0x22d0] sm:$0xff] }
 0x5a5   :  { %7483 = vmatprep.mubr.f32.mxu1 %v4641_v38  ;;  %10795 = vmatprep.subr.bf16.mxu0 %v10794_v22  ;;  %v10810_v22 = vpack.c.bf16 %v7043_v20, %v7039_v25  ;;  %v10938_v38 = vpack.c.bf16 %v7045_v52, %v7041_v23  ;;  %v7067_v7 = vld [vmem:[#allocation10 + $0x2228] sm:$0xff]  ;;  %v7068_v20 = vld [vmem:[#allocation10 + $0x2230] sm:$0xff] }
 0x5a6   :  { %10923 = vmatprep.subr.bf16.mxu1 %v10922_v32  ;;  %v7044_v32 = vld [vmem:[#allocation10 + $0x2170] sm:$0xff]  ;;  %v10822_v2 = vpack.c.bf16 %v7067_v7, %v7063_v6  ;;  %v7071_v23 = vld [vmem:[#allocation10 + $0x2248] sm:$0xff] }
 0x5a7   :  { %10797 = vmatpush1.bf16.msra.mxu0 %v10796_v31  ;;  %v7049_v31 = vld [vmem:[#allocation10 + $0x2198] sm:$0xff]  ;;  %v10940_v36 = vpack.c.bf16 %v7044_v32, %v7040_v28  ;;  %v7075_v52 = vld [vmem:[#allocation10 + $0x2268] sm:$0xff]  ;;  %v7070_v28 = vld [vmem:[#allocation10 + $0x2240] sm:$0xff] }
 0x5a8   :  { %10925 = vmatpush1.bf16.msra.mxu1 %v10924_v48  ;;  %10799 = vmatprep.subr.bf16.mxu0 %v10798_v9  ;;  %v7053_v48 = vld [vmem:[#allocation10 + $0x21b8] sm:$0xff]  ;;  %v10812_v9 = vpack.c.bf16 %v7042_v24, %v7038_v26  ;;  %v10952_v26 = vpack.c.bf16 %v7068_v20, %v7064_v18  ;;  %v10826_v24 = vpack.c.bf16 %v7075_v52, %v7071_v23  ;;  %v7072_v32 = vld [vmem:[#allocation10 + $0x2250] sm:$0xff]  ;;  %v7094_v18 = vld [vmem:[#allocation10 + $0x2300] sm:$0xff] }
 0x5a9   :  { %10927 = vmatprep.subr.bf16.mxu1 %v10926_v19  ;;  %v7050_v19 = vld [vmem:[#allocation10 + $0x21a0] sm:$0xff]  ;;  %v10942_v4 = vpack.c.bf16 %v7053_v48, %v7049_v31  ;;  %v7079_v31 = vld [vmem:[#allocation10 + $0x2288] sm:$0xff]  ;;  %v7092_v7 = vld [vmem:[#allocation10 + $0x22f0] sm:$0xff] }
 0x5aa   :  { %v7083_v48 = vld [vmem:[#allocation10 + $0x22a8] sm:$0xff]  ;;  %v7096_v20 = vld [vmem:[#allocation10 + $0x2310] sm:$0xff] }
 0x5ab   :  { %10801 = vmatpush1.bf16.msra.mxu0 %v10800_v59  ;;  %v7057_v59 = vld [vmem:[#allocation10 + $0x21d8] sm:$0xff]  ;;  %v7100_v52 = vld [vmem:[#allocation10 + $0x2330] sm:$0xff] }
 0x5ac   :  { %10929 = vmatpush1.bf16.msra.mxu1 %v10928_v54  ;;  %10803 = vmatprep.subr.bf16.mxu0 %v10802_v60  ;;  %v7061_v54 = vld [vmem:[#allocation10 + $0x21f8] sm:$0xff]  ;;  %v10816_v60 = vpack.c.bf16 %v7050_v19, %v7046_v43  ;;  %v10956_v43 = vpack.c.bf16 %v7076_v55, %v7072_v32  ;;  %v10830_v19 = vpack.c.bf16 %v7083_v48, %v7079_v31  ;;  %v7102_v32 = vld [vmem:[#allocation10 + $0x2340] sm:$0xff]  ;;  %v7104_v55 = vld [vmem:[#allocation10 + $0x2350] sm:$0xff] }
 0x5ad   :  { %10931 = vmatprep.subr.bf16.mxu1 %v10930_v47  ;;  %v7058_v47 = vld [vmem:[#allocation10 + $0x21e0] sm:$0xff]  ;;  %v10946_v3 = vpack.c.bf16 %v7061_v54, %v7057_v59  ;;  %v7087_v59 = vld [vmem:[#allocation10 + $0x22c8] sm:$0xff]  ;;  %v7108_v48 = vld [vmem:[#allocation10 + $0x2370] sm:$0xff] }
 0x5ae   :  { %v7091_v54 = vld [vmem:[#allocation10 + $0x22e8] sm:$0xff] }
 0x5af   :  { %10805 = vmatpush1.bf16.msra.mxu0 %v10804_v8  ;;  %v7065_v8 = vld [vmem:[#allocation10 + $0x2218] sm:$0xff] }
 0x5b0   :  { %10933 = vmatpush1.bf16.msra.mxu1 %v10932_v41  ;;  %10807 = vmatprep.subr.bf16.mxu0 %v10806_v10  ;;  %v7069_v41 = vld [vmem:[#allocation10 + $0x2238] sm:$0xff]  ;;  %v10820_v10 = vpack.c.bf16 %v7058_v47, %v7054_v0  ;;  %v10960_v0 = vpack.c.bf16 %v7084_v53, %v7080_v15  ;;  %v10834_v47 = vpack.c.bf16 %v7091_v54, %v7087_v59  ;;  %v7114_v53 = vld [vmem:[#allocation10 + $0x23a0] sm:$0xff]  ;;  %v7112_v59 = vld [vmem:[#allocation10 + $0x2390] sm:$0xff] }
 0x5b1   :  { %10935 = vmatprep.subr.bf16.mxu1 %v10934_v17  ;;  %v7066_v17 = vld [vmem:[#allocation10 + $0x2220] sm:$0xff]  ;;  %v10950_v25 = vpack.c.bf16 %v7069_v41, %v7065_v8  ;;  %v7095_v8 = vld [vmem:[#allocation10 + $0x2308] sm:$0xff] }
 0x5b2   :  { %v7099_v41 = vld [vmem:[#allocation10 + $0x2328] sm:$0xff] }
 0x5b3   :  { %10809 = vmatpush1.bf16.msra.mxu0 %v10808_v13  ;;  %v7073_v13 = vld [vmem:[#allocation10 + $0x2258] sm:$0xff] }
 0x5b4   :  { %10937 = vmatpush1.bf16.msra.mxu1 %v10936_v62  ;;  %10811 = vmatprep.subr.bf16.mxu0 %v10810_v22  ;;  %v7077_v62 = vld [vmem:[#allocation10 + $0x2278] sm:$0xff]  ;;  %v10824_v22 = vpack.c.bf16 %v7066_v17, %v7062_v12  ;;  %v10964_v12 = vpack.c.bf16 %v7092_v7, %v7088_v14  ;;  %v10838_v17 = vpack.c.bf16 %v7099_v41, %v7095_v8  ;;  %v7118_v41 = vld [vmem:[#allocation10 + $0x23c0] sm:$0xff] }
 0x5b5   :  { %10939 = vmatprep.subr.bf16.mxu1 %v10938_v38  ;;  %v7074_v38 = vld [vmem:[#allocation10 + $0x2260] sm:$0xff]  ;;  %v10954_v29 = vpack.c.bf16 %v7077_v62, %v7073_v13  ;;  %v7103_v13 = vld [vmem:[#allocation10 + $0x2348] sm:$0xff] }
 0x5b6   :  { %v7107_v62 = vld [vmem:[#allocation10 + $0x2368] sm:$0xff] }
 0x5b7   :  { %10813 = vmatpush1.bf16.msra.mxu0 %v10812_v9  ;;  %v7081_v9 = vld [vmem:[#allocation10 + $0x2298] sm:$0xff] }
 0x5b8   :  { %10941 = vmatpush1.bf16.msra.mxu1 %v10940_v36  ;;  %10815 = vmatprep.subr.bf16.mxu0 %v10814_v42  ;;  %v7085_v36 = vld [vmem:[#allocation10 + $0x22b8] sm:$0xff]  ;;  %v10828_v42 = vpack.c.bf16 %v7074_v38, %v7070_v28  ;;  %v10968_v28 = vpack.c.bf16 %v7100_v52, %v7096_v20  ;;  %v10842_v38 = vpack.c.bf16 %v7107_v62, %v7103_v13 }
 0x5b9   :  { %10943 = vmatprep.subr.bf16.mxu1 %v10942_v4  ;;  %v7082_v4 = vld [vmem:[#allocation10 + $0x22a0] sm:$0xff]  ;;  %v10958_v51 = vpack.c.bf16 %v7085_v36, %v7081_v9  ;;  %v7111_v9 = vld [vmem:[#allocation10 + $0x2388] sm:$0xff]  ;;  %v7129_v20 = vld [vmem:[#allocation10 + $0x2418] sm:$0xff] }
 0x5ba   :  { %v7115_v36 = vld [vmem:[#allocation10 + $0x23a8] sm:$0xff] }
 0x5bb   :  { %10817 = vmatpush1.bf16.msra.mxu0 %v10816_v60  ;;  %v7089_v60 = vld [vmem:[#allocation10 + $0x22d8] sm:$0xff]  ;;  %v10846_v15 = vpack.c.bf16 %v7115_v36, %v7111_v9  ;;  %v7134_v36 = vld [vmem:[#allocation10 + $0x2440] sm:$0xff] }
 0x5bc   :  { %10945 = vmatpush1.bf16.msra.mxu1 %v10944_v57  ;;  %10819 = vmatprep.subr.bf16.mxu0 %v10818_v63  ;;  %v7093_v57 = vld [vmem:[#allocation10 + $0x22f8] sm:$0xff]  ;;  %v10832_v63 = vpack.c.bf16 %v7082_v4, %v7078_v49  ;;  %v4397_v49 = vrot.slane %v12014_v21, %v11886_v37  ;;  %v10972_v4 = vpack.c.bf16 %v7108_v48, %v7104_v55 }
 0x5bd   :  { %10947 = vmatprep.subr.bf16.mxu1 %v10946_v3  ;;  %v7090_v3 = vld [vmem:[#allocation10 + $0x22e0] sm:$0xff]  ;;  %v10962_v6 = vpack.c.bf16 %v7093_v57, %v7089_v60  ;;  %v7116_v60 = vld [vmem:[#allocation10 + $0x23b0] sm:$0xff]  ;;  %v7119_v57 = vld [vmem:[#allocation10 + $0x23c8] sm:$0xff] }
 0x5be   :  { %v10976_v7 = vpack.c.bf16 %v7116_v60, %v7112_v59  ;;  %v7137_v55 = vld [vmem:[#allocation10 + $0x2458] sm:$0xff] }
 0x5bf   :  { %10821 = vmatpush1.bf16.msra.mxu0 %v10820_v10  ;;  %v7097_v10 = vld [vmem:[#allocation10 + $0x2318] sm:$0xff] }
 0x5c0   :  { %10949 = vmatpush1.bf16.msra.mxu1 %v10948_v56  ;;  %10823 = vmatprep.subr.bf16.mxu0 %v10822_v2  ;;  %v7101_v56 = vld [vmem:[#allocation10 + $0x2338] sm:$0xff]  ;;  %v10836_v2 = vpack.c.bf16 %v7090_v3, %v7086_v39  ;;  %v4547_v3 = vrot.slane %v12020_v33, %v11886_v37 }
 0x5c1   :  { %10951 = vmatprep.subr.bf16.mxu1 %v10950_v25  ;;  %v7098_v25 = vld [vmem:[#allocation10 + $0x2320] sm:$0xff]  ;;  %v10966_v23 = vpack.c.bf16 %v7101_v56, %v7097_v10  ;;  %v7125_v39 = vld [vmem:[#allocation10 + $0x23f8] sm:$0xff]  ;;  %v7120_v56 = vld [vmem:[#allocation10 + $0x23d0] sm:$0xff] }
 0x5c2   :  { %v7122_v10 = vld [vmem:[#allocation10 + $0x23e0] sm:$0xff]  ;;  %v7145_v59 = vld [vmem:[#allocation10 + $0x2498] sm:$0xff] }
 0x5c3   :  { %10825 = vmatpush1.bf16.msra.mxu0 %v10824_v22  ;;  %v7105_v22 = vld [vmem:[#allocation10 + $0x2358] sm:$0xff] }
 0x5c4   :  { %10953 = vmatpush1.bf16.msra.mxu1 %v10952_v26  ;;  %10827 = vmatprep.subr.bf16.mxu0 %v10826_v24  ;;  %v7109_v26 = vld [vmem:[#allocation10 + $0x2378] sm:$0xff]  ;;  %v10840_v24 = vpack.c.bf16 %v7098_v25, %v7094_v18  ;;  %v4559_v25 = vrot.slane %v12020_v33, %v11889_v58 }
 0x5c5   :  { %10955 = vmatprep.subr.bf16.mxu1 %v10954_v29  ;;  %v7106_v29 = vld [vmem:[#allocation10 + $0x2360] sm:$0xff]  ;;  %v10970_v31 = vpack.c.bf16 %v7109_v26, %v7105_v22 }
 0x5c6   :  { %v7126_v22 = vld [vmem:[#allocation10 + $0x2400] sm:$0xff] }
 0x5c7   :  { %10829 = vmatpush1.bf16.msra.mxu0 %v10828_v42  ;;  %v7113_v42 = vld [vmem:[#allocation10 + $0x2398] sm:$0xff]  ;;  %v7130_v26 = vld [vmem:[#allocation10 + $0x2420] sm:$0xff] }
 0x5c8   :  { %10957 = vmatpush1.bf16.msra.mxu1 %v10956_v43  ;;  %10831 = vmatprep.subr.bf16.mxu0 %v10830_v19  ;;  %v7117_v43 = vld [vmem:[#allocation10 + $0x23b8] sm:$0xff]  ;;  %v10844_v19 = vpack.c.bf16 %v7106_v29, %v7102_v32  ;;  %v7139_v29 = vld [vmem:[#allocation10 + $0x2468] sm:$0xff]  ;;  %v10856_v33 = vpack.c.bf16 %v7130_v26, %v7126_v22  ;;  %v7158_v26 = vld [vmem:[#allocation10 + $0x2500] sm:$0xff] }
 0x5c9   :  { %10959 = vmatprep.subr.bf16.mxu1 %v10958_v51  ;;  %v7110_v51 = vld [vmem:[#allocation10 + $0x2380] sm:$0xff]  ;;  %v10974_v54 = vpack.c.bf16 %v7117_v43, %v7113_v42  ;;  %v7136_v43 = vld [vmem:[#allocation10 + $0x2450] sm:$0xff] }
 0x5ca   :  { %v10848_v14 = vpack.c.bf16 %v7114_v53, %v7110_v51  ;;  %v7138_v42 = vld [vmem:[#allocation10 + $0x2460] sm:$0xff] }
 0x5cb   :  { %10833 = vmatpush1.bf16.msra.mxu0 %v10832_v63  ;;  %v7123_v63 = vld [vmem:[#allocation10 + $0x23e8] sm:$0xff]  ;;  %v10860_v60 = vpack.c.bf16 %v7138_v42, %v7134_v36  ;;  %v7166_v42 = vld [vmem:[#allocation10 + $0x2540] sm:$0xff] }
 0x5cc   :  { %10961 = vmatpush1.bf16.msra.mxu1 %v10960_v0  ;;  %10835 = vmatprep.subr.bf16.mxu0 %v10834_v47  ;;  %v4409_v0 = vrot.slane %v12014_v21, %v11889_v58  ;;  %v7121_v47 = vld [vmem:[#allocation10 + $0x23d8] sm:$0xff]  ;;  %v10850_v8 = vpack.c.bf16 %v7123_v63, %v7119_v57  ;;  %v7127_v21 = vld [vmem:[#allocation10 + $0x2408] sm:$0xff] }
 0x5cd   :  { %10963 = vmatprep.subr.bf16.mxu1 %v10962_v6  ;;  %v4466_v6 = vmul.f32 %v4397_v49, %v11901_v61  ;;  %v10852_v61 = vpack.c.bf16 %v7122_v10, %v7118_v41  ;;  %v7140_v49 = vld [vmem:[#allocation10 + $0x2470] sm:$0xff]  ;;  %v7157_v41 = vld [vmem:[#allocation10 + $0x24f8] sm:$0xff] }
 0x5ce   :  { %v4469_v18 = vmul.f32 %v4409_v0, %v11907_v5  ;;  %v7135_v5 = vld [vmem:[#allocation10 + $0x2448] sm:$0xff]  ;;  %v10988_v57 = vpack.c.bf16 %v7140_v49, %v7136_v43  ;;  %v7142_v0 = vld [vmem:[#allocation10 + $0x2480] sm:$0xff] }
 0x5cf   :  { %10837 = vmatpush1.bf16.msra.mxu0 %v10836_v2  ;;  %v10978_v2 = vpack.c.bf16 %v7125_v39, %v7121_v47  ;;  %v4616_v52 = vadd.f32 %v4547_v3, %v4466_v6  ;;  %v7146_v47 = vld [vmem:[#allocation10 + $0x24a0] sm:$0xff]  ;;  %v7144_v39 = vld [vmem:[#allocation10 + $0x2490] sm:$0xff]  ;;  %v7151_v6 = vld [vmem:[#allocation10 + $0x24c8] sm:$0xff] }
 0x5d0   :  { %10965 = vmatpush1.bf16.msra.mxu1 %v10964_v12  ;;  %10839 = vmatprep.subr.bf16.mxu0 %v10838_v17  ;;  %v7124_v12 = vld [vmem:[#allocation10 + $0x23f0] sm:$0xff]  ;;  %v7131_v17 = vld [vmem:[#allocation10 + $0x2428] sm:$0xff]  ;;  %v4619_v32 = vadd.f32 %v4559_v25, %v4469_v18  ;;  %v10864_v10 = vpack.c.bf16 %v7146_v47, %v7142_v0  ;;  %v7170_v43 = vld [vmem:[#allocation10 + $0x2560] sm:$0xff] }
 0x5d1   :  { %10967 = vmatprep.subr.bf16.mxu1 %v10966_v23  ;;  %v7133_v23 = vld [vmem:[#allocation10 + $0x2438] sm:$0xff]  ;;  %v10980_v13 = vpack.c.bf16 %v7124_v12, %v7120_v56  ;;  %v10854_v62 = vpack.c.bf16 %v7131_v17, %v7127_v21  ;;  %v4640_v48 = vmax.f32 %v4616_v52, 0.0  ;;  %v7150_v12 = vld [vmem:[#allocation10 + $0x24c0] sm:$0xff]  ;;  %v7152_v17 = vld [vmem:[#allocation10 + $0x24d0] sm:$0xff] }
 0x5d2   :  { %v4643_v51 = vmax.f32 %v4619_v32, 0.0  ;;  %v7154_v21 = vld [vmem:[#allocation10 + $0x24e0] sm:$0xff]  ;;  %v7156_v25 = vld [vmem:[#allocation10 + $0x24f0] sm:$0xff]  ;;  %v7165_v52 = vld [vmem:[#allocation10 + $0x2538] sm:$0xff] }
 0x5d3   :  { %10841 = vmatpush1.bf16.msra.mxu0 %v10840_v24  ;;  %v10982_v24 = vpack.c.bf16 %v7133_v23, %v7129_v20  ;;  %v7159_v20 = vld [vmem:[#allocation10 + $0x2508] sm:$0xff]  ;;  %v7164_v32 = vld [vmem:[#allocation10 + $0x2530] sm:$0xff] }
 0x5d4   :  { %10969 = vmatpush1.bf16.msra.mxu1 %v10968_v28  ;;  %10843 = vmatprep.subr.bf16.mxu0 %v10842_v38  ;;  %v7128_v28 = vld [vmem:[#allocation10 + $0x2410] sm:$0xff]  ;;  %v7163_v23 = vld [vmem:[#allocation10 + $0x2528] sm:$0xff] }
 0x5d5   :  { %10971 = vmatprep.subr.bf16.mxu1 %v10970_v31  ;;  %v7132_v38 = vld [vmem:[#allocation10 + $0x2430] sm:$0xff]  ;;  %v7141_v31 = vld [vmem:[#allocation10 + $0x2478] sm:$0xff]  ;;  %v10870_v22 = vpack.c.bf16 %v7163_v23, %v7159_v20 }
 0x5d6   :  { %v10984_v9 = vpack.c.bf16 %v7132_v38, %v7128_v28  ;;  %v10986_v53 = vpack.c.bf16 %v7141_v31, %v7137_v55  ;;  %v7160_v28 = vld [vmem:[#allocation10 + $0x2510] sm:$0xff]  ;;  %v7173_v55 = vld [vmem:[#allocation10 + $0x2578] sm:$0xff] }
 0x5d7   :  { %10845 = vmatpush1.bf16.msra.mxu0 %v10844_v19  ;;  %v10858_v19 = vpack.c.bf16 %v7139_v29, %v7135_v5  ;;  %v7167_v5 = vld [vmem:[#allocation10 + $0x2548] sm:$0xff] }
 0x5d8   :  { %10973 = vmatpush1.bf16.msra.mxu1 %v10972_v4  ;;  %10847 = vmatprep.subr.bf16.mxu0 %v10846_v15  ;;  %v7143_v4 = vld [vmem:[#allocation10 + $0x2488] sm:$0xff] }
 0x5d9   :  { %10975 = vmatprep.subr.bf16.mxu1 %v10974_v54  ;;  %v7147_v15 = vld [vmem:[#allocation10 + $0x24a8] sm:$0xff]  ;;  %v7149_v54 = vld [vmem:[#allocation10 + $0x24b8] sm:$0xff] }
 0x5da   :  { %v10862_v63 = vpack.c.bf16 %v7147_v15, %v7143_v4  ;;  %v10990_v3 = vpack.c.bf16 %v7149_v54, %v7145_v59  ;;  %v7171_v29 = vld [vmem:[#allocation10 + $0x2568] sm:$0xff]  ;;  %v7172_v4 = vld [vmem:[#allocation10 + $0x2570] sm:$0xff]  ;;  %v7177_v59 = vld [vmem:[#allocation10 + $0x2598] sm:$0xff] }
 0x5db   :  { %10849 = vmatpush1.bf16.msra.mxu0 %v10848_v14  ;;  %v7148_v14 = vld [vmem:[#allocation10 + $0x24b0] sm:$0xff]  ;;  %v10874_v36 = vpack.c.bf16 %v7171_v29, %v7167_v5  ;;  %v7175_v15 = vld [vmem:[#allocation10 + $0x2588] sm:$0xff]  ;;  %v7181_v54 = vld [vmem:[#allocation10 + $0x25b8] sm:$0xff] }
 0x5dc   :  { %10977 = vmatpush1.bf16.msra.mxu1 %v10976_v7  ;;  %10851 = vmatprep.subr.bf16.mxu0 %v10850_v8  ;;  %v7155_v7 = vld [vmem:[#allocation10 + $0x24e8] sm:$0xff]  ;;  %v7153_v8 = vld [vmem:[#allocation10 + $0x24d8] sm:$0xff]  ;;  %v10992_v56 = vpack.c.bf16 %v7148_v14, %v7144_v39  ;;  %v7178_v14 = vld [vmem:[#allocation10 + $0x25a0] sm:$0xff] }
 0x5dd   :  { %10979 = vmatprep.subr.bf16.mxu1 %v10978_v2  ;;  %v10866_v2 = vpack.c.bf16 %v7155_v7, %v7151_v6  ;;  %v10994_v18 = vpack.c.bf16 %v7157_v41, %v7153_v8  ;;  %v7176_v6 = vld [vmem:[#allocation10 + $0x2590] sm:$0xff]  ;;  %v11006_v8 = vpack.c.bf16 %v7181_v54, %v7177_v59  ;;  %v7191_v5 = vld [vmem:[#allocation10 + $0x2608] sm:$0xff] }
 0x5de   :  { %v7180_v41 = vld [vmem:[#allocation10 + $0x25b0] sm:$0xff]  ;;  %v7195_v29 = vld [vmem:[#allocation10 + $0x2628] sm:$0xff] }
 0x5df   :  { %10853 = vmatpush1.bf16.msra.mxu0 %v10852_v61  ;;  %v7161_v61 = vld [vmem:[#allocation10 + $0x2518] sm:$0xff]  ;;  %v7203_v59 = vld [vmem:[#allocation10 + $0x2668] sm:$0xff] }
 0x5e0   :  { %10981 = vmatpush1.bf16.msra.mxu1 %v10980_v13  ;;  %10855 = vmatprep.subr.bf16.mxu0 %v10854_v62  ;;  %v10868_v13 = vpack.c.bf16 %v7154_v21, %v7150_v12  ;;  %v10996_v62 = vpack.c.bf16 %v7156_v25, %v7152_v17  ;;  %v10998_v38 = vpack.c.bf16 %v7165_v52, %v7161_v61  ;;  %v7185_v17 = vld [vmem:[#allocation10 + $0x25d8] sm:$0xff] }
 0x5e1   :  { %10983 = vmatprep.subr.bf16.mxu1 %v10982_v24  ;;  %v7162_v24 = vld [vmem:[#allocation10 + $0x2520] sm:$0xff] }
 0x5e2   :  { %7342 = vmatmul.mubr.f32.vlgmr.msra.gmra.mrb[20].mxu0 %v4640_v48  ;;  %v10872_v31 = vpack.c.bf16 %v7162_v24, %v7158_v26  ;;  %v7186_v26 = vld [vmem:[#allocation10 + $0x25e0] sm:$0xff]  ;;  %v7184_v24 = vld [vmem:[#allocation10 + $0x25d0] sm:$0xff] }
 0x5e3   :  { %7484 = vmatmul.mubr.f32.vlgmr.msra.gmra.mrb[20].mxu1 %v4640_v48  ;;  %10857 = vmatpush1.bf16.msra.mxu0 %v10856_v33  ;;  %v7169_v33 = vld [vmem:[#allocation10 + $0x2558] sm:$0xff]  ;;  %v6079_v48 = vld [vmem:[#allocation11 + $0x8] sm:$0xf] }
 0x5e4   :  { %7412 = vmatprep.mubr.f32.mxu0 %v4643_v51  ;;  %10985 = vmatpush1.bf16.msra.mxu1 %v10984_v9  ;;  %v11000_v9 = vpack.c.bf16 %v7164_v32, %v7160_v28  ;;  %v11002_v49 = vpack.c.bf16 %v7173_v55, %v7169_v33  ;;  %v6096_v0 = vrot.slane %v6079_v48, %v11889_v58  ;;  %v7188_v32 = vld [vmem:[#allocation10 + $0x25f0] sm:$0xff]  ;;  %v7193_v55 = vld [vmem:[#allocation10 + $0x2618] sm:$0xff] }
 0x5e5   :  { %7554 = vmatprep.mubr.f32.mxu1 %v4643_v51  ;;  %10859 = vmatprep.subr.bf16.mxu0 %v10858_v19  ;;  %v7168_v19 = vld [vmem:[#allocation10 + $0x2550] sm:$0xff]  ;;  %v7179_v51 = vld [vmem:[#allocation10 + $0x25a8] sm:$0xff] }
 0x5e6   :  { %10987 = vmatprep.subr.bf16.mxu1 %v10986_v53  ;;  %v6084_v53 = vrot.slane %v6079_v48, %v11886_v37  ;;  %v11004_v47 = vpack.c.bf16 %v7172_v4, %v7168_v19  ;;  %v10878_v39 = vpack.c.bf16 %v7179_v51, %v7175_v15  ;;  %v7190_v19 = vld [vmem:[#allocation10 + $0x2600] sm:$0xff]  ;;  %v7192_v4 = vld [vmem:[#allocation10 + $0x2610] sm:$0xff] }
 0x5e7   :  { %10861 = vmatpush1.bf16.msra.mxu0 %v10860_v60  ;;  %v6092_v60 = vrot.slane %v6079_v48, %v11910_v27  ;;  %v7196_v51 = vld [vmem:[#allocation10 + $0x2630] sm:$0xff] }
 0x5e8   :  { %10989 = vmatpush1.bf16.msra.mxu1 %v10988_v57  ;;  %10863 = vmatprep.subr.bf16.mxu0 %v10862_v63  ;;  %v6088_v57 = vrot.slane %v6079_v48, %v11864_v45  ;;  %v10876_v63 = vpack.c.bf16 %v7170_v43, %v7166_v42  ;;  %v11012_v42 = vpack.c.bf16 %v7188_v32, %v7184_v24  ;;  %v7216_v32 = vld [vmem:[#allocation10 + $0x26d0] sm:$0xff] }
 0x5e9   :  { %10991 = vmatprep.subr.bf16.mxu1 %v10990_v3  ;;  %v7174_v3 = vld [vmem:[#allocation10 + $0x2580] sm:$0xff]  ;;  %v10886_v43 = vpack.c.bf16 %v7195_v29, %v7191_v5  ;;  %v7220_v29 = vld [vmem:[#allocation10 + $0x26f0] sm:$0xff] }
 0x5ea   :  { %v10880_v61 = vpack.c.bf16 %v7178_v14, %v7174_v3  ;;  %v7202_v3 = vld [vmem:[#allocation10 + $0x2660] sm:$0xff]  ;;  %v7200_v14 = vld [vmem:[#allocation10 + $0x2650] sm:$0xff] }
 0x5eb   :  { %10865 = vmatpush1.bf16.msra.mxu0 %v10864_v10  ;;  %v7183_v10 = vld [vmem:[#allocation10 + $0x25c8] sm:$0xff] }
 0x5ec   :  { %10993 = vmatpush1.bf16.msra.mxu1 %v10992_v56  ;;  %10867 = vmatprep.subr.bf16.mxu0 %v10866_v2  ;;  %v7187_v56 = vld [vmem:[#allocation10 + $0x25e8] sm:$0xff] }
 0x5ed   :  { %10995 = vmatprep.subr.bf16.mxu1 %v10994_v18  ;;  %v7189_v18 = vld [vmem:[#allocation10 + $0x25f8] sm:$0xff] }
 0x5ef   :  { %10869 = vmatpush1.bf16.msra.mxu0 %v10868_v13  ;;  %v11008_v13 = vpack.c.bf16 %v7180_v41, %v7176_v6  ;;  %v7211_v41 = vld [vmem:[#allocation10 + $0x26a8] sm:$0xff] }
 0x5f0   :  { %10997 = vmatpush1.bf16.msra.mxu1 %v10996_v62  ;;  %10871 = vmatprep.subr.bf16.mxu0 %v10870_v22  ;;  %v10882_v62 = vpack.c.bf16 %v7187_v56, %v7183_v10  ;;  %v7182_v22 = vld [vmem:[#allocation10 + $0x25c0] sm:$0xff]  ;;  %v7209_v10 = vld [vmem:[#allocation10 + $0x2698] sm:$0xff] }
 0x5f1   :  { %10999 = vmatprep.subr.bf16.mxu1 %v10998_v38  ;;  %v11010_v38 = vpack.c.bf16 %v7189_v18, %v7185_v17  ;;  %v7213_v56 = vld [vmem:[#allocation10 + $0x26b8] sm:$0xff]  ;;  %v7206_v17 = vld [vmem:[#allocation10 + $0x2680] sm:$0xff] }
 0x5f2   :  { %v7210_v18 = vld [vmem:[#allocation10 + $0x26a0] sm:$0xff] }
 0x5f3   :  { %10873 = vmatpush1.bf16.msra.mxu0 %v10872_v31  ;;  %v7197_v31 = vld [vmem:[#allocation10 + $0x2638] sm:$0xff] }
 0x5f4   :  { %11001 = vmatpush1.bf16.msra.mxu1 %v11000_v9  ;;  %10875 = vmatprep.subr.bf16.mxu0 %v10874_v36  ;;  %v10884_v9 = vpack.c.bf16 %v7186_v26, %v7182_v22  ;;  %v11014_v15 = vpack.c.bf16 %v7197_v31, %v7193_v55  ;;  %v10896_v22 = vpack.c.bf16 %v7210_v18, %v7206_v17  ;;  %v7227_v55 = vld [vmem:[#allocation10 + $0x2728] sm:$0xff]  ;;  %v7225_v31 = vld [vmem:[#allocation10 + $0x2718] sm:$0xff]  ;;  %v7238_v17 = vld [vmem:[#allocation10 + $0x2780] sm:$0xff] }
 0x5f5   :  { %v6238_v7 = vpop.f32.mrb[16].mxu0  ;;  %11003 = vmatprep.subr.bf16.mxu1 %v11002_v49  ;;  %v7194_v49 = vld [vmem:[#allocation10 + $0x2620] sm:$0xff] }
 0x5f6   :  { %v11310_v2 = vadd.f32 %v6238_v7, %v6084_v53  ;;  %v6380_v12 = vpop.f32.mrb[16].mxu1  ;;  %v6240_v21 = vpop.f32.mrb[17].mxu0  ;;  %v7199_v53 = vld [vmem:[#allocation10 + $0x2648] sm:$0xff]  ;;  %v7204_v7 = vld [vmem:[#allocation10 + $0x2670] sm:$0xff]  ;;  %v7242_v18 = vld [vmem:[#allocation10 + $0x27a0] sm:$0xff] }
 0x5f7   :  { %v11312_v25 = vadd.f32 %v6380_v12, %v6092_v60  ;;  %v11311_v20 = vadd.f32 %v6240_v21, %v6088_v57  ;;  %v6382_v23 = vpop.f32.mrb[17].mxu1  ;;  %10877 = vmatpush1.bf16.msra.mxu0 %v10876_v63  ;;  %v7201_v60 = vld [vmem:[#allocation10 + $0x2658] sm:$0xff]  ;;  %v10888_v63 = vpack.c.bf16 %v7194_v49, %v7190_v19  ;;  %v11020_v12 = vpack.c.bf16 %v7204_v7, %v7200_v14  ;;  %v7226_v19 = vld [vmem:[#allocation10 + $0x2720] sm:$0xff]  ;;  %v7224_v49 = vld [vmem:[#allocation10 + $0x2710] sm:$0xff] }
 0x5f8   :  { %v11313_v52 = vadd.f32 %v6382_v23, %v6096_v0  ;;  %11005 = vmatpush1.bf16.msra.mxu1 %v11004_v47  ;;  %10879 = vmatprep.subr.bf16.mxu0 %v10878_v39  ;;  %v7205_v57 = vld [vmem:[#allocation10 + $0x2678] sm:$0xff]  ;;  %v11016_v0 = vpack.c.bf16 %v7196_v51, %v7192_v4  ;;  %v10890_v47 = vpack.c.bf16 %v7203_v59, %v7199_v53  ;;  %v7198_v39 = vld [vmem:[#allocation10 + $0x2640] sm:$0xff]  ;;  %v7212_v23 = vld [vmem:[#allocation10 + $0x26b0] sm:$0xff] }
 0x5f9   :  { %v6389_v28 = vcombine.low %v11310_v2, %v11311_v20  ;;  %11007 = vmatprep.subr.bf16.mxu1 %v11006_v8  ;;  %v11018_v6 = vpack.c.bf16 %v7205_v57, %v7201_v60  ;;  %v7207_v8 = vld [vmem:[#allocation10 + $0x2688] sm:$0xff]  ;;  %v10892_v2 = vpack.c.bf16 %v7202_v3, %v7198_v39  ;;  %v11022_v20 = vpack.c.bf16 %v7213_v56, %v7209_v10  ;;  %v7233_v59 = vld [vmem:[#allocation10 + $0x2758] sm:$0xff]  ;;  %v7232_v39 = vld [vmem:[#allocation10 + $0x2750] sm:$0xff] }
 0x5fa   :  { %v6390_v33 = vcombine.low %v11312_v25, %v11313_v52  ;;  %v10894_v21 = vpack.c.bf16 %v7211_v41, %v7207_v8  ;;  %v7208_v25 = vld [vmem:[#allocation10 + $0x2690] sm:$0xff]  ;;  %v7219_v52 = vld [vmem:[#allocation10 + $0x26e8] sm:$0xff]  ;;  %v7241_v8 = vld [vmem:[#allocation10 + $0x2798] sm:$0xff] }
 0x5fb   :  { %v6397_v48 = vrot.slane %v6389_v28, %v11724_v11  ;;  %10881 = vmatpush1.bf16.msra.mxu0 %v10880_v61  ;;  %v7215_v61 = vld [vmem:[#allocation10 + $0x26c8] sm:$0xff]  ;;  %v11024_v26 = vpack.c.bf16 %v7212_v23, %v7208_v25  ;;  %v7214_v28 = vld [vmem:[#allocation10 + $0x26c0] sm:$0xff]  ;;  %v7236_v14 = vld [vmem:[#allocation10 + $0x2770] sm:$0xff] }
 0x5fc   :  { %v6404_v36 = vrot.slane %v6390_v33, %v11724_v11  ;;  %11009 = vmatpush1.bf16.msra.mxu1 %v11008_v13  ;;  %10883 = vmatprep.subr.bf16.mxu0 %v10882_v62  ;;  %v7217_v13 = vld [vmem:[#allocation10 + $0x26d8] sm:$0xff]  ;;  %v10898_v24 = vpack.c.bf16 %v7219_v52, %v7215_v61  ;;  %v7223_v33 = vld [vmem:[#allocation10 + $0x2708] sm:$0xff]  ;;  %v12042_v56 = vld [vmem:[#allocation7 + $0x10] sm:$0xff] }
 0x5fd   :  { %11011 = vmatprep.subr.bf16.mxu1 %v11010_v38  ;;  %v7221_v62 = vld [vmem:[#allocation10 + $0x26f8] sm:$0xff]  ;;  %v7218_v38 = vld [vmem:[#allocation10 + $0x26e0] sm:$0xff]  ;;  %v7231_v51 = vld [vmem:[#allocation10 + $0x2748] sm:$0xff] }
 0x5fe   :  { %v6405_v54 = vcombine.low %v6397_v48, %v6404_v36  ;;  %v11026_v5 = vpack.c.bf16 %v7221_v62, %v7217_v13  ;;  %v7229_v48 = vld [vmem:[#allocation10 + $0x2738] sm:$0xff]  ;;  %v11028_v36 = vpack.c.bf16 %v7220_v29, %v7216_v32  ;;  %v7235_v53 = vld [vmem:[#allocation10 + $0x2768] sm:$0xff]  ;;  %v7240_v25 = vld [vmem:[#allocation10 + $0x2790] sm:$0xff]  ;;  %v4417_v13 = vrot.slane %v12042_v56, %v11913_v35 }
 0x5ff   :  { %10885 = vmatpush1.bf16.msra.mxu0 %v10884_v9  ;;  %v10900_v9 = vpack.c.bf16 %v7218_v38, %v7214_v28  ;;  %v11030_v4 = vpack.c.bf16 %v7229_v48, %v7225_v31  ;;  %v7243_v7 = vld [vmem:[#allocation10 + $0x27a8] sm:$0xff]  ;;  %v7245_v41 = vld [vmem:[#allocation10 + $0x27b8] sm:$0xff]  ;;  %v7244_v23 = vld [vmem:[#allocation10 + $0x27b0] sm:$0xff]  ;;  %v10912_v28 = vpack.c.bf16 %v7242_v18, %v7238_v17 }
 0x600   :  { %6408 = vst [vmem:[#allocation13 + $0x10] sm:$0xff] %v6405_v54  ;;  %11013 = vmatpush1.bf16.msra.mxu1 %v11012_v42  ;;  %10887 = vmatprep.subr.bf16.mxu0 %v10886_v43  ;;  %v10902_v42 = vpack.c.bf16 %v7227_v55, %v7223_v33  ;;  %v7222_v43 = vld [vmem:[#allocation10 + $0x2700] sm:$0xff]  ;;  %v7237_v54 = vld [vmem:[#allocation10 + $0x2778] sm:$0xff]  ;;  %v7247_v61 = vld [vmem:[#allocation10 + $0x27c8] sm:$0xff]  ;;  %v11040_v32 = vpack.c.bf16 %v7244_v23, %v7240_v25 }
 0x601   :  { %11015 = vmatprep.subr.bf16.mxu1 %v11014_v15  ;;  %v7228_v15 = vld [vmem:[#allocation10 + $0x2730] sm:$0xff]  ;;  %v10904_v60 = vpack.c.bf16 %v7226_v19, %v7222_v43  ;;  %v11034_v3 = vpack.c.bf16 %v7237_v54, %v7233_v59  ;;  %v7251_v52 = vld [vmem:[#allocation10 + $0x27e8] sm:$0xff]  ;;  %v7249_v62 = vld [vmem:[#allocation10 + $0x27d8] sm:$0xff] }
 0x602   :  { %v11032_v57 = vpack.c.bf16 %v7228_v15, %v7224_v49  ;;  %v7246_v29 = vld [vmem:[#allocation10 + $0x27c0] sm:$0xff]  ;;  %v7248_v55 = vld [vmem:[#allocation10 + $0x27d0] sm:$0xff]  ;;  %v7589_v19 = vld [vmem:[#allocation10 + $0x2818] sm:$0xff] }
 0x603   :  { %10889 = vmatpush1.bf16.msra.mxu0 %v10888_v63  ;;  %v10906_v63 = vpack.c.bf16 %v7235_v53, %v7231_v51  ;;  %v7250_v33 = vld [vmem:[#allocation10 + $0x27e0] sm:$0xff]  ;;  %v7252_v48 = vld [vmem:[#allocation10 + $0x27f0] sm:$0xff]  ;;  %v7593_v49 = vld [vmem:[#allocation10 + $0x2838] sm:$0xff] }
 0x604   :  { %11017 = vmatpush1.bf16.msra.mxu1 %v11016_v0  ;;  %10891 = vmatprep.subr.bf16.mxu0 %v10890_v47  ;;  %v7230_v0 = vld [vmem:[#allocation10 + $0x2740] sm:$0xff]  ;;  %v11044_v15 = vpack.c.bf16 %v7252_v48, %v7248_v55  ;;  %v11174_v54 = vpack.c.bf16 %v7593_v49, %v7589_v19  ;;  %v7605_v18 = vld [vmem:[#allocation10 + $0x2898] sm:$0xff]  ;;  %v7623_v19 = vld [vmem:[#allocation10 + $0x2928] sm:$0xff] }
 0x605   :  { %11019 = vmatprep.subr.bf16.mxu1 %v11018_v6  ;;  %v7234_v47 = vld [vmem:[#allocation10 + $0x2760] sm:$0xff]  ;;  %v7239_v6 = vld [vmem:[#allocation10 + $0x2788] sm:$0xff]  ;;  %v7609_v25 = vld [vmem:[#allocation10 + $0x28b8] sm:$0xff] }
 0x606   :  { %v10908_v10 = vpack.c.bf16 %v7234_v47, %v7230_v0  ;;  %v7586_v53 = vld [vmem:[#allocation10 + $0x2800] sm:$0xff]  ;;  %v7599_v0 = vld [vmem:[#allocation10 + $0x2868] sm:$0xff]  ;;  %v7597_v47 = vld [vmem:[#allocation10 + $0x2858] sm:$0xff] }
 0x607   :  { %10893 = vmatpush1.bf16.msra.mxu0 %v10892_v2  ;;  %v4405_v2 = vrot.slane %v12042_v56, %v11910_v27  ;;  %v7590_v59 = vld [vmem:[#allocation10 + $0x2820] sm:$0xff]  ;;  %v7621_v49 = vld [vmem:[#allocation10 + $0x2918] sm:$0xff] }
 0x608   :  { %11021 = vmatpush1.bf16.msra.mxu1 %v11020_v12  ;;  %10895 = vmatprep.subr.bf16.mxu0 %v10894_v21  ;;  %v11036_v12 = vpack.c.bf16 %v7236_v14, %v7232_v39  ;;  %v10910_v21 = vpack.c.bf16 %v7243_v7, %v7239_v6  ;;  %v7601_v39 = vld [vmem:[#allocation10 + $0x2878] sm:$0xff]  ;;  %v7594_v6 = vld [vmem:[#allocation10 + $0x2840] sm:$0xff] }
 0x609   :  { %11023 = vmatprep.subr.bf16.mxu1 %v11022_v20  ;;  %v11038_v20 = vpack.c.bf16 %v7245_v41, %v7241_v8  ;;  %v4468_v38 = vmul.f32 %v4405_v2, %v11903_v1  ;;  %v10916_v1 = vpack.c.bf16 %v7250_v33, %v7246_v29  ;;  %v7598_v7 = vld [vmem:[#allocation10 + $0x2860] sm:$0xff]  ;;  %v7596_v8 = vld [vmem:[#allocation10 + $0x2850] sm:$0xff]  ;;  %v7603_v2 = vld [vmem:[#allocation10 + $0x2888] sm:$0xff]  ;;  %v11178_v17 = vpack.c.bf16 %v7601_v39, %v7597_v47 }
 0x60a   :  { %v7614_v48 = vld [vmem:[#allocation10 + $0x28e0] sm:$0xff] }
 0x60b   :  { %10897 = vmatpush1.bf16.msra.mxu0 %v10896_v22  ;;  %v7253_v22 = vld [vmem:[#allocation10 + $0x27f8] sm:$0xff] }
 0x60c   :  { %11025 = vmatpush1.bf16.msra.mxu1 %v11024_v26  ;;  %10899 = vmatprep.subr.bf16.mxu0 %v10898_v24  ;;  %v12048_v26 = vld [vmem:[#allocation8 + $0x10] sm:$0xff]  ;;  %v11042_v31 = vpack.c.bf16 %v7253_v22, %v7249_v62  ;;  %v7604_v62 = vld [vmem:[#allocation10 + $0x2890] sm:$0xff]  ;;  %v11182_v22 = vpack.c.bf16 %v7609_v25, %v7605_v18 }
 0x60d   :  { %11027 = vmatprep.subr.bf16.mxu1 %v11026_v5  ;;  %v4555_v24 = vrot.slane %v12048_v26, %v11910_v27  ;;  %v10914_v5 = vpack.c.bf16 %v7251_v52, %v7247_v61  ;;  %v4567_v43 = vrot.slane %v12048_v26, %v11913_v35  ;;  %v11048_v35 = vpack.c.bf16 %v7590_v59, %v7586_v53  ;;  %v7602_v52 = vld [vmem:[#allocation10 + $0x2880] sm:$0xff] }
 0x60e   :  { %v7618_v53 = vld [vmem:[#allocation10 + $0x2900] sm:$0xff] }
 0x60f   :  { %10901 = vmatpush1.bf16.msra.mxu0 %v10900_v9  ;;  %v7587_v9 = vld [vmem:[#allocation10 + $0x2808] sm:$0xff]  ;;  %v7622_v59 = vld [vmem:[#allocation10 + $0x2920] sm:$0xff] }
 0x610   :  { %11029 = vmatpush1.bf16.msra.mxu1 %v11028_v36  ;;  %10903 = vmatprep.subr.bf16.mxu0 %v10902_v42  ;;  %v7591_v36 = vld [vmem:[#allocation10 + $0x2828] sm:$0xff]  ;;  %v4471_v42 = vmul.f32 %v4417_v13, %v11949_v50  ;;  %v7606_v13 = vld [vmem:[#allocation10 + $0x28a0] sm:$0xff]  ;;  %v11064_v47 = vpack.c.bf16 %v7622_v59, %v7618_v53  ;;  %v7656_v59 = vld [vmem:[#allocation10 + $0x2a30] sm:$0xff] }
 0x611   :  { %11031 = vmatprep.subr.bf16.mxu1 %v11030_v4  ;;  %v4618_v4 = vadd.f32 %v4555_v24, %v4468_v38  ;;  %v11046_v51 = vpack.c.bf16 %v7591_v36, %v7587_v9  ;;  %v7595_v50 = vld [vmem:[#allocation10 + $0x2848] sm:$0xff]  ;;  %v7608_v24 = vld [vmem:[#allocation10 + $0x28b0] sm:$0xff]  ;;  %v11056_v29 = vpack.c.bf16 %v7606_v13, %v7602_v52 }
 0x612   :  { %v11050_v41 = vpack.c.bf16 %v7599_v0, %v7595_v50  ;;  %v7615_v38 = vld [vmem:[#allocation10 + $0x28e8] sm:$0xff]  ;;  %v11184_v33 = vpack.c.bf16 %v7608_v24, %v7604_v62  ;;  %v7612_v9 = vld [vmem:[#allocation10 + $0x28d0] sm:$0xff]  ;;  %v7629_v0 = vld [vmem:[#allocation10 + $0x2958] sm:$0xff] }
 0x613   :  { %10905 = vmatpush1.bf16.msra.mxu0 %v10904_v60  ;;  %v7588_v60 = vld [vmem:[#allocation10 + $0x2810] sm:$0xff]  ;;  %v7631_v50 = vld [vmem:[#allocation10 + $0x2968] sm:$0xff]  ;;  %v7645_v24 = vld [vmem:[#allocation10 + $0x29d8] sm:$0xff] }
 0x614   :  { %11033 = vmatpush1.bf16.msra.mxu1 %v11032_v57  ;;  %10907 = vmatprep.subr.bf16.mxu0 %v10906_v63  ;;  %v7592_v57 = vld [vmem:[#allocation10 + $0x2830] sm:$0xff]  ;;  %v4621_v63 = vadd.f32 %v4567_v43, %v4471_v42  ;;  %v7619_v43 = vld [vmem:[#allocation10 + $0x2908] sm:$0xff] }
 0x615   :  { %11035 = vmatprep.subr.bf16.mxu1 %v11034_v3  ;;  %v4642_v3 = vmax.f32 %v4618_v4, 0.0  ;;  %v11176_v14 = vpack.c.bf16 %v7592_v57, %v7588_v60  ;;  %v7616_v42 = vld [vmem:[#allocation10 + $0x28f0] sm:$0xff]  ;;  %v7643_v62 = vld [vmem:[#allocation10 + $0x29c8] sm:$0xff] }
 0x616   :  { %v7624_v57 = vld [vmem:[#allocation10 + $0x2930] sm:$0xff] }
 0x617   :  { %10909 = vmatpush1.bf16.msra.mxu0 %v10908_v10  ;;  %v7600_v10 = vld [vmem:[#allocation10 + $0x2870] sm:$0xff] }
 0x618   :  { %11037 = vmatpush1.bf16.msra.mxu1 %v11036_v12  ;;  %10911 = vmatprep.subr.bf16.mxu0 %v10910_v21  ;;  %v7607_v12 = vld [vmem:[#allocation10 + $0x28a8] sm:$0xff]  ;;  %v4645_v21 = vmax.f32 %v4621_v63, 0.0  ;;  %v11180_v23 = vpack.c.bf16 %v7600_v10, %v7596_v8  ;;  %v7640_v13 = vld [vmem:[#allocation10 + $0x29b0] sm:$0xff] }
 0x619   :  { %11039 = vmatprep.subr.bf16.mxu1 %v11038_v20  ;;  %v11052_v20 = vpack.c.bf16 %v7598_v7, %v7594_v6  ;;  %v11054_v61 = vpack.c.bf16 %v7607_v12, %v7603_v2  ;;  %v7627_v63 = vld [vmem:[#allocation10 + $0x2948] sm:$0xff]  ;;  %v7630_v6 = vld [vmem:[#allocation10 + $0x2960] sm:$0xff]  ;;  %v7628_v7 = vld [vmem:[#allocation10 + $0x2950] sm:$0xff] }
 0x61a   :  { %v7635_v10 = vld [vmem:[#allocation10 + $0x2988] sm:$0xff]  ;;  %v7637_v12 = vld [vmem:[#allocation10 + $0x2998] sm:$0xff] }
 0x61b   :  { %10913 = vmatpush1.bf16.msra.mxu0 %v10912_v28  ;;  %v7611_v28 = vld [vmem:[#allocation10 + $0x28c8] sm:$0xff] }
 0x61c   :  { %11041 = vmatpush1.bf16.msra.mxu1 %v11040_v32  ;;  %10915 = vmatprep.subr.bf16.mxu0 %v10914_v5  ;;  %v7613_v32 = vld [vmem:[#allocation10 + $0x28d8] sm:$0xff]  ;;  %v11058_v55 = vpack.c.bf16 %v7615_v38, %v7611_v28  ;;  %v7639_v2 = vld [vmem:[#allocation10 + $0x29a8] sm:$0xff] }
 0x61d   :  { %11043 = vmatprep.subr.bf16.mxu1 %v11042_v31  ;;  %v7617_v5 = vld [vmem:[#allocation10 + $0x28f8] sm:$0xff]  ;;  %v7610_v31 = vld [vmem:[#allocation10 + $0x28c0] sm:$0xff]  ;;  %v11070_v25 = vpack.c.bf16 %v7639_v2, %v7635_v10 }
 0x61e   :  { %v11186_v36 = vpack.c.bf16 %v7617_v5, %v7613_v32  ;;  %v11060_v4 = vpack.c.bf16 %v7614_v48, %v7610_v31  ;;  %v7649_v28 = vld [vmem:[#allocation10 + $0x29f8] sm:$0xff]  ;;  %v7648_v48 = vld [vmem:[#allocation10 + $0x29f0] sm:$0xff] }
 0x61f   :  { %10917 = vmatpush1.bf16.msra.mxu0 %v10916_v1  ;;  %v7625_v1 = vld [vmem:[#allocation10 + $0x2938] sm:$0xff]  ;;  %v11202_v31 = vpack.c.bf16 %v7649_v28, %v7645_v24 }
 0x620   :  { %11045 = vmatpush1.bf16.msra.mxu1 %v11044_v15  ;;  %11047 = vmatprep.subr.bf16.mxu0 %v11046_v51  ;;  %v11188_v15 = vpack.c.bf16 %v7616_v42, %v7612_v9  ;;  %v11062_v51 = vpack.c.bf16 %v7623_v19, %v7619_v43  ;;  %v11190_v60 = vpack.c.bf16 %v7625_v1, %v7621_v49  ;;  %v7651_v9 = vld [vmem:[#allocation10 + $0x2a08] sm:$0xff]  ;;  %v7653_v42 = vld [vmem:[#allocation10 + $0x2a18] sm:$0xff] }
 0x621   :  { %11175 = vmatprep.subr.bf16.mxu1 %v11174_v54  ;;  %v7620_v54 = vld [vmem:[#allocation10 + $0x2910] sm:$0xff]  ;;  %v7657_v43 = vld [vmem:[#allocation10 + $0x2a38] sm:$0xff] }
 0x622   :  { %7413 = vmatmul.mubr.f32.vlgmr.msra.gmra.mrb[20].mxu0 %v4642_v3  ;;  %v11192_v39 = vpack.c.bf16 %v7624_v57, %v7620_v54  ;;  %v11206_v53 = vpack.c.bf16 %v7657_v43, %v7653_v42  ;;  %v7659_v54 = vld [vmem:[#allocation10 + $0x2a48] sm:$0xff]  ;;  %v7661_v57 = vld [vmem:[#allocation10 + $0x2a58] sm:$0xff] }
 0x623   :  { %7555 = vmatmul.mubr.f32.vlgmr.msra.gmra.mrb[20].mxu1 %v4642_v3  ;;  %11049 = vmatpush1.bf16.msra.mxu0 %v11048_v35  ;;  %v7633_v35 = vld [vmem:[#allocation10 + $0x2978] sm:$0xff]  ;;  %v11066_v3 = vpack.c.bf16 %v7631_v50, %v7627_v63 }
 0x624   :  { %7929 = vmatprep.mubr.f32.mxu0 %v4645_v21  ;;  %11177 = vmatpush1.bf16.msra.mxu1 %v11176_v14  ;;  %v7626_v14 = vld [vmem:[#allocation10 + $0x2940] sm:$0xff]  ;;  %v11194_v8 = vpack.c.bf16 %v7633_v35, %v7629_v0  ;;  %v7665_v63 = vld [vmem:[#allocation10 + $0x2a78] sm:$0xff] }
 0x625   :  { %8071 = vmatprep.mubr.f32.mxu1 %v4645_v21  ;;  %11051 = vmatprep.subr.bf16.mxu0 %v11050_v41  ;;  %v7632_v41 = vld [vmem:[#allocation10 + $0x2970] sm:$0xff]  ;;  %v7641_v21 = vld [vmem:[#allocation10 + $0x29b8] sm:$0xff] }
 0x626   :  { %11179 = vmatprep.subr.bf16.mxu1 %v11178_v17  ;;  %v11068_v17 = vpack.c.bf16 %v7630_v6, %v7626_v14  ;;  %v11196_v18 = vpack.c.bf16 %v7632_v41, %v7628_v7  ;;  %v11198_v52 = vpack.c.bf16 %v7641_v21, %v7637_v12  ;;  %v11210_v14 = vpack.c.bf16 %v7665_v63, %v7661_v57  ;;  %v7664_v6 = vld [vmem:[#allocation10 + $0x2a70] sm:$0xff]  ;;  %v7667_v7 = vld [vmem:[#allocation10 + $0x2a88] sm:$0xff]  ;;  %v7669_v41 = vld [vmem:[#allocation10 + $0x2a98] sm:$0xff] }
 0x627   :  { %11053 = vmatpush1.bf16.msra.mxu0 %v11052_v20  ;;  %v7634_v20 = vld [vmem:[#allocation10 + $0x2980] sm:$0xff]  ;;  %v7673_v10 = vld [vmem:[#allocation10 + $0x2ab8] sm:$0xff] }
 0x628   :  { %11181 = vmatpush1.bf16.msra.mxu1 %v11180_v23  ;;  %11055 = vmatprep.subr.bf16.mxu0 %v11054_v61  ;;  %v7638_v23 = vld [vmem:[#allocation10 + $0x29a0] sm:$0xff]  ;;  %v7636_v61 = vld [vmem:[#allocation10 + $0x2990] sm:$0xff] }
 0x629   :  { %11183 = vmatprep.subr.bf16.mxu1 %v11182_v22  ;;  %v7647_v22 = vld [vmem:[#allocation10 + $0x29e8] sm:$0xff]  ;;  %v11072_v38 = vpack.c.bf16 %v7638_v23, %v7634_v20  ;;  %v11200_v32 = vpack.c.bf16 %v7640_v13, %v7636_v61  ;;  %v11214_v20 = vpack.c.bf16 %v7673_v10, %v7669_v41  ;;  %v7672_v23 = vld [vmem:[#allocation10 + $0x2ab0] sm:$0xff]  ;;  %v7677_v13 = vld [vmem:[#allocation10 + $0x2ad8] sm:$0xff]  ;;  %v4413_v41 = vrot.slane %v12042_v56, %v11930_v30 }
 0x62a   :  { %v11074_v5 = vpack.c.bf16 %v7647_v22, %v7643_v62  ;;  %v7675_v61 = vld [vmem:[#allocation10 + $0x2ac8] sm:$0xff]  ;;  %v7681_v62 = vld [vmem:[#allocation10 + $0x2af8] sm:$0xff] }
 0x62b   :  { %11057 = vmatpush1.bf16.msra.mxu0 %v11056_v29  ;;  %v7642_v29 = vld [vmem:[#allocation10 + $0x29c0] sm:$0xff] }
 0x62c   :  { %11185 = vmatpush1.bf16.msra.mxu1 %v11184_v33  ;;  %11059 = vmatprep.subr.bf16.mxu0 %v11058_v55  ;;  %v7646_v33 = vld [vmem:[#allocation10 + $0x29e0] sm:$0xff]  ;;  %v7644_v55 = vld [vmem:[#allocation10 + $0x29d0] sm:$0xff] }
 0x62d   :  { %11187 = vmatprep.subr.bf16.mxu1 %v11186_v36  ;;  %v7655_v36 = vld [vmem:[#allocation10 + $0x2a28] sm:$0xff]  ;;  %v11076_v19 = vpack.c.bf16 %v7646_v33, %v7642_v29  ;;  %v11204_v49 = vpack.c.bf16 %v7648_v48, %v7644_v55  ;;  %v11218_v29 = vpack.c.bf16 %v7681_v62, %v7677_v13  ;;  %v7680_v33 = vld [vmem:[#allocation10 + $0x2af0] sm:$0xff]  ;;  %v7685_v48 = vld [vmem:[#allocation10 + $0x2b18] sm:$0xff]  ;;  %v4563_v62 = vrot.slane %v12048_v26, %v11930_v30 }
 0x62e   :  { %v11078_v1 = vpack.c.bf16 %v7655_v36, %v7651_v9  ;;  %v7683_v55 = vld [vmem:[#allocation10 + $0x2b08] sm:$0xff]  ;;  %v7689_v9 = vld [vmem:[#allocation10 + $0x2b38] sm:$0xff]  ;;  %v4575_v30 = vrot.slane %v12048_v26, %v11933_v40 }
 0x62f   :  { %11061 = vmatpush1.bf16.msra.mxu0 %v11060_v4  ;;  %v7650_v4 = vld [vmem:[#allocation10 + $0x2a00] sm:$0xff]  ;;  %v7713_v13 = vld [vmem:[#allocation10 + $0x2bf8] sm:$0xff] }
 0x630   :  { %11189 = vmatpush1.bf16.msra.mxu1 %v11188_v15  ;;  %11063 = vmatprep.subr.bf16.mxu0 %v11062_v51  ;;  %v7654_v15 = vld [vmem:[#allocation10 + $0x2a20] sm:$0xff]  ;;  %v7652_v51 = vld [vmem:[#allocation10 + $0x2a10] sm:$0xff]  ;;  %v7725_v26 = vld [vmem:[#allocation10 + $0x2c58] sm:$0xff] }
 0x631   :  { %11191 = vmatprep.subr.bf16.mxu1 %v11190_v60  ;;  %v7663_v60 = vld [vmem:[#allocation10 + $0x2a68] sm:$0xff]  ;;  %v11080_v50 = vpack.c.bf16 %v7654_v15, %v7650_v4  ;;  %v11208_v0 = vpack.c.bf16 %v7656_v59, %v7652_v51  ;;  %v11222_v4 = vpack.c.bf16 %v7689_v9, %v7685_v48  ;;  %v7688_v15 = vld [vmem:[#allocation10 + $0x2b30] sm:$0xff]  ;;  %v7693_v59 = vld [vmem:[#allocation10 + $0x2b58] sm:$0xff] }
 0x632   :  { %v11082_v35 = vpack.c.bf16 %v7663_v60, %v7659_v54  ;;  %v7691_v51 = vld [vmem:[#allocation10 + $0x2b48] sm:$0xff]  ;;  %v7697_v54 = vld [vmem:[#allocation10 + $0x2b78] sm:$0xff] }
 0x633   :  { %11065 = vmatpush1.bf16.msra.mxu0 %v11064_v47  ;;  %v7658_v47 = vld [vmem:[#allocation10 + $0x2a40] sm:$0xff]  ;;  %v7717_v9 = vld [vmem:[#allocation10 + $0x2c18] sm:$0xff] }
 0x634   :  { %11193 = vmatpush1.bf16.msra.mxu1 %v11192_v39  ;;  %11067 = vmatprep.subr.bf16.mxu0 %v11066_v3  ;;  %v7662_v39 = vld [vmem:[#allocation10 + $0x2a60] sm:$0xff]  ;;  %v7660_v3 = vld [vmem:[#allocation10 + $0x2a50] sm:$0xff] }
 0x635   :  { %11195 = vmatprep.subr.bf16.mxu1 %v11194_v8  ;;  %v7671_v8 = vld [vmem:[#allocation10 + $0x2aa8] sm:$0xff]  ;;  %v11084_v2 = vpack.c.bf16 %v7662_v39, %v7658_v47  ;;  %v11212_v12 = vpack.c.bf16 %v7664_v6, %v7660_v3  ;;  %v11226_v47 = vpack.c.bf16 %v7697_v54, %v7693_v59  ;;  %v7696_v39 = vld [vmem:[#allocation10 + $0x2b70] sm:$0xff]  ;;  %v7701_v6 = vld [vmem:[#allocation10 + $0x2b98] sm:$0xff] }
 0x636   :  { %v11086_v21 = vpack.c.bf16 %v7671_v8, %v7667_v7  ;;  %v7699_v3 = vld [vmem:[#allocation10 + $0x2b88] sm:$0xff]  ;;  %v7705_v7 = vld [vmem:[#allocation10 + $0x2bb8] sm:$0xff] }
 0x637   :  { %11069 = vmatpush1.bf16.msra.mxu0 %v11068_v17  ;;  %v7666_v17 = vld [vmem:[#allocation10 + $0x2a80] sm:$0xff]  ;;  %v7727_v59 = vld [vmem:[#allocation10 + $0x2c68] sm:$0xff]  ;;  %v7729_v54 = vld [vmem:[#allocation10 + $0x2c78] sm:$0xff] }
 0x638   :  { %11197 = vmatpush1.bf16.msra.mxu1 %v11196_v18  ;;  %11071 = vmatprep.subr.bf16.mxu0 %v11070_v25  ;;  %v7670_v18 = vld [vmem:[#allocation10 + $0x2aa0] sm:$0xff]  ;;  %v7668_v25 = vld [vmem:[#allocation10 + $0x2a90] sm:$0xff] }
 0x639   :  { %11199 = vmatprep.subr.bf16.mxu1 %v11198_v52  ;;  %v7679_v52 = vld [vmem:[#allocation10 + $0x2ae8] sm:$0xff]  ;;  %v11088_v22 = vpack.c.bf16 %v7670_v18, %v7666_v17  ;;  %v11216_v24 = vpack.c.bf16 %v7672_v23, %v7668_v25  ;;  %v7700_v17 = vld [vmem:[#allocation10 + $0x2b90] sm:$0xff]  ;;  %v11230_v18 = vpack.c.bf16 %v7705_v7, %v7701_v6  ;;  %v11242_v6 = vpack.c.bf16 %v7729_v54, %v7725_v26  ;;  %v7733_v7 = vld [vmem:[#allocation10 + $0x2c98] sm:$0xff] }
 0x63a   :  { %v11090_v28 = vpack.c.bf16 %v7679_v52, %v7675_v61  ;;  %v7704_v25 = vld [vmem:[#allocation10 + $0x2bb0] sm:$0xff]  ;;  %v7711_v23 = vld [vmem:[#allocation10 + $0x2be8] sm:$0xff]  ;;  %v4425_v61 = vrot.slane %v12042_v56, %v11933_v40  ;;  %v7709_v52 = vld [vmem:[#allocation10 + $0x2bd8] sm:$0xff] }
 0x63b   :  { %11073 = vmatpush1.bf16.msra.mxu0 %v11072_v38  ;;  %v7674_v38 = vld [vmem:[#allocation10 + $0x2ac0] sm:$0xff]  ;;  %v7715_v56 = vld [vmem:[#allocation10 + $0x2c08] sm:$0xff]  ;;  %v7756_v26 = vld [vmem:[#allocation10 + $0x2d50] sm:$0xff] }
 0x63c   :  { %11201 = vmatpush1.bf16.msra.mxu1 %v11200_v32  ;;  %11075 = vmatprep.subr.bf16.mxu0 %v11074_v5  ;;  %v7678_v32 = vld [vmem:[#allocation10 + $0x2ae0] sm:$0xff]  ;;  %v7676_v5 = vld [vmem:[#allocation10 + $0x2ad0] sm:$0xff]  ;;  %v4473_v48 = vmul.f32 %v4425_v61, %v11951_v16  ;;  %v7723_v16 = vld [vmem:[#allocation10 + $0x2c48] sm:$0xff] }
 0x63d   :  { %11203 = vmatprep.subr.bf16.mxu1 %v11202_v31  ;;  %v7687_v31 = vld [vmem:[#allocation10 + $0x2b28] sm:$0xff]  ;;  %v11092_v36 = vpack.c.bf16 %v7678_v32, %v7674_v38  ;;  %v11220_v42 = vpack.c.bf16 %v7680_v33, %v7676_v5  ;;  %v7706_v32 = vld [vmem:[#allocation10 + $0x2bc0] sm:$0xff]  ;;  %v11234_v33 = vpack.c.bf16 %v7713_v13, %v7709_v52  ;;  %v7741_v61 = vld [vmem:[#allocation10 + $0x2cd8] sm:$0xff] }
 0x63e   :  { %v11094_v43 = vpack.c.bf16 %v7687_v31, %v7683_v55  ;;  %v7710_v5 = vld [vmem:[#allocation10 + $0x2be0] sm:$0xff]  ;;  %v7712_v55 = vld [vmem:[#allocation10 + $0x2bf0] sm:$0xff]  ;;  %v7719_v31 = vld [vmem:[#allocation10 + $0x2c28] sm:$0xff] }
 0x63f   :  { %11077 = vmatpush1.bf16.msra.mxu0 %v11076_v19  ;;  %v7682_v19 = vld [vmem:[#allocation10 + $0x2b00] sm:$0xff]  ;;  %v7745_v52 = vld [vmem:[#allocation10 + $0x2cf8] sm:$0xff] }
 0x640   :  { %11205 = vmatpush1.bf16.msra.mxu1 %v11204_v49  ;;  %11079 = vmatprep.subr.bf16.mxu0 %v11078_v1  ;;  %v7686_v49 = vld [vmem:[#allocation10 + $0x2b20] sm:$0xff]  ;;  %v7684_v1 = vld [vmem:[#allocation10 + $0x2b10] sm:$0xff] }
 0x641   :  { %11207 = vmatprep.subr.bf16.mxu1 %v11206_v53  ;;  %v7695_v53 = vld [vmem:[#allocation10 + $0x2b68] sm:$0xff]  ;;  %v11096_v60 = vpack.c.bf16 %v7686_v49, %v7682_v19  ;;  %v11224_v57 = vpack.c.bf16 %v7688_v15, %v7684_v1  ;;  %v11110_v19 = vpack.c.bf16 %v7719_v31, %v7715_v56  ;;  %v7714_v49 = vld [vmem:[#allocation10 + $0x2c00] sm:$0xff]  ;;  %v7716_v15 = vld [vmem:[#allocation10 + $0x2c10] sm:$0xff] }
 0x642   :  { %v11098_v63 = vpack.c.bf16 %v7695_v53, %v7691_v51  ;;  %v7718_v1 = vld [vmem:[#allocation10 + $0x2c20] sm:$0xff]  ;;  %v7720_v51 = vld [vmem:[#allocation10 + $0x2c30] sm:$0xff]  ;;  %v4623_v53 = vadd.f32 %v4575_v30, %v4473_v48  ;;  %v7753_v56 = vld [vmem:[#allocation10 + $0x2d38] sm:$0xff] }
 0x643   :  { %11081 = vmatpush1.bf16.msra.mxu0 %v11080_v50  ;;  %v7690_v50 = vld [vmem:[#allocation10 + $0x2b40] sm:$0xff]  ;;  %v11112_v40 = vpack.c.bf16 %v7718_v1, %v7714_v49  ;;  %v7759_v49 = vld [vmem:[#allocation10 + $0x2d68] sm:$0xff]  ;;  %v7757_v1 = vld [vmem:[#allocation10 + $0x2d58] sm:$0xff] }
 0x644   :  { %11209 = vmatpush1.bf16.msra.mxu1 %v11208_v0  ;;  %11083 = vmatprep.subr.bf16.mxu0 %v11082_v35  ;;  %v7694_v0 = vld [vmem:[#allocation10 + $0x2b60] sm:$0xff]  ;;  %v7692_v35 = vld [vmem:[#allocation10 + $0x2b50] sm:$0xff] }
 0x645   :  { %11211 = vmatprep.subr.bf16.mxu1 %v11210_v14  ;;  %v7703_v14 = vld [vmem:[#allocation10 + $0x2ba8] sm:$0xff]  ;;  %v11100_v8 = vpack.c.bf16 %v7694_v0, %v7690_v50  ;;  %v11228_v10 = vpack.c.bf16 %v7696_v39, %v7692_v35  ;;  %v7726_v50 = vld [vmem:[#allocation10 + $0x2c60] sm:$0xff]  ;;  %v7724_v0 = vld [vmem:[#allocation10 + $0x2c50] sm:$0xff]  ;;  %v11114_v35 = vpack.c.bf16 %v7727_v59, %v7723_v16 }
 0x646   :  { %v7731_v39 = vld [vmem:[#allocation10 + $0x2c88] sm:$0xff]  ;;  %v7754_v59 = vld [vmem:[#allocation10 + $0x2d40] sm:$0xff] }
 0x647   :  { %11085 = vmatpush1.bf16.msra.mxu0 %v11084_v2  ;;  %v11102_v2 = vpack.c.bf16 %v7703_v14, %v7699_v3  ;;  %v7735_v3 = vld [vmem:[#allocation10 + $0x2ca8] sm:$0xff]  ;;  %v4647_v14 = vmax.f32 %v4623_v53, 0.0 }
 0x648   :  { %11213 = vmatpush1.bf16.msra.mxu1 %v11212_v12  ;;  %11087 = vmatprep.subr.bf16.mxu0 %v11086_v21  ;;  %v7698_v12 = vld [vmem:[#allocation10 + $0x2b80] sm:$0xff] }
 0x649   :  { %11215 = vmatprep.subr.bf16.mxu1 %v11214_v20  ;;  %v7702_v21 = vld [vmem:[#allocation10 + $0x2ba0] sm:$0xff]  ;;  %v7707_v20 = vld [vmem:[#allocation10 + $0x2bc8] sm:$0xff] }
 0x64a   :  { %v11106_v38 = vpack.c.bf16 %v7711_v23, %v7707_v20  ;;  %v7739_v20 = vld [vmem:[#allocation10 + $0x2cc8] sm:$0xff] }
 0x64b   :  { %11089 = vmatpush1.bf16.msra.mxu0 %v11088_v22  ;;  %v11104_v22 = vpack.c.bf16 %v7702_v21, %v7698_v12  ;;  %v7730_v12 = vld [vmem:[#allocation10 + $0x2c80] sm:$0xff]  ;;  %v7743_v23 = vld [vmem:[#allocation10 + $0x2ce8] sm:$0xff] }
 0x64c   :  { %11217 = vmatpush1.bf16.msra.mxu1 %v11216_v24  ;;  %11091 = vmatprep.subr.bf16.mxu0 %v11090_v28  ;;  %v4470_v24 = vmul.f32 %v4413_v41, %v11945_v46  ;;  %v11232_v28 = vpack.c.bf16 %v7704_v25, %v7700_v17  ;;  %v11108_v46 = vpack.c.bf16 %v7710_v5, %v7706_v32  ;;  %v7734_v21 = vld [vmem:[#allocation10 + $0x2ca0] sm:$0xff]  ;;  %v7732_v17 = vld [vmem:[#allocation10 + $0x2c90] sm:$0xff] }
 0x64d   :  { %11219 = vmatprep.subr.bf16.mxu1 %v11218_v29  ;;  %v7708_v29 = vld [vmem:[#allocation10 + $0x2bd0] sm:$0xff]  ;;  %v11120_v13 = vpack.c.bf16 %v7734_v21, %v7730_v12  ;;  %v11250_v32 = vpack.c.bf16 %v7745_v52, %v7741_v61  ;;  %v7773_v61 = vld [vmem:[#allocation10 + $0x2dd8] sm:$0xff] }
 0x64e   :  { %v7736_v25 = vld [vmem:[#allocation10 + $0x2cb0] sm:$0xff]  ;;  %v7777_v52 = vld [vmem:[#allocation10 + $0x2df8] sm:$0xff] }
 0x64f   :  { %11093 = vmatpush1.bf16.msra.mxu0 %v11092_v36  ;;  %v7721_v36 = vld [vmem:[#allocation10 + $0x2c38] sm:$0xff]  ;;  %v7744_v5 = vld [vmem:[#allocation10 + $0x2cf0] sm:$0xff] }
 0x650   :  { %11221 = vmatpush1.bf16.msra.mxu1 %v11220_v42  ;;  %11095 = vmatprep.subr.bf16.mxu0 %v11094_v43  ;;  %v4620_v42 = vadd.f32 %v4563_v62, %v4470_v24  ;;  %v11236_v43 = vpack.c.bf16 %v7712_v55, %v7708_v29  ;;  %v11248_v62 = vpack.c.bf16 %v7736_v25, %v7732_v17  ;;  %v7738_v24 = vld [vmem:[#allocation10 + $0x2cc0] sm:$0xff]  ;;  %v7747_v29 = vld [vmem:[#allocation10 + $0x2d08] sm:$0xff]  ;;  %v7749_v55 = vld [vmem:[#allocation10 + $0x2d18] sm:$0xff] }
 0x651   :  { %11223 = vmatprep.subr.bf16.mxu1 %v11222_v4  ;;  %v11238_v4 = vpack.c.bf16 %v7721_v36, %v7717_v9  ;;  %v7746_v9 = vld [vmem:[#allocation10 + $0x2d00] sm:$0xff]  ;;  %v7768_v21 = vld [vmem:[#allocation10 + $0x2db0] sm:$0xff]  ;;  %v7771_v17 = vld [vmem:[#allocation10 + $0x2dc8] sm:$0xff] }
 0x652   :  { %v7750_v36 = vld [vmem:[#allocation10 + $0x2d20] sm:$0xff] }
 0x653   :  { %11097 = vmatpush1.bf16.msra.mxu0 %v11096_v60  ;;  %v4644_v60 = vmax.f32 %v4620_v42, 0.0  ;;  %v11254_v42 = vpack.c.bf16 %v7753_v56, %v7749_v55  ;;  %v11266_v56 = vpack.c.bf16 %v7777_v52, %v7773_v61  ;;  %v7805_v61 = vld [vmem:[#allocation10 + $0x2ed8] sm:$0xff] }
 0x654   :  { %11225 = vmatpush1.bf16.msra.mxu1 %v11224_v57  ;;  %11099 = vmatprep.subr.bf16.mxu0 %v11098_v63  ;;  %v11240_v57 = vpack.c.bf16 %v7720_v51, %v7716_v15  ;;  %v7722_v63 = vld [vmem:[#allocation10 + $0x2c40] sm:$0xff]  ;;  %v11128_v15 = vpack.c.bf16 %v7750_v36, %v7746_v9  ;;  %v6667_v51 = vld [vmem:[#allocation11 + $0xc] sm:$0xf]  ;;  %v7781_v36 = vld [vmem:[#allocation10 + $0x2e18] sm:$0xff] }
 0x655   :  { %11227 = vmatprep.subr.bf16.mxu1 %v11226_v47  ;;  %v7728_v47 = vld [vmem:[#allocation10 + $0x2c70] sm:$0xff]  ;;  %v11116_v41 = vpack.c.bf16 %v7726_v50, %v7722_v63  ;;  %v7767_v63 = vld [vmem:[#allocation10 + $0x2da8] sm:$0xff]  ;;  %v6672_v50 = vrot.slane %v6667_v51, %v11886_v37  ;;  %v7809_v52 = vld [vmem:[#allocation10 + $0x2ef8] sm:$0xff] }
 0x657   :  { %11101 = vmatpush1.bf16.msra.mxu0 %v11100_v8  ;;  %v7737_v8 = vld [vmem:[#allocation10 + $0x2cb8] sm:$0xff] }
 0x658   :  { %11229 = vmatpush1.bf16.msra.mxu1 %v11228_v10  ;;  %11103 = vmatprep.subr.bf16.mxu0 %v11102_v2  ;;  %v11244_v10 = vpack.c.bf16 %v7728_v47, %v7724_v0  ;;  %v11118_v2 = vpack.c.bf16 %v7735_v3, %v7731_v39  ;;  %v7765_v0 = vld [vmem:[#allocation10 + $0x2d98] sm:$0xff]  ;;  %v6680_v47 = vrot.slane %v6667_v51, %v11910_v27 }
 0x659   :  { %11231 = vmatprep.subr.bf16.mxu1 %v11230_v18  ;;  %v11246_v18 = vpack.c.bf16 %v7737_v8, %v7733_v7  ;;  %v6676_v39 = vrot.slane %v6667_v51, %v11864_v45  ;;  %v7762_v8 = vld [vmem:[#allocation10 + $0x2d80] sm:$0xff] }
 0x65b   :  { %11105 = vmatpush1.bf16.msra.mxu0 %v11104_v22  ;;  %v11122_v22 = vpack.c.bf16 %v7743_v23, %v7739_v20 }
 0x65c   :  { %11233 = vmatpush1.bf16.msra.mxu1 %v11232_v28  ;;  %11107 = vmatprep.subr.bf16.mxu0 %v11106_v38  ;;  %v7742_v28 = vld [vmem:[#allocation10 + $0x2ce0] sm:$0xff]  ;;  %v7740_v38 = vld [vmem:[#allocation10 + $0x2cd0] sm:$0xff] }
 0x65d   :  { %11235 = vmatprep.subr.bf16.mxu1 %v11234_v33  ;;  %v7751_v33 = vld [vmem:[#allocation10 + $0x2d28] sm:$0xff]  ;;  %v11124_v31 = vpack.c.bf16 %v7742_v28, %v7738_v24  ;;  %v11252_v48 = vpack.c.bf16 %v7744_v5, %v7740_v38  ;;  %v7770_v5 = vld [vmem:[#allocation10 + $0x2dc0] sm:$0xff] }
 0x65e   :  { %v11126_v30 = vpack.c.bf16 %v7751_v33, %v7747_v29  ;;  %v7774_v29 = vld [vmem:[#allocation10 + $0x2de0] sm:$0xff]  ;;  %v7772_v33 = vld [vmem:[#allocation10 + $0x2dd0] sm:$0xff] }
 0x65f   :  { %11109 = vmatpush1.bf16.msra.mxu0 %v11108_v46  ;;  %v7748_v46 = vld [vmem:[#allocation10 + $0x2d10] sm:$0xff] }
 0x660   :  { %11237 = vmatpush1.bf16.msra.mxu1 %v11236_v43  ;;  %11111 = vmatprep.subr.bf16.mxu0 %v11110_v19  ;;  %v7752_v43 = vld [vmem:[#allocation10 + $0x2d30] sm:$0xff]  ;;  %v7755_v19 = vld [vmem:[#allocation10 + $0x2d48] sm:$0xff] }
 0x661   :  { %11239 = vmatprep.subr.bf16.mxu1 %v11238_v4  ;;  %v7761_v4 = vld [vmem:[#allocation10 + $0x2d78] sm:$0xff]  ;;  %v11256_v53 = vpack.c.bf16 %v7752_v43, %v7748_v46  ;;  %v11130_v16 = vpack.c.bf16 %v7759_v49, %v7755_v19  ;;  %v11140_v43 = vpack.c.bf16 %v7774_v29, %v7770_v5  ;;  %v7808_v5 = vld [vmem:[#allocation10 + $0x2ef0] sm:$0xff]  ;;  %v7811_v29 = vld [vmem:[#allocation10 + $0x2f08] sm:$0xff] }
 0x662   :  { %7930 = vmatmul.mubr.f32.vlgmr.msra.gmra.mrb[22].mxu0 %v4644_v60  ;;  %v11258_v54 = vpack.c.bf16 %v7761_v4, %v7757_v1  ;;  %v7785_v46 = vld [vmem:[#allocation10 + $0x2e38] sm:$0xff]  ;;  %v7778_v4 = vld [vmem:[#allocation10 + $0x2e00] sm:$0xff] }
 0x663   :  { %8072 = vmatmul.mubr.f32.vlgmr.msra.gmra.mrb[22].mxu1 %v4644_v60  ;;  %11113 = vmatpush1.bf16.msra.mxu0 %v11112_v40  ;;  %v7758_v40 = vld [vmem:[#allocation10 + $0x2d60] sm:$0xff]  ;;  %v7760_v60 = vld [vmem:[#allocation10 + $0x2d70] sm:$0xff] }
 0x664   :  { %8000 = vmatprep.mubr.f32.mxu0 %v4647_v14  ;;  %11241 = vmatpush1.bf16.msra.mxu1 %v11240_v57  ;;  %v7763_v57 = vld [vmem:[#allocation10 + $0x2d88] sm:$0xff]  ;;  %v11132_v3 = vpack.c.bf16 %v7758_v40, %v7754_v59 }
 0x665   :  { %8142 = vmatprep.mubr.f32.mxu1 %v4647_v14  ;;  %11115 = vmatprep.subr.bf16.mxu0 %v11114_v35  ;;  %v7769_v35 = vld [vmem:[#allocation10 + $0x2db8] sm:$0xff]  ;;  %v6684_v14 = vrot.slane %v6667_v51, %v11889_v58  ;;  %v11134_v7 = vpack.c.bf16 %v7767_v63, %v7763_v57  ;;  %v7780_v51 = vld [vmem:[#allocation10 + $0x2e10] sm:$0xff]  ;;  %v7787_v59 = vld [vmem:[#allocation10 + $0x2e48] sm:$0xff] }
 0x666   :  { %11243 = vmatprep.subr.bf16.mxu1 %v11242_v6  ;;  %v11260_v6 = vpack.c.bf16 %v7760_v60, %v7756_v26  ;;  %v11262_v12 = vpack.c.bf16 %v7769_v35, %v7765_v0  ;;  %v7791_v40 = vld [vmem:[#allocation10 + $0x2e68] sm:$0xff]  ;;  %v7793_v60 = vld [vmem:[#allocation10 + $0x2e78] sm:$0xff]  ;;  %v7786_v0 = vld [vmem:[#allocation10 + $0x2e40] sm:$0xff] }
 0x667   :  { %11117 = vmatpush1.bf16.msra.mxu0 %v11116_v41  ;;  %v7766_v41 = vld [vmem:[#allocation10 + $0x2da0] sm:$0xff] }
 0x668   :  { %11245 = vmatpush1.bf16.msra.mxu1 %v11244_v10  ;;  %11119 = vmatprep.subr.bf16.mxu0 %v11118_v2  ;;  %v7764_v10 = vld [vmem:[#allocation10 + $0x2d90] sm:$0xff]  ;;  %v11136_v24 = vpack.c.bf16 %v7766_v41, %v7762_v8  ;;  %v7790_v35 = vld [vmem:[#allocation10 + $0x2e60] sm:$0xff]  ;;  %v7801_v8 = vld [vmem:[#allocation10 + $0x2eb8] sm:$0xff] }
 0x669   :  { %11247 = vmatprep.subr.bf16.mxu1 %v11246_v18  ;;  %v7775_v18 = vld [vmem:[#allocation10 + $0x2de8] sm:$0xff]  ;;  %v11264_v38 = vpack.c.bf16 %v7768_v21, %v7764_v10  ;;  %v11148_v41 = vpack.c.bf16 %v7790_v35, %v7786_v0  ;;  %v7798_v21 = vld [vmem:[#allocation10 + $0x2ea0] sm:$0xff] }
 0x66a   :  { %v11431_v35 = vld [vmem:[#allocation7 + $0x10] sm:$0xff] }
 0x66b   :  { %11121 = vmatpush1.bf16.msra.mxu0 %v11120_v13 }
 0x66c   :  { %11249 = vmatpush1.bf16.msra.mxu1 %v11248_v62  ;;  %11123 = vmatprep.subr.bf16.mxu0 %v11122_v22 }
 0x66d   :  { %11251 = vmatprep.subr.bf16.mxu1 %v11250_v32  ;;  %v11138_v32 = vpack.c.bf16 %v7775_v18, %v7771_v17  ;;  %v7796_v17 = vld [vmem:[#allocation10 + $0x2e90] sm:$0xff] }
 0x66f   :  { %11125 = vmatpush1.bf16.msra.mxu0 %v11124_v31  ;;  %v7776_v31 = vld [vmem:[#allocation10 + $0x2df0] sm:$0xff] }
 0x670   :  { %11253 = vmatpush1.bf16.msra.mxu1 %v11252_v48  ;;  %11127 = vmatprep.subr.bf16.mxu0 %v11126_v30  ;;  %v7779_v48 = vld [vmem:[#allocation10 + $0x2e08] sm:$0xff]  ;;  %v11268_v49 = vpack.c.bf16 %v7776_v31, %v7772_v33 }
 0x671   :  { %11255 = vmatprep.subr.bf16.mxu1 %v11254_v42  ;;  %v7783_v30 = vld [vmem:[#allocation10 + $0x2e28] sm:$0xff] }
 0x672   :  { %v11142_v1 = vpack.c.bf16 %v7783_v30, %v7779_v48  ;;  %v7815_v33 = vld [vmem:[#allocation10 + $0x2f28] sm:$0xff] }
 0x673   :  { %11129 = vmatpush1.bf16.msra.mxu0 %v11128_v15  ;;  %v7782_v15 = vld [vmem:[#allocation10 + $0x2e20] sm:$0xff]  ;;  %v11158_v30 = vpack.c.bf16 %v7815_v33, %v7811_v29 }
 0x674   :  { %11257 = vmatpush1.bf16.msra.mxu1 %v11256_v53  ;;  %11131 = vmatprep.subr.bf16.mxu0 %v11130_v16  ;;  %v11270_v53 = vpack.c.bf16 %v7785_v46, %v7781_v36  ;;  %v7784_v16 = vld [vmem:[#allocation10 + $0x2e30] sm:$0xff]  ;;  %v11144_v57 = vpack.c.bf16 %v7782_v15, %v7778_v4  ;;  %v7814_v36 = vld [vmem:[#allocation10 + $0x2f20] sm:$0xff]  ;;  %v7825_v4 = vld [vmem:[#allocation10 + $0x2f78] sm:$0xff] }
 0x675   :  { %v6826_v2 = vpop.f32.mrb[18].mxu0  ;;  %11259 = vmatprep.subr.bf16.mxu1 %v11258_v54  ;;  %v7789_v54 = vld [vmem:[#allocation10 + $0x2e58] sm:$0xff]  ;;  %v11272_v63 = vpack.c.bf16 %v7784_v16, %v7780_v51  ;;  %v7812_v46 = vld [vmem:[#allocation10 + $0x2f10] sm:$0xff]  ;;  %v7818_v16 = vld [vmem:[#allocation10 + $0x2f40] sm:$0xff] }
 0x676   :  { %v11314_v25 = vadd.f32 %v6826_v2, %v6672_v50  ;;  %v6968_v20 = vpop.f32.mrb[18].mxu1  ;;  %v6828_v23 = vpop.f32.mrb[19].mxu0  ;;  %v11146_v50 = vpack.c.bf16 %v7791_v40, %v7787_v59  ;;  %v7822_v59 = vld [vmem:[#allocation10 + $0x2f60] sm:$0xff]  ;;  %v7820_v40 = vld [vmem:[#allocation10 + $0x2f50] sm:$0xff] }
 0x677   :  { %v11316_v13 = vadd.f32 %v6968_v20, %v6680_v47  ;;  %v11315_v62 = vadd.f32 %v6828_v23, %v6676_v39  ;;  %v6970_v22 = vpop.f32.mrb[19].mxu1  ;;  %11133 = vmatpush1.bf16.msra.mxu0 %v11132_v3  ;;  %v7788_v47 = vld [vmem:[#allocation10 + $0x2e50] sm:$0xff]  ;;  %v11274_v39 = vpack.c.bf16 %v7793_v60, %v7789_v54  ;;  %v7803_v20 = vld [vmem:[#allocation10 + $0x2ec8] sm:$0xff]  ;;  %v11164_v0 = vpack.c.bf16 %v7822_v59, %v7818_v16 }
 0x678   :  { %v11317_v28 = vadd.f32 %v6970_v22, %v6684_v14  ;;  %11261 = vmatpush1.bf16.msra.mxu1 %v11260_v6  ;;  %11135 = vmatprep.subr.bf16.mxu0 %v11134_v7  ;;  %v7792_v3 = vld [vmem:[#allocation10 + $0x2e70] sm:$0xff]  ;;  %v7795_v14 = vld [vmem:[#allocation10 + $0x2e88] sm:$0xff]  ;;  %v7797_v7 = vld [vmem:[#allocation10 + $0x2e98] sm:$0xff] }
 0x679   :  { %v6977_v55 = vcombine.low %v11314_v25, %v11315_v62  ;;  %11263 = vmatprep.subr.bf16.mxu1 %v11262_v12  ;;  %v7799_v6 = vld [vmem:[#allocation10 + $0x2ea8] sm:$0xff]  ;;  %v11276_v10 = vpack.c.bf16 %v7792_v3, %v7788_v47  ;;  %v7794_v12 = vld [vmem:[#allocation10 + $0x2e80] sm:$0xff]  ;;  %v11278_v18 = vpack.c.bf16 %v7801_v8, %v7797_v7  ;;  %v7800_v25 = vld [vmem:[#allocation10 + $0x2eb0] sm:$0xff]  ;;  %v4421_v47 = vrot.slane %v11431_v35, %v11954_v44 }
 0x67a   :  { %v6978_v9 = vcombine.low %v11316_v13, %v11317_v28  ;;  %v11150_v2 = vpack.c.bf16 %v7799_v6, %v7795_v14  ;;  %v7807_v23 = vld [vmem:[#allocation10 + $0x2ee8] sm:$0xff]  ;;  %v11152_v13 = vpack.c.bf16 %v7798_v21, %v7794_v12  ;;  %v11280_v62 = vpack.c.bf16 %v7800_v25, %v7796_v17  ;;  %v7806_v28 = vld [vmem:[#allocation10 + $0x2ee0] sm:$0xff]  ;;  %v7824_v54 = vld [vmem:[#allocation10 + $0x2f70] sm:$0xff] }
 0x67b   :  { %v6985_v42 = vrot.slane %v6977_v55, %v11724_v11  ;;  %11137 = vmatpush1.bf16.msra.mxu0 %v11136_v24  ;;  %v11154_v22 = vpack.c.bf16 %v7807_v23, %v7803_v20  ;;  %v7802_v24 = vld [vmem:[#allocation10 + $0x2ec0] sm:$0xff]  ;;  %v7813_v55 = vld [vmem:[#allocation10 + $0x2f18] sm:$0xff]  ;;  %v7827_v60 = vld [vmem:[#allocation10 + $0x2f88] sm:$0xff]  ;;  %v4472_v20 = vmul.f32 %v4421_v47, %v11947_v34 }
 0x67c   :  { %v6992_v19 = vrot.slane %v6978_v9, %v11724_v11  ;;  %11265 = vmatpush1.bf16.msra.mxu1 %v11264_v38  ;;  %11139 = vmatprep.subr.bf16.mxu0 %v11138_v32  ;;  %v7804_v38 = vld [vmem:[#allocation10 + $0x2ed0] sm:$0xff]  ;;  %v11282_v32 = vpack.c.bf16 %v7809_v52, %v7805_v61  ;;  %v11156_v31 = vpack.c.bf16 %v7806_v28, %v7802_v24  ;;  %v7810_v9 = vld [vmem:[#allocation10 + $0x2f00] sm:$0xff]  ;;  %v7837_v12 = vld [vmem:[#allocation10 + $0x2fd8] sm:$0xff] }
 0x67d   :  { %11267 = vmatprep.subr.bf16.mxu1 %v11266_v56  ;;  %v7817_v56 = vld [vmem:[#allocation10 + $0x2f38] sm:$0xff]  ;;  %v11284_v48 = vpack.c.bf16 %v7808_v5, %v7804_v38  ;;  %v11160_v15 = vpack.c.bf16 %v7814_v36, %v7810_v9  ;;  %v7826_v14 = vld [vmem:[#allocation10 + $0x2f80] sm:$0xff]  ;;  %v7828_v7 = vld [vmem:[#allocation10 + $0x2f90] sm:$0xff] }
 0x67e   :  { %v6993_v26 = vcombine.low %v6985_v42, %v6992_v19  ;;  %v11286_v42 = vpack.c.bf16 %v7817_v56, %v7813_v55  ;;  %v7819_v19 = vld [vmem:[#allocation10 + $0x2f48] sm:$0xff]  ;;  %v7830_v6 = vld [vmem:[#allocation10 + $0x2fa0] sm:$0xff]  ;;  %v7841_v21 = vld [vmem:[#allocation10 + $0x2ff8] sm:$0xff] }
 0x67f   :  { %11141 = vmatpush1.bf16.msra.mxu0 %v11140_v43  ;;  %v7816_v43 = vld [vmem:[#allocation10 + $0x2f30] sm:$0xff]  ;;  %v11432_v17 = vld [vmem:[#allocation8 + $0x10] sm:$0xff]  ;;  %v11168_v25 = vpack.c.bf16 %v7830_v6, %v7826_v14  ;;  %v7834_v52 = vld [vmem:[#allocation10 + $0x2fc0] sm:$0xff] }
 0x680   :  { %6996 = vst [vmem:[#allocation13 + $0x18] sm:$0xff] %v6993_v26  ;;  %11269 = vmatpush1.bf16.msra.mxu1 %v11268_v49  ;;  %11143 = vmatprep.subr.bf16.mxu0 %v11142_v1  ;;  %v7823_v49 = vld [vmem:[#allocation10 + $0x2f68] sm:$0xff]  ;;  %v7821_v1 = vld [vmem:[#allocation10 + $0x2f58] sm:$0xff]  ;;  %v11288_v51 = vpack.c.bf16 %v7816_v43, %v7812_v46  ;;  %v7840_v24 = vld [vmem:[#allocation10 + $0x2ff0] sm:$0xff] }
 0x681   :  { %11271 = vmatprep.subr.bf16.mxu1 %v11270_v53  ;;  %v11162_v53 = vpack.c.bf16 %v7823_v49, %v7819_v19  ;;  %v11290_v26 = vpack.c.bf16 %v7825_v4, %v7821_v1  ;;  %v7255_v34 = vld [vmem:[#allocation11 + $0x10] sm:$0xf] }
 0x682   :  { %v7260_v5 = vrot.slane %v7255_v34, %v11886_v37  ;;  %v7268_v29 = vrot.slane %v7255_v34, %v11910_v27  ;;  %v7264_v33 = vrot.slane %v7255_v34, %v11864_v45  ;;  %v7272_v55 = vrot.slane %v7255_v34, %v11889_v58 }
 0x683   :  { %11145 = vmatpush1.bf16.msra.mxu0 %v11144_v57  ;;  %v7831_v57 = vld [vmem:[#allocation10 + $0x2fa8] sm:$0xff] }
 0x684   :  { %11273 = vmatpush1.bf16.msra.mxu1 %v11272_v63  ;;  %11147 = vmatprep.subr.bf16.mxu0 %v11146_v50  ;;  %v7829_v63 = vld [vmem:[#allocation10 + $0x2f98] sm:$0xff]  ;;  %v11166_v3 = vpack.c.bf16 %v7831_v57, %v7827_v60 }
 0x685   :  { %11275 = vmatprep.subr.bf16.mxu1 %v11274_v39  ;;  %v7833_v50 = vld [vmem:[#allocation10 + $0x2fb8] sm:$0xff]  ;;  %v11292_v39 = vpack.c.bf16 %v7824_v54, %v7820_v40 }
 0x686   :  { %v11294_v8 = vpack.c.bf16 %v7833_v50, %v7829_v63 }
 0x687   :  { %11149 = vmatpush1.bf16.msra.mxu0 %v11148_v41  ;;  %v7832_v41 = vld [vmem:[#allocation10 + $0x2fb0] sm:$0xff] }
 0x688   :  { %11277 = vmatpush1.bf16.msra.mxu1 %v11276_v10  ;;  %11151 = vmatprep.subr.bf16.mxu0 %v11150_v2  ;;  %v7835_v10 = vld [vmem:[#allocation10 + $0x2fc8] sm:$0xff]  ;;  %v11296_v23 = vpack.c.bf16 %v7832_v41, %v7828_v7 }
 0x689   :  { %11279 = vmatprep.subr.bf16.mxu1 %v11278_v18  ;;  %v7839_v2 = vld [vmem:[#allocation10 + $0x2fe8] sm:$0xff]  ;;  %v4571_v18 = vrot.slane %v11432_v17, %v11954_v44 }
 0x68a   :  { %v11170_v61 = vpack.c.bf16 %v7839_v2, %v7835_v10 }
 0x68b   :  { %11153 = vmatpush1.bf16.msra.mxu0 %v11152_v13  ;;  %v7838_v13 = vld [vmem:[#allocation10 + $0x2fe0] sm:$0xff]  ;;  %v4622_v38 = vadd.f32 %v4571_v18, %v4472_v20 }
 0x68c   :  { %11281 = vmatpush1.bf16.msra.mxu1 %v11280_v62  ;;  %11155 = vmatprep.subr.bf16.mxu0 %v11154_v22  ;;  %v11298_v62 = vpack.c.bf16 %v7841_v21, %v7837_v12  ;;  %v7836_v22 = vld [vmem:[#allocation10 + $0x2fd0] sm:$0xff]  ;;  %v11172_v28 = vpack.c.bf16 %v7838_v13, %v7834_v52 }
 0x68d   :  { %11283 = vmatprep.subr.bf16.mxu1 %v11282_v32  ;;  %v11300_v44 = vpack.c.bf16 %v7840_v24, %v7836_v22  ;;  %v4646_v32 = vmax.f32 %v4622_v38, 0.0 }
 0x68f   :  { %11157 = vmatpush1.bf16.msra.mxu0 %v11156_v31 }
 0x690   :  { %11285 = vmatpush1.bf16.msra.mxu1 %v11284_v48  ;;  %11159 = vmatprep.subr.bf16.mxu0 %v11158_v30 }
 0x691   :  { %11287 = vmatprep.subr.bf16.mxu1 %v11286_v42 }
 0x693   :  { %11161 = vmatpush1.bf16.msra.mxu0 %v11160_v15  ;;  %v7843_v15 = vld [vmem:[#allocation11 + $0x14] sm:$0xf] }
 0x694   :  { %11289 = vmatpush1.bf16.msra.mxu1 %v11288_v51  ;;  %11163 = vmatprep.subr.bf16.mxu0 %v11162_v53  ;;  %v7848_v51 = vrot.slane %v7843_v15, %v11886_v37  ;;  %v7856_v53 = vrot.slane %v7843_v15, %v11910_v27  ;;  %v7852_v16 = vrot.slane %v7843_v15, %v11864_v45 }
 0x695   :  { %11291 = vmatprep.subr.bf16.mxu1 %v11290_v26  ;;  %v7860_v59 = vrot.slane %v7843_v15, %v11889_v58 }
 0x697   :  { %11165 = vmatpush1.bf16.msra.mxu0 %v11164_v0 }
 0x698   :  { %11293 = vmatpush1.bf16.msra.mxu1 %v11292_v39  ;;  %11167 = vmatprep.subr.bf16.mxu0 %v11166_v3 }
 0x699   :  { %11295 = vmatprep.subr.bf16.mxu1 %v11294_v8 }
 0x69b   :  { %11169 = vmatpush1.bf16.msra.mxu0 %v11168_v25 }
 0x69c   :  { %11297 = vmatpush1.bf16.msra.mxu1 %v11296_v23  ;;  %11171 = vmatprep.subr.bf16.mxu0 %v11170_v61 }
 0x69d   :  { %11299 = vmatprep.subr.bf16.mxu1 %v11298_v62 }
 0x69f   :  { %11173 = vmatpush1.bf16.msra.mxu0 %v11172_v28 }
 0x6a0   :  { %11301 = vmatpush1.bf16.msra.mxu1 %v11300_v44 }
 0x6a2   :  { %8001 = vmatmul.mubr.f32.vlgmr.msra.gmra.mrb[22].mxu0 %v4646_v32 }
 0x6a3   :  { %8143 = vmatmul.mubr.f32.vlgmr.msra.gmra.mrb[22].mxu1 %v4646_v32 }
 0x6f5   :  { %v7414_v56 = vpop.f32.mrb[20].mxu0 }
 0x6f6   :  { %v11318_v31 = vadd.f32 %v7414_v56, %v7260_v5  ;;  %v7556_v48 = vpop.f32.mrb[20].mxu1  ;;  %v7416_v30 = vpop.f32.mrb[21].mxu0 }
 0x6f7   :  { %v11320_v9 = vadd.f32 %v7556_v48, %v7268_v29  ;;  %v11319_v36 = vadd.f32 %v7416_v30, %v7264_v33  ;;  %v7558_v46 = vpop.f32.mrb[21].mxu1 }
 0x6f8   :  { %v11321_v42 = vadd.f32 %v7558_v46, %v7272_v55 }
 0x6f9   :  { %v7565_v43 = vcombine.low %v11318_v31, %v11319_v36 }
 0x6fa   :  { %v7566_v19 = vcombine.low %v11320_v9, %v11321_v42 }
 0x6fb   :  { %v7573_v49 = vrot.slane %v7565_v43, %v11724_v11 }
 0x6fc   :  { %v7580_v1 = vrot.slane %v7566_v19, %v11724_v11 }
 0x6fe   :  { %v7581_v4 = vcombine.low %v7573_v49, %v7580_v1 }
 0x700   :  { %7584 = vst [vmem:[#allocation13 + $0x20] sm:$0xff] %v7581_v4 }
 0x775   :  { %v8002_v40 = vpop.f32.mrb[22].mxu0 }
 0x776   :  { %v11322_v26 = vadd.f32 %v8002_v40, %v7848_v51  ;;  %v8144_v54 = vpop.f32.mrb[22].mxu1  ;;  %v8004_v60 = vpop.f32.mrb[23].mxu0 }
 0x777   :  { %v11324_v57 = vadd.f32 %v8144_v54, %v7856_v53  ;;  %v11323_v63 = vadd.f32 %v8004_v60, %v7852_v16  ;;  %v8146_v50 = vpop.f32.mrb[23].mxu1 }
 0x778   :  { %v11325_v0 = vadd.f32 %v8146_v50, %v7860_v59 }
 0x779   :  { %v8153_v35 = vcombine.low %v11322_v26, %v11323_v63 }
 0x77a   :  { %v8154_v47 = vcombine.low %v11324_v57, %v11325_v0 }
 0x77b   :  { %v8161_v39 = vrot.slane %v8153_v35, %v11724_v11 }
 0x77c   :  { %v8168_v37 = vrot.slane %v8154_v47, %v11724_v11 }
 0x77e   :  { %v8169_v27 = vcombine.low %v8161_v39, %v8168_v37 }
 0x780   :  { %8172 = vst [vmem:[#allocation13 + $0x28] sm:$0xff] %v8169_v27 }
 0x781   :  { %11576 = shalt.err (!%p11573_p10)
}
 0x782   :  { %s11577_s22 = scalar_lea.hbm %s12105_s6, 768 }
 0x783   :  { %p11578_p11 = scmp.ne.s32.totalorder %s12105_s6, %s11577_s22  ;;  %p11581_p12 = scmp.lt.u32.totalorder %s11577_s22, %s12105_s6 }
 0x785   :  { %p11583_p13 = pnand %p11581_p12, %p11578_p11 }
 0x787   :  { %11586 = shalt.err (!%p11583_p13)
}
 0x788   :  { %s11612_s27 = smov 128   ;;  %s11613_s28 = smov 8  }
 0x789   :  { %8184 = dma.vmem_to_hbm [thread:$0]  %s8179_s0, 768, %s12105_s6, [#allocation4], %s11612_s27, %s11612_s27, %s11613_s28  }
 0x78a   :  { %11595 = dma.done.wait [#allocation4], 768  }
 0x78b   :  { %11596 = vsyncadd [#allocation4], 4294966528 }
 0x78c   :  { %8188 = vsyncpa [#allocation3], 1 }
 0x78d   :  { %8189 = vsyncpa [#allocation6], 1 }
 0x78e   :  { %8190 = vsyncpa [#allocation9], 1 }
 0x78f   :  { %8191 = vsyncpa [#allocation12], 1 }
 0x790   :  { %8192 = vsyncpa [#allocation4], 1 }

</bundles_post_ra>
